<compile_context>
chip_gen: v7x
topology: tpu7x:2x2x1
jax: 0.10.0
libtpu: 0.0.40
codegen_flags: <defaults>
</compile_context>

<pallas_src>
import functools
from collections import namedtuple

import jax
import jax.numpy as jnp
from jax import lax
from jax.experimental import pallas as pl
from jax.experimental.pallas import tpu as pltpu


# ------------------------------------------------------------------
# Genotype (normal, non-reduction cell; reduction=False, reduction_prev=False)
# ------------------------------------------------------------------
Genotype = namedtuple("Genotype", "normal normal_concat reduce reduce_concat")
GENOTYPE = Genotype(
    normal=[("sep_conv_3x3", 0), ("sep_conv_3x3", 1),
            ("skip_connect", 0), ("max_pool_3x3", 1),
            ("avg_pool_3x3", 0), ("skip_connect", 2),
            ("dil_conv_3x3", 1), ("skip_connect", 3)],
    normal_concat=[2, 3, 4, 5],
    reduce=[("sep_conv_3x3", 0), ("sep_conv_3x3", 1),
            ("skip_connect", 0), ("max_pool_3x3", 1),
            ("avg_pool_3x3", 0), ("skip_connect", 2),
            ("dil_conv_3x3", 1), ("skip_connect", 3)],
    reduce_concat=[2, 3, 4, 5],
)


# ------------------------------------------------------------------
# Fused Pallas kernel: the whole cell for `bt` batch elements per grid step.
# ------------------------------------------------------------------
def _fused_cell_kernel(s0_ref, s1_ref, w_ref, a_ref, out_ref,
                       st0_ref, st1_ref, pad_ref, patch_ref,
                       *, plan, op_names, indices, concat, bt, H, W, C, mxu_bf16):
    M = bt * H * W
    # float32 min as a stand-in for -inf in the max-pool halo (identical result unless an
    # activation equals float32 min exactly).
    NEG = float(jnp.finfo(jnp.float32).min)
    pit = iter(plan)   # (w_row_start, w_rows, affine_idx), consumed in trace order

    def matmul(x2d, ws, wn):
        w = w_ref[ws:ws + wn, :]
        if mxu_bf16:   # v6e/v7x: halve MXU operand bytes; accumulation stays f32
            x2d, w = x2d.astype(jnp.bfloat16), w.astype(jnp.bfloat16)
        return jnp.dot(x2d, w, preferred_element_type=jnp.float32)

    def affine(y2d, ai):
        return y2d * a_ref[2 * ai:2 * ai + 1, :] + a_ref[2 * ai + 1:2 * ai + 2, :]

    def preprocess(x_ref):
        # ReLUConvBN(1x1): ReLU -> channel matmul -> folded BN affine.
        ws, wn, ai = next(pit)
        y = affine(matmul(jnp.maximum(x_ref[...], 0.0), ws, wn), ai)    # (M, C)
        return y.reshape(bt, H, W, C)

    def fill_pad(x4, p, val):
        # Memset the shared halo scratch with the pad value, then one interior slice store.
        pad_ref[...] = jnp.full((bt, H + 4, W + 4, C), val, jnp.float32)
        pad_ref[:, p:p + H, p:p + W, :] = x4

    def tap(ki, kj, d):
        return pad_ref[:, ki * d:ki * d + H, kj * d:kj * d + W, :]

    def dw_pw(x4, dil, pad):
        # ReLU -> depthwise 3x3 folded into pointwise 1x1 as one (M,9C)x(9C,C) MXU matmul
        # -> folded BN affine.  Taps are written one at a time into the persistent patch
        # scratch at static lane offsets (no 9-way concat; one tap live at a time).
        ws, wn, ai = next(pit)
        fill_pad(jnp.maximum(x4, 0.0), pad, 0.0)
        for t in range(9):
            patch_ref[:, :, :, t * C:(t + 1) * C] = tap(t // 3, t % 3, dil)
        y = affine(matmul(patch_ref[...].reshape(M, 9 * C), ws, wn), ai)
        return y.reshape(bt, H, W, C)

    def maxpool(x4):
        fill_pad(x4, 1, NEG)
        rows = [jnp.maximum(jnp.maximum(tap(ki, 0, 1), tap(ki, 1, 1)), tap(ki, 2, 1))
                for ki in range(3)]
        return jnp.maximum(jnp.maximum(rows[0], rows[1]), rows[2])

    def avgpool(x4):
        # AvgPool2d(3, stride=1, pad=1, count_include_pad=False); divisor built in-kernel.
        fill_pad(x4, 1, 0.0)
        rows = [tap(ki, 0, 1) + tap(ki, 1, 1) + tap(ki, 2, 1) for ki in range(3)]
        acc = rows[0] + rows[1] + rows[2]
        ri = lax.broadcasted_iota(jnp.int32, (H, W, 1), 0)
        ci = lax.broadcasted_iota(jnp.int32, (H, W, 1), 1)
        rcnt = 3.0 - jnp.where(ri == 0, 1.0, 0.0) - jnp.where(ri == H - 1, 1.0, 0.0)
        ccnt = 3.0 - jnp.where(ci == 0, 1.0, 0.0) - jnp.where(ci == W - 1, 1.0, 0.0)
        return acc * (1.0 / (rcnt * ccnt))      # (H,W,1) broadcasts over (bt,H,W,C)

    def apply_op(name, x4):
        if name == "skip_connect":
            return x4
        if name == "max_pool_3x3":
            return maxpool(x4)
        if name == "avg_pool_3x3":
            return avgpool(x4)
        if name == "sep_conv_3x3":
            return dw_pw(dw_pw(x4, 1, 1), 1, 1)
        if name == "dil_conv_3x3":
            return dw_pw(x4, 2, 2)
        raise ValueError(name)

    def get_state(j):
        if j == 0:
            return st0_ref[...]
        if j == 1:
            return st1_ref[...]
        # Intermediate states live directly in out_ref at their concat channel offset.
        k = concat.index(j)
        return out_ref[:, :, :, k * C:(k + 1) * C]

    st0_ref[...] = preprocess(s0_ref)
    st1_ref[...] = preprocess(s1_ref)
    for i in range(len(op_names) // 2):
        h1 = apply_op(op_names[2 * i], get_state(indices[2 * i]))
        h2 = apply_op(op_names[2 * i + 1], get_state(indices[2 * i + 1]))
        k = concat.index(2 + i)
        out_ref[:, :, :, k * C:(k + 1) * C] = h1 + h2   # state written once, in place


# ------------------------------------------------------------------
# Wrapper: param folding / slab packing + one pallas_call
# ------------------------------------------------------------------
def _fold_dw_pw(wd, wp):
    # wd: (9, C) depthwise taps, wp: (C, Cout) pointwise -> (9C, Cout) combined MXU weight.
    return (wd[:, :, None] * wp[None, :, :]).reshape(wd.shape[0] * wd.shape[1], wp.shape[1])


def _pack_params(params):
    """Pack all weights into one (sum_K, C) slab and all BN affines into one (2*n, C) slab.

    Returns (wslab, aslab, plan) where plan is a tuple of (w_row_start, w_rows, affine_idx)
    in exactly the order the kernel consumes them.
    """
    w_parts, a_parts, plan = [], [], []
    w_off = 0

    def add(w, s, b):
        nonlocal w_off
        ai = len(a_parts) // 2
        a_parts.append(s.reshape(1, -1))
        a_parts.append(b.reshape(1, -1))
        plan.append((w_off, int(w.shape[0]), ai))
        w_parts.append(w)
        w_off += int(w.shape[0])

    add(params["pre0"]["w"], params["pre0"]["s"], params["pre0"]["b"])
    add(params["pre1"]["w"], params["pre1"]["s"], params["pre1"]["b"])
    for (name, _), p in zip(GENOTYPE.normal, params["ops"]):
        if name == "sep_conv_3x3":
            add(_fold_dw_pw(p["wd1"], p["wp1"]), p["s1"], p["b1"])
            add(_fold_dw_pw(p["wd2"], p["wp2"]), p["s2"], p["b2"])
        elif name == "dil_conv_3x3":
            add(_fold_dw_pw(p["wd"], p["wp"]), p["s"], p["b"])
        # pools / skip_connect: no params
    return (jnp.concatenate(w_parts, axis=0),
            jnp.concatenate(a_parts, axis=0),
            tuple(plan))


def _pick_batch_block(B, HW, target_rows=128, max_rows=2048):
    # Want bt*H*W >= 128 (fill the MXU M rows) but keep >= 2 grid steps when B >= 2 so both
    # v7x TensorCores get work; keep blocks sublane-aligned and small enough for VMEM.
    cands = [d for d in range(1, B + 1)
             if B % d == 0 and d * HW <= max_rows and ((d * HW) % 8 == 0 or d == B)]
    if not cands:
        return 1
    pref = [d for d in cands if B // d >= 2] or cands
    meets = [d for d in pref if d * HW >= target_rows]
    return min(meets) if meets else max(pref)


def cell_forward(params, s0_nchw, s1_nchw, drop_prob=0.0, *, batch_block=None,
                 mxu_bf16=False):
    if drop_prob:
        # TODO(synk): drop_path (training-only stochastic depth) is not implemented.
        raise NotImplementedError("eval mode only (drop_prob must be 0.0)")

    B, C0, H, W = s0_nchw.shape
    C1 = s1_nchw.shape[1]
    C = params["pre0"]["w"].shape[1]
    op_names = tuple(n for n, _ in GENOTYPE.normal)
    indices = tuple(i for _, i in GENOTYPE.normal)
    concat = tuple(GENOTYPE.normal_concat)
    steps = len(op_names) // 2
    mult = len(concat)
    # Intermediate states are stored directly in the output block, so they must all be part
    # of the concat set (true for the AutoSpeech genotype).
    assert set(concat) == set(range(2, 2 + steps))

    bt = batch_block if batch_block is not None else _pick_batch_block(B, H * W)
    assert B % bt == 0
    assert (bt * H * W) % 8 == 0 or bt == B, "input block rows must be sublane-aligned"

    # NCHW -> NHWC -> (B*H*W, C) rows (channels on lanes) for the in-kernel matmuls.
    s0 = jnp.transpose(s0_nchw, (0, 2, 3, 1)).reshape(B * H * W, C0)
    s1 = jnp.transpose(s1_nchw, (0, 2, 3, 1)).reshape(B * H * W, C1)

    wslab, aslab, plan = _pack_params(params)

    kern = functools.partial(
        _fused_cell_kernel, plan=plan, op_names=op_names, indices=indices,
        concat=concat, bt=bt, H=H, W=W, C=C, mxu_bf16=mxu_bf16)

    in_specs = [
        pl.BlockSpec((bt * H * W, C0), lambda g: (g, 0)),
        pl.BlockSpec((bt * H * W, C1), lambda g: (g, 0)),
        pl.BlockSpec(wslab.shape, lambda g: (0, 0)),   # single weight slab (2 DMA windows
        pl.BlockSpec(aslab.shape, lambda g: (0, 0)),   # total instead of ~23)
    ]
    scratch_shapes = [
        pltpu.VMEM((bt, H, W, C), jnp.float32),          # preprocessed s0
        pltpu.VMEM((bt, H, W, C), jnp.float32),          # preprocessed s1
        pltpu.VMEM((bt, H + 4, W + 4, C), jnp.float32),  # shared halo-padded buffer
        pltpu.VMEM((bt, H, W, 9 * C), jnp.float32),      # shared im2col patch
    ]

    # Explicit VMEM budget (in/out blocks double-buffered + param slabs + scratch), clamped.
    est = 4 * (2 * bt * H * W * (C0 + C1)
               + 2 * bt * H * W * mult * C
               + 2 * (wslab.size + aslab.size)
               + 2 * bt * H * W * C
               + bt * (H + 4) * (W + 4) * C
               + bt * H * W * 9 * C)
    vmem_limit = int(min(32 * 1024 * 1024, max(4 * est, 8 * 1024 * 1024)))

    out_nhwc = pl.pallas_call(
        kern,
        out_shape=jax.ShapeDtypeStruct((B, H, W, mult * C), jnp.float32),
        grid_spec=pltpu.PrefetchScalarGridSpec(
            num_scalar_prefetch=0,
            grid=(B // bt,),
            in_specs=in_specs,
            out_specs=pl.BlockSpec((bt, H, W, mult * C), lambda g: (g, 0, 0, 0)),
            scratch_shapes=scratch_shapes,
        ),
        compiler_params=pltpu.CompilerParams(
            dimension_semantics=("parallel",),
            vmem_limit_bytes=vmem_limit),
    )(s0, s1, wslab, aslab)
    # TODO(synk): for real AutoSpeech sizes (4C >= 128) present a lane-dense output slab and
    # add an H-row grid axis (with 1-2 row halo) so the working set fits v7x's 64 MiB VMEM.
    return jnp.transpose(out_nhwc, (0, 3, 1, 2))   # back to NCHW


# ------------------------------------------------------------------
# Parameter init (deterministic, synthetic weights; BN folded to scale/shift)
# ------------------------------------------------------------------
def init_bn_affine(key, C):
    k1, k2, k3, k4 = jax.random.split(key, 4)
    gamma = 1.0 + 0.1 * jax.random.normal(k1, (C,), jnp.float32)
    beta = 0.1 * jax.random.normal(k2, (C,), jnp.float32)
    mean = 0.1 * jax.random.normal(k3, (C,), jnp.float32)
    var = 1.0 + 0.1 * jax.random.uniform(k4, (C,), jnp.float32)
    scale = gamma * lax.rsqrt(var + 1e-5)
    shift = beta - mean * scale
    return scale, shift


def init_relu_conv_bn(key, cin, cout):
    kw, kb = jax.random.split(key)
    w = 0.1 * jax.random.normal(kw, (cin, cout), jnp.float32)
    s, b = init_bn_affine(kb, cout)
    return {"w": w, "s": s, "b": b}


def init_op(key, name, C):
    if name in ("skip_connect", "max_pool_3x3", "avg_pool_3x3"):
        return {}
    if name == "sep_conv_3x3":
        k = jax.random.split(key, 6)
        s1, b1 = init_bn_affine(k[2], C)
        s2, b2 = init_bn_affine(k[5], C)
        return {
            "wd1": 0.2 * jax.random.normal(k[0], (9, C), jnp.float32),
            "wp1": 0.15 * jax.random.normal(k[1], (C, C), jnp.float32),
            "s1": s1, "b1": b1,
            "wd2": 0.2 * jax.random.normal(k[3], (9, C), jnp.float32),
            "wp2": 0.15 * jax.random.normal(k[4], (C, C), jnp.float32),
            "s2": s2, "b2": b2,
        }
    if name == "dil_conv_3x3":
        k = jax.random.split(key, 3)
        s, b = init_bn_affine(k[2], C)
        return {
            "wd": 0.2 * jax.random.normal(k[0], (9, C), jnp.float32),
            "wp": 0.15 * jax.random.normal(k[1], (C, C), jnp.float32),
            "s": s, "b": b,
        }
    raise ValueError(name)


def init_cell_params(key, C_prev_prev, C_prev, C):
    n_ops = len(GENOTYPE.normal)
    keys = jax.random.split(key, n_ops + 2)
    return {
        "pre0": init_relu_conv_bn(keys[0], C_prev_prev, C),
        "pre1": init_relu_conv_bn(keys[1], C_prev, C),
        "ops": [init_op(keys[2 + j], name, C)
                for j, (name, _) in enumerate(GENOTYPE.normal)],
    }


# ------------------------------------------------------------------
# Pure-JAX reference (for correctness check only)
# ------------------------------------------------------------------
def _ref_relu_conv_bn(x, w, s, b):
    y = jnp.maximum(x, 0.0)
    y = jnp.einsum("bhwc,cd->bhwd", y, w)
    return y * s + b


def _ref_dw_pw_bn(x, wd, wp, s, b, dil, pad):
    C = x.shape[-1]
    y = jnp.maximum(x, 0.0)
    w = wd.reshape(3, 3, 1, C)
    y = lax.conv_general_dilated(
        y, w, (1, 1), [(pad, pad), (pad, pad)], rhs_dilation=(dil, dil),
        dimension_numbers=("NHWC", "HWIO", "NHWC"), feature_group_count=C)
    y = jnp.einsum("bhwc,cd->bhwd", y, wp)
    return y * s + b


def _ref_max_pool(x):
    return lax.reduce_window(x, -jnp.inf, lax.max, (1, 3, 3, 1), (1, 1, 1, 1),
                             [(0, 0), (1, 1), (1, 1), (0, 0)])


def _ref_avg_pool(x):
    s = lax.reduce_window(x, 0.0, lax.add, (1, 3, 3, 1), (1, 1, 1, 1),
                          [(0, 0), (1, 1), (1, 1), (0, 0)])
    cnt = lax.reduce_window(jnp.ones_like(x), 0.0, lax.add, (1, 3, 3, 1), (1, 1, 1, 1),
                            [(0, 0), (1, 1), (1, 1), (0, 0)])
    return s / cnt


def _ref_apply_op(name, x, p):
    if name == "skip_connect":
        return x
    if name == "max_pool_3x3":
        return _ref_max_pool(x)
    if name == "avg_pool_3x3":
        return _ref_avg_pool(x)
    if name == "sep_conv_3x3":
        y = _ref_dw_pw_bn(x, p["wd1"], p["wp1"], p["s1"], p["b1"], 1, 1)
        return _ref_dw_pw_bn(y, p["wd2"], p["wp2"], p["s2"], p["b2"], 1, 1)
    if name == "dil_conv_3x3":
        return _ref_dw_pw_bn(x, p["wd"], p["wp"], p["s"], p["b"], 2, 2)
    raise ValueError(name)


def ref_cell_forward(params, s0_nchw, s1_nchw):
    s0 = jnp.transpose(s0_nchw, (0, 2, 3, 1))
    s1 = jnp.transpose(s1_nchw, (0, 2, 3, 1))
    s0 = _ref_relu_conv_bn(s0, params["pre0"]["w"], params["pre0"]["s"], params["pre0"]["b"])
    s1 = _ref_relu_conv_bn(s1, params["pre1"]["w"], params["pre1"]["s"], params["pre1"]["b"])
    states = [s0, s1]
    op_names = [n for n, _ in GENOTYPE.normal]
    indices = [i for _, i in GENOTYPE.normal]
    for i in range(len(op_names) // 2):
        h1 = _ref_apply_op(op_names[2 * i], states[indices[2 * i]], params["ops"][2 * i])
        h2 = _ref_apply_op(op_names[2 * i + 1], states[indices[2 * i + 1]],
                           params["ops"][2 * i + 1])
        states.append(h1 + h2)
    out = jnp.concatenate([states[i] for i in GENOTYPE.normal_concat], axis=-1)
    return jnp.transpose(out, (0, 3, 1, 2))


# ------------------------------------------------------------------
if __name__ == "__main__":
    # Small shapes; B=4 so the batch-block heuristic picks bt=2 -> matmul M = 128 rows and
    # the grid still has 2 parallel steps (both v7x TensorCores busy).
    B, C, H, W = 4, 8, 8, 8          # C_prev_prev = C_prev = C
    key = jax.random.PRNGKey(0)
    k0, k1, kp = jax.random.split(key, 3)
    s0 = jax.random.normal(k0, (B, C, H, W), jnp.float32)   # NCHW, like PyTorch
    s1 = jax.random.normal(k1, (B, C, H, W), jnp.float32)
    params = init_cell_params(kp, C_prev_prev=C, C_prev=C, C=C)

    fwd = jax.jit(functools.partial(cell_forward, params))
    out = jax.block_until_ready(fwd(s0, s1))

    assert out.shape == (B, 4 * C, H, W), out.shape
    ref = ref_cell_forward(params, s0, s1)
    assert bool(jnp.allclose(out, ref, rtol=5e-2, atol=5e-3)), \
        float(jnp.max(jnp.abs(out - ref)))
    print("KERNEL_OK")
</pallas_src>

<mosaic_0001>
module attributes {stable_mosaic.version = 11 : i64} {
  func.func @_fused_cell_kernel(%arg0: i32, %arg1: memref<128x8xf32, #tpu.memory_space<vmem>>, %arg2: memref<128x8xf32, #tpu.memory_space<vmem>>, %arg3: memref<376x8xf32, #tpu.memory_space<vmem>>, %arg4: memref<14x8xf32, #tpu.memory_space<vmem>>, %arg5: memref<2x8x8x32xf32, #tpu.memory_space<vmem>>, %arg6: memref<2x8x8x8xf32, #tpu.memory_space<vmem>>, %arg7: memref<2x8x8x8xf32, #tpu.memory_space<vmem>>, %arg8: memref<2x12x12x8xf32, #tpu.memory_space<vmem>>, %arg9: memref<2x8x8x72xf32, #tpu.memory_space<vmem>>) attributes {dimension_semantics = [#tpu.dimension_semantics<parallel>], iteration_bounds = array<i64: 2>, scalar_prefetch = 0 : i64, scratch_operands = 4 : i64, tpu.core_type = #tpu.core_type<tc>, window_params = [{transform_indices = @transform_0, window_bounds = array<i64: 128, 8>}, {transform_indices = @transform_1, window_bounds = array<i64: 128, 8>}, {pipeline_mode = #tpu.pipeline_mode<synchronous>, transform_indices = @transform_2, window_bounds = array<i64: 376, 8>}, {pipeline_mode = #tpu.pipeline_mode<synchronous>, transform_indices = @transform_3, window_bounds = array<i64: 14, 8>}, {transform_indices = @transform_4, window_bounds = array<i64: 2, 8, 8, 32>}]} {
    %c0 = arith.constant 0 : index
    %c0_0 = arith.constant 0 : index
    %0 = vector.load %arg1[%c0, %c0_0] : memref<128x8xf32, #tpu.memory_space<vmem>>, vector<128x8xf32>
    %cst = arith.constant 0.000000e+00 : f32
    %1 = vector.broadcast %cst : f32 to vector<128x8xf32>
    %2 = arith.maximumf %0, %1 : vector<128x8xf32>
    %c0_1 = arith.constant 0 : index
    %c0_2 = arith.constant 0 : index
    %3 = vector.load %arg3[%c0_1, %c0_2] : memref<376x8xf32, #tpu.memory_space<vmem>>, vector<8x8xf32>
    %cst_3 = arith.constant dense<0.000000e+00> : vector<128x8xf32>
    %4 = tpu.matmul %2, %3, %cst_3 {dimension_numbers = #tpu.dot_dimension_numbers<[1], [0], [0], [1], [0, 0, 1, 1], [], []>} : vector<128x8xf32>, vector<8x8xf32>, vector<128x8xf32> -> vector<128x8xf32>
    %c0_4 = arith.constant 0 : index
    %c0_5 = arith.constant 0 : index
    %5 = vector.load %arg4[%c0_4, %c0_5] : memref<14x8xf32, #tpu.memory_space<vmem>>, vector<1x8xf32>
    %6 = vector.broadcast %5 : vector<1x8xf32> to vector<128x8xf32>
    %7 = arith.mulf %4, %6 : vector<128x8xf32>
    %c1 = arith.constant 1 : index
    %c0_6 = arith.constant 0 : index
    %8 = vector.load %arg4[%c1, %c0_6] : memref<14x8xf32, #tpu.memory_space<vmem>>, vector<1x8xf32>
    %9 = vector.broadcast %8 : vector<1x8xf32> to vector<128x8xf32>
    %10 = arith.addf %7, %9 : vector<128x8xf32>
    %11 = vector.shape_cast %10 : vector<128x8xf32> to vector<2x8x8x8xf32>
    %c0_7 = arith.constant 0 : index
    %c0_8 = arith.constant 0 : index
    %c0_9 = arith.constant 0 : index
    %c0_10 = arith.constant 0 : index
    %12 = vector.load %arg6[%c0_7, %c0_8, %c0_9, %c0_10] : memref<2x8x8x8xf32, #tpu.memory_space<vmem>>, vector<2x8x8x8xf32>
    tpu.vector_store %arg6[%c0_7, %c0_8, %c0_9, %c0_10], %11 {strides = array<i32>} : memref<2x8x8x8xf32, #tpu.memory_space<vmem>>, vector<2x8x8x8xf32>,
    %c0_11 = arith.constant 0 : index
    %c0_12 = arith.constant 0 : index
    %13 = vector.load %arg2[%c0_11, %c0_12] : memref<128x8xf32, #tpu.memory_space<vmem>>, vector<128x8xf32>
    %cst_13 = arith.constant 0.000000e+00 : f32
    %14 = vector.broadcast %cst_13 : f32 to vector<128x8xf32>
    %15 = arith.maximumf %13, %14 : vector<128x8xf32>
    %c8 = arith.constant 8 : index
    %c0_14 = arith.constant 0 : index
    %16 = vector.load %arg3[%c8, %c0_14] : memref<376x8xf32, #tpu.memory_space<vmem>>, vector<8x8xf32>
    %cst_15 = arith.constant dense<0.000000e+00> : vector<128x8xf32>
    %17 = tpu.matmul %15, %16, %cst_15 {dimension_numbers = #tpu.dot_dimension_numbers<[1], [0], [0], [1], [0, 0, 1, 1], [], []>} : vector<128x8xf32>, vector<8x8xf32>, vector<128x8xf32> -> vector<128x8xf32>
    %c2 = arith.constant 2 : index
    %c0_16 = arith.constant 0 : index
    %18 = vector.load %arg4[%c2, %c0_16] : memref<14x8xf32, #tpu.memory_space<vmem>>, vector<1x8xf32>
    %19 = vector.broadcast %18 : vector<1x8xf32> to vector<128x8xf32>
    %20 = arith.mulf %17, %19 : vector<128x8xf32>
    %c3 = arith.constant 3 : index
    %c0_17 = arith.constant 0 : index
    %21 = vector.load %arg4[%c3, %c0_17] : memref<14x8xf32, #tpu.memory_space<vmem>>, vector<1x8xf32>
    %22 = vector.broadcast %21 : vector<1x8xf32> to vector<128x8xf32>
    %23 = arith.addf %20, %22 : vector<128x8xf32>
    %24 = vector.shape_cast %23 : vector<128x8xf32> to vector<2x8x8x8xf32>
    %c0_18 = arith.constant 0 : index
    %c0_19 = arith.constant 0 : index
    %c0_20 = arith.constant 0 : index
    %c0_21 = arith.constant 0 : index
    %25 = vector.load %arg7[%c0_18, %c0_19, %c0_20, %c0_21] : memref<2x8x8x8xf32, #tpu.memory_space<vmem>>, vector<2x8x8x8xf32>
    tpu.vector_store %arg7[%c0_18, %c0_19, %c0_20, %c0_21], %24 {strides = array<i32>} : memref<2x8x8x8xf32, #tpu.memory_space<vmem>>, vector<2x8x8x8xf32>,
    %c0_22 = arith.constant 0 : index
    %c0_23 = arith.constant 0 : index
    %c0_24 = arith.constant 0 : index
    %c0_25 = arith.constant 0 : index
    %26 = vector.load %arg6[%c0_22, %c0_23, %c0_24, %c0_25] : memref<2x8x8x8xf32, #tpu.memory_space<vmem>>, vector<2x8x8x8xf32>
    %cst_26 = arith.constant 0.000000e+00 : f32
    %27 = vector.broadcast %cst_26 : f32 to vector<2x8x8x8xf32>
    %28 = arith.maximumf %26, %27 : vector<2x8x8x8xf32>
    %cst_27 = arith.constant 0.000000e+00 : f32
    %29 = vector.broadcast %cst_27 : f32 to vector<2x12x12x8xf32>
    %c0_28 = arith.constant 0 : index
    %c0_29 = arith.constant 0 : index
    %c0_30 = arith.constant 0 : index
    %c0_31 = arith.constant 0 : index
    %30 = vector.load %arg8[%c0_28, %c0_29, %c0_30, %c0_31] : memref<2x12x12x8xf32, #tpu.memory_space<vmem>>, vector<2x12x12x8xf32>
    tpu.vector_store %arg8[%c0_28, %c0_29, %c0_30, %c0_31], %29 {strides = array<i32>} : memref<2x12x12x8xf32, #tpu.memory_space<vmem>>, vector<2x12x12x8xf32>,
    %c0_32 = arith.constant 0 : index
    %c1_33 = arith.constant 1 : index
    %c1_34 = arith.constant 1 : index
    %c0_35 = arith.constant 0 : index
    %31 = vector.load %arg8[%c0_32, %c1_33, %c1_34, %c0_35] : memref<2x12x12x8xf32, #tpu.memory_space<vmem>>, vector<2x8x8x8xf32>
    tpu.vector_store %arg8[%c0_32, %c1_33, %c1_34, %c0_35], %28 {strides = array<i32>} : memref<2x12x12x8xf32, #tpu.memory_space<vmem>>, vector<2x8x8x8xf32>,
    %c0_36 = arith.constant 0 : index
    %c0_37 = arith.constant 0 : index
    %c0_38 = arith.constant 0 : index
    %c0_39 = arith.constant 0 : index
    %32 = vector.load %arg8[%c0_36, %c0_37, %c0_38, %c0_39] : memref<2x12x12x8xf32, #tpu.memory_space<vmem>>, vector<2x8x8x8xf32>
    %c0_40 = arith.constant 0 : index
    %c0_41 = arith.constant 0 : index
    %c0_42 = arith.constant 0 : index
    %c0_43 = arith.constant 0 : index
    %33 = vector.load %arg9[%c0_40, %c0_41, %c0_42, %c0_43] : memref<2x8x8x72xf32, #tpu.memory_space<vmem>>, vector<2x8x8x8xf32>
    tpu.vector_store %arg9[%c0_40, %c0_41, %c0_42, %c0_43], %32 {strides = array<i32>} : memref<2x8x8x72xf32, #tpu.memory_space<vmem>>, vector<2x8x8x8xf32>,
    %c0_44 = arith.constant 0 : index
    %c0_45 = arith.constant 0 : index
    %c1_46 = arith.constant 1 : index
    %c0_47 = arith.constant 0 : index
    %34 = vector.load %arg8[%c0_44, %c0_45, %c1_46, %c0_47] : memref<2x12x12x8xf32, #tpu.memory_space<vmem>>, vector<2x8x8x8xf32>
    %c0_48 = arith.constant 0 : index
    %c0_49 = arith.constant 0 : index
    %c0_50 = arith.constant 0 : index
    %c8_51 = arith.constant 8 : index
    %35 = vector.load %arg9[%c0_48, %c0_49, %c0_50, %c8_51] : memref<2x8x8x72xf32, #tpu.memory_space<vmem>>, vector<2x8x8x8xf32>
    tpu.vector_store %arg9[%c0_48, %c0_49, %c0_50, %c8_51], %34 {strides = array<i32>} : memref<2x8x8x72xf32, #tpu.memory_space<vmem>>, vector<2x8x8x8xf32>,
    %c0_52 = arith.constant 0 : index
    %c0_53 = arith.constant 0 : index
    %c2_54 = arith.constant 2 : index
    %c0_55 = arith.constant 0 : index
    %36 = vector.load %arg8[%c0_52, %c0_53, %c2_54, %c0_55] : memref<2x12x12x8xf32, #tpu.memory_space<vmem>>, vector<2x8x8x8xf32>
    %c0_56 = arith.constant 0 : index
    %c0_57 = arith.constant 0 : index
    %c0_58 = arith.constant 0 : index
    %c16 = arith.constant 16 : index
    %37 = vector.load %arg9[%c0_56, %c0_57, %c0_58, %c16] : memref<2x8x8x72xf32, #tpu.memory_space<vmem>>, vector<2x8x8x8xf32>
    tpu.vector_store %arg9[%c0_56, %c0_57, %c0_58, %c16], %36 {strides = array<i32>} : memref<2x8x8x72xf32, #tpu.memory_space<vmem>>, vector<2x8x8x8xf32>,
    %c0_59 = arith.constant 0 : index
    %c1_60 = arith.constant 1 : index
    %c0_61 = arith.constant 0 : index
    %c0_62 = arith.constant 0 : index
    %38 = vector.load %arg8[%c0_59, %c1_60, %c0_61, %c0_62] : memref<2x12x12x8xf32, #tpu.memory_space<vmem>>, vector<2x8x8x8xf32>
    %c0_63 = arith.constant 0 : index
    %c0_64 = arith.constant 0 : index
    %c0_65 = arith.constant 0 : index
    %c24 = arith.constant 24 : index
    %39 = vector.load %arg9[%c0_63, %c0_64, %c0_65, %c24] : memref<2x8x8x72xf32, #tpu.memory_space<vmem>>, vector<2x8x8x8xf32>
    tpu.vector_store %arg9[%c0_63, %c0_64, %c0_65, %c24], %38 {strides = array<i32>} : memref<2x8x8x72xf32, #tpu.memory_space<vmem>>, vector<2x8x8x8xf32>,
    %c0_66 = arith.constant 0 : index
    %c1_67 = arith.constant 1 : index
    %c1_68 = arith.constant 1 : index
    %c0_69 = arith.constant 0 : index
    %40 = vector.load %arg8[%c0_66, %c1_67, %c1_68, %c0_69] : memref<2x12x12x8xf32, #tpu.memory_space<vmem>>, vector<2x8x8x8xf32>
    %c0_70 = arith.constant 0 : index
    %c0_71 = arith.constant 0 : index
    %c0_72 = arith.constant 0 : index
    %c32 = arith.constant 32 : index
    %41 = vector.load %arg9[%c0_70, %c0_71, %c0_72, %c32] : memref<2x8x8x72xf32, #tpu.memory_space<vmem>>, vector<2x8x8x8xf32>
    tpu.vector_store %arg9[%c0_70, %c0_71, %c0_72, %c32], %40 {strides = array<i32>} : memref<2x8x8x72xf32, #tpu.memory_space<vmem>>, vector<2x8x8x8xf32>,
    %c0_73 = arith.constant 0 : index
    %c1_74 = arith.constant 1 : index
    %c2_75 = arith.constant 2 : index
    %c0_76 = arith.constant 0 : index
    %42 = vector.load %arg8[%c0_73, %c1_74, %c2_75, %c0_76] : memref<2x12x12x8xf32, #tpu.memory_space<vmem>>, vector<2x8x8x8xf32>
    %c0_77 = arith.constant 0 : index
    %c0_78 = arith.constant 0 : index
    %c0_79 = arith.constant 0 : index
    %c40 = arith.constant 40 : index
    %43 = vector.load %arg9[%c0_77, %c0_78, %c0_79, %c40] : memref<2x8x8x72xf32, #tpu.memory_space<vmem>>, vector<2x8x8x8xf32>
    tpu.vector_store %arg9[%c0_77, %c0_78, %c0_79, %c40], %42 {strides = array<i32>} : memref<2x8x8x72xf32, #tpu.memory_space<vmem>>, vector<2x8x8x8xf32>,
    %c0_80 = arith.constant 0 : index
    %c2_81 = arith.constant 2 : index
    %c0_82 = arith.constant 0 : index
    %c0_83 = arith.constant 0 : index
    %44 = vector.load %arg8[%c0_80, %c2_81, %c0_82, %c0_83] : memref<2x12x12x8xf32, #tpu.memory_space<vmem>>, vector<2x8x8x8xf32>
    %c0_84 = arith.constant 0 : index
    %c0_85 = arith.constant 0 : index
    %c0_86 = arith.constant 0 : index
    %c48 = arith.constant 48 : index
    %45 = vector.load %arg9[%c0_84, %c0_85, %c0_86, %c48] : memref<2x8x8x72xf32, #tpu.memory_space<vmem>>, vector<2x8x8x8xf32>
    tpu.vector_store %arg9[%c0_84, %c0_85, %c0_86, %c48], %44 {strides = array<i32>} : memref<2x8x8x72xf32, #tpu.memory_space<vmem>>, vector<2x8x8x8xf32>,
    %c0_87 = arith.constant 0 : index
    %c2_88 = arith.constant 2 : index
    %c1_89 = arith.constant 1 : index
    %c0_90 = arith.constant 0 : index
    %46 = vector.load %arg8[%c0_87, %c2_88, %c1_89, %c0_90] : memref<2x12x12x8xf32, #tpu.memory_space<vmem>>, vector<2x8x8x8xf32>
    %c0_91 = arith.constant 0 : index
    %c0_92 = arith.constant 0 : index
    %c0_93 = arith.constant 0 : index
    %c56 = arith.constant 56 : index
    %47 = vector.load %arg9[%c0_91, %c0_92, %c0_93, %c56] : memref<2x8x8x72xf32, #tpu.memory_space<vmem>>, vector<2x8x8x8xf32>
    tpu.vector_store %arg9[%c0_91, %c0_92, %c0_93, %c56], %46 {strides = array<i32>} : memref<2x8x8x72xf32, #tpu.memory_space<vmem>>, vector<2x8x8x8xf32>,
    %c0_94 = arith.constant 0 : index
    %c2_95 = arith.constant 2 : index
    %c2_96 = arith.constant 2 : index
    %c0_97 = arith.constant 0 : index
    %48 = vector.load %arg8[%c0_94, %c2_95, %c2_96, %c0_97] : memref<2x12x12x8xf32, #tpu.memory_space<vmem>>, vector<2x8x8x8xf32>
    %c0_98 = arith.constant 0 : index
    %c0_99 = arith.constant 0 : index
    %c0_100 = arith.constant 0 : index
    %c64 = arith.constant 64 : index
    %49 = vector.load %arg9[%c0_98, %c0_99, %c0_100, %c64] : memref<2x8x8x72xf32, #tpu.memory_space<vmem>>, vector<2x8x8x8xf32>
    tpu.vector_store %arg9[%c0_98, %c0_99, %c0_100, %c64], %48 {strides = array<i32>} : memref<2x8x8x72xf32, #tpu.memory_space<vmem>>, vector<2x8x8x8xf32>,
    %c0_101 = arith.constant 0 : index
    %c0_102 = arith.constant 0 : index
    %c0_103 = arith.constant 0 : index
    %c0_104 = arith.constant 0 : index
    %50 = vector.load %arg9[%c0_101, %c0_102, %c0_103, %c0_104] : memref<2x8x8x72xf32, #tpu.memory_space<vmem>>, vector<2x8x8x72xf32>
    %51 = vector.shape_cast %50 : vector<2x8x8x72xf32> to vector<128x72xf32>
    %c16_105 = arith.constant 16 : index
    %c0_106 = arith.constant 0 : index
    %52 = vector.load %arg3[%c16_105, %c0_106] : memref<376x8xf32, #tpu.memory_space<vmem>>, vector<72x8xf32>
    %cst_107 = arith.constant dense<0.000000e+00> : vector<128x8xf32>
    %53 = tpu.matmul %51, %52, %cst_107 {dimension_numbers = #tpu.dot_dimension_numbers<[1], [0], [0], [1], [0, 0, 1, 1], [], []>} : vector<128x72xf32>, vector<72x8xf32>, vector<128x8xf32> -> vector<128x8xf32>
    %c4 = arith.constant 4 : index
    %c0_108 = arith.constant 0 : index
    %54 = vector.load %arg4[%c4, %c0_108] : memref<14x8xf32, #tpu.memory_space<vmem>>, vector<1x8xf32>
    %55 = vector.broadcast %54 : vector<1x8xf32> to vector<128x8xf32>
    %56 = arith.mulf %53, %55 : vector<128x8xf32>
    %c5 = arith.constant 5 : index
    %c0_109 = arith.constant 0 : index
    %57 = vector.load %arg4[%c5, %c0_109] : memref<14x8xf32, #tpu.memory_space<vmem>>, vector<1x8xf32>
    %58 = vector.broadcast %57 : vector<1x8xf32> to vector<128x8xf32>
    %59 = arith.addf %56, %58 : vector<128x8xf32>
    %60 = vector.shape_cast %59 : vector<128x8xf32> to vector<2x8x8x8xf32>
    %cst_110 = arith.constant 0.000000e+00 : f32
    %61 = vector.broadcast %cst_110 : f32 to vector<2x8x8x8xf32>
    %62 = arith.maximumf %60, %61 : vector<2x8x8x8xf32>
    %cst_111 = arith.constant 0.000000e+00 : f32
    %63 = vector.broadcast %cst_111 : f32 to vector<2x12x12x8xf32>
    %c0_112 = arith.constant 0 : index
    %c0_113 = arith.constant 0 : index
    %c0_114 = arith.constant 0 : index
    %c0_115 = arith.constant 0 : index
    %64 = vector.load %arg8[%c0_112, %c0_113, %c0_114, %c0_115] : memref<2x12x12x8xf32, #tpu.memory_space<vmem>>, vector<2x12x12x8xf32>
    tpu.vector_store %arg8[%c0_112, %c0_113, %c0_114, %c0_115], %63 {strides = array<i32>} : memref<2x12x12x8xf32, #tpu.memory_space<vmem>>, vector<2x12x12x8xf32>,
    %c0_116 = arith.constant 0 : index
    %c1_117 = arith.constant 1 : index
    %c1_118 = arith.constant 1 : index
    %c0_119 = arith.constant 0 : index
    %65 = vector.load %arg8[%c0_116, %c1_117, %c1_118, %c0_119] : memref<2x12x12x8xf32, #tpu.memory_space<vmem>>, vector<2x8x8x8xf32>
    tpu.vector_store %arg8[%c0_116, %c1_117, %c1_118, %c0_119], %62 {strides = array<i32>} : memref<2x12x12x8xf32, #tpu.memory_space<vmem>>, vector<2x8x8x8xf32>,
    %c0_120 = arith.constant 0 : index
    %c0_121 = arith.constant 0 : index
    %c0_122 = arith.constant 0 : index
    %c0_123 = arith.constant 0 : index
    %66 = vector.load %arg8[%c0_120, %c0_121, %c0_122, %c0_123] : memref<2x12x12x8xf32, #tpu.memory_space<vmem>>, vector<2x8x8x8xf32>
    %c0_124 = arith.constant 0 : index
    %c0_125 = arith.constant 0 : index
    %c0_126 = arith.constant 0 : index
    %c0_127 = arith.constant 0 : index
    %67 = vector.load %arg9[%c0_124, %c0_125, %c0_126, %c0_127] : memref<2x8x8x72xf32, #tpu.memory_space<vmem>>, vector<2x8x8x8xf32>
    tpu.vector_store %arg9[%c0_124, %c0_125, %c0_126, %c0_127], %66 {strides = array<i32>} : memref<2x8x8x72xf32, #tpu.memory_space<vmem>>, vector<2x8x8x8xf32>,
    %c0_128 = arith.constant 0 : index
    %c0_129 = arith.constant 0 : index
    %c1_130 = arith.constant 1 : index
    %c0_131 = arith.constant 0 : index
    %68 = vector.load %arg8[%c0_128, %c0_129, %c1_130, %c0_131] : memref<2x12x12x8xf32, #tpu.memory_space<vmem>>, vector<2x8x8x8xf32>
    %c0_132 = arith.constant 0 : index
    %c0_133 = arith.constant 0 : index
    %c0_134 = arith.constant 0 : index
    %c8_135 = arith.constant 8 : index
    %69 = vector.load %arg9[%c0_132, %c0_133, %c0_134, %c8_135] : memref<2x8x8x72xf32, #tpu.memory_space<vmem>>, vector<2x8x8x8xf32>
    tpu.vector_store %arg9[%c0_132, %c0_133, %c0_134, %c8_135], %68 {strides = array<i32>} : memref<2x8x8x72xf32, #tpu.memory_space<vmem>>, vector<2x8x8x8xf32>,
    %c0_136 = arith.constant 0 : index
    %c0_137 = arith.constant 0 : index
    %c2_138 = arith.constant 2 : index
    %c0_139 = arith.constant 0 : index
    %70 = vector.load %arg8[%c0_136, %c0_137, %c2_138, %c0_139] : memref<2x12x12x8xf32, #tpu.memory_space<vmem>>, vector<2x8x8x8xf32>
    %c0_140 = arith.constant 0 : index
    %c0_141 = arith.constant 0 : index
    %c0_142 = arith.constant 0 : index
    %c16_143 = arith.constant 16 : index
    %71 = vector.load %arg9[%c0_140, %c0_141, %c0_142, %c16_143] : memref<2x8x8x72xf32, #tpu.memory_space<vmem>>, vector<2x8x8x8xf32>
    tpu.vector_store %arg9[%c0_140, %c0_141, %c0_142, %c16_143], %70 {strides = array<i32>} : memref<2x8x8x72xf32, #tpu.memory_space<vmem>>, vector<2x8x8x8xf32>,
    %c0_144 = arith.constant 0 : index
    %c1_145 = arith.constant 1 : index
    %c0_146 = arith.constant 0 : index
    %c0_147 = arith.constant 0 : index
    %72 = vector.load %arg8[%c0_144, %c1_145, %c0_146, %c0_147] : memref<2x12x12x8xf32, #tpu.memory_space<vmem>>, vector<2x8x8x8xf32>
    %c0_148 = arith.constant 0 : index
    %c0_149 = arith.constant 0 : index
    %c0_150 = arith.constant 0 : index
    %c24_151 = arith.constant 24 : index
    %73 = vector.load %arg9[%c0_148, %c0_149, %c0_150, %c24_151] : memref<2x8x8x72xf32, #tpu.memory_space<vmem>>, vector<2x8x8x8xf32>
    tpu.vector_store %arg9[%c0_148, %c0_149, %c0_150, %c24_151], %72 {strides = array<i32>} : memref<2x8x8x72xf32, #tpu.memory_space<vmem>>, vector<2x8x8x8xf32>,
    %c0_152 = arith.constant 0 : index
    %c1_153 = arith.constant 1 : index
    %c1_154 = arith.constant 1 : index
    %c0_155 = arith.constant 0 : index
    %74 = vector.load %arg8[%c0_152, %c1_153, %c1_154, %c0_155] : memref<2x12x12x8xf32, #tpu.memory_space<vmem>>, vector<2x8x8x8xf32>
    %c0_156 = arith.constant 0 : index
    %c0_157 = arith.constant 0 : index
    %c0_158 = arith.constant 0 : index
    %c32_159 = arith.constant 32 : index
    %75 = vector.load %arg9[%c0_156, %c0_157, %c0_158, %c32_159] : memref<2x8x8x72xf32, #tpu.memory_space<vmem>>, vector<2x8x8x8xf32>
    tpu.vector_store %arg9[%c0_156, %c0_157, %c0_158, %c32_159], %74 {strides = array<i32>} : memref<2x8x8x72xf32, #tpu.memory_space<vmem>>, vector<2x8x8x8xf32>,
    %c0_160 = arith.constant 0 : index
    %c1_161 = arith.constant 1 : index
    %c2_162 = arith.constant 2 : index
    %c0_163 = arith.constant 0 : index
    %76 = vector.load %arg8[%c0_160, %c1_161, %c2_162, %c0_163] : memref<2x12x12x8xf32, #tpu.memory_space<vmem>>, vector<2x8x8x8xf32>
    %c0_164 = arith.constant 0 : index
    %c0_165 = arith.constant 0 : index
    %c0_166 = arith.constant 0 : index
    %c40_167 = arith.constant 40 : index
    %77 = vector.load %arg9[%c0_164, %c0_165, %c0_166, %c40_167] : memref<2x8x8x72xf32, #tpu.memory_space<vmem>>, vector<2x8x8x8xf32>
    tpu.vector_store %arg9[%c0_164, %c0_165, %c0_166, %c40_167], %76 {strides = array<i32>} : memref<2x8x8x72xf32, #tpu.memory_space<vmem>>, vector<2x8x8x8xf32>,
    %c0_168 = arith.constant 0 : index
    %c2_169 = arith.constant 2 : index
    %c0_170 = arith.constant 0 : index
    %c0_171 = arith.constant 0 : index
    %78 = vector.load %arg8[%c0_168, %c2_169, %c0_170, %c0_171] : memref<2x12x12x8xf32, #tpu.memory_space<vmem>>, vector<2x8x8x8xf32>
    %c0_172 = arith.constant 0 : index
    %c0_173 = arith.constant 0 : index
    %c0_174 = arith.constant 0 : index
    %c48_175 = arith.constant 48 : index
    %79 = vector.load %arg9[%c0_172, %c0_173, %c0_174, %c48_175] : memref<2x8x8x72xf32, #tpu.memory_space<vmem>>, vector<2x8x8x8xf32>
    tpu.vector_store %arg9[%c0_172, %c0_173, %c0_174, %c48_175], %78 {strides = array<i32>} : memref<2x8x8x72xf32, #tpu.memory_space<vmem>>, vector<2x8x8x8xf32>,
    %c0_176 = arith.constant 0 : index
    %c2_177 = arith.constant 2 : index
    %c1_178 = arith.constant 1 : index
    %c0_179 = arith.constant 0 : index
    %80 = vector.load %arg8[%c0_176, %c2_177, %c1_178, %c0_179] : memref<2x12x12x8xf32, #tpu.memory_space<vmem>>, vector<2x8x8x8xf32>
    %c0_180 = arith.constant 0 : index
    %c0_181 = arith.constant 0 : index
    %c0_182 = arith.constant 0 : index
    %c56_183 = arith.constant 56 : index
    %81 = vector.load %arg9[%c0_180, %c0_181, %c0_182, %c56_183] : memref<2x8x8x72xf32, #tpu.memory_space<vmem>>, vector<2x8x8x8xf32>
    tpu.vector_store %arg9[%c0_180, %c0_181, %c0_182, %c56_183], %80 {strides = array<i32>} : memref<2x8x8x72xf32, #tpu.memory_space<vmem>>, vector<2x8x8x8xf32>,
    %c0_184 = arith.constant 0 : index
    %c2_185 = arith.constant 2 : index
    %c2_186 = arith.constant 2 : index
    %c0_187 = arith.constant 0 : index
    %82 = vector.load %arg8[%c0_184, %c2_185, %c2_186, %c0_187] : memref<2x12x12x8xf32, #tpu.memory_space<vmem>>, vector<2x8x8x8xf32>
    %c0_188 = arith.constant 0 : index
    %c0_189 = arith.constant 0 : index
    %c0_190 = arith.constant 0 : index
    %c64_191 = arith.constant 64 : index
    %83 = vector.load %arg9[%c0_188, %c0_189, %c0_190, %c64_191] : memref<2x8x8x72xf32, #tpu.memory_space<vmem>>, vector<2x8x8x8xf32>
    tpu.vector_store %arg9[%c0_188, %c0_189, %c0_190, %c64_191], %82 {strides = array<i32>} : memref<2x8x8x72xf32, #tpu.memory_space<vmem>>, vector<2x8x8x8xf32>,
    %c0_192 = arith.constant 0 : index
    %c0_193 = arith.constant 0 : index
    %c0_194 = arith.constant 0 : index
    %c0_195 = arith.constant 0 : index
    %84 = vector.load %arg9[%c0_192, %c0_193, %c0_194, %c0_195] : memref<2x8x8x72xf32, #tpu.memory_space<vmem>>, vector<2x8x8x72xf32>
    %85 = vector.shape_cast %84 : vector<2x8x8x72xf32> to vector<128x72xf32>
    %c88 = arith.constant 88 : index
    %c0_196 = arith.constant 0 : index
    %86 = vector.load %arg3[%c88, %c0_196] : memref<376x8xf32, #tpu.memory_space<vmem>>, vector<72x8xf32>
    %cst_197 = arith.constant dense<0.000000e+00> : vector<128x8xf32>
    %87 = tpu.matmul %85, %86, %cst_197 {dimension_numbers = #tpu.dot_dimension_numbers<[1], [0], [0], [1], [0, 0, 1, 1], [], []>} : vector<128x72xf32>, vector<72x8xf32>, vector<128x8xf32> -> vector<128x8xf32>
    %c6 = arith.constant 6 : index
    %c0_198 = arith.constant 0 : index
    %88 = vector.load %arg4[%c6, %c0_198] : memref<14x8xf32, #tpu.memory_space<vmem>>, vector<1x8xf32>
    %89 = vector.broadcast %88 : vector<1x8xf32> to vector<128x8xf32>
    %90 = arith.mulf %87, %89 : vector<128x8xf32>
    %c7 = arith.constant 7 : index
    %c0_199 = arith.constant 0 : index
    %91 = vector.load %arg4[%c7, %c0_199] : memref<14x8xf32, #tpu.memory_space<vmem>>, vector<1x8xf32>
    %92 = vector.broadcast %91 : vector<1x8xf32> to vector<128x8xf32>
    %93 = arith.addf %90, %92 : vector<128x8xf32>
    %94 = vector.shape_cast %93 : vector<128x8xf32> to vector<2x8x8x8xf32>
    %c0_200 = arith.constant 0 : index
    %c0_201 = arith.constant 0 : index
    %c0_202 = arith.constant 0 : index
    %c0_203 = arith.constant 0 : index
    %95 = vector.load %arg7[%c0_200, %c0_201, %c0_202, %c0_203] : memref<2x8x8x8xf32, #tpu.memory_space<vmem>>, vector<2x8x8x8xf32>
    %cst_204 = arith.constant 0.000000e+00 : f32
    %96 = vector.broadcast %cst_204 : f32 to vector<2x8x8x8xf32>
    %97 = arith.maximumf %95, %96 : vector<2x8x8x8xf32>
    %cst_205 = arith.constant 0.000000e+00 : f32
    %98 = vector.broadcast %cst_205 : f32 to vector<2x12x12x8xf32>
    %c0_206 = arith.constant 0 : index
    %c0_207 = arith.constant 0 : index
    %c0_208 = arith.constant 0 : index
    %c0_209 = arith.constant 0 : index
    %99 = vector.load %arg8[%c0_206, %c0_207, %c0_208, %c0_209] : memref<2x12x12x8xf32, #tpu.memory_space<vmem>>, vector<2x12x12x8xf32>
    tpu.vector_store %arg8[%c0_206, %c0_207, %c0_208, %c0_209], %98 {strides = array<i32>} : memref<2x12x12x8xf32, #tpu.memory_space<vmem>>, vector<2x12x12x8xf32>,
    %c0_210 = arith.constant 0 : index
    %c1_211 = arith.constant 1 : index
    %c1_212 = arith.constant 1 : index
    %c0_213 = arith.constant 0 : index
    %100 = vector.load %arg8[%c0_210, %c1_211, %c1_212, %c0_213] : memref<2x12x12x8xf32, #tpu.memory_space<vmem>>, vector<2x8x8x8xf32>
    tpu.vector_store %arg8[%c0_210, %c1_211, %c1_212, %c0_213], %97 {strides = array<i32>} : memref<2x12x12x8xf32, #tpu.memory_space<vmem>>, vector<2x8x8x8xf32>,
    %c0_214 = arith.constant 0 : index
    %c0_215 = arith.constant 0 : index
    %c0_216 = arith.constant 0 : index
    %c0_217 = arith.constant 0 : index
    %101 = vector.load %arg8[%c0_214, %c0_215, %c0_216, %c0_217] : memref<2x12x12x8xf32, #tpu.memory_space<vmem>>, vector<2x8x8x8xf32>
    %c0_218 = arith.constant 0 : index
    %c0_219 = arith.constant 0 : index
    %c0_220 = arith.constant 0 : index
    %c0_221 = arith.constant 0 : index
    %102 = vector.load %arg9[%c0_218, %c0_219, %c0_220, %c0_221] : memref<2x8x8x72xf32, #tpu.memory_space<vmem>>, vector<2x8x8x8xf32>
    tpu.vector_store %arg9[%c0_218, %c0_219, %c0_220, %c0_221], %101 {strides = array<i32>} : memref<2x8x8x72xf32, #tpu.memory_space<vmem>>, vector<2x8x8x8xf32>,
    %c0_222 = arith.constant 0 : index
    %c0_223 = arith.constant 0 : index
    %c1_224 = arith.constant 1 : index
    %c0_225 = arith.constant 0 : index
    %103 = vector.load %arg8[%c0_222, %c0_223, %c1_224, %c0_225] : memref<2x12x12x8xf32, #tpu.memory_space<vmem>>, vector<2x8x8x8xf32>
    %c0_226 = arith.constant 0 : index
    %c0_227 = arith.constant 0 : index
    %c0_228 = arith.constant 0 : index
    %c8_229 = arith.constant 8 : index
    %104 = vector.load %arg9[%c0_226, %c0_227, %c0_228, %c8_229] : memref<2x8x8x72xf32, #tpu.memory_space<vmem>>, vector<2x8x8x8xf32>
    tpu.vector_store %arg9[%c0_226, %c0_227, %c0_228, %c8_229], %103 {strides = array<i32>} : memref<2x8x8x72xf32, #tpu.memory_space<vmem>>, vector<2x8x8x8xf32>,
    %c0_230 = arith.constant 0 : index
    %c0_231 = arith.constant 0 : index
    %c2_232 = arith.constant 2 : index
    %c0_233 = arith.constant 0 : index
    %105 = vector.load %arg8[%c0_230, %c0_231, %c2_232, %c0_233] : memref<2x12x12x8xf32, #tpu.memory_space<vmem>>, vector<2x8x8x8xf32>
    %c0_234 = arith.constant 0 : index
    %c0_235 = arith.constant 0 : index
    %c0_236 = arith.constant 0 : index
    %c16_237 = arith.constant 16 : index
    %106 = vector.load %arg9[%c0_234, %c0_235, %c0_236, %c16_237] : memref<2x8x8x72xf32, #tpu.memory_space<vmem>>, vector<2x8x8x8xf32>
    tpu.vector_store %arg9[%c0_234, %c0_235, %c0_236, %c16_237], %105 {strides = array<i32>} : memref<2x8x8x72xf32, #tpu.memory_space<vmem>>, vector<2x8x8x8xf32>,
    %c0_238 = arith.constant 0 : index
    %c1_239 = arith.constant 1 : index
    %c0_240 = arith.constant 0 : index
    %c0_241 = arith.constant 0 : index
    %107 = vector.load %arg8[%c0_238, %c1_239, %c0_240, %c0_241] : memref<2x12x12x8xf32, #tpu.memory_space<vmem>>, vector<2x8x8x8xf32>
    %c0_242 = arith.constant 0 : index
    %c0_243 = arith.constant 0 : index
    %c0_244 = arith.constant 0 : index
    %c24_245 = arith.constant 24 : index
    %108 = vector.load %arg9[%c0_242, %c0_243, %c0_244, %c24_245] : memref<2x8x8x72xf32, #tpu.memory_space<vmem>>, vector<2x8x8x8xf32>
    tpu.vector_store %arg9[%c0_242, %c0_243, %c0_244, %c24_245], %107 {strides = array<i32>} : memref<2x8x8x72xf32, #tpu.memory_space<vmem>>, vector<2x8x8x8xf32>,
    %c0_246 = arith.constant 0 : index
    %c1_247 = arith.constant 1 : index
    %c1_248 = arith.constant 1 : index
    %c0_249 = arith.constant 0 : index
    %109 = vector.load %arg8[%c0_246, %c1_247, %c1_248, %c0_249] : memref<2x12x12x8xf32, #tpu.memory_space<vmem>>, vector<2x8x8x8xf32>
    %c0_250 = arith.constant 0 : index
    %c0_251 = arith.constant 0 : index
    %c0_252 = arith.constant 0 : index
    %c32_253 = arith.constant 32 : index
    %110 = vector.load %arg9[%c0_250, %c0_251, %c0_252, %c32_253] : memref<2x8x8x72xf32, #tpu.memory_space<vmem>>, vector<2x8x8x8xf32>
    tpu.vector_store %arg9[%c0_250, %c0_251, %c0_252, %c32_253], %109 {strides = array<i32>} : memref<2x8x8x72xf32, #tpu.memory_space<vmem>>, vector<2x8x8x8xf32>,
    %c0_254 = arith.constant 0 : index
    %c1_255 = arith.constant 1 : index
    %c2_256 = arith.constant 2 : index
    %c0_257 = arith.constant 0 : index
    %111 = vector.load %arg8[%c0_254, %c1_255, %c2_256, %c0_257] : memref<2x12x12x8xf32, #tpu.memory_space<vmem>>, vector<2x8x8x8xf32>
    %c0_258 = arith.constant 0 : index
    %c0_259 = arith.constant 0 : index
    %c0_260 = arith.constant 0 : index
    %c40_261 = arith.constant 40 : index
    %112 = vector.load %arg9[%c0_258, %c0_259, %c0_260, %c40_261] : memref<2x8x8x72xf32, #tpu.memory_space<vmem>>, vector<2x8x8x8xf32>
    tpu.vector_store %arg9[%c0_258, %c0_259, %c0_260, %c40_261], %111 {strides = array<i32>} : memref<2x8x8x72xf32, #tpu.memory_space<vmem>>, vector<2x8x8x8xf32>,
    %c0_262 = arith.constant 0 : index
    %c2_263 = arith.constant 2 : index
    %c0_264 = arith.constant 0 : index
    %c0_265 = arith.constant 0 : index
    %113 = vector.load %arg8[%c0_262, %c2_263, %c0_264, %c0_265] : memref<2x12x12x8xf32, #tpu.memory_space<vmem>>, vector<2x8x8x8xf32>
    %c0_266 = arith.constant 0 : index
    %c0_267 = arith.constant 0 : index
    %c0_268 = arith.constant 0 : index
    %c48_269 = arith.constant 48 : index
    %114 = vector.load %arg9[%c0_266, %c0_267, %c0_268, %c48_269] : memref<2x8x8x72xf32, #tpu.memory_space<vmem>>, vector<2x8x8x8xf32>
    tpu.vector_store %arg9[%c0_266, %c0_267, %c0_268, %c48_269], %113 {strides = array<i32>} : memref<2x8x8x72xf32, #tpu.memory_space<vmem>>, vector<2x8x8x8xf32>,
    %c0_270 = arith.constant 0 : index
    %c2_271 = arith.constant 2 : index
    %c1_272 = arith.constant 1 : index
    %c0_273 = arith.constant 0 : index
    %115 = vector.load %arg8[%c0_270, %c2_271, %c1_272, %c0_273] : memref<2x12x12x8xf32, #tpu.memory_space<vmem>>, vector<2x8x8x8xf32>
    %c0_274 = arith.constant 0 : index
    %c0_275 = arith.constant 0 : index
    %c0_276 = arith.constant 0 : index
    %c56_277 = arith.constant 56 : index
    %116 = vector.load %arg9[%c0_274, %c0_275, %c0_276, %c56_277] : memref<2x8x8x72xf32, #tpu.memory_space<vmem>>, vector<2x8x8x8xf32>
    tpu.vector_store %arg9[%c0_274, %c0_275, %c0_276, %c56_277], %115 {strides = array<i32>} : memref<2x8x8x72xf32, #tpu.memory_space<vmem>>, vector<2x8x8x8xf32>,
    %c0_278 = arith.constant 0 : index
    %c2_279 = arith.constant 2 : index
    %c2_280 = arith.constant 2 : index
    %c0_281 = arith.constant 0 : index
    %117 = vector.load %arg8[%c0_278, %c2_279, %c2_280, %c0_281] : memref<2x12x12x8xf32, #tpu.memory_space<vmem>>, vector<2x8x8x8xf32>
    %c0_282 = arith.constant 0 : index
    %c0_283 = arith.constant 0 : index
    %c0_284 = arith.constant 0 : index
    %c64_285 = arith.constant 64 : index
    %118 = vector.load %arg9[%c0_282, %c0_283, %c0_284, %c64_285] : memref<2x8x8x72xf32, #tpu.memory_space<vmem>>, vector<2x8x8x8xf32>
    tpu.vector_store %arg9[%c0_282, %c0_283, %c0_284, %c64_285], %117 {strides = array<i32>} : memref<2x8x8x72xf32, #tpu.memory_space<vmem>>, vector<2x8x8x8xf32>,
    %c0_286 = arith.constant 0 : index
    %c0_287 = arith.constant 0 : index
    %c0_288 = arith.constant 0 : index
    %c0_289 = arith.constant 0 : index
    %119 = vector.load %arg9[%c0_286, %c0_287, %c0_288, %c0_289] : memref<2x8x8x72xf32, #tpu.memory_space<vmem>>, vector<2x8x8x72xf32>
    %120 = vector.shape_cast %119 : vector<2x8x8x72xf32> to vector<128x72xf32>
    %c160 = arith.constant 160 : index
    %c0_290 = arith.constant 0 : index
    %121 = vector.load %arg3[%c160, %c0_290] : memref<376x8xf32, #tpu.memory_space<vmem>>, vector<72x8xf32>
    %cst_291 = arith.constant dense<0.000000e+00> : vector<128x8xf32>
    %122 = tpu.matmul %120, %121, %cst_291 {dimension_numbers = #tpu.dot_dimension_numbers<[1], [0], [0], [1], [0, 0, 1, 1], [], []>} : vector<128x72xf32>, vector<72x8xf32>, vector<128x8xf32> -> vector<128x8xf32>
    %c8_292 = arith.constant 8 : index
    %c0_293 = arith.constant 0 : index
    %123 = vector.load %arg4[%c8_292, %c0_293] : memref<14x8xf32, #tpu.memory_space<vmem>>, vector<1x8xf32>
    %124 = vector.broadcast %123 : vector<1x8xf32> to vector<128x8xf32>
    %125 = arith.mulf %122, %124 : vector<128x8xf32>
    %c9 = arith.constant 9 : index
    %c0_294 = arith.constant 0 : index
    %126 = vector.load %arg4[%c9, %c0_294] : memref<14x8xf32, #tpu.memory_space<vmem>>, vector<1x8xf32>
    %127 = vector.broadcast %126 : vector<1x8xf32> to vector<128x8xf32>
    %128 = arith.addf %125, %127 : vector<128x8xf32>
    %129 = vector.shape_cast %128 : vector<128x8xf32> to vector<2x8x8x8xf32>
    %cst_295 = arith.constant 0.000000e+00 : f32
    %130 = vector.broadcast %cst_295 : f32 to vector<2x8x8x8xf32>
    %131 = arith.maximumf %129, %130 : vector<2x8x8x8xf32>
    %cst_296 = arith.constant 0.000000e+00 : f32
    %132 = vector.broadcast %cst_296 : f32 to vector<2x12x12x8xf32>
    %c0_297 = arith.constant 0 : index
    %c0_298 = arith.constant 0 : index
    %c0_299 = arith.constant 0 : index
    %c0_300 = arith.constant 0 : index
    %133 = vector.load %arg8[%c0_297, %c0_298, %c0_299, %c0_300] : memref<2x12x12x8xf32, #tpu.memory_space<vmem>>, vector<2x12x12x8xf32>
    tpu.vector_store %arg8[%c0_297, %c0_298, %c0_299, %c0_300], %132 {strides = array<i32>} : memref<2x12x12x8xf32, #tpu.memory_space<vmem>>, vector<2x12x12x8xf32>,
    %c0_301 = arith.constant 0 : index
    %c1_302 = arith.constant 1 : index
    %c1_303 = arith.constant 1 : index
    %c0_304 = arith.constant 0 : index
    %134 = vector.load %arg8[%c0_301, %c1_302, %c1_303, %c0_304] : memref<2x12x12x8xf32, #tpu.memory_space<vmem>>, vector<2x8x8x8xf32>
    tpu.vector_store %arg8[%c0_301, %c1_302, %c1_303, %c0_304], %131 {strides = array<i32>} : memref<2x12x12x8xf32, #tpu.memory_space<vmem>>, vector<2x8x8x8xf32>,
    %c0_305 = arith.constant 0 : index
    %c0_306 = arith.constant 0 : index
    %c0_307 = arith.constant 0 : index
    %c0_308 = arith.constant 0 : index
    %135 = vector.load %arg8[%c0_305, %c0_306, %c0_307, %c0_308] : memref<2x12x12x8xf32, #tpu.memory_space<vmem>>, vector<2x8x8x8xf32>
    %c0_309 = arith.constant 0 : index
    %c0_310 = arith.constant 0 : index
    %c0_311 = arith.constant 0 : index
    %c0_312 = arith.constant 0 : index
    %136 = vector.load %arg9[%c0_309, %c0_310, %c0_311, %c0_312] : memref<2x8x8x72xf32, #tpu.memory_space<vmem>>, vector<2x8x8x8xf32>
    tpu.vector_store %arg9[%c0_309, %c0_310, %c0_311, %c0_312], %135 {strides = array<i32>} : memref<2x8x8x72xf32, #tpu.memory_space<vmem>>, vector<2x8x8x8xf32>,
    %c0_313 = arith.constant 0 : index
    %c0_314 = arith.constant 0 : index
    %c1_315 = arith.constant 1 : index
    %c0_316 = arith.constant 0 : index
    %137 = vector.load %arg8[%c0_313, %c0_314, %c1_315, %c0_316] : memref<2x12x12x8xf32, #tpu.memory_space<vmem>>, vector<2x8x8x8xf32>
    %c0_317 = arith.constant 0 : index
    %c0_318 = arith.constant 0 : index
    %c0_319 = arith.constant 0 : index
    %c8_320 = arith.constant 8 : index
    %138 = vector.load %arg9[%c0_317, %c0_318, %c0_319, %c8_320] : memref<2x8x8x72xf32, #tpu.memory_space<vmem>>, vector<2x8x8x8xf32>
    tpu.vector_store %arg9[%c0_317, %c0_318, %c0_319, %c8_320], %137 {strides = array<i32>} : memref<2x8x8x72xf32, #tpu.memory_space<vmem>>, vector<2x8x8x8xf32>,
    %c0_321 = arith.constant 0 : index
    %c0_322 = arith.constant 0 : index
    %c2_323 = arith.constant 2 : index
    %c0_324 = arith.constant 0 : index
    %139 = vector.load %arg8[%c0_321, %c0_322, %c2_323, %c0_324] : memref<2x12x12x8xf32, #tpu.memory_space<vmem>>, vector<2x8x8x8xf32>
    %c0_325 = arith.constant 0 : index
    %c0_326 = arith.constant 0 : index
    %c0_327 = arith.constant 0 : index
    %c16_328 = arith.constant 16 : index
    %140 = vector.load %arg9[%c0_325, %c0_326, %c0_327, %c16_328] : memref<2x8x8x72xf32, #tpu.memory_space<vmem>>, vector<2x8x8x8xf32>
    tpu.vector_store %arg9[%c0_325, %c0_326, %c0_327, %c16_328], %139 {strides = array<i32>} : memref<2x8x8x72xf32, #tpu.memory_space<vmem>>, vector<2x8x8x8xf32>,
    %c0_329 = arith.constant 0 : index
    %c1_330 = arith.constant 1 : index
    %c0_331 = arith.constant 0 : index
    %c0_332 = arith.constant 0 : index
    %141 = vector.load %arg8[%c0_329, %c1_330, %c0_331, %c0_332] : memref<2x12x12x8xf32, #tpu.memory_space<vmem>>, vector<2x8x8x8xf32>
    %c0_333 = arith.constant 0 : index
    %c0_334 = arith.constant 0 : index
    %c0_335 = arith.constant 0 : index
    %c24_336 = arith.constant 24 : index
    %142 = vector.load %arg9[%c0_333, %c0_334, %c0_335, %c24_336] : memref<2x8x8x72xf32, #tpu.memory_space<vmem>>, vector<2x8x8x8xf32>
    tpu.vector_store %arg9[%c0_333, %c0_334, %c0_335, %c24_336], %141 {strides = array<i32>} : memref<2x8x8x72xf32, #tpu.memory_space<vmem>>, vector<2x8x8x8xf32>,
    %c0_337 = arith.constant 0 : index
    %c1_338 = arith.constant 1 : index
    %c1_339 = arith.constant 1 : index
    %c0_340 = arith.constant 0 : index
    %143 = vector.load %arg8[%c0_337, %c1_338, %c1_339, %c0_340] : memref<2x12x12x8xf32, #tpu.memory_space<vmem>>, vector<2x8x8x8xf32>
    %c0_341 = arith.constant 0 : index
    %c0_342 = arith.constant 0 : index
    %c0_343 = arith.constant 0 : index
    %c32_344 = arith.constant 32 : index
    %144 = vector.load %arg9[%c0_341, %c0_342, %c0_343, %c32_344] : memref<2x8x8x72xf32, #tpu.memory_space<vmem>>, vector<2x8x8x8xf32>
    tpu.vector_store %arg9[%c0_341, %c0_342, %c0_343, %c32_344], %143 {strides = array<i32>} : memref<2x8x8x72xf32, #tpu.memory_space<vmem>>, vector<2x8x8x8xf32>,
    %c0_345 = arith.constant 0 : index
    %c1_346 = arith.constant 1 : index
    %c2_347 = arith.constant 2 : index
    %c0_348 = arith.constant 0 : index
    %145 = vector.load %arg8[%c0_345, %c1_346, %c2_347, %c0_348] : memref<2x12x12x8xf32, #tpu.memory_space<vmem>>, vector<2x8x8x8xf32>
    %c0_349 = arith.constant 0 : index
    %c0_350 = arith.constant 0 : index
    %c0_351 = arith.constant 0 : index
    %c40_352 = arith.constant 40 : index
    %146 = vector.load %arg9[%c0_349, %c0_350, %c0_351, %c40_352] : memref<2x8x8x72xf32, #tpu.memory_space<vmem>>, vector<2x8x8x8xf32>
    tpu.vector_store %arg9[%c0_349, %c0_350, %c0_351, %c40_352], %145 {strides = array<i32>} : memref<2x8x8x72xf32, #tpu.memory_space<vmem>>, vector<2x8x8x8xf32>,
    %c0_353 = arith.constant 0 : index
    %c2_354 = arith.constant 2 : index
    %c0_355 = arith.constant 0 : index
    %c0_356 = arith.constant 0 : index
    %147 = vector.load %arg8[%c0_353, %c2_354, %c0_355, %c0_356] : memref<2x12x12x8xf32, #tpu.memory_space<vmem>>, vector<2x8x8x8xf32>
    %c0_357 = arith.constant 0 : index
    %c0_358 = arith.constant 0 : index
    %c0_359 = arith.constant 0 : index
    %c48_360 = arith.constant 48 : index
    %148 = vector.load %arg9[%c0_357, %c0_358, %c0_359, %c48_360] : memref<2x8x8x72xf32, #tpu.memory_space<vmem>>, vector<2x8x8x8xf32>
    tpu.vector_store %arg9[%c0_357, %c0_358, %c0_359, %c48_360], %147 {strides = array<i32>} : memref<2x8x8x72xf32, #tpu.memory_space<vmem>>, vector<2x8x8x8xf32>,
    %c0_361 = arith.constant 0 : index
    %c2_362 = arith.constant 2 : index
    %c1_363 = arith.constant 1 : index
    %c0_364 = arith.constant 0 : index
    %149 = vector.load %arg8[%c0_361, %c2_362, %c1_363, %c0_364] : memref<2x12x12x8xf32, #tpu.memory_space<vmem>>, vector<2x8x8x8xf32>
    %c0_365 = arith.constant 0 : index
    %c0_366 = arith.constant 0 : index
    %c0_367 = arith.constant 0 : index
    %c56_368 = arith.constant 56 : index
    %150 = vector.load %arg9[%c0_365, %c0_366, %c0_367, %c56_368] : memref<2x8x8x72xf32, #tpu.memory_space<vmem>>, vector<2x8x8x8xf32>
    tpu.vector_store %arg9[%c0_365, %c0_366, %c0_367, %c56_368], %149 {strides = array<i32>} : memref<2x8x8x72xf32, #tpu.memory_space<vmem>>, vector<2x8x8x8xf32>,
    %c0_369 = arith.constant 0 : index
    %c2_370 = arith.constant 2 : index
    %c2_371 = arith.constant 2 : index
    %c0_372 = arith.constant 0 : index
    %151 = vector.load %arg8[%c0_369, %c2_370, %c2_371, %c0_372] : memref<2x12x12x8xf32, #tpu.memory_space<vmem>>, vector<2x8x8x8xf32>
    %c0_373 = arith.constant 0 : index
    %c0_374 = arith.constant 0 : index
    %c0_375 = arith.constant 0 : index
    %c64_376 = arith.constant 64 : index
    %152 = vector.load %arg9[%c0_373, %c0_374, %c0_375, %c64_376] : memref<2x8x8x72xf32, #tpu.memory_space<vmem>>, vector<2x8x8x8xf32>
    tpu.vector_store %arg9[%c0_373, %c0_374, %c0_375, %c64_376], %151 {strides = array<i32>} : memref<2x8x8x72xf32, #tpu.memory_space<vmem>>, vector<2x8x8x8xf32>,
    %c0_377 = arith.constant 0 : index
    %c0_378 = arith.constant 0 : index
    %c0_379 = arith.constant 0 : index
    %c0_380 = arith.constant 0 : index
    %153 = vector.load %arg9[%c0_377, %c0_378, %c0_379, %c0_380] : memref<2x8x8x72xf32, #tpu.memory_space<vmem>>, vector<2x8x8x72xf32>
    %154 = vector.shape_cast %153 : vector<2x8x8x72xf32> to vector<128x72xf32>
    %c232 = arith.constant 232 : index
    %c0_381 = arith.constant 0 : index
    %155 = vector.load %arg3[%c232, %c0_381] : memref<376x8xf32, #tpu.memory_space<vmem>>, vector<72x8xf32>
    %cst_382 = arith.constant dense<0.000000e+00> : vector<128x8xf32>
    %156 = tpu.matmul %154, %155, %cst_382 {dimension_numbers = #tpu.dot_dimension_numbers<[1], [0], [0], [1], [0, 0, 1, 1], [], []>} : vector<128x72xf32>, vector<72x8xf32>, vector<128x8xf32> -> vector<128x8xf32>
    %c10 = arith.constant 10 : index
    %c0_383 = arith.constant 0 : index
    %157 = vector.load %arg4[%c10, %c0_383] : memref<14x8xf32, #tpu.memory_space<vmem>>, vector<1x8xf32>
    %158 = vector.broadcast %157 : vector<1x8xf32> to vector<128x8xf32>
    %159 = arith.mulf %156, %158 : vector<128x8xf32>
    %c11 = arith.constant 11 : index
    %c0_384 = arith.constant 0 : index
    %160 = vector.load %arg4[%c11, %c0_384] : memref<14x8xf32, #tpu.memory_space<vmem>>, vector<1x8xf32>
    %161 = vector.broadcast %160 : vector<1x8xf32> to vector<128x8xf32>
    %162 = arith.addf %159, %161 : vector<128x8xf32>
    %163 = vector.shape_cast %162 : vector<128x8xf32> to vector<2x8x8x8xf32>
    %164 = arith.addf %94, %163 : vector<2x8x8x8xf32>
    %c0_385 = arith.constant 0 : index
    %c0_386 = arith.constant 0 : index
    %c0_387 = arith.constant 0 : index
    %c0_388 = arith.constant 0 : index
    %165 = vector.load %arg5[%c0_385, %c0_386, %c0_387, %c0_388] : memref<2x8x8x32xf32, #tpu.memory_space<vmem>>, vector<2x8x8x8xf32>
    tpu.vector_store %arg5[%c0_385, %c0_386, %c0_387, %c0_388], %164 {strides = array<i32>} : memref<2x8x8x32xf32, #tpu.memory_space<vmem>>, vector<2x8x8x8xf32>,
    %c0_389 = arith.constant 0 : index
    %c0_390 = arith.constant 0 : index
    %c0_391 = arith.constant 0 : index
    %c0_392 = arith.constant 0 : index
    %166 = vector.load %arg6[%c0_389, %c0_390, %c0_391, %c0_392] : memref<2x8x8x8xf32, #tpu.memory_space<vmem>>, vector<2x8x8x8xf32>
    %c0_393 = arith.constant 0 : index
    %c0_394 = arith.constant 0 : index
    %c0_395 = arith.constant 0 : index
    %c0_396 = arith.constant 0 : index
    %167 = vector.load %arg7[%c0_393, %c0_394, %c0_395, %c0_396] : memref<2x8x8x8xf32, #tpu.memory_space<vmem>>, vector<2x8x8x8xf32>
    %cst_397 = arith.constant -3.40282347E+38 : f32
    %168 = vector.broadcast %cst_397 : f32 to vector<2x12x12x8xf32>
    %c0_398 = arith.constant 0 : index
    %c0_399 = arith.constant 0 : index
    %c0_400 = arith.constant 0 : index
    %c0_401 = arith.constant 0 : index
    %169 = vector.load %arg8[%c0_398, %c0_399, %c0_400, %c0_401] : memref<2x12x12x8xf32, #tpu.memory_space<vmem>>, vector<2x12x12x8xf32>
    tpu.vector_store %arg8[%c0_398, %c0_399, %c0_400, %c0_401], %168 {strides = array<i32>} : memref<2x12x12x8xf32, #tpu.memory_space<vmem>>, vector<2x12x12x8xf32>,
    %c0_402 = arith.constant 0 : index
    %c1_403 = arith.constant 1 : index
    %c1_404 = arith.constant 1 : index
    %c0_405 = arith.constant 0 : index
    %170 = vector.load %arg8[%c0_402, %c1_403, %c1_404, %c0_405] : memref<2x12x12x8xf32, #tpu.memory_space<vmem>>, vector<2x8x8x8xf32>
    tpu.vector_store %arg8[%c0_402, %c1_403, %c1_404, %c0_405], %167 {strides = array<i32>} : memref<2x12x12x8xf32, #tpu.memory_space<vmem>>, vector<2x8x8x8xf32>,
    %c0_406 = arith.constant 0 : index
    %c0_407 = arith.constant 0 : index
    %c0_408 = arith.constant 0 : index
    %c0_409 = arith.constant 0 : index
    %171 = vector.load %arg8[%c0_406, %c0_407, %c0_408, %c0_409] : memref<2x12x12x8xf32, #tpu.memory_space<vmem>>, vector<2x8x8x8xf32>
    %c0_410 = arith.constant 0 : index
    %c0_411 = arith.constant 0 : index
    %c1_412 = arith.constant 1 : index
    %c0_413 = arith.constant 0 : index
    %172 = vector.load %arg8[%c0_410, %c0_411, %c1_412, %c0_413] : memref<2x12x12x8xf32, #tpu.memory_space<vmem>>, vector<2x8x8x8xf32>
    %173 = arith.maximumf %171, %172 : vector<2x8x8x8xf32>
    %c0_414 = arith.constant 0 : index
    %c0_415 = arith.constant 0 : index
    %c2_416 = arith.constant 2 : index
    %c0_417 = arith.constant 0 : index
    %174 = vector.load %arg8[%c0_414, %c0_415, %c2_416, %c0_417] : memref<2x12x12x8xf32, #tpu.memory_space<vmem>>, vector<2x8x8x8xf32>
    %175 = arith.maximumf %173, %174 : vector<2x8x8x8xf32>
    %c0_418 = arith.constant 0 : index
    %c1_419 = arith.constant 1 : index
    %c0_420 = arith.constant 0 : index
    %c0_421 = arith.constant 0 : index
    %176 = vector.load %arg8[%c0_418, %c1_419, %c0_420, %c0_421] : memref<2x12x12x8xf32, #tpu.memory_space<vmem>>, vector<2x8x8x8xf32>
    %c0_422 = arith.constant 0 : index
    %c1_423 = arith.constant 1 : index
    %c1_424 = arith.constant 1 : index
    %c0_425 = arith.constant 0 : index
    %177 = vector.load %arg8[%c0_422, %c1_423, %c1_424, %c0_425] : memref<2x12x12x8xf32, #tpu.memory_space<vmem>>, vector<2x8x8x8xf32>
    %178 = arith.maximumf %176, %177 : vector<2x8x8x8xf32>
    %c0_426 = arith.constant 0 : index
    %c1_427 = arith.constant 1 : index
    %c2_428 = arith.constant 2 : index
    %c0_429 = arith.constant 0 : index
    %179 = vector.load %arg8[%c0_426, %c1_427, %c2_428, %c0_429] : memref<2x12x12x8xf32, #tpu.memory_space<vmem>>, vector<2x8x8x8xf32>
    %180 = arith.maximumf %178, %179 : vector<2x8x8x8xf32>
    %c0_430 = arith.constant 0 : index
    %c2_431 = arith.constant 2 : index
    %c0_432 = arith.constant 0 : index
    %c0_433 = arith.constant 0 : index
    %181 = vector.load %arg8[%c0_430, %c2_431, %c0_432, %c0_433] : memref<2x12x12x8xf32, #tpu.memory_space<vmem>>, vector<2x8x8x8xf32>
    %c0_434 = arith.constant 0 : index
    %c2_435 = arith.constant 2 : index
    %c1_436 = arith.constant 1 : index
    %c0_437 = arith.constant 0 : index
    %182 = vector.load %arg8[%c0_434, %c2_435, %c1_436, %c0_437] : memref<2x12x12x8xf32, #tpu.memory_space<vmem>>, vector<2x8x8x8xf32>
    %183 = arith.maximumf %181, %182 : vector<2x8x8x8xf32>
    %c0_438 = arith.constant 0 : index
    %c2_439 = arith.constant 2 : index
    %c2_440 = arith.constant 2 : index
    %c0_441 = arith.constant 0 : index
    %184 = vector.load %arg8[%c0_438, %c2_439, %c2_440, %c0_441] : memref<2x12x12x8xf32, #tpu.memory_space<vmem>>, vector<2x8x8x8xf32>
    %185 = arith.maximumf %183, %184 : vector<2x8x8x8xf32>
    %186 = arith.maximumf %175, %180 : vector<2x8x8x8xf32>
    %187 = arith.maximumf %186, %185 : vector<2x8x8x8xf32>
    %188 = arith.addf %166, %187 : vector<2x8x8x8xf32>
    %c0_442 = arith.constant 0 : index
    %c0_443 = arith.constant 0 : index
    %c0_444 = arith.constant 0 : index
    %c8_445 = arith.constant 8 : index
    %189 = vector.load %arg5[%c0_442, %c0_443, %c0_444, %c8_445] : memref<2x8x8x32xf32, #tpu.memory_space<vmem>>, vector<2x8x8x8xf32>
    tpu.vector_store %arg5[%c0_442, %c0_443, %c0_444, %c8_445], %188 {strides = array<i32>} : memref<2x8x8x32xf32, #tpu.memory_space<vmem>>, vector<2x8x8x8xf32>,
    %c0_446 = arith.constant 0 : index
    %c0_447 = arith.constant 0 : index
    %c0_448 = arith.constant 0 : index
    %c0_449 = arith.constant 0 : index
    %190 = vector.load %arg6[%c0_446, %c0_447, %c0_448, %c0_449] : memref<2x8x8x8xf32, #tpu.memory_space<vmem>>, vector<2x8x8x8xf32>
    %cst_450 = arith.constant 0.000000e+00 : f32
    %191 = vector.broadcast %cst_450 : f32 to vector<2x12x12x8xf32>
    %c0_451 = arith.constant 0 : index
    %c0_452 = arith.constant 0 : index
    %c0_453 = arith.constant 0 : index
    %c0_454 = arith.constant 0 : index
    %192 = vector.load %arg8[%c0_451, %c0_452, %c0_453, %c0_454] : memref<2x12x12x8xf32, #tpu.memory_space<vmem>>, vector<2x12x12x8xf32>
    tpu.vector_store %arg8[%c0_451, %c0_452, %c0_453, %c0_454], %191 {strides = array<i32>} : memref<2x12x12x8xf32, #tpu.memory_space<vmem>>, vector<2x12x12x8xf32>,
    %c0_455 = arith.constant 0 : index
    %c1_456 = arith.constant 1 : index
    %c1_457 = arith.constant 1 : index
    %c0_458 = arith.constant 0 : index
    %193 = vector.load %arg8[%c0_455, %c1_456, %c1_457, %c0_458] : memref<2x12x12x8xf32, #tpu.memory_space<vmem>>, vector<2x8x8x8xf32>
    tpu.vector_store %arg8[%c0_455, %c1_456, %c1_457, %c0_458], %190 {strides = array<i32>} : memref<2x12x12x8xf32, #tpu.memory_space<vmem>>, vector<2x8x8x8xf32>,
    %c0_459 = arith.constant 0 : index
    %c0_460 = arith.constant 0 : index
    %c0_461 = arith.constant 0 : index
    %c0_462 = arith.constant 0 : index
    %194 = vector.load %arg8[%c0_459, %c0_460, %c0_461, %c0_462] : memref<2x12x12x8xf32, #tpu.memory_space<vmem>>, vector<2x8x8x8xf32>
    %c0_463 = arith.constant 0 : index
    %c0_464 = arith.constant 0 : index
    %c1_465 = arith.constant 1 : index
    %c0_466 = arith.constant 0 : index
    %195 = vector.load %arg8[%c0_463, %c0_464, %c1_465, %c0_466] : memref<2x12x12x8xf32, #tpu.memory_space<vmem>>, vector<2x8x8x8xf32>
    %196 = arith.addf %194, %195 : vector<2x8x8x8xf32>
    %c0_467 = arith.constant 0 : index
    %c0_468 = arith.constant 0 : index
    %c2_469 = arith.constant 2 : index
    %c0_470 = arith.constant 0 : index
    %197 = vector.load %arg8[%c0_467, %c0_468, %c2_469, %c0_470] : memref<2x12x12x8xf32, #tpu.memory_space<vmem>>, vector<2x8x8x8xf32>
    %198 = arith.addf %196, %197 : vector<2x8x8x8xf32>
    %c0_471 = arith.constant 0 : index
    %c1_472 = arith.constant 1 : index
    %c0_473 = arith.constant 0 : index
    %c0_474 = arith.constant 0 : index
    %199 = vector.load %arg8[%c0_471, %c1_472, %c0_473, %c0_474] : memref<2x12x12x8xf32, #tpu.memory_space<vmem>>, vector<2x8x8x8xf32>
    %c0_475 = arith.constant 0 : index
    %c1_476 = arith.constant 1 : index
    %c1_477 = arith.constant 1 : index
    %c0_478 = arith.constant 0 : index
    %200 = vector.load %arg8[%c0_475, %c1_476, %c1_477, %c0_478] : memref<2x12x12x8xf32, #tpu.memory_space<vmem>>, vector<2x8x8x8xf32>
    %201 = arith.addf %199, %200 : vector<2x8x8x8xf32>
    %c0_479 = arith.constant 0 : index
    %c1_480 = arith.constant 1 : index
    %c2_481 = arith.constant 2 : index
    %c0_482 = arith.constant 0 : index
    %202 = vector.load %arg8[%c0_479, %c1_480, %c2_481, %c0_482] : memref<2x12x12x8xf32, #tpu.memory_space<vmem>>, vector<2x8x8x8xf32>
    %203 = arith.addf %201, %202 : vector<2x8x8x8xf32>
    %c0_483 = arith.constant 0 : index
    %c2_484 = arith.constant 2 : index
    %c0_485 = arith.constant 0 : index
    %c0_486 = arith.constant 0 : index
    %204 = vector.load %arg8[%c0_483, %c2_484, %c0_485, %c0_486] : memref<2x12x12x8xf32, #tpu.memory_space<vmem>>, vector<2x8x8x8xf32>
    %c0_487 = arith.constant 0 : index
    %c2_488 = arith.constant 2 : index
    %c1_489 = arith.constant 1 : index
    %c0_490 = arith.constant 0 : index
    %205 = vector.load %arg8[%c0_487, %c2_488, %c1_489, %c0_490] : memref<2x12x12x8xf32, #tpu.memory_space<vmem>>, vector<2x8x8x8xf32>
    %206 = arith.addf %204, %205 : vector<2x8x8x8xf32>
    %c0_491 = arith.constant 0 : index
    %c2_492 = arith.constant 2 : index
    %c2_493 = arith.constant 2 : index
    %c0_494 = arith.constant 0 : index
    %207 = vector.load %arg8[%c0_491, %c2_492, %c2_493, %c0_494] : memref<2x12x12x8xf32, #tpu.memory_space<vmem>>, vector<2x8x8x8xf32>
    %208 = arith.addf %206, %207 : vector<2x8x8x8xf32>
    %209 = arith.addf %198, %203 : vector<2x8x8x8xf32>
    %210 = arith.addf %209, %208 : vector<2x8x8x8xf32>
    %211 = tpu.iota {dimensions = array<i32: 0>} : vector<8x8x1xi32>
    %212 = tpu.iota {dimensions = array<i32: 1>} : vector<8x8x1xi32>
    %c0_i32 = arith.constant 0 : i32
    %213 = vector.broadcast %c0_i32 : i32 to vector<8x8x1xi32>
    %214 = arith.cmpi eq, %211, %213 : vector<8x8x1xi32>
    %cst_495 = arith.constant 1.000000e+00 : f32
    %cst_496 = arith.constant 0.000000e+00 : f32
    %215 = vector.broadcast %cst_495 : f32 to vector<8x8x1xf32>
    %216 = vector.broadcast %cst_496 : f32 to vector<8x8x1xf32>
    %217 = arith.select %214, %215, %216 : vector<8x8x1xi1>, vector<8x8x1xf32>
    %cst_497 = arith.constant 3.000000e+00 : f32
    %218 = vector.broadcast %cst_497 : f32 to vector<8x8x1xf32>
    %219 = arith.subf %218, %217 : vector<8x8x1xf32>
    %c7_i32 = arith.constant 7 : i32
    %220 = vector.broadcast %c7_i32 : i32 to vector<8x8x1xi32>
    %221 = arith.cmpi eq, %211, %220 : vector<8x8x1xi32>
    %cst_498 = arith.constant 1.000000e+00 : f32
    %cst_499 = arith.constant 0.000000e+00 : f32
    %222 = vector.broadcast %cst_498 : f32 to vector<8x8x1xf32>
    %223 = vector.broadcast %cst_499 : f32 to vector<8x8x1xf32>
    %224 = arith.select %221, %222, %223 : vector<8x8x1xi1>, vector<8x8x1xf32>
    %225 = arith.subf %219, %224 : vector<8x8x1xf32>
    %c0_i32_500 = arith.constant 0 : i32
    %226 = vector.broadcast %c0_i32_500 : i32 to vector<8x8x1xi32>
    %227 = arith.cmpi eq, %212, %226 : vector<8x8x1xi32>
    %cst_501 = arith.constant 1.000000e+00 : f32
    %cst_502 = arith.constant 0.000000e+00 : f32
    %228 = vector.broadcast %cst_501 : f32 to vector<8x8x1xf32>
    %229 = vector.broadcast %cst_502 : f32 to vector<8x8x1xf32>
    %230 = arith.select %227, %228, %229 : vector<8x8x1xi1>, vector<8x8x1xf32>
    %cst_503 = arith.constant 3.000000e+00 : f32
    %231 = vector.broadcast %cst_503 : f32 to vector<8x8x1xf32>
    %232 = arith.subf %231, %230 : vector<8x8x1xf32>
    %c7_i32_504 = arith.constant 7 : i32
    %233 = vector.broadcast %c7_i32_504 : i32 to vector<8x8x1xi32>
    %234 = arith.cmpi eq, %212, %233 : vector<8x8x1xi32>
    %cst_505 = arith.constant 1.000000e+00 : f32
    %cst_506 = arith.constant 0.000000e+00 : f32
    %235 = vector.broadcast %cst_505 : f32 to vector<8x8x1xf32>
    %236 = vector.broadcast %cst_506 : f32 to vector<8x8x1xf32>
    %237 = arith.select %234, %235, %236 : vector<8x8x1xi1>, vector<8x8x1xf32>
    %238 = arith.subf %232, %237 : vector<8x8x1xf32>
    %239 = arith.mulf %225, %238 : vector<8x8x1xf32>
    %cst_507 = arith.constant 1.000000e+00 : f32
    %240 = vector.broadcast %cst_507 : f32 to vector<8x8x1xf32>
    %241 = arith.divf %240, %239 : vector<8x8x1xf32>
    %242 = vector.shape_cast %241 : vector<8x8x1xf32> to vector<1x8x8x1xf32>
    %243 = vector.broadcast %242 : vector<1x8x8x1xf32> to vector<2x8x8x8xf32>
    %244 = arith.mulf %210, %243 : vector<2x8x8x8xf32>
    %c0_508 = arith.constant 0 : index
    %c0_509 = arith.constant 0 : index
    %c0_510 = arith.constant 0 : index
    %c0_511 = arith.constant 0 : index
    %245 = vector.load %arg5[%c0_508, %c0_509, %c0_510, %c0_511] : memref<2x8x8x32xf32, #tpu.memory_space<vmem>>, vector<2x8x8x8xf32>
    %246 = arith.addf %244, %245 : vector<2x8x8x8xf32>
    %c0_512 = arith.constant 0 : index
    %c0_513 = arith.constant 0 : index
    %c0_514 = arith.constant 0 : index
    %c16_515 = arith.constant 16 : index
    %247 = vector.load %arg5[%c0_512, %c0_513, %c0_514, %c16_515] : memref<2x8x8x32xf32, #tpu.memory_space<vmem>>, vector<2x8x8x8xf32>
    tpu.vector_store %arg5[%c0_512, %c0_513, %c0_514, %c16_515], %246 {strides = array<i32>} : memref<2x8x8x32xf32, #tpu.memory_space<vmem>>, vector<2x8x8x8xf32>,
    %c0_516 = arith.constant 0 : index
    %c0_517 = arith.constant 0 : index
    %c0_518 = arith.constant 0 : index
    %c0_519 = arith.constant 0 : index
    %248 = vector.load %arg7[%c0_516, %c0_517, %c0_518, %c0_519] : memref<2x8x8x8xf32, #tpu.memory_space<vmem>>, vector<2x8x8x8xf32>
    %cst_520 = arith.constant 0.000000e+00 : f32
    %249 = vector.broadcast %cst_520 : f32 to vector<2x8x8x8xf32>
    %250 = arith.maximumf %248, %249 : vector<2x8x8x8xf32>
    %cst_521 = arith.constant 0.000000e+00 : f32
    %251 = vector.broadcast %cst_521 : f32 to vector<2x12x12x8xf32>
    %c0_522 = arith.constant 0 : index
    %c0_523 = arith.constant 0 : index
    %c0_524 = arith.constant 0 : index
    %c0_525 = arith.constant 0 : index
    %252 = vector.load %arg8[%c0_522, %c0_523, %c0_524, %c0_525] : memref<2x12x12x8xf32, #tpu.memory_space<vmem>>, vector<2x12x12x8xf32>
    tpu.vector_store %arg8[%c0_522, %c0_523, %c0_524, %c0_525], %251 {strides = array<i32>} : memref<2x12x12x8xf32, #tpu.memory_space<vmem>>, vector<2x12x12x8xf32>,
    %c0_526 = arith.constant 0 : index
    %c2_527 = arith.constant 2 : index
    %c2_528 = arith.constant 2 : index
    %c0_529 = arith.constant 0 : index
    %253 = vector.load %arg8[%c0_526, %c2_527, %c2_528, %c0_529] : memref<2x12x12x8xf32, #tpu.memory_space<vmem>>, vector<2x8x8x8xf32>
    tpu.vector_store %arg8[%c0_526, %c2_527, %c2_528, %c0_529], %250 {strides = array<i32>} : memref<2x12x12x8xf32, #tpu.memory_space<vmem>>, vector<2x8x8x8xf32>,
    %c0_530 = arith.constant 0 : index
    %c0_531 = arith.constant 0 : index
    %c0_532 = arith.constant 0 : index
    %c0_533 = arith.constant 0 : index
    %254 = vector.load %arg8[%c0_530, %c0_531, %c0_532, %c0_533] : memref<2x12x12x8xf32, #tpu.memory_space<vmem>>, vector<2x8x8x8xf32>
    %c0_534 = arith.constant 0 : index
    %c0_535 = arith.constant 0 : index
    %c0_536 = arith.constant 0 : index
    %c0_537 = arith.constant 0 : index
    %255 = vector.load %arg9[%c0_534, %c0_535, %c0_536, %c0_537] : memref<2x8x8x72xf32, #tpu.memory_space<vmem>>, vector<2x8x8x8xf32>
    tpu.vector_store %arg9[%c0_534, %c0_535, %c0_536, %c0_537], %254 {strides = array<i32>} : memref<2x8x8x72xf32, #tpu.memory_space<vmem>>, vector<2x8x8x8xf32>,
    %c0_538 = arith.constant 0 : index
    %c0_539 = arith.constant 0 : index
    %c2_540 = arith.constant 2 : index
    %c0_541 = arith.constant 0 : index
    %256 = vector.load %arg8[%c0_538, %c0_539, %c2_540, %c0_541] : memref<2x12x12x8xf32, #tpu.memory_space<vmem>>, vector<2x8x8x8xf32>
    %c0_542 = arith.constant 0 : index
    %c0_543 = arith.constant 0 : index
    %c0_544 = arith.constant 0 : index
    %c8_545 = arith.constant 8 : index
    %257 = vector.load %arg9[%c0_542, %c0_543, %c0_544, %c8_545] : memref<2x8x8x72xf32, #tpu.memory_space<vmem>>, vector<2x8x8x8xf32>
    tpu.vector_store %arg9[%c0_542, %c0_543, %c0_544, %c8_545], %256 {strides = array<i32>} : memref<2x8x8x72xf32, #tpu.memory_space<vmem>>, vector<2x8x8x8xf32>,
    %c0_546 = arith.constant 0 : index
    %c0_547 = arith.constant 0 : index
    %c4_548 = arith.constant 4 : index
    %c0_549 = arith.constant 0 : index
    %258 = vector.load %arg8[%c0_546, %c0_547, %c4_548, %c0_549] : memref<2x12x12x8xf32, #tpu.memory_space<vmem>>, vector<2x8x8x8xf32>
    %c0_550 = arith.constant 0 : index
    %c0_551 = arith.constant 0 : index
    %c0_552 = arith.constant 0 : index
    %c16_553 = arith.constant 16 : index
    %259 = vector.load %arg9[%c0_550, %c0_551, %c0_552, %c16_553] : memref<2x8x8x72xf32, #tpu.memory_space<vmem>>, vector<2x8x8x8xf32>
    tpu.vector_store %arg9[%c0_550, %c0_551, %c0_552, %c16_553], %258 {strides = array<i32>} : memref<2x8x8x72xf32, #tpu.memory_space<vmem>>, vector<2x8x8x8xf32>,
    %c0_554 = arith.constant 0 : index
    %c2_555 = arith.constant 2 : index
    %c0_556 = arith.constant 0 : index
    %c0_557 = arith.constant 0 : index
    %260 = vector.load %arg8[%c0_554, %c2_555, %c0_556, %c0_557] : memref<2x12x12x8xf32, #tpu.memory_space<vmem>>, vector<2x8x8x8xf32>
    %c0_558 = arith.constant 0 : index
    %c0_559 = arith.constant 0 : index
    %c0_560 = arith.constant 0 : index
    %c24_561 = arith.constant 24 : index
    %261 = vector.load %arg9[%c0_558, %c0_559, %c0_560, %c24_561] : memref<2x8x8x72xf32, #tpu.memory_space<vmem>>, vector<2x8x8x8xf32>
    tpu.vector_store %arg9[%c0_558, %c0_559, %c0_560, %c24_561], %260 {strides = array<i32>} : memref<2x8x8x72xf32, #tpu.memory_space<vmem>>, vector<2x8x8x8xf32>,
    %c0_562 = arith.constant 0 : index
    %c2_563 = arith.constant 2 : index
    %c2_564 = arith.constant 2 : index
    %c0_565 = arith.constant 0 : index
    %262 = vector.load %arg8[%c0_562, %c2_563, %c2_564, %c0_565] : memref<2x12x12x8xf32, #tpu.memory_space<vmem>>, vector<2x8x8x8xf32>
    %c0_566 = arith.constant 0 : index
    %c0_567 = arith.constant 0 : index
    %c0_568 = arith.constant 0 : index
    %c32_569 = arith.constant 32 : index
    %263 = vector.load %arg9[%c0_566, %c0_567, %c0_568, %c32_569] : memref<2x8x8x72xf32, #tpu.memory_space<vmem>>, vector<2x8x8x8xf32>
    tpu.vector_store %arg9[%c0_566, %c0_567, %c0_568, %c32_569], %262 {strides = array<i32>} : memref<2x8x8x72xf32, #tpu.memory_space<vmem>>, vector<2x8x8x8xf32>,
    %c0_570 = arith.constant 0 : index
    %c2_571 = arith.constant 2 : index
    %c4_572 = arith.constant 4 : index
    %c0_573 = arith.constant 0 : index
    %264 = vector.load %arg8[%c0_570, %c2_571, %c4_572, %c0_573] : memref<2x12x12x8xf32, #tpu.memory_space<vmem>>, vector<2x8x8x8xf32>
    %c0_574 = arith.constant 0 : index
    %c0_575 = arith.constant 0 : index
    %c0_576 = arith.constant 0 : index
    %c40_577 = arith.constant 40 : index
    %265 = vector.load %arg9[%c0_574, %c0_575, %c0_576, %c40_577] : memref<2x8x8x72xf32, #tpu.memory_space<vmem>>, vector<2x8x8x8xf32>
    tpu.vector_store %arg9[%c0_574, %c0_575, %c0_576, %c40_577], %264 {strides = array<i32>} : memref<2x8x8x72xf32, #tpu.memory_space<vmem>>, vector<2x8x8x8xf32>,
    %c0_578 = arith.constant 0 : index
    %c4_579 = arith.constant 4 : index
    %c0_580 = arith.constant 0 : index
    %c0_581 = arith.constant 0 : index
    %266 = vector.load %arg8[%c0_578, %c4_579, %c0_580, %c0_581] : memref<2x12x12x8xf32, #tpu.memory_space<vmem>>, vector<2x8x8x8xf32>
    %c0_582 = arith.constant 0 : index
    %c0_583 = arith.constant 0 : index
    %c0_584 = arith.constant 0 : index
    %c48_585 = arith.constant 48 : index
    %267 = vector.load %arg9[%c0_582, %c0_583, %c0_584, %c48_585] : memref<2x8x8x72xf32, #tpu.memory_space<vmem>>, vector<2x8x8x8xf32>
    tpu.vector_store %arg9[%c0_582, %c0_583, %c0_584, %c48_585], %266 {strides = array<i32>} : memref<2x8x8x72xf32, #tpu.memory_space<vmem>>, vector<2x8x8x8xf32>,
    %c0_586 = arith.constant 0 : index
    %c4_587 = arith.constant 4 : index
    %c2_588 = arith.constant 2 : index
    %c0_589 = arith.constant 0 : index
    %268 = vector.load %arg8[%c0_586, %c4_587, %c2_588, %c0_589] : memref<2x12x12x8xf32, #tpu.memory_space<vmem>>, vector<2x8x8x8xf32>
    %c0_590 = arith.constant 0 : index
    %c0_591 = arith.constant 0 : index
    %c0_592 = arith.constant 0 : index
    %c56_593 = arith.constant 56 : index
    %269 = vector.load %arg9[%c0_590, %c0_591, %c0_592, %c56_593] : memref<2x8x8x72xf32, #tpu.memory_space<vmem>>, vector<2x8x8x8xf32>
    tpu.vector_store %arg9[%c0_590, %c0_591, %c0_592, %c56_593], %268 {strides = array<i32>} : memref<2x8x8x72xf32, #tpu.memory_space<vmem>>, vector<2x8x8x8xf32>,
    %c0_594 = arith.constant 0 : index
    %c4_595 = arith.constant 4 : index
    %c4_596 = arith.constant 4 : index
    %c0_597 = arith.constant 0 : index
    %270 = vector.load %arg8[%c0_594, %c4_595, %c4_596, %c0_597] : memref<2x12x12x8xf32, #tpu.memory_space<vmem>>, vector<2x8x8x8xf32>
    %c0_598 = arith.constant 0 : index
    %c0_599 = arith.constant 0 : index
    %c0_600 = arith.constant 0 : index
    %c64_601 = arith.constant 64 : index
    %271 = vector.load %arg9[%c0_598, %c0_599, %c0_600, %c64_601] : memref<2x8x8x72xf32, #tpu.memory_space<vmem>>, vector<2x8x8x8xf32>
    tpu.vector_store %arg9[%c0_598, %c0_599, %c0_600, %c64_601], %270 {strides = array<i32>} : memref<2x8x8x72xf32, #tpu.memory_space<vmem>>, vector<2x8x8x8xf32>,
    %c0_602 = arith.constant 0 : index
    %c0_603 = arith.constant 0 : index
    %c0_604 = arith.constant 0 : index
    %c0_605 = arith.constant 0 : index
    %272 = vector.load %arg9[%c0_602, %c0_603, %c0_604, %c0_605] : memref<2x8x8x72xf32, #tpu.memory_space<vmem>>, vector<2x8x8x72xf32>
    %273 = vector.shape_cast %272 : vector<2x8x8x72xf32> to vector<128x72xf32>
    %c304 = arith.constant 304 : index
    %c0_606 = arith.constant 0 : index
    %274 = vector.load %arg3[%c304, %c0_606] : memref<376x8xf32, #tpu.memory_space<vmem>>, vector<72x8xf32>
    %cst_607 = arith.constant dense<0.000000e+00> : vector<128x8xf32>
    %275 = tpu.matmul %273, %274, %cst_607 {dimension_numbers = #tpu.dot_dimension_numbers<[1], [0], [0], [1], [0, 0, 1, 1], [], []>} : vector<128x72xf32>, vector<72x8xf32>, vector<128x8xf32> -> vector<128x8xf32>
    %c12 = arith.constant 12 : index
    %c0_608 = arith.constant 0 : index
    %276 = vector.load %arg4[%c12, %c0_608] : memref<14x8xf32, #tpu.memory_space<vmem>>, vector<1x8xf32>
    %277 = vector.broadcast %276 : vector<1x8xf32> to vector<128x8xf32>
    %278 = arith.mulf %275, %277 : vector<128x8xf32>
    %c13 = arith.constant 13 : index
    %c0_609 = arith.constant 0 : index
    %279 = vector.load %arg4[%c13, %c0_609] : memref<14x8xf32, #tpu.memory_space<vmem>>, vector<1x8xf32>
    %280 = vector.broadcast %279 : vector<1x8xf32> to vector<128x8xf32>
    %281 = arith.addf %278, %280 : vector<128x8xf32>
    %282 = vector.shape_cast %281 : vector<128x8xf32> to vector<2x8x8x8xf32>
    %c0_610 = arith.constant 0 : index
    %c0_611 = arith.constant 0 : index
    %c0_612 = arith.constant 0 : index
    %c8_613 = arith.constant 8 : index
    %283 = vector.load %arg5[%c0_610, %c0_611, %c0_612, %c8_613] : memref<2x8x8x32xf32, #tpu.memory_space<vmem>>, vector<2x8x8x8xf32>
    %284 = arith.addf %282, %283 : vector<2x8x8x8xf32>
    %c0_614 = arith.constant 0 : index
    %c0_615 = arith.constant 0 : index
    %c0_616 = arith.constant 0 : index
    %c24_617 = arith.constant 24 : index
    %285 = vector.load %arg5[%c0_614, %c0_615, %c0_616, %c24_617] : memref<2x8x8x32xf32, #tpu.memory_space<vmem>>, vector<2x8x8x8xf32>
    tpu.vector_store %arg5[%c0_614, %c0_615, %c0_616, %c24_617], %284 {strides = array<i32>} : memref<2x8x8x32xf32, #tpu.memory_space<vmem>>, vector<2x8x8x8xf32>,
    return
  }
  func.func @transform_0(%arg0: i32) -> (i32, i32) {
    %c0_i32 = arith.constant 0 : i32
    %c0_i32_0 = arith.constant 0 : i32
    return %arg0, %c0_i32 : i32, i32
  }
  func.func @transform_1(%arg0: i32) -> (i32, i32) {
    %c0_i32 = arith.constant 0 : i32
    %c0_i32_0 = arith.constant 0 : i32
    return %arg0, %c0_i32 : i32, i32
  }
  func.func @transform_2(%arg0: i32) -> (i32, i32) {
    %c0_i32 = arith.constant 0 : i32
    %c0_i32_0 = arith.constant 0 : i32
    %c0_i32_1 = arith.constant 0 : i32
    return %c0_i32, %c0_i32_0 : i32, i32
  }
  func.func @transform_3(%arg0: i32) -> (i32, i32) {
    %c0_i32 = arith.constant 0 : i32
    %c0_i32_0 = arith.constant 0 : i32
    %c0_i32_1 = arith.constant 0 : i32
    return %c0_i32, %c0_i32_0 : i32, i32
  }
  func.func @transform_4(%arg0: i32) -> (i32, i32, i32, i32) {
    %c0_i32 = arith.constant 0 : i32
    %c0_i32_0 = arith.constant 0 : i32
    %c0_i32_1 = arith.constant 0 : i32
    %c0_i32_2 = arith.constant 0 : i32
    return %arg0, %c0_i32, %c0_i32_0, %c0_i32_1 : i32, i32, i32, i32
  }
}

</mosaic_0001>

<bundles_post_ra>
// kernel: cell_forward.1
= control target key start
LH: loop header
LB: loop body
LE: loop exit
PB: predicated region body
PF: predicated region fallthrough
CT: control target
= control target key end

     0   :  { %9 = vsyncpa [#allocation7], 0  ;;  %s13330_s0 = inlined_call_operand.vmem [shape: f32[256,8], index: 0, kind: input, shape index: {}]   ;;  %s13331_s1 = inlined_call_operand.vmem [shape: f32[256,8], index: 1, kind: input, shape index: {}]   ;;  %s13332_s2 = inlined_call_operand.vmem [shape: f32[376,8], index: 2, kind: input, shape index: {}]   ;;  %s13333_s3 = inlined_call_operand.vmem [shape: f32[14,8], index: 3, kind: input, shape index: {}]   ;;  %s13334_s4 = inlined_call_operand.hbm [shape: f32[4,8,8,32], index: 4, kind: output, shape index: {}]  }
   0x1   :  { %11 = vsyncpa [#allocation7 + $0x1], 0  ;;  %s8627_s15 = smov 0   ;;  %s8629_s16 = smov 0  }
   0x2   :  { %s8631_s17 = smov 0   ;;  %s8633_s18 = smov 0  }
   0x3 LB: > { %s8648_s19 = sadd.s32 4294967295, %s8587_s18   ;;  %s7806_s20 = sadd.s32 4294967294, %s8587_s18   ;;  %s8587_s18 = sphi %s8633_s18, %s13601_s18   ;;  %s8583_s17 = sphi %s8631_s17, %s13600_s17   ;;  %s8579_s16 = sphi %s8629_s16, %s13599_s16   ;;  %s8575_s15 = sphi %s8627_s15, %s13598_s15  }
   0x4   : > { %s8652_s21 = sadd.s32 1, %s8587_s18   ;;  %s118_s22 = sadd.s32 1, %s8583_s17 }
   0x5   : > { %s115_s23 = ssub.s32 %s8587_s18, %s8652_s21  ;;  %p128_p0 = scmp.ne.s32.totalorder %s8583_s17, %s8579_s16 }
   0x6   : > { %p116_p1 = scmp.eq.s32.totalorder %s115_s23, 0  ;;  %p129_p2 = scmp.eq.s32.totalorder %s8648_s19, 1 }
   0x7   : > { %p134_p3 = scmp.ne.s32.totalorder %s8579_s16, %s8575_s15  ;;  %p135_p4 = scmp.eq.s32.totalorder %s7806_s20, 1 }
   0x8   : > { %s8663_s24 = scalar_select %p116_p1, %s8583_s17, %s118_s22  }
   0x9   : > { %p8665_p5 = por %p129_p2, %p128_p0  ;;  %p8669_p6 = por %p135_p4, %p134_p3 }
   0xa   : > { %p7809_p7 = scmp.ge.s32.totalorder %s8587_s18, 1  ;;  %p177_p8 = scmp.lt.s32.totalorder %s8587_s18, 3 }
   0xc   : > { %p178_p9 = pnand %p7809_p7, %p177_p8 }
   0xe   : > { %181 = sbr.rel (%p178_p9) target bundleno = 2409 (0x969), region = 36 }
  0x15   : > { %v253_v0 = vld [vmem:[%s13332_s2] sm:$0xff]  ;;  %s7811_s29 = sshll.u32 %s8648_s19, 4  ;;  %vm254_vm0 = vcmask 64512   ;;  %vm823_vm1 = vcmask 60416   ;;  %v13335_v1 = vmov 0.0   ;;  %s8590_s9 = smov 48  }
  0x16   : > { %8108 = vmatprep.subr.mxu0 %v253_v0  ;;  %p8681_p10 = scmp.lt.s32.totalorder %s7811_s29, 31  ;;  %841 = vst.msk [vmem:[#allocation4 + $0x90] sm:$0xff] %vm254_vm0, %v13335_v1  ;;  %822 = vst.msk [vmem:[#allocation4] sm:$0xff] %vm254_vm0, %v13335_v1  ;;  %s8591_s10 = smov 8   ;;  %vm1000_vm2 = vcmask 130112   ;;  %vm1097_vm3 = vcmask 195712  }
  0x17   : > { %842 = vst.msk [vmem:[#allocation4 + $0x98] sm:$0xf] %vm823_vm1, %v13335_v1  ;;  %824 = vst.msk [vmem:[#allocation4 + $0x8] sm:$0xf] %vm823_vm1, %v13335_v1  ;;  %8109 = vmatpush3.msra.mxu0 %v253_v0  ;;  %s8592_s11 = smov 56   ;;  %s8593_s12 = smov 16  }
  0x18   : > { %825 = vst.msk [vmem:[#allocation4 + $0x10] sm:$0xff] %vm254_vm0, %v13335_v1  ;;  %827 = vst.msk [vmem:[#allocation4 + $0x20] sm:$0xff] %vm254_vm0, %v13335_v1  ;;  %s13603_s29 = smov (!%p8681_p10, %s7811_s29), 31  ;;  %s8594_s13 = smov 64   ;;  %v8933_v60 = vld [vmem:[%s13333_s3] ss:$0 sm:$0xff] }
  0x19   : > { %826 = vst.msk [vmem:[#allocation4 + $0x18] sm:$0xf] %vm823_vm1, %v13335_v1  ;;  %828 = vst.msk [vmem:[#allocation4 + $0x28] sm:$0xf] %vm823_vm1, %v13335_v1  ;;  %s7812_s5 = sshll.u32 %s13603_s29, 3  ;;  %s8595_s27 = smov 24  }
  0x1a   : > { %829 = vst.msk [vmem:[#allocation4 + $0x30] sm:$0xff] %vm254_vm0, %v13335_v1  ;;  %831 = vst.msk [vmem:[#allocation4 + $0x40] sm:$0xff] %vm254_vm0, %v13335_v1  ;;  %s8841_s8 = scalar_lea.vmem %s13330_s0, %s7812_s5  ;;  %v8938_v62 = vld [vmem:[%s13333_s3 + $0x1] ss:$0 sm:$0xff]  ;;  %s8596_s28 = smov 32   ;;  %vm1194_vm4 = vcmask 261312  }
  0x1b   : > { %830 = vst.msk [vmem:[#allocation4 + $0x38] sm:$0xf] %vm823_vm1, %v13335_v1  ;;  %832 = vst.msk [vmem:[#allocation4 + $0x48] sm:$0xf] %vm823_vm1, %v13335_v1  ;;  %v221_v2 = vld [vmem:[%s8841_s8] sm:$0xff]  ;;  %v222_v3 = vld [vmem:[%s8841_s8 + $0x8] sm:$0xff]  ;;  %s9426_s23 = scalar_lea.vmem %s13331_s1, %s7812_s5 }
  0x1c   : > { %833 = vst.msk [vmem:[#allocation4 + $0x50] sm:$0xff] %vm254_vm0, %v13335_v1  ;;  %835 = vst.msk [vmem:[#allocation4 + $0x60] sm:$0xff] %vm254_vm0, %v13335_v1  ;;  %v223_v4 = vld [vmem:[%s8841_s8 + $0x10] sm:$0xff]  ;;  %v237_v5 = vmax.f32 %v221_v2, 0.0  ;;  %v238_v6 = vmax.f32 %v222_v3, 0.0  ;;  %v224_v8 = vld [vmem:[%s8841_s8 + $0x18] sm:$0xff] }
  0x1d   : > { %834 = vst.msk [vmem:[#allocation4 + $0x58] sm:$0xf] %vm823_vm1, %v13335_v1  ;;  %836 = vst.msk [vmem:[#allocation4 + $0x68] sm:$0xf] %vm823_vm1, %v13335_v1  ;;  %v239_v7 = vmax.f32 %v223_v4, 0.0  ;;  %v225_v9 = vld [vmem:[%s8841_s8 + $0x20] sm:$0xff] }
  0x1e   : > { %837 = vst.msk [vmem:[#allocation4 + $0x70] sm:$0xff] %vm254_vm0, %v13335_v1  ;;  %839 = vst.msk [vmem:[#allocation4 + $0x80] sm:$0xff] %vm254_vm0, %v13335_v1  ;;  %8110 = vmatprep.mubr.msk.f32.mxu0 %vm254_vm0, %v237_v5  ;;  %v240_v10 = vmax.f32 %v224_v8, 0.0  ;;  %v226_v11 = vld [vmem:[%s8841_s8 + $0x28] sm:$0xff]  ;;  %v1413_v12 = vld [vmem:[#allocation4 + $0x90] sm:$0xff]  ;;  %v241_v13 = vmax.f32 %v225_v9, 0.0 }
  0x1f   : > { %838 = vst.msk [vmem:[#allocation4 + $0x78] sm:$0xf] %vm823_vm1, %v13335_v1  ;;  %840 = vst.msk [vmem:[#allocation4 + $0x88] sm:$0xf] %vm823_vm1, %v13335_v1  ;;  %8111 = vmatmul.mubr.msk.f32.vlgmr.msra.gmra.mrb[0].mxu0 %vm254_vm0, %v238_v6  ;;  %v227_v14 = vld [vmem:[%s8841_s8 + $0x30] sm:$0xff]  ;;  %1452 = vrot.lane.b32.xlu1 %v1413_v12, %s8590_s9  ;;  %v920_v20 = vld [vmem:[#allocation4 + $0x1] sm:$0xff] }
  0x20   : > { %843 = vst.msk [vmem:[#allocation4 + $0xa0] sm:$0xff] %vm254_vm0, %v13335_v1  ;;  %845 = vst.msk [vmem:[#allocation4 + $0xb0] sm:$0xff] %vm254_vm0, %v13335_v1  ;;  %8113 = vmatprep.mubr.msk.f32.mxu0 %vm254_vm0, %v239_v7  ;;  %v1510_v15 = vld [vmem:[#allocation4 + $0x91] sm:$0xff]  ;;  %v242_v21 = vmax.f32 %v226_v11, 0.0  ;;  %952 = vrot.lane.b32.xlu0 %v920_v20, %s8591_s10  ;;  %v1017_v22 = vld [vmem:[#allocation4 + $0x2] sm:$0xff]  ;;  %v243_v23 = vmax.f32 %v227_v14, 0.0 }
  0x21   : > { %844 = vst.msk [vmem:[#allocation4 + $0xa8] sm:$0xf] %vm823_vm1, %v13335_v1  ;;  %846 = vst.msk [vmem:[#allocation4 + $0xb8] sm:$0xf] %vm823_vm1, %v13335_v1  ;;  %v1607_v16 = vld [vmem:[#allocation4 + $0x92] sm:$0xff]  ;;  %v229_v26 = vld [vmem:[%s8841_s8 + $0x40] sm:$0xff] }
  0x22   : > { %847 = vst.msk [vmem:[#allocation4 + $0xc0] sm:$0xff] %vm254_vm0, %v13335_v1  ;;  %849 = vst.msk [vmem:[#allocation4 + $0xd0] sm:$0xff] %vm254_vm0, %v13335_v1  ;;  %v228_v24 = vld [vmem:[%s8841_s8 + $0x38] sm:$0xff]  ;;  %v245_v28 = vmax.f32 %v229_v26, 0.0  ;;  %v230_v29 = vld [vmem:[%s8841_s8 + $0x48] sm:$0xff]  ;;  %s8597_s30 = smov 40  }
  0x23   : > { %848 = vst.msk [vmem:[#allocation4 + $0xc8] sm:$0xf] %vm823_vm1, %v13335_v1  ;;  %850 = vst.msk [vmem:[#allocation4 + $0xd8] sm:$0xf] %vm823_vm1, %v13335_v1  ;;  %8114 = vmatmul.mubr.msk.f32.gmra.mrb[2].mxu0 %vm254_vm0, %v240_v10  ;;  %v244_v27 = vmax.f32 %v228_v24, 0.0  ;;  %v231_v32 = vld [vmem:[%s8841_s8 + $0x50] sm:$0xff] }
  0x24   : > { %851 = vst.msk [vmem:[#allocation4 + $0xe0] sm:$0xff] %vm254_vm0, %v13335_v1  ;;  %853 = vst.msk [vmem:[#allocation4 + $0xf0] sm:$0xff] %vm254_vm0, %v13335_v1  ;;  %8116 = vmatprep.mubr.msk.f32.mxu0 %vm254_vm0, %v241_v13  ;;  %v246_v35 = vmax.f32 %v230_v29, 0.0  ;;  %v247_v36 = vmax.f32 %v231_v32, 0.0  ;;  %v232_v37 = vld [vmem:[%s8841_s8 + $0x58] sm:$0xff]  ;;  %v233_v38 = vld [vmem:[%s8841_s8 + $0x60] sm:$0xff] }
  0x25   : > { %852 = vst.msk [vmem:[#allocation4 + $0xe8] sm:$0xf] %vm823_vm1, %v13335_v1  ;;  %854 = vst.msk [vmem:[#allocation4 + $0xf8] sm:$0xf] %vm823_vm1, %v13335_v1  ;;  %v248_v39 = vmax.f32 %v232_v37, 0.0  ;;  %v249_v40 = vmax.f32 %v233_v38, 0.0 }
  0x26   : > { %855 = vst.msk [vmem:[#allocation4 + $0x100] sm:$0xff] %vm254_vm0, %v13335_v1  ;;  %857 = vst.msk [vmem:[#allocation4 + $0x110] sm:$0xff] %vm254_vm0, %v13335_v1  ;;  %v234_v41 = vld [vmem:[%s8841_s8 + $0x68] sm:$0xff]  ;;  %v235_v42 = vld [vmem:[%s8841_s8 + $0x70] sm:$0xff]  ;;  %vm1291_vm5 = vcmask 326912   ;;  %vm1388_vm6 = vcmask 392512  }
  0x27   : > { %856 = vst.msk [vmem:[#allocation4 + $0x108] sm:$0xf] %vm823_vm1, %v13335_v1  ;;  %858 = vst.msk [vmem:[#allocation4 + $0x118] sm:$0xf] %vm823_vm1, %v13335_v1  ;;  %8117 = vmatmul.mubr.msk.f32.gmra.mrb[4].mxu0 %vm254_vm0, %v242_v21  ;;  %v250_v43 = vmax.f32 %v234_v41, 0.0  ;;  %v251_v44 = vmax.f32 %v235_v42, 0.0 }
  0x28   : > { %859 = vst.msk [vmem:[#allocation4 + $0x120] sm:$0xff] %vm254_vm0, %v13335_v1  ;;  %861 = vst.msk [vmem:[#allocation4 + $0x130] sm:$0xff] %vm254_vm0, %v13335_v1  ;;  %8119 = vmatprep.mubr.msk.f32.mxu0 %vm254_vm0, %v243_v23  ;;  %v236_v45 = vld [vmem:[%s8841_s8 + $0x78] sm:$0xff]  ;;  %v888_v47 = vld [vmem:[#allocation4] sm:$0xff]  ;;  %vm1486_vm7 = vcmask 458112   ;;  %vm1583_vm8 = vcmask 523712  }
  0x29   : > { %860 = vst.msk [vmem:[#allocation4 + $0x128] sm:$0xf] %vm823_vm1, %v13335_v1  ;;  %862 = vst.msk [vmem:[#allocation4 + $0x138] sm:$0xf] %vm823_vm1, %v13335_v1  ;;  %v252_v46 = vmax.f32 %v236_v45, 0.0  ;;  %v896_v50 = vld [vmem:[#allocation4 + $0xc0] sm:$0xff] }
  0x2a   : > { %863 = vst.msk [vmem:[#allocation4 + $0x140] sm:$0xff] %vm254_vm0, %v13335_v1  ;;  %865 = vst.msk [vmem:[#allocation4 + $0x150] sm:$0xff] %vm254_vm0, %v13335_v1  ;;  %v928_v25 = vld [vmem:[#allocation4 + $0xc1] sm:$0xff]  ;;  %vm1680_vm9 = vcmask 589312   ;;  %vm1722_vm10 = vcmask 588800   ;;  %s8599_s14 = smov 120  }
  0x2b   : > { %864 = vst.msk [vmem:[#allocation4 + $0x148] sm:$0xf] %vm823_vm1, %v13335_v1  ;;  %866 = vst.msk [vmem:[#allocation4 + $0x158] sm:$0xf] %vm823_vm1, %v13335_v1  ;;  %968 = vrot.lane.b32.xlu0 %v928_v25, %s8591_s10  ;;  %8120 = vmatmul.mubr.msk.f32.gmra.mrb[6].mxu0 %vm254_vm0, %v244_v27  ;;  %v1025_v49 = vld [vmem:[#allocation4 + $0xc2] sm:$0xff]  ;;  %s8600_s29 = smov [#allocation6]  }
  0x2c   : > { %867 = vst.msk [vmem:[#allocation4 + $0x160] sm:$0xff] %vm254_vm0, %v13335_v1  ;;  %869 = vst.msk [vmem:[#allocation4 + $0x170] sm:$0xff] %vm254_vm0, %v13335_v1  ;;  %8122 = vmatprep.mubr.msk.f32.mxu0 %vm254_vm0, %v245_v28  ;;  %s8529_s5 = sshll.u32 %s8600_s29, 4  ;;  %s8530_s5 = int_to_ptr.vmem [resolvable:$false] %s8529_s5 }
  0x2d   : > { %868 = vst.msk [vmem:[#allocation4 + $0x168] sm:$0xf] %vm823_vm1, %v13335_v1  ;;  %870 = vst.msk [vmem:[#allocation4 + $0x178] sm:$0xf] %vm823_vm1, %v13335_v1  ;;  %s8531_s8 = scalar_lea.vmem %s8530_s5, 4096 }
  0x2e   : > { %1994 = vst.msk [vmem:[#allocation4 + $0xa0] sm:$0xff] %vm254_vm0, %v13335_v1  ;;  %1996 = vst.msk [vmem:[#allocation4 + $0xb0] sm:$0xff] %vm254_vm0, %v13335_v1 }
  0x2f   : > { %1995 = vst.msk [vmem:[#allocation4 + $0xa8] sm:$0xf] %vm823_vm1, %v13335_v1  ;;  %1997 = vst.msk [vmem:[#allocation4 + $0xb8] sm:$0xf] %vm823_vm1, %v13335_v1  ;;  %1049 = vrot.lane.b32.xlu0 %v1017_v22, %s8593_s12  ;;  %8123 = vmatmul.mubr.msk.f32.gmra.mrb[8].mxu0 %vm254_vm0, %v246_v35 }
  0x30   : > { %2018 = vst.msk [vmem:[#allocation4 + $0x160] sm:$0xff] %vm254_vm0, %v13335_v1  ;;  %2020 = vst.msk [vmem:[#allocation4 + $0x170] sm:$0xff] %vm254_vm0, %v13335_v1  ;;  %8125 = vmatprep.mubr.msk.f32.mxu0 %vm254_vm0, %v247_v36 }
  0x31   : > { %2019 = vst.msk [vmem:[#allocation4 + $0x168] sm:$0xf] %vm823_vm1, %v13335_v1  ;;  %2021 = vst.msk [vmem:[#allocation4 + $0x178] sm:$0xf] %vm823_vm1, %v13335_v1  ;;  %v1421_v17 = vld [vmem:[#allocation4 + $0x150] sm:$0xff] }
  0x32   : > { %3150 = vst.msk [vmem:[#allocation4 + $0xa0] sm:$0xff] %vm254_vm0, %v13335_v1  ;;  %3152 = vst.msk [vmem:[#allocation4 + $0xb0] sm:$0xff] %vm254_vm0, %v13335_v1  ;;  %v1518_v18 = vld [vmem:[#allocation4 + $0x151] sm:$0xff]  ;;  %1468 = vrot.lane.b32.xlu1 %v1421_v17, %s8590_s9 }
  0x33   : > { %3151 = vst.msk [vmem:[#allocation4 + $0xa8] sm:$0xf] %vm823_vm1, %v13335_v1  ;;  %3153 = vst.msk [vmem:[#allocation4 + $0xb8] sm:$0xf] %vm823_vm1, %v13335_v1  ;;  %v1615_v19 = vld [vmem:[#allocation4 + $0x152] sm:$0xff]  ;;  %8126 = vmatmul.mubr.msk.f32.gmra.mrb[10].mxu0 %vm254_vm0, %v248_v39  ;;  %1065 = vrot.lane.b32.xlu0 %v1025_v49, %s8593_s12 }
  0x34   : > { %3174 = vst.msk [vmem:[#allocation4 + $0x160] sm:$0xff] %vm254_vm0, %v13335_v1  ;;  %3176 = vst.msk [vmem:[#allocation4 + $0x170] sm:$0xff] %vm254_vm0, %v13335_v1  ;;  %8128 = vmatprep.mubr.msk.f32.mxu0 %vm254_vm0, %v249_v40 }
  0x35   : > { %3175 = vst.msk [vmem:[#allocation4 + $0x168] sm:$0xf] %vm823_vm1, %v13335_v1  ;;  %3177 = vst.msk [vmem:[#allocation4 + $0x178] sm:$0xf] %vm823_vm1, %v13335_v1 }
  0x36   : > { %4290 = vst.msk [vmem:[#allocation4 + $0xa0] sm:$0xff] %vm254_vm0, %v13335_v1  ;;  %4292 = vst.msk [vmem:[#allocation4 + $0xb0] sm:$0xff] %vm254_vm0, %v13335_v1  ;;  %1549 = vrot.lane.b32.xlu1 %v1510_v15, %s8592_s11 }
  0x37   : > { %4291 = vst.msk [vmem:[#allocation4 + $0xa8] sm:$0xf] %vm823_vm1, %v13335_v1  ;;  %4293 = vst.msk [vmem:[#allocation4 + $0xb8] sm:$0xf] %vm823_vm1, %v13335_v1  ;;  %8129 = vmatmul.mubr.msk.f32.gmra.mrb[12].mxu0 %vm254_vm0, %v250_v43 }
  0x38   : > { %4314 = vst.msk [vmem:[#allocation4 + $0x160] sm:$0xff] %vm254_vm0, %v13335_v1  ;;  %4316 = vst.msk [vmem:[#allocation4 + $0x170] sm:$0xff] %vm254_vm0, %v13335_v1  ;;  %8131 = vmatprep.mubr.msk.f32.mxu0 %vm254_vm0, %v251_v44 }
  0x39   : > { %4315 = vst.msk [vmem:[#allocation4 + $0x168] sm:$0xf] %vm823_vm1, %v13335_v1  ;;  %4317 = vst.msk [vmem:[#allocation4 + $0x178] sm:$0xf] %vm823_vm1, %v13335_v1 }
  0x3a   : > { %1993 = vst.msk [vmem:[#allocation4 + $0x98] sm:$0xf] %vm823_vm1, %v13335_v1  ;;  %2017 = vst.msk [vmem:[#allocation4 + $0x158] sm:$0xf] %vm823_vm1, %v13335_v1  ;;  %1565 = vrot.lane.b32.xlu1 %v1518_v18, %s8592_s11 }
  0x3b   : > { %1992 = vst.msk [vmem:[#allocation4 + $0x90] sm:$0xff] %vm254_vm0, %v13335_v1  ;;  %2016 = vst.msk [vmem:[#allocation4 + $0x150] sm:$0xff] %vm254_vm0, %v13335_v1  ;;  %8132 = vmatmul.mubr.msk.f32.gmra.mrb[14].mxu0 %vm254_vm0, %v252_v46 }
  0x3c   : > { %1975 = vst.msk [vmem:[#allocation4 + $0x8] sm:$0xf] %vm823_vm1, %v13335_v1  ;;  %1999 = vst.msk [vmem:[#allocation4 + $0xc8] sm:$0xf] %vm823_vm1, %v13335_v1 }
  0x3d   : > { %1974 = vst.msk [vmem:[#allocation4] sm:$0xff] %vm254_vm0, %v13335_v1  ;;  %904 = vst.msk [vmem:[#allocation5] sm:$0xff] %vm254_vm0, %v888_v47 }
  0x3e   : > { %1646 = vrot.lane.b32.xlu1 %v1607_v16, %s8594_s13  ;;  %1998 = vst.msk [vmem:[#allocation4 + $0xc0] sm:$0xff] %vm254_vm0, %v13335_v1  ;;  %912 = vst.msk [vmem:[#allocation5 + $0x40] sm:$0xff] %vm254_vm0, %v896_v50 }
  0x42   : > { %v2653_v30 = vld [vmem:[#allocation4 + $0x91] sm:$0xff]  ;;  %1662 = vrot.lane.b32.xlu1 %v1615_v19, %s8594_s13 }
  0x43   : > { %v2749_v31 = vld [vmem:[#allocation4 + $0x92] sm:$0xff] }
  0x44   : > { %3149 = vst.msk [vmem:[#allocation4 + $0x98] sm:$0xf] %vm823_vm1, %v13335_v1  ;;  %v2661_v33 = vld [vmem:[#allocation4 + $0x151] sm:$0xff]  ;;  %v2070_v52 = vld [vmem:[#allocation4 + $0x1] sm:$0xff] }
  0x45   : > { %v8878_v34 = vld [vmem:[#allocation4 + $0x152] sm:$0xff]  ;;  %2102 = vrot.lane.b32.xlu0 %v2070_v52, %s8591_s10  ;;  %v2078_v53 = vld [vmem:[#allocation4 + $0xc1] sm:$0xff] }
  0x46   : > { %3173 = vst.msk [vmem:[#allocation4 + $0x158] sm:$0xf] %vm823_vm1, %v13335_v1  ;;  %v2557_v48 = vld [vmem:[#allocation4 + $0x90] sm:$0xff]  ;;  %v2166_v54 = vld [vmem:[#allocation4 + $0x2] sm:$0xff] }
  0x47   : > { %2596 = vrot.lane.b32.xlu1 %v2557_v48, %s8590_s9  ;;  %3148 = vst.msk [vmem:[#allocation4 + $0x90] sm:$0xff] %vm254_vm0, %v13335_v1  ;;  %v2565_v51 = vld [vmem:[#allocation4 + $0x150] sm:$0xff]  ;;  %v2174_v55 = vld [vmem:[#allocation4 + $0xc2] sm:$0xff] }
  0x48   : > { %3172 = vst.msk [vmem:[#allocation4 + $0x150] sm:$0xff] %vm254_vm0, %v13335_v1 }
  0x49   : > { %2118 = vrot.lane.b32.xlu0 %v2078_v53, %s8591_s10  ;;  %3131 = vst.msk [vmem:[#allocation4 + $0x8] sm:$0xf] %vm823_vm1, %v13335_v1  ;;  %3155 = vst.msk [vmem:[#allocation4 + $0xc8] sm:$0xf] %vm823_vm1, %v13335_v1 }
  0x4b   : > { %2612 = vrot.lane.b32.xlu1 %v2565_v51, %s8590_s9 }
  0x4d   : > { %2198 = vrot.lane.b32.xlu0 %v2166_v54, %s8593_s12 }
  0x4f   : > { %2692 = vrot.lane.b32.xlu1 %v2653_v30, %s8592_s11 }
  0x51   : > { %2214 = vrot.lane.b32.xlu0 %v2174_v55, %s8593_s12 }
  0x53   : > { %2708 = vrot.lane.b32.xlu1 %v2661_v33, %s8592_s11 }
  0x57   : > { %2788 = vrot.lane.b32.xlu1 %v2749_v31, %s8594_s13 }
  0x92   : > { %v953_v56 = vpop.permute.xlu0 %952 }
  0x93   : > { %1001 = vst.msk [vmem:[#allocation5] sm:$0xff] %vm1000_vm2, %v953_v56 }
  0x9d   : > { %v969_v57 = vpop.permute.xlu0 %968 }
  0x9e   : > { %1009 = vst.msk [vmem:[#allocation5 + $0x40] sm:$0xff] %vm1000_vm2, %v969_v57 }
  0xa1   : > { %v1050_v58 = vpop.permute.xlu0 %1049 }
  0xa2   : > { %1098 = vst.msk [vmem:[#allocation5] sm:$0xff] %vm1097_vm3, %v1050_v58 }
  0xa5   : > { %v1066_v59 = vpop.permute.xlu0 %1065 }
  0xa6   : > { %1106 = vst.msk [vmem:[#allocation5 + $0x40] sm:$0xff] %vm1097_vm3, %v1066_v59 }
  0xf2   : > { %v8112_v61 = vpop.f32.mrb[0].mxu0 }
  0xf3   : > { %v454_v63 = vmul.f32 %v8112_v61, %v8933_v60  ;;  %v369_v0 = vpop.f32.mrb[1].mxu0 }
  0xf4   : > { %v453_v2 = vmul.f32 %v8933_v60, %v369_v0 }
  0xf5   : > { %v475_v3 = vadd.f32 %v8938_v62, %v454_v63 }
  0xf6   : > { %v474_v4 = vadd.f32 %v8938_v62, %v453_v2  ;;  %v8115_v5 = vpop.f32.mrb[2].mxu0 }
  0xf7   : > { %491 = vst.msk [vmem:[#allocation2 + $0x8] sm:$0xff] %vm254_vm0, %v475_v3  ;;  %v456_v6 = vmul.f32 %v8115_v5, %v8933_v60  ;;  %v379_v7 = vpop.f32.mrb[3].mxu0 }
  0xf8   : > { %490 = vst.msk [vmem:[#allocation2] sm:$0xff] %vm254_vm0, %v474_v4  ;;  %v455_v8 = vmul.f32 %v8933_v60, %v379_v7 }
  0xf9   : > { %v477_v9 = vadd.f32 %v8938_v62, %v456_v6 }
  0xfa   : > { %v476_v10 = vadd.f32 %v8938_v62, %v455_v8  ;;  %v8118_v11 = vpop.f32.mrb[4].mxu0 }
  0xfb   : > { %493 = vst.msk [vmem:[#allocation2 + $0x18] sm:$0xff] %vm254_vm0, %v477_v9  ;;  %v458_v12 = vmul.f32 %v8118_v11, %v8933_v60  ;;  %v389_v13 = vpop.f32.mrb[5].mxu0 }
  0xfc   : > { %492 = vst.msk [vmem:[#allocation2 + $0x10] sm:$0xff] %vm254_vm0, %v476_v10  ;;  %v457_v14 = vmul.f32 %v8933_v60, %v389_v13 }
  0xfd   : > { %v479_v15 = vadd.f32 %v8938_v62, %v458_v12 }
  0xfe   : > { %v8955_v16 = vld [vmem:[#allocation2 + $0x8] sm:$0xff]  ;;  %v478_v17 = vadd.f32 %v8938_v62, %v457_v14  ;;  %v8121_v18 = vpop.f32.mrb[6].mxu0 }
  0xff   : > { %13410 = vst [vmem:[#allocation9_spill] sm:$0xff] %v8955_v16  ;;  %v807_v19 = vmax.f32 %v8955_v16, 0.0  ;;  %v8959_v20 = vld [vmem:[#allocation2] sm:$0xff]  ;;  %495 = vst.msk [vmem:[#allocation2 + $0x28] sm:$0xff] %vm254_vm0, %v479_v15  ;;  %v460_v21 = vmul.f32 %v8121_v18, %v8933_v60  ;;  %v399_v22 = vpop.f32.mrb[7].mxu0 }
 0x100   : > { %13411 = vst [vmem:[#allocation10_spill] sm:$0xff] %v8959_v20  ;;  %v806_v23 = vmax.f32 %v8959_v20, 0.0  ;;  %494 = vst.msk [vmem:[#allocation2 + $0x20] sm:$0xff] %vm254_vm0, %v478_v17  ;;  %v459_v24 = vmul.f32 %v8933_v60, %v399_v22 }
 0x101   : > { %873 = vst.msk [vmem:[#allocation4 + $0x21] sm:$0xff] %vm254_vm0, %v807_v19  ;;  %v481_v25 = vadd.f32 %v8938_v62, %v460_v21 }
 0x102   : > { %872 = vst.msk [vmem:[#allocation4 + $0x11] sm:$0xff] %vm254_vm0, %v806_v23  ;;  %v8969_v26 = vld [vmem:[#allocation2 + $0x18] sm:$0xff]  ;;  %v480_v27 = vadd.f32 %v8938_v62, %v459_v24  ;;  %v8124_v28 = vpop.f32.mrb[8].mxu0 }
 0x103   : > { %13412 = vst [vmem:[#allocation11_spill] sm:$0xff] %v8969_v26  ;;  %v809_v29 = vmax.f32 %v8969_v26, 0.0  ;;  %v8973_v30 = vld [vmem:[#allocation2 + $0x10] sm:$0xff]  ;;  %497 = vst.msk [vmem:[#allocation2 + $0x38] sm:$0xff] %vm254_vm0, %v481_v25  ;;  %v462_v31 = vmul.f32 %v8124_v28, %v8933_v60  ;;  %v409_v32 = vpop.f32.mrb[9].mxu0 }
 0x104   : > { %13413 = vst [vmem:[#allocation12_spill] sm:$0xff] %v8973_v30  ;;  %v808_v33 = vmax.f32 %v8973_v30, 0.0  ;;  %496 = vst.msk [vmem:[#allocation2 + $0x30] sm:$0xff] %vm254_vm0, %v480_v27  ;;  %v461_v35 = vmul.f32 %v8933_v60, %v409_v32 }
 0x105   : > { %875 = vst.msk [vmem:[#allocation4 + $0x41] sm:$0xff] %vm254_vm0, %v809_v29  ;;  %v483_v36 = vadd.f32 %v8938_v62, %v462_v31 }
 0x106   : > { %874 = vst.msk [vmem:[#allocation4 + $0x31] sm:$0xff] %vm254_vm0, %v808_v33  ;;  %v8983_v37 = vld [vmem:[#allocation2 + $0x28] sm:$0xff]  ;;  %v482_v38 = vadd.f32 %v8938_v62, %v461_v35  ;;  %v8127_v39 = vpop.f32.mrb[10].mxu0 }
 0x107   : > { %13414 = vst [vmem:[#allocation13_spill] sm:$0xff] %v8983_v37  ;;  %v811_v40 = vmax.f32 %v8983_v37, 0.0  ;;  %v8987_v41 = vld [vmem:[#allocation2 + $0x20] sm:$0xff]  ;;  %499 = vst.msk [vmem:[#allocation2 + $0x48] sm:$0xff] %vm254_vm0, %v483_v36  ;;  %v464_v42 = vmul.f32 %v8127_v39, %v8933_v60  ;;  %v419_v43 = vpop.f32.mrb[11].mxu0 }
 0x108   : > { %13415 = vst [vmem:[#allocation14_spill] sm:$0xff] %v8987_v41  ;;  %v8991_v44 = vld [vmem:[#allocation4 + $0x22] sm:$0xff]  ;;  %v810_v47 = vmax.f32 %v8987_v41, 0.0  ;;  %498 = vst.msk [vmem:[#allocation2 + $0x40] sm:$0xff] %vm254_vm0, %v482_v38  ;;  %v463_v48 = vmul.f32 %v8933_v60, %v419_v43 }
 0x109   : > { %v922_v45 = vld [vmem:[#allocation4 + $0x21] sm:$0xff]  ;;  %v8996_v49 = vld [vmem:[#allocation4 + $0x12] sm:$0xff]  ;;  %1053 = vrot.lane.b32.xlu0 %v8991_v44, %s8593_s12  ;;  %877 = vst.msk [vmem:[#allocation4 + $0x61] sm:$0xff] %vm254_vm0, %v811_v40  ;;  %v485_v52 = vadd.f32 %v8938_v62, %v464_v42 }
 0x10a   : > { %v1406_v46 = vld [vmem:[#allocation4 + $0x20] sm:$0xff]  ;;  %956 = vrot.lane.b32.xlu1 %v922_v45, %s8591_s10  ;;  %1979 = vst.msk [vmem:[#allocation4 + $0x28] sm:$0xf] %vm823_vm1, %v13335_v1  ;;  %v9003_v50 = vld [vmem:[#allocation4 + $0x11] sm:$0xff]  ;;  %v484_v54 = vadd.f32 %v8938_v62, %v463_v48  ;;  %v8130_v33 = vpop.f32.mrb[12].mxu0 }
 0x10b   : > { %v9005_v51 = vld [vmem:[#allocation4 + $0x10] sm:$0xff]  ;;  %906 = vst.msk [vmem:[#allocation5 + $0x10] sm:$0xff] %vm254_vm0, %v1406_v46  ;;  %1978 = vst.msk [vmem:[#allocation4 + $0x20] sm:$0xff] %vm254_vm0, %v13335_v1  ;;  %v9015_v53 = vld [vmem:[#allocation2 + $0x38] sm:$0xff]  ;;  %v466_v35 = vmul.f32 %v8130_v33, %v8933_v60 }
 0x10c   : > { %1977 = vst.msk [vmem:[#allocation4 + $0x18] sm:$0xf] %vm823_vm1, %v13335_v1  ;;  %13416 = vst [vmem:[#allocation15_spill] sm:$0xff] %v9015_v53  ;;  %v813_v55 = vmax.f32 %v9015_v53, 0.0  ;;  %v9023_v56 = vld [vmem:[#allocation2 + $0x30] sm:$0xff]  ;;  %v9026_v57 = vld [vmem:[#allocation4 + $0x40] sm:$0xff] }
 0x10d   : > { %876 = vst.msk [vmem:[#allocation4 + $0x51] sm:$0xff] %vm254_vm0, %v810_v47  ;;  %905 = vst.msk [vmem:[#allocation5 + $0x8] sm:$0xff] %vm254_vm0, %v9005_v51  ;;  %v9028_v58 = vld [vmem:[#allocation4 + $0x42] sm:$0xff]  ;;  %v812_v61 = vmax.f32 %v9023_v56, 0.0  ;;  %1438 = vrot.lane.b32.xlu0 %v1406_v46, %s8590_s9  ;;  %v9036_v63 = vld [vmem:[#allocation4 + $0x31] sm:$0xff]  ;;  %v487_v40 = vadd.f32 %v8938_v62, %v466_v35 }
 0x10e   : > { %1976 = vst.msk [vmem:[#allocation4 + $0x10] sm:$0xff] %vm254_vm0, %v13335_v1  ;;  %13417 = vst [vmem:[#allocation16_spill] sm:$0xff] %v9023_v56  ;;  %v9030_v59 = vld [vmem:[#allocation4 + $0x41] sm:$0xff]  ;;  %1148 = vrot.lane.b32.xlu1 %v1406_v46, %s8595_s27  ;;  %v9038_v0 = vld [vmem:[#allocation4 + $0x32] sm:$0xff] }
 0x10f   : > { %501 = vst.msk [vmem:[#allocation2 + $0x58] sm:$0xff] %vm254_vm0, %v485_v52  ;;  %500 = vst.msk [vmem:[#allocation2 + $0x50] sm:$0xff] %vm254_vm0, %v484_v54  ;;  %v9040_v2 = vld [vmem:[#allocation4 + $0x30] sm:$0xff]  ;;  %v9052_v3 = vld [vmem:[#allocation2 + $0x48] sm:$0xff]  ;;  %v429_v54 = vpop.f32.mrb[13].mxu0 }
 0x110   : > { %1983 = vst.msk [vmem:[#allocation4 + $0x48] sm:$0xf] %vm823_vm1, %v13335_v1  ;;  %1981 = vst.msk [vmem:[#allocation4 + $0x38] sm:$0xf] %vm823_vm1, %v13335_v1  ;;  %v815_v4 = vmax.f32 %v9052_v3, 0.0  ;;  %v9059_v5 = vld [vmem:[#allocation2 + $0x40] sm:$0xff] }
 0x111   : > { %879 = vst.msk [vmem:[#allocation4 + $0x81] sm:$0xff] %vm254_vm0, %v813_v55  ;;  %908 = vst.msk [vmem:[#allocation5 + $0x20] sm:$0xff] %vm254_vm0, %v9026_v57  ;;  %v9061_v6 = vld [vmem:[#allocation4 + $0x60] sm:$0xff]  ;;  %v814_v9 = vmax.f32 %v9059_v5, 0.0  ;;  %1535 = vrot.lane.b32.xlu0 %v922_v45, %s8592_s11  ;;  %v1720_v35 = vld [vmem:[%s13332_s2 + $0x48] sm:$0xff] }
 0x112   : > { %1982 = vst.msk [vmem:[#allocation4 + $0x40] sm:$0xff] %vm254_vm0, %v13335_v1  ;;  %878 = vst.msk [vmem:[#allocation4 + $0x71] sm:$0xff] %vm254_vm0, %v812_v61  ;;  %v9063_v7 = vld [vmem:[#allocation4 + $0x62] sm:$0xff]  ;;  %1245 = vrot.lane.b32.xlu1 %v922_v45, %s8596_s28  ;;  %v1714_v45 = vld [vmem:[%s13332_s2 + $0x18] sm:$0xff]  ;;  %v465_v61 = vmul.f32 %v8933_v60, %v429_v54  ;;  %v8133_v54 = vpop.f32.mrb[14].mxu0 }
 0x113   : > { %13418 = vst [vmem:[#allocation17_spill] sm:$0xff] %v9052_v3  ;;  %907 = vst.msk [vmem:[#allocation5 + $0x18] sm:$0xff] %vm254_vm0, %v9040_v2  ;;  %v9065_v8 = vld [vmem:[#allocation4 + $0x61] sm:$0xff] }
 0x114   : > { %1980 = vst.msk [vmem:[#allocation4 + $0x30] sm:$0xff] %vm254_vm0, %v13335_v1  ;;  %13419 = vst [vmem:[#allocation18_spill] sm:$0xff] %v9059_v5  ;;  %v9070_v10 = vld [vmem:[#allocation4 + $0x51] sm:$0xff]  ;;  %v9187_v47 = vld [vmem:[#allocation4] sm:$0xff] }
 0x115   : > { %v9072_v11 = vld [vmem:[#allocation4 + $0x52] sm:$0xff]  ;;  %1987 = vst.msk [vmem:[#allocation4 + $0x68] sm:$0xf] %vm823_vm1, %v13335_v1  ;;  %1632 = vrot.lane.b32.xlu0 %v8991_v44, %s8594_s13  ;;  %v1715_v48 = vld [vmem:[%s13332_s2 + $0x20] sm:$0xff] }
 0x116   : > { %v9074_v12 = vld [vmem:[#allocation4 + $0x50] sm:$0xff]  ;;  %881 = vst.msk [vmem:[#allocation4 + $0xe1] sm:$0xff] %vm254_vm0, %v815_v4  ;;  %910 = vst.msk [vmem:[#allocation5 + $0x30] sm:$0xff] %vm254_vm0, %v9061_v6  ;;  %v9086_v13 = vld [vmem:[#allocation2 + $0x58] sm:$0xff]  ;;  %1342 = vrot.lane.b32.xlu1 %v8991_v44, %s8597_s30 }
 0x117   : > { %1986 = vst.msk [vmem:[#allocation4 + $0x60] sm:$0xff] %vm254_vm0, %v13335_v1  ;;  %880 = vst.msk [vmem:[#allocation4 + $0xd1] sm:$0xff] %vm254_vm0, %v814_v9  ;;  %v817_v14 = vmax.f32 %v9086_v13, 0.0  ;;  %v9093_v15 = vld [vmem:[#allocation2 + $0x50] sm:$0xff]  ;;  %v1718_v9 = vld [vmem:[%s13332_s2 + $0x38] sm:$0xff] }
 0x118   : > { %1985 = vst.msk [vmem:[#allocation4 + $0x58] sm:$0xf] %vm823_vm1, %v13335_v1  ;;  %13420 = vst [vmem:[#allocation19_spill] sm:$0xff] %v9086_v13  ;;  %v9095_v17 = vld [vmem:[#allocation4 + $0x80] sm:$0xff]  ;;  %v816_v21 = vmax.f32 %v9093_v15, 0.0  ;;  %v1713_v44 = vld [vmem:[%s13332_s2 + $0x10] sm:$0xff] }
 0x119   : > { %909 = vst.msk [vmem:[#allocation5 + $0x28] sm:$0xff] %vm254_vm0, %v9074_v12  ;;  %1984 = vst.msk [vmem:[#allocation4 + $0x50] sm:$0xff] %vm254_vm0, %v13335_v1  ;;  %v9097_v18 = vld [vmem:[#allocation4 + $0x82] sm:$0xff]  ;;  %v9106_v22 = vld [vmem:[#allocation4 + $0x71] sm:$0xff]  ;;  %954 = vrot.lane.b32.xlu0 %v9003_v50, %s8591_s10  ;;  %v8370_v46 = vpack.c.bf16 %v1714_v45, %v1713_v44 }
 0x11a   : > { %13421 = vst [vmem:[#allocation20_spill] sm:$0xff] %v9093_v15  ;;  %v9099_v19 = vld [vmem:[#allocation4 + $0x81] sm:$0xff]  ;;  %v9108_v23 = vld [vmem:[#allocation4 + $0x72] sm:$0xff]  ;;  %883 = vst.msk [vmem:[#allocation4 + $0x101] sm:$0xff] %vm254_vm0, %v817_v14  ;;  %1051 = vrot.lane.b32.xlu1 %v8996_v49, %s8593_s12  ;;  %v486_v14 = vadd.f32 %v8938_v62, %v465_v61 }
 0x11b   : > { %1990 = vst.msk [vmem:[#allocation4 + $0x80] sm:$0xff] %vm254_vm0, %v13335_v1  ;;  %v9114_v24 = vld [vmem:[#allocation4 + $0x70] sm:$0xff]  ;;  %882 = vst.msk [vmem:[#allocation4 + $0xf1] sm:$0xff] %vm254_vm0, %v816_v21  ;;  %8371 = vmatprep.subr.bf16.mxu0 %v8370_v46  ;;  %v1719_v33 = vld [vmem:[%s13332_s2 + $0x40] sm:$0xff] }
 0x11c   : > { %1991 = vst.msk [vmem:[#allocation4 + $0x88] sm:$0xf] %vm823_vm1, %v13335_v1  ;;  %1989 = vst.msk [vmem:[#allocation4 + $0x78] sm:$0xf] %vm823_vm1, %v13335_v1  ;;  %8373 = vmatpush3.bf16.msra.mxu0 %v8370_v46  ;;  %v1721_v46 = vld [vmem:[%s13332_s2 + $0x50] sm:$0xff] }
 0x11d   : > { %911 = vst.msk [vmem:[#allocation5 + $0x38] sm:$0xff] %vm254_vm0, %v9114_v24  ;;  %1988 = vst.msk [vmem:[#allocation4 + $0x70] sm:$0xff] %vm254_vm0, %v13335_v1  ;;  %v9124_v25 = vld [vmem:[#allocation4 + $0xe0] sm:$0xff]  ;;  %1146 = vrot.lane.b32.xlu0 %v9005_v51, %s8595_s27  ;;  %v1716_v51 = vld [vmem:[%s13332_s2 + $0x28] sm:$0xff] }
 0x11e   : > { %v9126_v27 = vld [vmem:[#allocation4 + $0xe2] sm:$0xff]  ;;  %v9134_v29 = vld [vmem:[#allocation4 + $0xd1] sm:$0xff]  ;;  %914 = vst.msk [vmem:[#allocation5 + $0x50] sm:$0xff] %vm254_vm0, %v9124_v25  ;;  %1152 = vrot.lane.b32.xlu1 %v9026_v57, %s8595_s27  ;;  %503 = vst.msk [vmem:[#allocation2 + $0x68] sm:$0xff] %vm254_vm0, %v487_v40  ;;  %v8382_v40 = vpack.c.bf16 %v1720_v35, %v1719_v33 }
 0x11f   : > { %v9128_v28 = vld [vmem:[#allocation4 + $0xe1] sm:$0xff]  ;;  %v9136_v31 = vld [vmem:[#allocation4 + $0xd2] sm:$0xff]  ;;  %3130 = vst.msk [vmem:[#allocation4] sm:$0xff] %vm254_vm0, %v13335_v1  ;;  %502 = vst.msk [vmem:[#allocation2 + $0x60] sm:$0xff] %vm254_vm0, %v486_v14  ;;  %v439_v14 = vpop.f32.mrb[15].mxu0 }
 0x120   : > { %2003 = vst.msk [vmem:[#allocation4 + $0xe8] sm:$0xf] %vm823_vm1, %v13335_v1  ;;  %v9140_v32 = vld [vmem:[#allocation4 + $0xd0] sm:$0xff]  ;;  %2001 = vst.msk [vmem:[#allocation4 + $0xd8] sm:$0xf] %vm823_vm1, %v13335_v1 }
 0x121   : > { %2002 = vst.msk [vmem:[#allocation4 + $0xe0] sm:$0xff] %vm254_vm0, %v13335_v1  ;;  %913 = vst.msk [vmem:[#allocation5 + $0x48] sm:$0xff] %vm254_vm0, %v9140_v32  ;;  %v9153_v36 = vld [vmem:[#allocation4 + $0x100] sm:$0xff]  ;;  %1243 = vrot.lane.b32.xlu0 %v9003_v50, %s8596_s28  ;;  %v8374_v50 = vpack.c.bf16 %v1716_v51, %v1715_v48 }
 0x122   : > { %2000 = vst.msk [vmem:[#allocation4 + $0xd0] sm:$0xff] %vm254_vm0, %v13335_v1  ;;  %v9155_v38 = vld [vmem:[#allocation4 + $0x102] sm:$0xff]  ;;  %v9164_v42 = vld [vmem:[#allocation4 + $0xf1] sm:$0xff]  ;;  %916 = vst.msk [vmem:[#allocation5 + $0x60] sm:$0xff] %vm254_vm0, %v9153_v36  ;;  %1249 = vrot.lane.b32.xlu1 %v9030_v59, %s8596_s28 }
 0x123   : > { %v9157_v39 = vld [vmem:[#allocation4 + $0x101] sm:$0xff]  ;;  %v9166_v43 = vld [vmem:[#allocation4 + $0xf2] sm:$0xff]  ;;  %8375 = vmatprep.subr.bf16.mxu0 %v8374_v50 }
 0x124   : > { %2007 = vst.msk [vmem:[#allocation4 + $0x108] sm:$0xf] %vm823_vm1, %v13335_v1  ;;  %2005 = vst.msk [vmem:[#allocation4 + $0xf8] sm:$0xf] %vm823_vm1, %v13335_v1  ;;  %v9197_v52 = vld [vmem:[#allocation4 + $0xf0] sm:$0xff]  ;;  %8377 = vmatpush3.bf16.msra.mxu0 %v8374_v50  ;;  %v9265_v50 = vpop.permute.xlu1 %1452 }
 0x125   : > { %2006 = vst.msk [vmem:[#allocation4 + $0x100] sm:$0xff] %vm254_vm0, %v13335_v1  ;;  %1340 = vrot.lane.b32.xlu0 %v8996_v49, %s8597_s30  ;;  %915 = vst.msk [vmem:[#allocation5 + $0x58] sm:$0xff] %vm254_vm0, %v9197_v52  ;;  %v9207_v55 = vld [vmem:[#allocation2 + $0x68] sm:$0xff]  ;;  %v1717_v49 = vld [vmem:[%s13332_s2 + $0x30] sm:$0xff] }
 0x126   : > { %1346 = vrot.lane.b32.xlu1 %v9028_v58, %s8597_s30  ;;  %2004 = vst.msk [vmem:[#allocation4 + $0xf0] sm:$0xff] %vm254_vm0, %v13335_v1  ;;  %13422 = vst [vmem:[#allocation21_spill] sm:$0xff] %v9207_v55  ;;  %v819_v4 = vmax.f32 %v9207_v55, 0.0  ;;  %v8378_v21 = vpack.c.bf16 %v1718_v9, %v1717_v49  ;;  %v9240_v45 = vld [vmem:[#allocation2 + $0x60] sm:$0xff] }
 0x127   : > { %13423 = vst [vmem:[#allocation22_spill] sm:$0xff] %v9240_v45  ;;  %v818_v48 = vmax.f32 %v9240_v45, 0.0  ;;  %v507_v45 = vld [vmem:[%s9426_s23 + $0x8] sm:$0xff] }
 0x128   : > { %885 = vst.msk [vmem:[#allocation4 + $0x121] sm:$0xff] %vm254_vm0, %v819_v4  ;;  %8379 = vmatprep.subr.bf16.mxu0 %v8378_v21  ;;  %v523_v55 = vmax.f32 %v507_v45, 0.0 }
 0x129   : > { %960 = vrot.lane.b32.xlu0 %v9030_v59, %s8591_s10  ;;  %8381 = vmatpush3.bf16.msra.mxu0 %v8378_v21  ;;  %884 = vst.msk [vmem:[#allocation4 + $0x111] sm:$0xff] %vm254_vm0, %v818_v48  ;;  %v467_v21 = vmul.f32 %v8933_v60, %v439_v14 }
 0x12a   : > { %958 = vrot.lane.b32.xlu1 %v9036_v63, %s8591_s10  ;;  %8383 = vmatprep.subr.bf16.mxu0 %v8382_v40 }
 0x12d   : > { %1057 = vrot.lane.b32.xlu0 %v9028_v58, %s8593_s12  ;;  %8385 = vmatpush3.bf16.msra.mxu0 %v8382_v40 }
 0x12e   : > { %1055 = vrot.lane.b32.xlu1 %v9038_v0, %s8593_s12  ;;  %8176 = vmatprep.subr.mxu0 %v1721_v46 }
 0x12f   : > { %v9234_v44 = vld [vmem:[#allocation4 + $0x120] sm:$0xff] }
 0x130   : > { %918 = vst.msk [vmem:[#allocation5 + $0x70] sm:$0xff] %vm254_vm0, %v9234_v44  ;;  %v9249_v51 = vld [vmem:[#allocation4 + $0x122] sm:$0xff]  ;;  %v9273_v4 = vld [vmem:[#allocation4 + $0x111] sm:$0xff] }
 0x131   : > { %1442 = vrot.lane.b32.xlu0 %v9026_v57, %s8590_s9  ;;  %8177 = vmatpush3.msra.mxu0 %v1721_v46  ;;  %v9251_v57 = vld [vmem:[#allocation4 + $0x121] sm:$0xff]  ;;  %v9275_v49 = vld [vmem:[#allocation4 + $0x112] sm:$0xff] }
 0x132   : > { %1440 = vrot.lane.b32.xlu1 %v9040_v2, %s8590_s9  ;;  %2011 = vst.msk [vmem:[#allocation4 + $0x128] sm:$0xf] %vm823_vm1, %v13335_v1  ;;  %2009 = vst.msk [vmem:[#allocation4 + $0x118] sm:$0xf] %vm823_vm1, %v13335_v1 }
 0x133   : > { %2010 = vst.msk [vmem:[#allocation4 + $0x120] sm:$0xff] %vm254_vm0, %v13335_v1 }
 0x135   : > { %1539 = vrot.lane.b32.xlu0 %v9030_v59, %s8592_s11  ;;  %v468_v59 = vmul.f32 %v8133_v54, %v8933_v60 }
 0x136   : > { %1537 = vrot.lane.b32.xlu1 %v9036_v63, %s8592_s11 }
 0x137   : > { %v489_v61 = vadd.f32 %v8938_v62, %v468_v59 }
 0x139   : > { %1636 = vrot.lane.b32.xlu0 %v9028_v58, %s8594_s13  ;;  %v9279_v58 = vpop.permute.xlu1 %1468  ;;  %505 = vst.msk [vmem:[#allocation2 + $0x78] sm:$0xff] %vm254_vm0, %v489_v61 }
 0x13a   : > { %1634 = vrot.lane.b32.xlu1 %v9038_v0, %s8594_s13 }
 0x13d   : > { %1150 = vrot.lane.b32.xlu0 %v9040_v2, %s8595_s27  ;;  %v9286_v2 = vld [vmem:[#allocation4 + $0x110] sm:$0xff]  ;;  %v9292_v9 = vpop.permute.xlu1 %1549 }
 0x13e   : > { %1156 = vrot.lane.b32.xlu1 %v9061_v6, %s8595_s27  ;;  %917 = vst.msk [vmem:[#allocation5 + $0x68] sm:$0xff] %vm254_vm0, %v9286_v2  ;;  %2008 = vst.msk [vmem:[#allocation4 + $0x110] sm:$0xff] %vm254_vm0, %v13335_v1 }
 0x141   : > { %1247 = vrot.lane.b32.xlu0 %v9036_v63, %s8596_s28  ;;  %v9298_v63 = vld [vmem:[#allocation2 + $0x78] sm:$0xff]  ;;  %v9309_v35 = vpop.permute.xlu1 %1565 }
 0x142   : > { %1253 = vrot.lane.b32.xlu1 %v9065_v8, %s8596_s28  ;;  %13424 = vst [vmem:[#allocation23_spill] sm:$0xff] %v9298_v63  ;;  %v821_v33 = vmax.f32 %v9298_v63, 0.0 }
 0x144   : > { %887 = vst.msk [vmem:[#allocation4 + $0x141] sm:$0xff] %vm254_vm0, %v821_v33 }
 0x145   : > { %1344 = vrot.lane.b32.xlu0 %v9038_v0, %s8597_s30  ;;  %v488_v0 = vadd.f32 %v8938_v62, %v467_v21  ;;  %v9319_v60 = vpop.permute.xlu1 %1646 }
 0x146   : > { %1350 = vrot.lane.b32.xlu1 %v9063_v7, %s8597_s30 }
 0x147   : > { %504 = vst.msk [vmem:[#allocation2 + $0x70] sm:$0xff] %vm254_vm0, %v488_v0 }
 0x149   : > { %964 = vrot.lane.b32.xlu0 %v9065_v8, %s8591_s10 }
 0x14a   : > { %962 = vrot.lane.b32.xlu1 %v9070_v10, %s8591_s10 }
 0x14b   : > { %v9325_v46 = vld [vmem:[#allocation4 + $0x140] sm:$0xff] }
 0x14c   : > { %v9327_v48 = vld [vmem:[#allocation4 + $0x142] sm:$0xff] }
 0x14d   : > { %1061 = vrot.lane.b32.xlu0 %v9063_v7, %s8593_s12  ;;  %v9329_v54 = vld [vmem:[#allocation4 + $0x141] sm:$0xff] }
 0x14e   : > { %1059 = vrot.lane.b32.xlu1 %v9072_v11, %s8593_s12  ;;  %v9321_v62 = vld [vmem:[#allocation2 + $0x70] sm:$0xff]  ;;  %2014 = vst.msk [vmem:[#allocation4 + $0x140] sm:$0xff] %vm254_vm0, %v13335_v1 }
 0x14f   : > { %13425 = vst [vmem:[#allocation24_spill] sm:$0xff] %v9321_v62  ;;  %v820_v40 = vmax.f32 %v9321_v62, 0.0  ;;  %2015 = vst.msk [vmem:[#allocation4 + $0x148] sm:$0xf] %vm823_vm1, %v13335_v1  ;;  %v538_v62 = vld [vmem:[%s13332_s2 + $0x8] sm:$0xff] }
 0x150   : > { %8134 = vmatprep.subr.mxu1 %v538_v62 }
 0x151   : > { %1446 = vrot.lane.b32.xlu0 %v9061_v6, %s8590_s9  ;;  %886 = vst.msk [vmem:[#allocation4 + $0x131] sm:$0xff] %vm254_vm0, %v820_v40  ;;  %v9339_v6 = vpop.permute.xlu1 %1662  ;;  %8135 = vmatpush3.msra.mxu1 %v538_v62 }
 0x152   : > { %1444 = vrot.lane.b32.xlu1 %v9074_v12, %s8590_s9 }
 0x155   : > { %1543 = vrot.lane.b32.xlu0 %v9065_v8, %s8592_s11  ;;  %v9349_v8 = vpop.permute.xlu1 %2596 }
 0x156   : > { %1541 = vrot.lane.b32.xlu1 %v9070_v10, %s8592_s11 }
 0x158   : > { %v9351_v59 = vld [vmem:[#allocation4 + $0x131] sm:$0xff] }
 0x159   : > { %1640 = vrot.lane.b32.xlu0 %v9063_v7, %s8594_s13  ;;  %v9353_v61 = vld [vmem:[#allocation4 + $0x132] sm:$0xff]  ;;  %v9361_v7 = vpop.permute.xlu1 %2612 }
 0x15a   : > { %1638 = vrot.lane.b32.xlu1 %v9072_v11, %s8594_s13  ;;  %2013 = vst.msk [vmem:[#allocation4 + $0x138] sm:$0xf] %vm823_vm1, %v13335_v1  ;;  %13426 = vst [vmem:[#allocation25_spill] sm:$0xff] %v9361_v7  ;;  %v9377_v21 = vld [vmem:[#allocation4 + $0x130] sm:$0xff] }
 0x15b   : > { %919 = vst.msk [vmem:[#allocation5 + $0x78] sm:$0xff] %vm254_vm0, %v9377_v21  ;;  %2012 = vst.msk [vmem:[#allocation4 + $0x130] sm:$0xff] %vm254_vm0, %v13335_v1 }
 0x15d   : > { %1154 = vrot.lane.b32.xlu0 %v9074_v12, %s8595_s27  ;;  %v9363_v12 = vpop.permute.xlu0 %2102 }
 0x15e   : > { %1160 = vrot.lane.b32.xlu1 %v9095_v17, %s8595_s27 }
 0x161   : > { %1251 = vrot.lane.b32.xlu0 %v9070_v10, %s8596_s28  ;;  %v9373_v10 = vpop.permute.xlu1 %2692  ;;  %v9375_v14 = vpop.permute.xlu0 %2118 }
 0x162   : > { %1257 = vrot.lane.b32.xlu1 %v9099_v19, %s8596_s28 }
 0x165   : > { %1348 = vrot.lane.b32.xlu0 %v9072_v11, %s8597_s30  ;;  %v9387_v11 = vpop.permute.xlu1 %2708 }
 0x166   : > { %1354 = vrot.lane.b32.xlu1 %v9097_v18, %s8597_s30  ;;  %13427 = vst [vmem:[#allocation26_spill] sm:$0xff] %v9387_v11 }
 0x169   : > { %1450 = vrot.lane.b32.xlu0 %v9095_v17, %s8590_s9  ;;  %v9389_v17 = vpop.permute.xlu0 %2198 }
 0x16a   : > { %966 = vrot.lane.b32.xlu1 %v9106_v22, %s8591_s10 }
 0x16d   : > { %1547 = vrot.lane.b32.xlu0 %v9099_v19, %s8592_s11  ;;  %v9399_v19 = vpop.permute.xlu1 %2788  ;;  %v9401_v33 = vpop.permute.xlu0 %2214 }
 0x16e   : > { %1063 = vrot.lane.b32.xlu1 %v9108_v23, %s8593_s12 }
 0x171   : > { %1644 = vrot.lane.b32.xlu0 %v9097_v18, %s8594_s13 }
 0x172   : > { %1448 = vrot.lane.b32.xlu1 %v9114_v24, %s8590_s9 }
 0x175   : > { %1158 = vrot.lane.b32.xlu0 %v9114_v24, %s8595_s27 }
 0x176   : > { %1545 = vrot.lane.b32.xlu1 %v9106_v22, %s8592_s11 }
 0x179   : > { %1255 = vrot.lane.b32.xlu0 %v9106_v22, %s8596_s28 }
 0x17a   : > { %1642 = vrot.lane.b32.xlu1 %v9108_v23, %s8594_s13 }
 0x17b   : > { %v1054_v18 = vpop.permute.xlu0 %1053 }
 0x17c   : > { %v957_v0 = vpop.permute.xlu1 %956 }
 0x17d   : > { %1003 = vst.msk [vmem:[#allocation5 + $0x10] sm:$0xff] %vm1000_vm2, %v957_v0  ;;  %1352 = vrot.lane.b32.xlu0 %v9108_v23, %s8597_s30  ;;  %v506_v0 = vld [vmem:[%s9426_s23] sm:$0xff] }
 0x17e   : > { %1100 = vst.msk [vmem:[#allocation5 + $0x10] sm:$0xff] %vm1097_vm3, %v1054_v18  ;;  %1164 = vrot.lane.b32.xlu1 %v9124_v25, %s8595_s27  ;;  %v522_v63 = vmax.f32 %v506_v0, 0.0 }
 0x17f   : > { %v1439_v24 = vpop.permute.xlu0 %1438 }
 0x180   : > { %v1149_v40 = vpop.permute.xlu1 %1148  ;;  %8136 = vmatprep.mubr.msk.f32.mxu1 %vm254_vm0, %v522_v63  ;;  %v13428_v63 = vmov 0.0  }
 0x181   : > { %972 = vrot.lane.b32.xlu0 %v9128_v28, %s8591_s10  ;;  %8137 = vmatmul.mubr.msk.f32.vlgmr.msra.gmra.mrb[0].mxu1 %vm254_vm0, %v523_v55 }
 0x182   : > { %1261 = vrot.lane.b32.xlu1 %v9128_v28, %s8596_s28 }
 0x183   : > { %v1536_v22 = vpop.permute.xlu0 %1535 }
 0x184   : > { %v1246_v1 = vpop.permute.xlu1 %1245 }
 0x185   : > { %1069 = vrot.lane.b32.xlu0 %v9126_v27, %s8593_s12 }
 0x186   : > { %1358 = vrot.lane.b32.xlu1 %v9126_v27, %s8597_s30 }
 0x187   : > { %v1633_v23 = vpop.permute.xlu0 %1632 }
 0x188   : > { %v1343_v18 = vpop.permute.xlu1 %1342 }
 0x189   : > { %1454 = vrot.lane.b32.xlu0 %v9124_v25, %s8590_s9 }
 0x18a   : > { %970 = vrot.lane.b32.xlu1 %v9134_v29, %s8591_s10 }
 0x18b   : > { %v955_v13 = vpop.permute.xlu0 %954 }
 0x18c   : > { %v1052_v15 = vpop.permute.xlu1 %1051  ;;  %1002 = vst.msk [vmem:[#allocation5 + $0x8] sm:$0xff] %vm1000_vm2, %v955_v13 }
 0x18d   : > { %1099 = vst.msk [vmem:[#allocation5 + $0x8] sm:$0xff] %vm1097_vm3, %v1052_v15  ;;  %1551 = vrot.lane.b32.xlu0 %v9128_v28, %s8592_s11 }
 0x18e   : > { %1067 = vrot.lane.b32.xlu1 %v9136_v31, %s8593_s12  ;;  %1196 = vst.msk [vmem:[#allocation5 + $0x8] sm:$0xff] %vm1194_vm4, %v1149_v40 }
 0x18f   : > { %v1147_v25 = vpop.permute.xlu0 %1146  ;;  %1293 = vst.msk [vmem:[#allocation5 + $0x8] sm:$0xff] %vm1291_vm5, %v1246_v1 }
 0x190   : > { %v1153_v45 = vpop.permute.xlu1 %1152  ;;  %1195 = vst.msk [vmem:[#allocation5] sm:$0xff] %vm1194_vm4, %v1147_v25 }
 0x191   : > { %1390 = vst.msk [vmem:[#allocation5 + $0x8] sm:$0xff] %vm1388_vm6, %v1343_v18  ;;  %1648 = vrot.lane.b32.xlu0 %v9126_v27, %s8594_s13  ;;  %v9465_v27 = vld [vmem:[#allocation4 + $0xc0] sm:$0xff] }
 0x192   : > { %1168 = vrot.lane.b32.xlu1 %v9153_v36, %s8595_s27  ;;  %3154 = vst.msk [vmem:[#allocation4 + $0xc0] sm:$0xff] %vm254_vm0, %v13428_v63 }
 0x193   : > { %v1244_v13 = vpop.permute.xlu0 %1243 }
 0x194   : > { %v1250_v15 = vpop.permute.xlu1 %1249  ;;  %1292 = vst.msk [vmem:[#allocation5] sm:$0xff] %vm1291_vm5, %v1244_v13 }
 0x195   : > { %1162 = vrot.lane.b32.xlu0 %v9140_v32, %s8595_s27 }
 0x196   : > { %1265 = vrot.lane.b32.xlu1 %v9157_v39, %s8596_s28 }
 0x197   : > { %v1341_v1 = vpop.permute.xlu0 %1340 }
 0x198   : > { %v1347_v28 = vpop.permute.xlu1 %1346  ;;  %1389 = vst.msk [vmem:[#allocation5] sm:$0xff] %vm1388_vm6, %v1341_v1 }
 0x199   : > { %1487 = vst.msk [vmem:[#allocation5] sm:$0xff] %vm1486_vm7, %v1439_v24  ;;  %1259 = vrot.lane.b32.xlu0 %v9134_v29, %s8596_s28 }
 0x19a   : > { %1362 = vrot.lane.b32.xlu1 %v9155_v38, %s8597_s30  ;;  %1584 = vst.msk [vmem:[#allocation5] sm:$0xff] %vm1583_vm8, %v1536_v22 }
 0x19b   : > { %1681 = vst.msk [vmem:[#allocation5] sm:$0xff] %vm1680_vm9, %v1633_v23  ;;  %v961_v32 = vpop.permute.xlu0 %960 }
 0x19c   : > { %v959_v55 = vpop.permute.xlu1 %958  ;;  %1005 = vst.msk [vmem:[#allocation5 + $0x20] sm:$0xff] %vm1000_vm2, %v961_v32 }
 0x19d   : > { %1004 = vst.msk [vmem:[#allocation5 + $0x18] sm:$0xff] %vm1000_vm2, %v959_v55  ;;  %1356 = vrot.lane.b32.xlu0 %v9136_v31, %s8597_s30 }
 0x19e   : > { %974 = vrot.lane.b32.xlu1 %v9164_v42, %s8591_s10 }
 0x19f   : > { %v1058_v29 = vpop.permute.xlu0 %1057 }
 0x1a0   : > { %v1056_v62 = vpop.permute.xlu1 %1055  ;;  %1102 = vst.msk [vmem:[#allocation5 + $0x20] sm:$0xff] %vm1097_vm3, %v1058_v29 }
 0x1a1   : > { %1101 = vst.msk [vmem:[#allocation5 + $0x18] sm:$0xff] %vm1097_vm3, %v1056_v62  ;;  %976 = vrot.lane.b32.xlu0 %v9157_v39, %s8591_s10 }
 0x1a2   : > { %1198 = vst.msk [vmem:[#allocation5 + $0x18] sm:$0xff] %vm1194_vm4, %v1153_v45  ;;  %1071 = vrot.lane.b32.xlu1 %v9166_v43, %s8593_s12  ;;  %v1697_v31 = vld [vmem:[#allocation5] sm:$0xff] }
 0x1a3   : > { %1295 = vst.msk [vmem:[#allocation5 + $0x18] sm:$0xff] %vm1291_vm5, %v1250_v15  ;;  %8178 = vmatprep.mubr.msk.f32.mxu0 %vm1722_vm10, %v1697_v31  ;;  %v1443_v24 = vpop.permute.xlu0 %1442  ;;  %v509_v15 = vld [vmem:[%s9426_s23 + $0x18] sm:$0xff] }
 0x1a4   : > { %1392 = vst.msk [vmem:[#allocation5 + $0x18] sm:$0xff] %vm1388_vm6, %v1347_v28  ;;  %v1441_v40 = vpop.permute.xlu1 %1440 }
 0x1a5   : > { %2054 = vst.msk [vmem:[#allocation5] sm:$0xff] %vm254_vm0, %v9187_v47  ;;  %1073 = vrot.lane.b32.xlu0 %v9155_v38, %s8593_s12 }
 0x1a6   : > { %2150 = vst.msk [vmem:[#allocation5] sm:$0xff] %vm1000_vm2, %v9363_v12  ;;  %1456 = vrot.lane.b32.xlu1 %v9197_v52, %s8590_s9 }
 0x1a7   : > { %1488 = vst.msk [vmem:[#allocation5 + $0x8] sm:$0xff] %vm1486_vm7, %v1441_v40  ;;  %v1540_v22 = vpop.permute.xlu0 %1539 }
 0x1a8   : > { %2246 = vst.msk [vmem:[#allocation5] sm:$0xff] %vm1097_vm3, %v9389_v17  ;;  %v1538_v23 = vpop.permute.xlu1 %1537 }
 0x1a9   : > { %1585 = vst.msk [vmem:[#allocation5 + $0x8] sm:$0xff] %vm1583_vm8, %v1538_v23  ;;  %1458 = vrot.lane.b32.xlu0 %v9153_v36, %s8590_s9 }
 0x1aa   : > { %1553 = vrot.lane.b32.xlu1 %v9164_v42, %s8592_s11 }
 0x1ab   : > { %v1637_v47 = vpop.permute.xlu0 %1636 }
 0x1ac   : > { %v1635_v12 = vpop.permute.xlu1 %1634 }
 0x1ad   : > { %1682 = vst.msk [vmem:[#allocation5 + $0x8] sm:$0xff] %vm1680_vm9, %v1635_v12  ;;  %1555 = vrot.lane.b32.xlu0 %v9157_v39, %s8592_s11 }
 0x1ae   : > { %1650 = vrot.lane.b32.xlu1 %v9166_v43, %s8594_s13 }
 0x1af   : > { %v1151_v17 = vpop.permute.xlu0 %1150 }
 0x1b0   : > { %v1157_v18 = vpop.permute.xlu1 %1156  ;;  %1197 = vst.msk [vmem:[#allocation5 + $0x10] sm:$0xff] %vm1194_vm4, %v1151_v17 }
 0x1b1   : > { %1652 = vrot.lane.b32.xlu0 %v9155_v38, %s8594_s13  ;;  %v508_v38 = vld [vmem:[%s9426_s23 + $0x10] sm:$0xff] }
 0x1b2   : > { %1172 = vrot.lane.b32.xlu1 %v9234_v44, %s8595_s27  ;;  %v524_v13 = vmax.f32 %v508_v38, 0.0  ;;  %v511_v38 = vld [vmem:[%s9426_s23 + $0x28] sm:$0xff] }
 0x1b3   : > { %v1248_v36 = vpop.permute.xlu0 %1247 }
 0x1b4   : > { %v1254_v0 = vpop.permute.xlu1 %1253  ;;  %v1698_v25 = vld [vmem:[#allocation5 + $0x8] sm:$0xff]  ;;  %1294 = vst.msk [vmem:[#allocation5 + $0x10] sm:$0xff] %vm1291_vm5, %v1248_v36  ;;  %8139 = vmatprep.mubr.msk.f32.mxu1 %vm254_vm0, %v524_v13  ;;  %v527_v13 = vmax.f32 %v511_v38, 0.0 }
 0x1b5   : > { %8179 = vmatmul.mubr.msk.f32.vlgmr.msra.gmra.mrb[16].mxu0 %vm1722_vm10, %v1698_v25  ;;  %1166 = vrot.lane.b32.xlu0 %v9197_v52, %s8595_s27  ;;  %v525_v52 = vmax.f32 %v509_v15, 0.0  ;;  %v3226_v15 = vld [vmem:[#allocation4 + $0x1] sm:$0xff] }
 0x1b6   : > { %1269 = vrot.lane.b32.xlu1 %v9251_v57, %s8596_s28 }
 0x1b7   : > { %v1345_v39 = vpop.permute.xlu0 %1344  ;;  %8140 = vmatmul.mubr.msk.f32.gmra.mrb[2].mxu1 %vm254_vm0, %v525_v52 }
 0x1b8   : > { %v1351_v45 = vpop.permute.xlu1 %1350  ;;  %1391 = vst.msk [vmem:[#allocation5 + $0x10] sm:$0xff] %vm1388_vm6, %v1345_v39 }
 0x1b9   : > { %1489 = vst.msk [vmem:[#allocation5 + $0x10] sm:$0xff] %vm1486_vm7, %v1443_v24  ;;  %1263 = vrot.lane.b32.xlu0 %v9164_v42, %s8596_s28 }
 0x1ba   : > { %1366 = vrot.lane.b32.xlu1 %v9249_v51, %s8597_s30  ;;  %1586 = vst.msk [vmem:[#allocation5 + $0x10] sm:$0xff] %vm1583_vm8, %v1540_v22 }
 0x1bb   : > { %1683 = vst.msk [vmem:[#allocation5 + $0x10] sm:$0xff] %vm1680_vm9, %v1637_v47  ;;  %v965_v1 = vpop.permute.xlu0 %964 }
 0x1bc   : > { %v963_v28 = vpop.permute.xlu1 %962  ;;  %1007 = vst.msk [vmem:[#allocation5 + $0x30] sm:$0xff] %vm1000_vm2, %v965_v1 }
 0x1bd   : > { %1006 = vst.msk [vmem:[#allocation5 + $0x28] sm:$0xff] %vm1000_vm2, %v963_v28  ;;  %1360 = vrot.lane.b32.xlu0 %v9166_v43, %s8597_s30 }
 0x1be   : > { %978 = vrot.lane.b32.xlu1 %v9273_v4, %s8591_s10 }
 0x1bf   : > { %v1062_v42 = vpop.permute.xlu0 %1061 }
 0x1c0   : > { %v1060_v32 = vpop.permute.xlu1 %1059  ;;  %1104 = vst.msk [vmem:[#allocation5 + $0x30] sm:$0xff] %vm1097_vm3, %v1062_v42 }
 0x1c1   : > { %1103 = vst.msk [vmem:[#allocation5 + $0x28] sm:$0xff] %vm1097_vm3, %v1060_v32  ;;  %980 = vrot.lane.b32.xlu0 %v9251_v57, %s8591_s10 }
 0x1c2   : > { %1200 = vst.msk [vmem:[#allocation5 + $0x28] sm:$0xff] %vm1194_vm4, %v1157_v18  ;;  %1075 = vrot.lane.b32.xlu1 %v9275_v49, %s8593_s12  ;;  %v1699_v43 = vld [vmem:[#allocation5 + $0x10] sm:$0xff] }
 0x1c3   : > { %1297 = vst.msk [vmem:[#allocation5 + $0x28] sm:$0xff] %vm1291_vm5, %v1254_v0  ;;  %8181 = vmatprep.mubr.msk.f32.mxu0 %vm1722_vm10, %v1699_v43  ;;  %v1447_v55 = vpop.permute.xlu0 %1446 }
 0x1c4   : > { %1394 = vst.msk [vmem:[#allocation5 + $0x28] sm:$0xff] %vm1388_vm6, %v1351_v45  ;;  %v1445_v29 = vpop.permute.xlu1 %1444  ;;  %v510_v45 = vld [vmem:[%s9426_s23 + $0x20] sm:$0xff] }
 0x1c5   : > { %1490 = vst.msk [vmem:[#allocation5 + $0x18] sm:$0xff] %vm1486_vm7, %v1445_v29  ;;  %1077 = vrot.lane.b32.xlu0 %v9249_v51, %s8593_s12 }
 0x1c6   : > { %1460 = vrot.lane.b32.xlu1 %v9286_v2, %s8590_s9 }
 0x1c7   : > { %v1544_v62 = vpop.permute.xlu0 %1543 }
 0x1c8   : > { %v1542_v31 = vpop.permute.xlu1 %1541 }
 0x1c9   : > { %1587 = vst.msk [vmem:[#allocation5 + $0x18] sm:$0xff] %vm1583_vm8, %v1542_v31  ;;  %1462 = vrot.lane.b32.xlu0 %v9234_v44, %s8590_s9 }
 0x1ca   : > { %1557 = vrot.lane.b32.xlu1 %v9273_v4, %s8592_s11 }
 0x1cb   : > { %v1641_v24 = vpop.permute.xlu0 %1640 }
 0x1cc   : > { %v1639_v40 = vpop.permute.xlu1 %1638 }
 0x1cd   : > { %1684 = vst.msk [vmem:[#allocation5 + $0x18] sm:$0xff] %vm1680_vm9, %v1639_v40  ;;  %1559 = vrot.lane.b32.xlu0 %v9251_v57, %s8592_s11 }
 0x1ce   : > { %1654 = vrot.lane.b32.xlu1 %v9275_v49, %s8594_s13 }
 0x1cf   : > { %v1155_v22 = vpop.permute.xlu0 %1154 }
 0x1d0   : > { %v1161_v23 = vpop.permute.xlu1 %1160  ;;  %1199 = vst.msk [vmem:[#allocation5 + $0x20] sm:$0xff] %vm1194_vm4, %v1155_v22 }
 0x1d1   : > { %1656 = vrot.lane.b32.xlu0 %v9249_v51, %s8594_s13 }
 0x1d2   : > { %1176 = vrot.lane.b32.xlu1 %v9325_v46, %s8595_s27 }
 0x1d3   : > { %v1252_v44 = vpop.permute.xlu0 %1251 }
 0x1d4   : > { %v1258_v47 = vpop.permute.xlu1 %1257  ;;  %v1700_v12 = vld [vmem:[#allocation5 + $0x18] sm:$0xff]  ;;  %1296 = vst.msk [vmem:[#allocation5 + $0x20] sm:$0xff] %vm1291_vm5, %v1252_v44 }
 0x1d5   : > { %8182 = vmatmul.mubr.msk.f32.gmra.mrb[18].mxu0 %vm1722_vm10, %v1700_v12  ;;  %1170 = vrot.lane.b32.xlu0 %v9286_v2, %s8595_s27  ;;  %v3330_v12 = vld [vmem:[#allocation4 + $0xc2] sm:$0xff] }
 0x1d6   : > { %1273 = vrot.lane.b32.xlu1 %v9329_v54, %s8596_s28 }
 0x1d7   : > { %v1349_v57 = vpop.permute.xlu0 %1348 }
 0x1d8   : > { %v1355_v17 = vpop.permute.xlu1 %1354  ;;  %1393 = vst.msk [vmem:[#allocation5 + $0x20] sm:$0xff] %vm1388_vm6, %v1349_v57 }
 0x1d9   : > { %1491 = vst.msk [vmem:[#allocation5 + $0x20] sm:$0xff] %vm1486_vm7, %v1447_v55  ;;  %1267 = vrot.lane.b32.xlu0 %v9273_v4, %s8596_s28 }
 0x1da   : > { %1370 = vrot.lane.b32.xlu1 %v9327_v48, %s8597_s30  ;;  %1588 = vst.msk [vmem:[#allocation5 + $0x20] sm:$0xff] %vm1583_vm8, %v1544_v62 }
 0x1db   : > { %1685 = vst.msk [vmem:[#allocation5 + $0x20] sm:$0xff] %vm1680_vm9, %v1641_v24  ;;  %v1451_v51 = vpop.permute.xlu0 %1450  ;;  %v3234_v24 = vld [vmem:[#allocation4 + $0xc1] sm:$0xff] }
 0x1dc   : > { %v967_v2 = vpop.permute.xlu1 %966  ;;  %4295 = vst.msk [vmem:[#allocation4 + $0xc8] sm:$0xf] %vm823_vm1, %v13428_v63 }
 0x1dd   : > { %1008 = vst.msk [vmem:[#allocation5 + $0x38] sm:$0xff] %vm1000_vm2, %v967_v2  ;;  %1364 = vrot.lane.b32.xlu0 %v9275_v49, %s8597_s30 }
 0x1de   : > { %982 = vrot.lane.b32.xlu1 %v9351_v59, %s8591_s10 }
 0x1df   : > { %v1548_v18 = vpop.permute.xlu0 %1547 }
 0x1e0   : > { %v1064_v36 = vpop.permute.xlu1 %1063 }
 0x1e1   : > { %1105 = vst.msk [vmem:[#allocation5 + $0x38] sm:$0xff] %vm1097_vm3, %v1064_v36  ;;  %1466 = vrot.lane.b32.xlu0 %v9325_v46, %s8590_s9 }
 0x1e2   : > { %1202 = vst.msk [vmem:[#allocation5 + $0x38] sm:$0xff] %vm1194_vm4, %v1161_v23  ;;  %1079 = vrot.lane.b32.xlu1 %v9353_v61, %s8593_s12  ;;  %v1701_v4 = vld [vmem:[#allocation5 + $0x20] sm:$0xff] }
 0x1e3   : > { %1299 = vst.msk [vmem:[#allocation5 + $0x38] sm:$0xff] %vm1291_vm5, %v1258_v47  ;;  %8184 = vmatprep.mubr.msk.f32.mxu0 %vm1722_vm10, %v1701_v4  ;;  %v1645_v49 = vpop.permute.xlu0 %1644  ;;  %v3322_v23 = vld [vmem:[#allocation4 + $0x2] sm:$0xff] }
 0x1e4   : > { %1396 = vst.msk [vmem:[#allocation5 + $0x38] sm:$0xff] %vm1388_vm6, %v1355_v17  ;;  %v1449_v0 = vpop.permute.xlu1 %1448 }
 0x1e5   : > { %1494 = vst.msk [vmem:[#allocation5 + $0x38] sm:$0xff] %vm1486_vm7, %v9265_v50  ;;  %1492 = vst.msk [vmem:[#allocation5 + $0x28] sm:$0xff] %vm1486_vm7, %v1449_v0  ;;  %1563 = vrot.lane.b32.xlu0 %v9329_v54, %s8592_s11 }
 0x1e6   : > { %1591 = vst.msk [vmem:[#allocation5 + $0x38] sm:$0xff] %vm1583_vm8, %v9292_v9  ;;  %1464 = vrot.lane.b32.xlu1 %v9377_v21, %s8590_s9 }
 0x1e7   : > { %1688 = vst.msk [vmem:[#allocation5 + $0x38] sm:$0xff] %vm1680_vm9, %v9319_v60  ;;  %v1159_v46 = vpop.permute.xlu0 %1158 }
 0x1e8   : > { %v1546_v25 = vpop.permute.xlu1 %1545  ;;  %1201 = vst.msk [vmem:[#allocation5 + $0x30] sm:$0xff] %vm1194_vm4, %v1159_v46 }
 0x1e9   : > { %1589 = vst.msk [vmem:[#allocation5 + $0x28] sm:$0xff] %vm1583_vm8, %v1546_v25  ;;  %1660 = vrot.lane.b32.xlu0 %v9327_v48, %s8594_s13 }
 0x1ea   : > { %1561 = vrot.lane.b32.xlu1 %v9351_v59, %s8592_s11  ;;  %4271 = vst.msk [vmem:[#allocation4 + $0x8] sm:$0xf] %vm823_vm1, %v13428_v63 }
 0x1eb   : > { %v1256_v50 = vpop.permute.xlu0 %1255 }
 0x1ec   : > { %v1643_v9 = vpop.permute.xlu1 %1642  ;;  %1298 = vst.msk [vmem:[#allocation5 + $0x30] sm:$0xff] %vm1291_vm5, %v1256_v50 }
 0x1ed   : > { %1686 = vst.msk [vmem:[#allocation5 + $0x28] sm:$0xff] %vm1680_vm9, %v1643_v9  ;;  %1174 = vrot.lane.b32.xlu0 %v9377_v21, %s8595_s27 }
 0x1ee   : > { %1658 = vrot.lane.b32.xlu1 %v9353_v61, %s8594_s13  ;;  %v1704_v32 = vld [vmem:[#allocation5 + $0x38] sm:$0xff] }
 0x1ef   : > { %v1353_v60 = vpop.permute.xlu0 %1352 }
 0x1f0   : > { %v1165_v54 = vpop.permute.xlu1 %1164  ;;  %1395 = vst.msk [vmem:[#allocation5 + $0x30] sm:$0xff] %vm1388_vm6, %v1353_v60 }
 0x1f1   : > { %1493 = vst.msk [vmem:[#allocation5 + $0x30] sm:$0xff] %vm1486_vm7, %v1451_v51  ;;  %1271 = vrot.lane.b32.xlu0 %v9351_v59, %s8596_s28  ;;  %v526_v59 = vmax.f32 %v510_v45, 0.0 }
 0x1f2   : > { %2804 = vrot.lane.b32.xlu1 %v8878_v34, %s8594_s13  ;;  %1590 = vst.msk [vmem:[#allocation5 + $0x30] sm:$0xff] %vm1583_vm8, %v1548_v18 }
 0x1f3   : > { %1687 = vst.msk [vmem:[#allocation5 + $0x30] sm:$0xff] %vm1680_vm9, %v1645_v49  ;;  %v973_v21 = vpop.permute.xlu0 %972  ;;  %8142 = vmatprep.mubr.msk.f32.mxu1 %vm254_vm0, %v526_v59 }
 0x1f4   : > { %v1262_v48 = vpop.permute.xlu1 %1261  ;;  %v1702_v39 = vld [vmem:[#allocation5 + $0x28] sm:$0xff]  ;;  %1011 = vst.msk [vmem:[#allocation5 + $0x50] sm:$0xff] %vm1000_vm2, %v973_v21  ;;  %8143 = vmatmul.mubr.msk.f32.gmra.mrb[4].mxu1 %vm254_vm0, %v527_v13 }
 0x1f5   : > { %8185 = vmatmul.mubr.msk.f32.gmra.mrb[20].mxu0 %vm1722_vm10, %v1702_v39  ;;  %1368 = vrot.lane.b32.xlu0 %v9353_v61, %s8597_s30 }
 0x1f7   : > { %v1070_v52 = vpop.permute.xlu0 %1069 }
 0x1f8   : > { %v1359_v34 = vpop.permute.xlu1 %1358  ;;  %1108 = vst.msk [vmem:[#allocation5 + $0x50] sm:$0xff] %vm1097_vm3, %v1070_v52 }
 0x1f9   : > { %3258 = vrot.lane.b32.xlu0 %v3226_v15, %s8591_s10 }
 0x1fa   : > { %v1703_v1 = vld [vmem:[#allocation5 + $0x30] sm:$0xff] }
 0x1fb   : > { %8187 = vmatprep.mubr.msk.f32.mxu0 %vm1722_vm10, %v1703_v1  ;;  %v1455_v28 = vpop.permute.xlu0 %1454 }
 0x1fc   : > { %v971_v42 = vpop.permute.xlu1 %970  ;;  %8188 = vmatmul.mubr.msk.f32.gmra.mrb[22].mxu0 %vm1722_vm10, %v1704_v32 }
 0x1fd   : > { %1010 = vst.msk [vmem:[#allocation5 + $0x48] sm:$0xff] %vm1000_vm2, %v971_v42  ;;  %3274 = vrot.lane.b32.xlu0 %v3234_v24, %s8591_s10 }
 0x1ff   : > { %v1552_v61 = vpop.permute.xlu0 %1551 }
 0x200   : > { %v1068_v43 = vpop.permute.xlu1 %1067 }
 0x201   : > { %1107 = vst.msk [vmem:[#allocation5 + $0x48] sm:$0xff] %vm1097_vm3, %v1068_v43  ;;  %3354 = vrot.lane.b32.xlu0 %v3322_v23, %s8593_s12 }
 0x202   : > { %1204 = vst.msk [vmem:[#allocation5 + $0x48] sm:$0xff] %vm1194_vm4, %v1165_v54 }
 0x203   : > { %1301 = vst.msk [vmem:[#allocation5 + $0x48] sm:$0xff] %vm1291_vm5, %v1262_v48  ;;  %v1649_v55 = vpop.permute.xlu0 %1648  ;;  %v513_v48 = vld [vmem:[%s9426_s23 + $0x38] sm:$0xff] }
 0x204   : > { %1398 = vst.msk [vmem:[#allocation5 + $0x48] sm:$0xff] %vm1388_vm6, %v1359_v34  ;;  %v1169_v29 = vpop.permute.xlu1 %1168  ;;  %v529_v21 = vmax.f32 %v513_v48, 0.0  ;;  %v516_v48 = vld [vmem:[%s9426_s23 + $0x50] sm:$0xff] }
 0x205   : > { %3370 = vrot.lane.b32.xlu0 %v3330_v12, %s8593_s12 }
 0x207   : > { %v1163_v62 = vpop.permute.xlu0 %1162 }
 0x208   : > { %v1266_v31 = vpop.permute.xlu1 %1265  ;;  %1203 = vst.msk [vmem:[#allocation5 + $0x40] sm:$0xff] %vm1194_vm4, %v1163_v62 }
 0x20b   : > { %v1260_v40 = vpop.permute.xlu0 %1259 }
 0x20c   : > { %v1363_v22 = vpop.permute.xlu1 %1362  ;;  %1300 = vst.msk [vmem:[#allocation5 + $0x40] sm:$0xff] %vm1291_vm5, %v1260_v40 }
 0x20f   : > { %v1357_v44 = vpop.permute.xlu0 %1356 }
 0x210   : > { %v975_v47 = vpop.permute.xlu1 %974  ;;  %1397 = vst.msk [vmem:[#allocation5 + $0x40] sm:$0xff] %vm1388_vm6, %v1357_v44  ;;  %v515_v44 = vld [vmem:[%s9426_s23 + $0x48] sm:$0xff] }
 0x211   : > { %1012 = vst.msk [vmem:[#allocation5 + $0x58] sm:$0xff] %vm1000_vm2, %v975_v47  ;;  %v531_v47 = vmax.f32 %v515_v44, 0.0 }
 0x212   : > { %1495 = vst.msk [vmem:[#allocation5 + $0x40] sm:$0xff] %vm1486_vm7, %v1455_v28 }
 0x213   : > { %1592 = vst.msk [vmem:[#allocation5 + $0x40] sm:$0xff] %vm1583_vm8, %v1552_v61  ;;  %v977_v57 = vpop.permute.xlu0 %976 }
 0x214   : > { %1689 = vst.msk [vmem:[#allocation5 + $0x40] sm:$0xff] %vm1680_vm9, %v1649_v55  ;;  %v1072_v17 = vpop.permute.xlu1 %1071 }
 0x215   : > { %1013 = vst.msk [vmem:[#allocation5 + $0x60] sm:$0xff] %vm1000_vm2, %v977_v57 }
 0x216   : > { %1109 = vst.msk [vmem:[#allocation5 + $0x58] sm:$0xff] %vm1097_vm3, %v1072_v17 }
 0x217   : > { %1206 = vst.msk [vmem:[#allocation5 + $0x58] sm:$0xff] %vm1194_vm4, %v1169_v29  ;;  %v1074_v51 = vpop.permute.xlu0 %1073 }
 0x218   : > { %1303 = vst.msk [vmem:[#allocation5 + $0x58] sm:$0xff] %vm1291_vm5, %v1266_v31  ;;  %v1457_v2 = vpop.permute.xlu1 %1456 }
 0x219   : > { %1400 = vst.msk [vmem:[#allocation5 + $0x58] sm:$0xff] %vm1388_vm6, %v1363_v22  ;;  %v514_v22 = vld [vmem:[%s9426_s23 + $0x40] sm:$0xff] }
 0x21a   : > { %1110 = vst.msk [vmem:[#allocation5 + $0x60] sm:$0xff] %vm1097_vm3, %v1074_v51  ;;  %v530_v23 = vmax.f32 %v514_v22, 0.0 }
 0x21b   : > { %1496 = vst.msk [vmem:[#allocation5 + $0x48] sm:$0xff] %vm1486_vm7, %v1457_v2  ;;  %v1705_v18 = vld [vmem:[#allocation5 + $0x40] sm:$0xff]  ;;  %v1459_v36 = vpop.permute.xlu0 %1458 }
 0x21c   : > { %v1554_v4 = vpop.permute.xlu1 %1553  ;;  %8190 = vmatprep.mubr.msk.f32.mxu0 %vm1722_vm10, %v1705_v18  ;;  %2062 = vst.msk [vmem:[#allocation5 + $0x40] sm:$0xff] %vm254_vm0, %v9465_v27 }
 0x21d   : > { %1593 = vst.msk [vmem:[#allocation5 + $0x48] sm:$0xff] %vm1583_vm8, %v1554_v4  ;;  %v9722_v4 = vld [vmem:[%s13333_s3 + $0x2] ss:$0 sm:$0xff] }
 0x21e   : > { %2158 = vst.msk [vmem:[#allocation5 + $0x40] sm:$0xff] %vm1000_vm2, %v9375_v14  ;;  %v512_v14 = vld [vmem:[%s9426_s23 + $0x30] sm:$0xff] }
 0x21f   : > { %2254 = vst.msk [vmem:[#allocation5 + $0x40] sm:$0xff] %vm1097_vm3, %v9401_v33  ;;  %v1556_v49 = vpop.permute.xlu0 %1555  ;;  %v528_v33 = vmax.f32 %v512_v14, 0.0 }
 0x220   : > { %v1651_v0 = vpop.permute.xlu1 %1650 }
 0x221   : > { %1690 = vst.msk [vmem:[#allocation5 + $0x48] sm:$0xff] %vm1680_vm9, %v1651_v0  ;;  %8145 = vmatprep.mubr.msk.f32.mxu1 %vm254_vm0, %v528_v33 }
 0x222   : > { %8146 = vmatmul.mubr.msk.f32.gmra.mrb[6].mxu1 %vm254_vm0, %v529_v21  ;;  %v532_v21 = vmax.f32 %v516_v48, 0.0 }
 0x223   : > { %v1653_v46 = vpop.permute.xlu0 %1652  ;;  %8148 = vmatprep.mubr.msk.f32.mxu1 %vm254_vm0, %v530_v23 }
 0x224   : > { %v1173_v25 = vpop.permute.xlu1 %1172 }
 0x226   : > { %8149 = vmatmul.mubr.msk.f32.gmra.mrb[8].mxu1 %vm254_vm0, %v531_v47 }
 0x227   : > { %v1167_v50 = vpop.permute.xlu0 %1166  ;;  %8151 = vmatprep.mubr.msk.f32.mxu1 %vm254_vm0, %v532_v21 }
 0x228   : > { %v1270_v9 = vpop.permute.xlu1 %1269  ;;  %v1706_v60 = vld [vmem:[#allocation5 + $0x48] sm:$0xff]  ;;  %1205 = vst.msk [vmem:[#allocation5 + $0x50] sm:$0xff] %vm1194_vm4, %v1167_v50 }
 0x229   : > { %8191 = vmatmul.mubr.msk.f32.gmra.mrb[24].mxu0 %vm1722_vm10, %v1706_v60 }
 0x22b   : > { %v1264_v27 = vpop.permute.xlu0 %1263 }
 0x22c   : > { %v1367_v54 = vpop.permute.xlu1 %1366  ;;  %1302 = vst.msk [vmem:[#allocation5 + $0x50] sm:$0xff] %vm1291_vm5, %v1264_v27 }
 0x22f   : > { %v1361_v39 = vpop.permute.xlu0 %1360 }
 0x230   : > { %v979_v45 = vpop.permute.xlu1 %978  ;;  %1399 = vst.msk [vmem:[#allocation5 + $0x50] sm:$0xff] %vm1388_vm6, %v1361_v39  ;;  %v517_v39 = vld [vmem:[%s9426_s23 + $0x58] sm:$0xff] }
 0x231   : > { %1014 = vst.msk [vmem:[#allocation5 + $0x68] sm:$0xff] %vm1000_vm2, %v979_v45  ;;  %v533_v45 = vmax.f32 %v517_v39, 0.0 }
 0x232   : > { %1497 = vst.msk [vmem:[#allocation5 + $0x50] sm:$0xff] %vm1486_vm7, %v1459_v36 }
 0x233   : > { %1594 = vst.msk [vmem:[#allocation5 + $0x50] sm:$0xff] %vm1583_vm8, %v1556_v49  ;;  %v981_v38 = vpop.permute.xlu0 %980  ;;  %8152 = vmatmul.mubr.msk.f32.gmra.mrb[10].mxu1 %vm254_vm0, %v533_v45 }
 0x234   : > { %1691 = vst.msk [vmem:[#allocation5 + $0x50] sm:$0xff] %vm1680_vm9, %v1653_v46  ;;  %v1076_v59 = vpop.permute.xlu1 %1075 }
 0x235   : > { %1015 = vst.msk [vmem:[#allocation5 + $0x70] sm:$0xff] %vm1000_vm2, %v981_v38  ;;  %v518_v38 = vld [vmem:[%s9426_s23 + $0x60] sm:$0xff] }
 0x236   : > { %1111 = vst.msk [vmem:[#allocation5 + $0x68] sm:$0xff] %vm1097_vm3, %v1076_v59  ;;  %v534_v59 = vmax.f32 %v518_v38, 0.0 }
 0x237   : > { %1208 = vst.msk [vmem:[#allocation5 + $0x68] sm:$0xff] %vm1194_vm4, %v1173_v25  ;;  %v1078_v13 = vpop.permute.xlu0 %1077 }
 0x238   : > { %1305 = vst.msk [vmem:[#allocation5 + $0x68] sm:$0xff] %vm1291_vm5, %v1270_v9  ;;  %v1461_v15 = vpop.permute.xlu1 %1460  ;;  %8154 = vmatprep.mubr.msk.f32.mxu1 %vm254_vm0, %v534_v59 }
 0x239   : > { %1402 = vst.msk [vmem:[#allocation5 + $0x68] sm:$0xff] %vm1388_vm6, %v1367_v54 }
 0x23a   : > { %1112 = vst.msk [vmem:[#allocation5 + $0x70] sm:$0xff] %vm1097_vm3, %v1078_v13  ;;  %v519_v13 = vld [vmem:[%s9426_s23 + $0x68] sm:$0xff] }
 0x23b   : > { %1498 = vst.msk [vmem:[#allocation5 + $0x58] sm:$0xff] %vm1486_vm7, %v1461_v15  ;;  %v1707_v34 = vld [vmem:[#allocation5 + $0x50] sm:$0xff]  ;;  %v1463_v52 = vpop.permute.xlu0 %1462  ;;  %v535_v15 = vmax.f32 %v519_v13, 0.0  ;;  %v9839_v13 = vld [vmem:[#allocation4] sm:$0xff] }
 0x23c   : > { %v1558_v1 = vpop.permute.xlu1 %1557  ;;  %8193 = vmatprep.mubr.msk.f32.mxu0 %vm1722_vm10, %v1707_v34  ;;  %v9756_v34 = vld [vmem:[%s13333_s3 + $0x4] ss:$0 sm:$0xff]  ;;  %4270 = vst.msk [vmem:[#allocation4] sm:$0xff] %vm254_vm0, %v13428_v63 }
 0x23d   : > { %1595 = vst.msk [vmem:[#allocation5 + $0x58] sm:$0xff] %vm1583_vm8, %v1558_v1  ;;  %8155 = vmatmul.mubr.msk.f32.gmra.mrb[12].mxu1 %vm254_vm0, %v535_v15  ;;  %v9761_v1 = vld [vmem:[%s13333_s3 + $0x5] ss:$0 sm:$0xff] }
 0x23f   : > { %v1560_v28 = vpop.permute.xlu0 %1559 }
 0x240   : > { %v1655_v42 = vpop.permute.xlu1 %1654 }
 0x241   : > { %1692 = vst.msk [vmem:[#allocation5 + $0x58] sm:$0xff] %vm1680_vm9, %v1655_v42 }
 0x243   : > { %v1657_v32 = vpop.permute.xlu0 %1656 }
 0x244   : > { %v1177_v61 = vpop.permute.xlu1 %1176 }
 0x247   : > { %v1171_v43 = vpop.permute.xlu0 %1170 }
 0x248   : > { %v1274_v55 = vpop.permute.xlu1 %1273  ;;  %v1708_v29 = vld [vmem:[#allocation5 + $0x58] sm:$0xff]  ;;  %1207 = vst.msk [vmem:[#allocation5 + $0x60] sm:$0xff] %vm1194_vm4, %v1171_v43 }
 0x249   : > { %8194 = vmatmul.mubr.msk.f32.gmra.mrb[26].mxu0 %vm1722_vm10, %v1708_v29 }
 0x24b   : > { %v1268_v62 = vpop.permute.xlu0 %1267 }
 0x24c   : > { %v1371_v31 = vpop.permute.xlu1 %1370  ;;  %1304 = vst.msk [vmem:[#allocation5 + $0x60] sm:$0xff] %vm1291_vm5, %v1268_v62 }
 0x24f   : > { %v1365_v24 = vpop.permute.xlu0 %1364 }
 0x250   : > { %v983_v40 = vpop.permute.xlu1 %982  ;;  %1401 = vst.msk [vmem:[#allocation5 + $0x60] sm:$0xff] %vm1388_vm6, %v1365_v24 }
 0x251   : > { %1016 = vst.msk [vmem:[#allocation5 + $0x78] sm:$0xff] %vm1000_vm2, %v983_v40 }
 0x252   : > { %1499 = vst.msk [vmem:[#allocation5 + $0x60] sm:$0xff] %vm1486_vm7, %v1463_v52 }
 0x253   : > { %1596 = vst.msk [vmem:[#allocation5 + $0x60] sm:$0xff] %vm1583_vm8, %v1560_v28  ;;  %v1467_v12 = vpop.permute.xlu0 %1466 }
 0x254   : > { %1693 = vst.msk [vmem:[#allocation5 + $0x60] sm:$0xff] %vm1680_vm9, %v1657_v32  ;;  %v1080_v57 = vpop.permute.xlu1 %1079 }
 0x255   : > { %1113 = vst.msk [vmem:[#allocation5 + $0x78] sm:$0xff] %vm1097_vm3, %v1080_v57 }
 0x256   : > { %1210 = vst.msk [vmem:[#allocation5 + $0x78] sm:$0xff] %vm1194_vm4, %v1177_v61 }
 0x257   : > { %1307 = vst.msk [vmem:[#allocation5 + $0x78] sm:$0xff] %vm1291_vm5, %v1274_v55  ;;  %v1564_v17 = vpop.permute.xlu0 %1563 }
 0x258   : > { %1404 = vst.msk [vmem:[#allocation5 + $0x78] sm:$0xff] %vm1388_vm6, %v1371_v31  ;;  %v1465_v51 = vpop.permute.xlu1 %1464 }
 0x259   : > { %1502 = vst.msk [vmem:[#allocation5 + $0x78] sm:$0xff] %vm1486_vm7, %v9279_v58  ;;  %1500 = vst.msk [vmem:[#allocation5 + $0x68] sm:$0xff] %vm1486_vm7, %v1465_v51 }
 0x25a   : > { %1599 = vst.msk [vmem:[#allocation5 + $0x78] sm:$0xff] %vm1583_vm8, %v9309_v35  ;;  %v8138_v35 = vpop.f32.mrb[0].mxu1 }
 0x25b   : > { %1696 = vst.msk [vmem:[#allocation5 + $0x78] sm:$0xff] %vm1680_vm9, %v9339_v6  ;;  %v1709_v2 = vld [vmem:[#allocation5 + $0x60] sm:$0xff]  ;;  %v1661_v18 = vpop.permute.xlu0 %1660  ;;  %v738_v0 = vmul.f32 %v8138_v35, %v9722_v4  ;;  %v653_v46 = vpop.f32.mrb[1].mxu1 }
 0x25c   : > { %v1562_v36 = vpop.permute.xlu1 %1561  ;;  %8196 = vmatprep.mubr.msk.f32.mxu0 %vm1722_vm10, %v1709_v2  ;;  %v9729_v6 = vld [vmem:[%s13333_s3 + $0x3] ss:$0 sm:$0xff]  ;;  %v737_v25 = vmul.f32 %v9722_v4, %v653_v46 }
 0x25d   : > { %1597 = vst.msk [vmem:[#allocation5 + $0x68] sm:$0xff] %vm1583_vm8, %v1562_v36  ;;  %v759_v9 = vadd.f32 %v9729_v6, %v738_v0  ;;  %v521_v36 = vld [vmem:[%s9426_s23 + $0x78] sm:$0xff] }
 0x25e   : > { %v758_v60 = vadd.f32 %v9729_v6, %v737_v25 }
 0x25f   : > { %v1175_v58 = vpop.permute.xlu0 %1174  ;;  %775 = vst.msk [vmem:[#allocation3 + $0x8] sm:$0xff] %vm254_vm0, %v759_v9 }
 0x260   : > { %v1659_v49 = vpop.permute.xlu1 %1658  ;;  %1209 = vst.msk [vmem:[#allocation5 + $0x70] sm:$0xff] %vm1194_vm4, %v1175_v58 }
 0x261   : > { %1694 = vst.msk [vmem:[#allocation5 + $0x68] sm:$0xff] %vm1680_vm9, %v1659_v49  ;;  %v537_v49 = vmax.f32 %v521_v36, 0.0 }
 0x262   : > { %774 = vst.msk [vmem:[#allocation3] sm:$0xff] %vm254_vm0, %v758_v60  ;;  %v1712_v33 = vld [vmem:[#allocation5 + $0x78] sm:$0xff] }
 0x263   : > { %v1272_v50 = vpop.permute.xlu0 %1271 }
 0x264   : > { %1306 = vst.msk [vmem:[#allocation5 + $0x70] sm:$0xff] %vm1291_vm5, %v1272_v50 }
 0x266   : > { %v9769_v31 = vld [vmem:[#allocation3 + $0x8] sm:$0xff] }
 0x267   : > { %v1369_v27 = vpop.permute.xlu0 %1368  ;;  %13429 = vst [vmem:[#allocation27_spill] sm:$0xff] %v9769_v31  ;;  %v13346_v23 = vmax.f32 %v9769_v31, 0.0 }
 0x268   : > { %v1710_v54 = vld [vmem:[#allocation5 + $0x68] sm:$0xff]  ;;  %1403 = vst.msk [vmem:[#allocation5 + $0x70] sm:$0xff] %vm1388_vm6, %v1369_v27 }
 0x269   : > { %8197 = vmatmul.mubr.msk.f32.gmra.mrb[28].mxu0 %vm1722_vm10, %v1710_v54  ;;  %1501 = vst.msk [vmem:[#allocation5 + $0x70] sm:$0xff] %vm1486_vm7, %v1467_v12  ;;  %v9772_v40 = vld [vmem:[#allocation3] sm:$0xff] }
 0x26a   : > { %1598 = vst.msk [vmem:[#allocation5 + $0x70] sm:$0xff] %vm1583_vm8, %v1564_v17  ;;  %13430 = vst [vmem:[#allocation28_spill] sm:$0xff] %v9772_v40  ;;  %v13348_v44 = vmax.f32 %v9772_v40, 0.0 }
 0x26b   : > { %1695 = vst.msk [vmem:[#allocation5 + $0x70] sm:$0xff] %vm1680_vm9, %v1661_v18  ;;  %v520_v18 = vld [vmem:[%s9426_s23 + $0x70] sm:$0xff]  ;;  %s205_s23 = sand.u32 1, %s8579_s16  }
 0x26c   : > { %v536_v58 = vmax.f32 %v520_v18, 0.0  ;;  %s7810_s6 = sshll.u32 %s205_s23, 7 }
 0x26d   : > { %s12672_s7 = scalar_lea.vmem [#allocation6], %s7810_s6 }
 0x26e   : > { %8157 = vmatprep.mubr.msk.f32.mxu1 %vm254_vm0, %v536_v58 }
 0x26f   : > { %8158 = vmatmul.mubr.msk.f32.gmra.mrb[14].mxu1 %vm254_vm0, %v537_v49 }
 0x272   : > { %v1711_v14 = vld [vmem:[#allocation5 + $0x70] sm:$0xff] }
 0x273   : > { %8199 = vmatprep.mubr.msk.f32.mxu0 %vm1722_vm10, %v1711_v14 }
 0x274   : > { %8200 = vmatmul.mubr.msk.f32.gmra.mrb[30].mxu0 %vm1722_vm10, %v1712_v33 }
 0x288   : > { %v8180_v52 = vpop.f32.mrb[16].mxu0 }
 0x289   : > { %v1922_v28 = vmul.f32 %v8180_v52, %v9756_v34  ;;  %v1837_v42 = vpop.f32.mrb[17].mxu0 }
 0x28a   : > { %v1921_v32 = vmul.f32 %v9756_v34, %v1837_v42  ;;  %v8141_v62 = vpop.f32.mrb[2].mxu1 }
 0x28b   : > { %v1943_v61 = vadd.f32 %v9761_v1, %v1922_v28  ;;  %v740_v24 = vmul.f32 %v8141_v62, %v9722_v4  ;;  %v663_v35 = vpop.f32.mrb[3].mxu1 }
 0x28c   : > { %v1942_v43 = vadd.f32 %v9761_v1, %v1921_v32  ;;  %v739_v0 = vmul.f32 %v9722_v4, %v663_v35  ;;  %v2858_v35 = vld [vmem:[%s13332_s2 + $0x78] sm:$0xff] }
 0x28d   : > { %v1959_v55 = vmax.f32 %v1943_v61, 0.0  ;;  %v761_v22 = vadd.f32 %v9729_v6, %v740_v24  ;;  %v2854_v24 = vld [vmem:[%s13332_s2 + $0x58] sm:$0xff] }
 0x28e   : > { %v1958_v29 = vmax.f32 %v1942_v43, 0.0  ;;  %v760_v9 = vadd.f32 %v9729_v6, %v739_v0  ;;  %v2859_v0 = vld [vmem:[%s13332_s2 + $0x80] sm:$0xff] }
 0x28f   : > { %2023 = vst.msk [vmem:[#allocation4 + $0x21] sm:$0xff] %vm254_vm0, %v1959_v55  ;;  %777 = vst.msk [vmem:[#allocation3 + $0x18] sm:$0xff] %vm254_vm0, %v761_v22  ;;  %v2855_v22 = vld [vmem:[%s13332_s2 + $0x60] sm:$0xff] }
 0x290   : > { %2022 = vst.msk [vmem:[#allocation4 + $0x11] sm:$0xff] %vm254_vm0, %v1958_v29  ;;  %776 = vst.msk [vmem:[#allocation3 + $0x10] sm:$0xff] %vm254_vm0, %v760_v9  ;;  %v8394_v9 = vpack.c.bf16 %v2859_v0, %v2858_v35 }
 0x296   : > { %v2040_v47 = vld [vmem:[#allocation4 + $0x20] sm:$0xff]  ;;  %v9841_v15 = vld [vmem:[#allocation3 + $0x18] sm:$0xff] }
 0x297   : > { %v2072_v12 = vld [vmem:[#allocation4 + $0x21] sm:$0xff]  ;;  %v2039_v17 = vld [vmem:[#allocation4 + $0x10] sm:$0xff]  ;;  %2056 = vst.msk [vmem:[#allocation5 + $0x10] sm:$0xff] %vm254_vm0, %v2040_v47  ;;  %2296 = vrot.lane.b32.xlu1 %v2040_v47, %s8595_s27  ;;  %13431 = vst [vmem:[#allocation29_spill] sm:$0xff] %v9841_v15  ;;  %v13345_v28 = vmax.f32 %v9841_v15, 0.0 }
 0x298   : > { %v2742_v57 = vld [vmem:[#allocation4 + $0x22] sm:$0xff]  ;;  %v2454_v51 = vld [vmem:[#allocation4 + $0x12] sm:$0xff]  ;;  %2106 = vrot.lane.b32.xlu0 %v2072_v12, %s8591_s10  ;;  %2055 = vst.msk [vmem:[#allocation5 + $0x8] sm:$0xff] %vm254_vm0, %v2039_v17 }
 0x299   : > { %3134 = vst.msk [vmem:[#allocation4 + $0x20] sm:$0xff] %vm254_vm0, %v13428_v63  ;;  %v2071_v2 = vld [vmem:[#allocation4 + $0x11] sm:$0xff] }
 0x29a   : > { %3135 = vst.msk [vmem:[#allocation4 + $0x28] sm:$0xf] %vm823_vm1, %v13428_v63  ;;  %3133 = vst.msk [vmem:[#allocation4 + $0x18] sm:$0xf] %vm823_vm1, %v13428_v63  ;;  %v9845_v52 = vld [vmem:[#allocation3 + $0x10] sm:$0xff] }
 0x29b   : > { %3132 = vst.msk [vmem:[#allocation4 + $0x10] sm:$0xff] %vm254_vm0, %v13428_v63  ;;  %3179 = vst.msk [vmem:[#allocation4 + $0x21] sm:$0xff] %vm254_vm0, %v13346_v23  ;;  %2392 = vrot.lane.b32.xlu1 %v2072_v12, %s8596_s28  ;;  %v13347_v42 = vmax.f32 %v9845_v52, 0.0 }
 0x29c   : > { %3178 = vst.msk [vmem:[#allocation4 + $0x11] sm:$0xff] %vm254_vm0, %v13348_v44  ;;  %2202 = vrot.lane.b32.xlu0 %v2742_v57, %s8593_s12  ;;  %13432 = vst [vmem:[#allocation30_spill] sm:$0xff] %v9845_v52 }
 0x29f   : > { %2488 = vrot.lane.b32.xlu1 %v2742_v57, %s8597_s30 }
 0x2a0   : > { %2582 = vrot.lane.b32.xlu0 %v2040_v47, %s8590_s9  ;;  %v8386_v47 = vpack.c.bf16 %v2855_v22, %v2854_v24 }
 0x2a2   : > { %v9805_v46 = vld [vmem:[#allocation4 + $0x21] sm:$0xff]  ;;  %8387 = vmatprep.subr.bf16.mxu1 %v8386_v47 }
 0x2a3   : > { %v9807_v25 = vld [vmem:[#allocation4 + $0x20] sm:$0xff]  ;;  %v9812_v60 = vld [vmem:[#allocation4 + $0x11] sm:$0xff]  ;;  %2104 = vrot.lane.b32.xlu1 %v2071_v2, %s8591_s10  ;;  %8389 = vmatpush3.bf16.msra.mxu1 %v8386_v47 }
 0x2a4   : > { %v9809_v50 = vld [vmem:[#allocation4 + $0x22] sm:$0xff]  ;;  %v9816_v27 = vld [vmem:[#allocation4 + $0x12] sm:$0xff]  ;;  %2678 = vrot.lane.b32.xlu0 %v2072_v12, %s8592_s11 }
 0x2a5   : > { %4275 = vst.msk [vmem:[#allocation4 + $0x28] sm:$0xf] %vm823_vm1, %v13428_v63  ;;  %v9818_v54 = vld [vmem:[#allocation4 + $0x10] sm:$0xff]  ;;  %4273 = vst.msk [vmem:[#allocation4 + $0x18] sm:$0xf] %vm823_vm1, %v13428_v63  ;;  %v2856_v12 = vld [vmem:[%s13332_s2 + $0x68] sm:$0xff] }
 0x2a6   : > { %4274 = vst.msk [vmem:[#allocation4 + $0x20] sm:$0xff] %vm254_vm0, %v13428_v63  ;;  %4272 = vst.msk [vmem:[#allocation4 + $0x10] sm:$0xff] %vm254_vm0, %v13428_v63 }
 0x2a7   : > { %2200 = vrot.lane.b32.xlu1 %v2454_v51, %s8593_s12 }
 0x2a8   : > { %2774 = vrot.lane.b32.xlu0 %v2742_v57, %s8594_s13  ;;  %v8183_v14 = vpop.f32.mrb[18].mxu0  ;;  %v2857_v57 = vld [vmem:[%s13332_s2 + $0x70] sm:$0xff] }
 0x2a9   : > { %v1924_v33 = vmul.f32 %v8183_v14, %v9756_v34  ;;  %v1847_v48 = vpop.f32.mrb[19].mxu0  ;;  %v2860_v14 = vld [vmem:[%s13332_s2 + $0x88] sm:$0xff] }
 0x2aa   : > { %v1923_v21 = vmul.f32 %v9756_v34, %v1847_v48 }
 0x2ab   : > { %v1945_v39 = vadd.f32 %v9761_v1, %v1924_v33  ;;  %v2861_v33 = vld [vmem:[%s13332_s2 + $0x90] sm:$0xff] }
 0x2ac   : > { %2294 = vrot.lane.b32.xlu0 %v2039_v17, %s8595_s27  ;;  %v1944_v45 = vadd.f32 %v9761_v1, %v1923_v21  ;;  %v8390_v17 = vpack.c.bf16 %v2857_v57, %v2856_v12  ;;  %v8398_v48 = vpack.c.bf16 %v2861_v33, %v2860_v14 }
 0x2ad   : > { %v1961_v38 = vmax.f32 %v1945_v39, 0.0 }
 0x2ae   : > { %v1960_v59 = vmax.f32 %v1944_v45, 0.0  ;;  %8391 = vmatprep.subr.bf16.mxu1 %v8390_v17 }
 0x2af   : > { %2025 = vst.msk [vmem:[#allocation4 + $0x41] sm:$0xff] %vm254_vm0, %v1961_v38  ;;  %8393 = vmatpush3.bf16.msra.mxu1 %v8390_v17 }
 0x2b0   : > { %2390 = vrot.lane.b32.xlu0 %v2071_v2, %s8596_s28  ;;  %2024 = vst.msk [vmem:[#allocation4 + $0x31] sm:$0xff] %vm254_vm0, %v1960_v59  ;;  %8395 = vmatprep.subr.bf16.mxu1 %v8394_v9 }
 0x2b3   : > { %8397 = vmatpush3.bf16.msra.mxu1 %v8394_v9 }
 0x2b4   : > { %2486 = vrot.lane.b32.xlu0 %v2454_v51, %s8597_s30  ;;  %8399 = vmatprep.subr.bf16.mxu1 %v8398_v48 }
 0x2b6   : > { %v2042_v32 = vld [vmem:[#allocation4 + $0x40] sm:$0xff] }
 0x2b7   : > { %v2074_v61 = vld [vmem:[#allocation4 + $0x41] sm:$0xff]  ;;  %2058 = vst.msk [vmem:[#allocation5 + $0x20] sm:$0xff] %vm254_vm0, %v2042_v32  ;;  %2300 = vrot.lane.b32.xlu1 %v2042_v32, %s8595_s27  ;;  %v2073_v55 = vld [vmem:[#allocation4 + $0x31] sm:$0xff]  ;;  %8401 = vmatpush3.bf16.msra.mxu1 %v8398_v48 }
 0x2b8   : > { %v2744_v43 = vld [vmem:[#allocation4 + $0x42] sm:$0xff]  ;;  %2110 = vrot.lane.b32.xlu0 %v2074_v61, %s8591_s10  ;;  %v9857_v29 = vld [vmem:[#allocation4 + $0x32] sm:$0xff] }
 0x2b9   : > { %3138 = vst.msk [vmem:[#allocation4 + $0x40] sm:$0xff] %vm254_vm0, %v13428_v63  ;;  %v2264_v62 = vld [vmem:[#allocation4 + $0x30] sm:$0xff] }
 0x2ba   : > { %3139 = vst.msk [vmem:[#allocation4 + $0x48] sm:$0xf] %vm823_vm1, %v13428_v63  ;;  %3137 = vst.msk [vmem:[#allocation4 + $0x38] sm:$0xf] %vm823_vm1, %v13428_v63 }
 0x2bb   : > { %3181 = vst.msk [vmem:[#allocation4 + $0x41] sm:$0xff] %vm254_vm0, %v13345_v28  ;;  %2057 = vst.msk [vmem:[#allocation5 + $0x18] sm:$0xff] %vm254_vm0, %v2264_v62  ;;  %2396 = vrot.lane.b32.xlu1 %v2074_v61, %s8596_s28 }
 0x2bc   : > { %3136 = vst.msk [vmem:[#allocation4 + $0x30] sm:$0xff] %vm254_vm0, %v13428_v63  ;;  %2206 = vrot.lane.b32.xlu0 %v2744_v43, %s8593_s12 }
 0x2bd   : > { %3180 = vst.msk [vmem:[#allocation4 + $0x31] sm:$0xff] %vm254_vm0, %v13347_v42 }
 0x2bf   : > { %2492 = vrot.lane.b32.xlu1 %v2744_v43, %s8597_s30 }
 0x2c0   : > { %2586 = vrot.lane.b32.xlu0 %v2042_v32, %s8590_s9 }
 0x2c2   : > { %v9886_v51 = vld [vmem:[#allocation4 + $0x41] sm:$0xff] }
 0x2c3   : > { %v9888_v2 = vld [vmem:[#allocation4 + $0x42] sm:$0xff]  ;;  %2108 = vrot.lane.b32.xlu1 %v2073_v55, %s8591_s10 }
 0x2c4   : > { %v9890_v18 = vld [vmem:[#allocation4 + $0x40] sm:$0xff]  ;;  %v9892_v36 = vld [vmem:[#allocation4 + $0x30] sm:$0xff]  ;;  %4279 = vst.msk [vmem:[#allocation4 + $0x48] sm:$0xf] %vm823_vm1, %v13428_v63  ;;  %2682 = vrot.lane.b32.xlu0 %v2074_v61, %s8592_s11  ;;  %v2862_v61 = vld [vmem:[%s13332_s2 + $0x98] sm:$0xff] }
 0x2c5   : > { %v9894_v58 = vld [vmem:[#allocation4 + $0x31] sm:$0xff]  ;;  %4278 = vst.msk [vmem:[#allocation4 + $0x40] sm:$0xff] %vm254_vm0, %v13428_v63  ;;  %8218 = vmatprep.subr.mxu1 %v2862_v61 }
 0x2c6   : > { %v9898_v49 = vld [vmem:[#allocation4 + $0x32] sm:$0xff]  ;;  %8219 = vmatpush3.msra.mxu1 %v2862_v61 }
 0x2c7   : > { %4277 = vst.msk [vmem:[#allocation4 + $0x38] sm:$0xf] %vm823_vm1, %v13428_v63  ;;  %2204 = vrot.lane.b32.xlu1 %v9857_v29, %s8593_s12 }
 0x2c8   : > { %4276 = vst.msk [vmem:[#allocation4 + $0x30] sm:$0xff] %vm254_vm0, %v13428_v63  ;;  %2778 = vrot.lane.b32.xlu0 %v2744_v43, %s8594_s13  ;;  %v8186_v21 = vpop.f32.mrb[20].mxu0 }
 0x2c9   : > { %v1926_v39 = vmul.f32 %v8186_v21, %v9756_v34  ;;  %v1857_v45 = vpop.f32.mrb[21].mxu0 }
 0x2ca   : > { %v1925_v38 = vmul.f32 %v9756_v34, %v1857_v45 }
 0x2cb   : > { %v1947_v59 = vadd.f32 %v9761_v1, %v1926_v39  ;;  %2584 = vrot.lane.b32.xlu1 %v2264_v62, %s8590_s9 }
 0x2cc   : > { %2298 = vrot.lane.b32.xlu0 %v2264_v62, %s8595_s27  ;;  %v1946_v32 = vadd.f32 %v9761_v1, %v1925_v38  ;;  %v8144_v62 = vpop.f32.mrb[4].mxu1 }
 0x2cd   : > { %v1963_v43 = vmax.f32 %v1947_v59, 0.0  ;;  %v673_v57 = vpop.f32.mrb[5].mxu1  ;;  %v742_v35 = vmul.f32 %v8144_v62, %v9722_v4 }
 0x2ce   : > { %v1962_v24 = vmax.f32 %v1946_v32, 0.0  ;;  %v741_v0 = vmul.f32 %v9722_v4, %v673_v57 }
 0x2cf   : > { %2027 = vst.msk [vmem:[#allocation4 + $0x61] sm:$0xff] %vm254_vm0, %v1963_v43  ;;  %2680 = vrot.lane.b32.xlu1 %v2073_v55, %s8592_s11  ;;  %v8189_v22 = vpop.f32.mrb[22].mxu0  ;;  %v763_v14 = vadd.f32 %v9729_v6, %v742_v35 }
 0x2d0   : > { %2394 = vrot.lane.b32.xlu0 %v2073_v55, %s8596_s28  ;;  %2026 = vst.msk [vmem:[#allocation4 + $0x51] sm:$0xff] %vm254_vm0, %v1962_v24  ;;  %v1928_v47 = vmul.f32 %v8189_v22, %v9756_v34  ;;  %v1867_v12 = vpop.f32.mrb[23].mxu0  ;;  %v762_v33 = vadd.f32 %v9729_v6, %v741_v0 }
 0x2d1   : > { %v1927_v17 = vmul.f32 %v9756_v34, %v1867_v12  ;;  %779 = vst.msk [vmem:[#allocation3 + $0x28] sm:$0xff] %vm254_vm0, %v763_v14 }
 0x2d2   : > { %v1949_v9 = vadd.f32 %v9761_v1, %v1928_v47  ;;  %778 = vst.msk [vmem:[#allocation3 + $0x20] sm:$0xff] %vm254_vm0, %v762_v33 }
 0x2d3   : > { %2776 = vrot.lane.b32.xlu1 %v9857_v29, %s8594_s13  ;;  %v1948_v55 = vadd.f32 %v9761_v1, %v1927_v17 }
 0x2d4   : > { %2490 = vrot.lane.b32.xlu0 %v9857_v29, %s8597_s30  ;;  %v1965_v48 = vmax.f32 %v1949_v9, 0.0 }
 0x2d5   : > { %v1964_v39 = vmax.f32 %v1948_v55, 0.0 }
 0x2d6   : > { %v2746_v21 = vld [vmem:[#allocation4 + $0x62] sm:$0xff]  ;;  %2029 = vst.msk [vmem:[#allocation4 + $0x81] sm:$0xff] %vm254_vm0, %v1965_v48 }
 0x2d7   : > { %v2076_v45 = vld [vmem:[#allocation4 + $0x61] sm:$0xff]  ;;  %v2458_v59 = vld [vmem:[#allocation4 + $0x52] sm:$0xff]  ;;  %2028 = vst.msk [vmem:[#allocation4 + $0x71] sm:$0xff] %vm254_vm0, %v1964_v39  ;;  %v10032_v39 = vpop.permute.xlu0 %3258 }
 0x2d8   : > { %v2267_v38 = vld [vmem:[#allocation4 + $0x60] sm:$0xff]  ;;  %2114 = vrot.lane.b32.xlu0 %v2076_v45, %s8591_s10  ;;  %3143 = vst.msk [vmem:[#allocation4 + $0x68] sm:$0xf] %vm823_vm1, %v13428_v63  ;;  %v2075_v29 = vld [vmem:[#allocation4 + $0x51] sm:$0xff]  ;;  %v9966_v61 = vld [vmem:[#allocation3 + $0x28] sm:$0xff] }
 0x2d9   : > { %2304 = vrot.lane.b32.xlu1 %v2267_v38, %s8595_s27  ;;  %v2266_v32 = vld [vmem:[#allocation4 + $0x50] sm:$0xff]  ;;  %2060 = vst.msk [vmem:[#allocation5 + $0x30] sm:$0xff] %vm254_vm0, %v2267_v38  ;;  %3142 = vst.msk [vmem:[#allocation4 + $0x60] sm:$0xff] %vm254_vm0, %v13428_v63  ;;  %v9968_v43 = vld [vmem:[#allocation3 + $0x20] sm:$0xff]  ;;  %v13343_v47 = vmax.f32 %v9966_v61, 0.0 }
 0x2da   : > { %3141 = vst.msk [vmem:[#allocation4 + $0x58] sm:$0xf] %vm823_vm1, %v13428_v63  ;;  %13433 = vst [vmem:[#allocation31_spill] sm:$0xff] %v9966_v61  ;;  %v13344_v12 = vmax.f32 %v9968_v43, 0.0 }
 0x2db   : > { %2059 = vst.msk [vmem:[#allocation5 + $0x28] sm:$0xff] %vm254_vm0, %v2266_v32  ;;  %3140 = vst.msk [vmem:[#allocation4 + $0x50] sm:$0xff] %vm254_vm0, %v13428_v63 }
 0x2dc   : > { %2210 = vrot.lane.b32.xlu0 %v2746_v21, %s8593_s12  ;;  %13434 = vst [vmem:[#allocation32_spill] sm:$0xff] %v9968_v43  ;;  %3183 = vst.msk [vmem:[#allocation4 + $0x61] sm:$0xff] %vm254_vm0, %v13343_v47 }
 0x2dd   : > { %2400 = vrot.lane.b32.xlu1 %v2076_v45, %s8596_s28  ;;  %v9970_v24 = vld [vmem:[#allocation4 + $0x82] sm:$0xff]  ;;  %3182 = vst.msk [vmem:[#allocation4 + $0x51] sm:$0xff] %vm254_vm0, %v13344_v12 }
 0x2de   : > { %v9972_v22 = vld [vmem:[#allocation4 + $0x80] sm:$0xff]  ;;  %v9978_v57 = vld [vmem:[#allocation4 + $0x72] sm:$0xff] }
 0x2df   : > { %v9974_v62 = vld [vmem:[#allocation4 + $0x81] sm:$0xff]  ;;  %v9986_v17 = vld [vmem:[#allocation4 + $0x70] sm:$0xff] }
 0x2e0   : > { %2590 = vrot.lane.b32.xlu0 %v2267_v38, %s8590_s9  ;;  %3147 = vst.msk [vmem:[#allocation4 + $0x88] sm:$0xf] %vm823_vm1, %v13428_v63  ;;  %v9988_v35 = vld [vmem:[#allocation4 + $0x71] sm:$0xff] }
 0x2e1   : > { %2496 = vrot.lane.b32.xlu1 %v2746_v21, %s8597_s30  ;;  %3146 = vst.msk [vmem:[#allocation4 + $0x80] sm:$0xff] %vm254_vm0, %v13428_v63  ;;  %2061 = vst.msk [vmem:[#allocation5 + $0x38] sm:$0xff] %vm254_vm0, %v9986_v17  ;;  %v10046_v38 = vld [vmem:[#allocation4 + $0x90] sm:$0xff] }
 0x2e2   : > { %3145 = vst.msk [vmem:[#allocation4 + $0x78] sm:$0xf] %vm823_vm1, %v13428_v63 }
 0x2e3   : > { %3144 = vst.msk [vmem:[#allocation4 + $0x70] sm:$0xff] %vm254_vm0, %v13428_v63  ;;  %v10006_v0 = vld [vmem:[#allocation4 + $0x61] sm:$0xff] }
 0x2e4   : > { %2686 = vrot.lane.b32.xlu0 %v2076_v45, %s8592_s11  ;;  %v10008_v9 = vld [vmem:[#allocation4 + $0x50] sm:$0xff]  ;;  %v10014_v33 = vld [vmem:[#allocation4 + $0x60] sm:$0xff]  ;;  %v10040_v45 = vpop.permute.xlu0 %3274 }
 0x2e5   : > { %2112 = vrot.lane.b32.xlu1 %v2075_v29, %s8591_s10  ;;  %v10010_v55 = vld [vmem:[#allocation4 + $0x51] sm:$0xff]  ;;  %v10016_v48 = vld [vmem:[#allocation4 + $0x62] sm:$0xff] }
 0x2e6   : > { %v10012_v14 = vld [vmem:[#allocation4 + $0x52] sm:$0xff] }
 0x2e7   : > { %4280 = vst.msk [vmem:[#allocation4 + $0x50] sm:$0xff] %vm254_vm0, %v13428_v63 }
 0x2e8   : > { %2782 = vrot.lane.b32.xlu0 %v2746_v21, %s8594_s13  ;;  %4281 = vst.msk [vmem:[#allocation4 + $0x58] sm:$0xf] %vm823_vm1, %v13428_v63  ;;  %v10022_v21 = vld [vmem:[#allocation4 + $0x61] sm:$0xff]  ;;  %v10056_v47 = vpop.permute.xlu0 %3354 }
 0x2e9   : > { %2208 = vrot.lane.b32.xlu1 %v2458_v59, %s8593_s12  ;;  %4283 = vst.msk [vmem:[#allocation4 + $0x68] sm:$0xf] %vm823_vm1, %v13428_v63 }
 0x2ea   : > { %4282 = vst.msk [vmem:[#allocation4 + $0x60] sm:$0xff] %vm254_vm0, %v13428_v63 }
 0x2ec   : > { %2302 = vrot.lane.b32.xlu0 %v2266_v32, %s8595_s27 }
 0x2ed   : > { %2588 = vrot.lane.b32.xlu1 %v2266_v32, %s8590_s9  ;;  %v10050_v32 = vld [vmem:[#allocation4 + $0x92] sm:$0xff] }
 0x2ee   : > { %13436 = vst [vmem:[#allocation34_spill] sm:$0xff] %v10050_v32 }
 0x2f0   : > { %2398 = vrot.lane.b32.xlu0 %v2075_v29, %s8596_s28 }
 0x2f1   : > { %2684 = vrot.lane.b32.xlu1 %v2075_v29, %s8592_s11  ;;  %v10048_v29 = vld [vmem:[#allocation4 + $0x91] sm:$0xff] }
 0x2f2   : > { %13435 = vst [vmem:[#allocation33_spill] sm:$0xff] %v10048_v29  ;;  %4288 = vst.msk [vmem:[#allocation4 + $0x90] sm:$0xff] %vm254_vm0, %v13428_v63 }
 0x2f3   : > { %4289 = vst.msk [vmem:[#allocation4 + $0x98] sm:$0xf] %vm823_vm1, %v13428_v63 }
 0x2f4   : > { %2494 = vrot.lane.b32.xlu0 %v2458_v59, %s8597_s30 }
 0x2f5   : > { %2780 = vrot.lane.b32.xlu1 %v2458_v59, %s8594_s13 }
 0x2f8   : > { %3262 = vrot.lane.b32.xlu0 %v9805_v46, %s8591_s10 }
 0x2f9   : > { %3452 = vrot.lane.b32.xlu1 %v9807_v25, %s8595_s27  ;;  %v10075_v56 = vld [vmem:[#allocation4 + $0x90] sm:$0xff] }
 0x2fa   : > { %13438 = vst [vmem:[#allocation36_spill] sm:$0xff] %v10075_v56 }
 0x2fc   : > { %3358 = vrot.lane.b32.xlu0 %v9809_v50, %s8593_s12  ;;  %v8192_v59 = vpop.f32.mrb[24].mxu0 }
 0x2fd   : > { %3738 = vrot.lane.b32.xlu1 %v9807_v25, %s8590_s9  ;;  %v1930_v12 = vmul.f32 %v8192_v59, %v9756_v34  ;;  %v1877_v28 = vpop.f32.mrb[25].mxu0  ;;  %v10070_v59 = vpop.permute.xlu0 %3370 }
 0x2fe   : > { %v1929_v23 = vmul.f32 %v9756_v34, %v1877_v28  ;;  %v10072_v28 = vpop.permute.xlu1 %2804 }
 0x2ff   : > { %v1951_v42 = vadd.f32 %v9761_v1, %v1930_v12  ;;  %13437 = vst [vmem:[#allocation35_spill] sm:$0xff] %v10072_v28  ;;  %v10079_v12 = vld [vmem:[#allocation4 + $0x91] sm:$0xff]  ;;  %v10470_v28 = vld [vmem:[%s13333_s3 + $0x2] ss:$0 sm:$0xff] }
 0x300   : > { %3548 = vrot.lane.b32.xlu0 %v9805_v46, %s8596_s28  ;;  %v1950_v44 = vadd.f32 %v9761_v1, %v1929_v23  ;;  %13440 = vst [vmem:[#allocation38_spill] sm:$0xff] %v10079_v12  ;;  %v8147_v23 = vpop.f32.mrb[6].mxu1 }
 0x301   : > { %3834 = vrot.lane.b32.xlu1 %v9805_v46, %s8592_s11  ;;  %v1967_v3 = vmax.f32 %v1951_v42, 0.0  ;;  %v10077_v46 = vld [vmem:[#allocation4 + $0x92] sm:$0xff] }
 0x302   : > { %v1966_v5 = vmax.f32 %v1950_v44, 0.0  ;;  %13439 = vst [vmem:[#allocation37_spill] sm:$0xff] %v10077_v46  ;;  %v13352_v44 = vmov -3.4028235e+38  }
 0x303   : > { %2031 = vst.msk [vmem:[#allocation4 + $0xe1] sm:$0xff] %vm254_vm0, %v1967_v3  ;;  %5478 = vst.msk [vmem:[#allocation4 + $0xa0] sm:$0xff] %vm254_vm0, %v13352_v44  ;;  %v744_v3 = vmul.f32 %v8147_v23, %v9722_v4 }
 0x304   : > { %3644 = vrot.lane.b32.xlu0 %v9809_v50, %s8597_s30  ;;  %2030 = vst.msk [vmem:[#allocation4 + $0xd1] sm:$0xff] %vm254_vm0, %v1966_v5  ;;  %5480 = vst.msk [vmem:[#allocation4 + $0xb0] sm:$0xff] %vm254_vm0, %v13352_v44  ;;  %v683_v5 = vpop.f32.mrb[7].mxu1 }
 0x305   : > { %3260 = vrot.lane.b32.xlu1 %v9812_v60, %s8591_s10  ;;  %5479 = vst.msk [vmem:[#allocation4 + $0xa8] sm:$0xf] %vm823_vm1, %v13352_v44  ;;  %5481 = vst.msk [vmem:[#allocation4 + $0xb8] sm:$0xf] %vm823_vm1, %v13352_v44  ;;  %v743_v42 = vmul.f32 %v9722_v4, %v683_v5  ;;  %v765_v23 = vadd.f32 %v9729_v6, %v744_v3 }
 0x306   : > { %5502 = vst.msk [vmem:[#allocation4 + $0x160] sm:$0xff] %vm254_vm0, %v13352_v44  ;;  %5504 = vst.msk [vmem:[#allocation4 + $0x170] sm:$0xff] %vm254_vm0, %v13352_v44 }
 0x307   : > { %5503 = vst.msk [vmem:[#allocation4 + $0x168] sm:$0xf] %vm823_vm1, %v13352_v44  ;;  %5505 = vst.msk [vmem:[#allocation4 + $0x178] sm:$0xf] %vm823_vm1, %v13352_v44  ;;  %v764_v5 = vadd.f32 %v9729_v6, %v743_v42 }
 0x308   : > { %5477 = vst.msk [vmem:[#allocation4 + $0x98] sm:$0xf] %vm823_vm1, %v13352_v44  ;;  %5927 = vst.msk [vmem:[#allocation4 + $0xa8] sm:$0xf] %vm823_vm1, %v13428_v63  ;;  %3930 = vrot.lane.b32.xlu0 %v9809_v50, %s8594_s13 }
 0x309   : > { %5476 = vst.msk [vmem:[#allocation4 + $0x90] sm:$0xff] %vm254_vm0, %v13352_v44  ;;  %5926 = vst.msk [vmem:[#allocation4 + $0xa0] sm:$0xff] %vm254_vm0, %v13428_v63  ;;  %3356 = vrot.lane.b32.xlu1 %v9816_v27, %s8593_s12  ;;  %v2297_v53 = vpop.permute.xlu1 %2296 }
 0x30a   : > { %5928 = vst.msk [vmem:[#allocation4 + $0xb0] sm:$0xff] %vm254_vm0, %v13428_v63  ;;  %5950 = vst.msk [vmem:[#allocation4 + $0x160] sm:$0xff] %vm254_vm0, %v13428_v63  ;;  %v2107_v44 = vpop.permute.xlu0 %2106  ;;  %v10144_v41 = vld [vmem:[#allocation4 + $0xe2] sm:$0xff] }
 0x30b   : > { %5929 = vst.msk [vmem:[#allocation4 + $0xb8] sm:$0xf] %vm823_vm1, %v13428_v63  ;;  %5951 = vst.msk [vmem:[#allocation4 + $0x168] sm:$0xf] %vm823_vm1, %v13428_v63  ;;  %v10146_v37 = vld [vmem:[#allocation4 + $0xe1] sm:$0xff]  ;;  %v10155_v50 = vld [vmem:[#allocation4 + $0xd0] sm:$0xff] }
 0x30c   : > { %5952 = vst.msk [vmem:[#allocation4 + $0x170] sm:$0xff] %vm254_vm0, %v13428_v63  ;;  %6436 = vst.msk [vmem:[#allocation4 + $0xa0] sm:$0xff] %vm254_vm0, %v13428_v63  ;;  %v10148_v43 = vld [vmem:[#allocation4 + $0xe0] sm:$0xff]  ;;  %3450 = vrot.lane.b32.xlu0 %v9818_v54, %s8595_s27  ;;  %v10157_v3 = vld [vmem:[#allocation4 + $0xd2] sm:$0xff] }
 0x30d   : > { %5953 = vst.msk [vmem:[#allocation4 + $0x178] sm:$0xf] %vm823_vm1, %v13428_v63  ;;  %6437 = vst.msk [vmem:[#allocation4 + $0xa8] sm:$0xf] %vm823_vm1, %v13428_v63  ;;  %3546 = vrot.lane.b32.xlu1 %v9812_v60, %s8596_s28  ;;  %v2393_v61 = vpop.permute.xlu1 %2392 }
 0x30e   : > { %6438 = vst.msk [vmem:[#allocation4 + $0xb0] sm:$0xff] %vm254_vm0, %v13428_v63  ;;  %6460 = vst.msk [vmem:[#allocation4 + $0x160] sm:$0xff] %vm254_vm0, %v13428_v63 }
 0x30f   : > { %6439 = vst.msk [vmem:[#allocation4 + $0xb8] sm:$0xf] %vm823_vm1, %v13428_v63  ;;  %6461 = vst.msk [vmem:[#allocation4 + $0x168] sm:$0xf] %vm823_vm1, %v13428_v63 }
 0x310   : > { %6462 = vst.msk [vmem:[#allocation4 + $0x170] sm:$0xff] %vm254_vm0, %v13428_v63  ;;  %781 = vst.msk [vmem:[#allocation3 + $0x38] sm:$0xff] %vm254_vm0, %v765_v23  ;;  %v10173_v60 = vld [vmem:[#allocation4 + $0x90] sm:$0xff]  ;;  %2594 = vrot.lane.b32.xlu0 %v9972_v22, %s8590_s9 }
 0x311   : > { %6463 = vst.msk [vmem:[#allocation4 + $0x178] sm:$0xf] %vm823_vm1, %v13428_v63  ;;  %3159 = vst.msk [vmem:[#allocation4 + $0xe8] sm:$0xf] %vm823_vm1, %v13428_v63  ;;  %v10175_v42 = vld [vmem:[#allocation4 + $0x91] sm:$0xff]  ;;  %3642 = vrot.lane.b32.xlu1 %v9816_v27, %s8597_s30 }
 0x312   : > { %2152 = vst.msk [vmem:[#allocation5 + $0x10] sm:$0xff] %vm1000_vm2, %v2107_v44  ;;  %v10161_v44 = vld [vmem:[#allocation4 + $0xd1] sm:$0xff]  ;;  %13441 = vst [vmem:[#allocation39_spill] sm:$0xff] %v10173_v60 }
 0x313   : > { %780 = vst.msk [vmem:[#allocation3 + $0x30] sm:$0xff] %vm254_vm0, %v764_v5  ;;  %2064 = vst.msk [vmem:[#allocation5 + $0x50] sm:$0xff] %vm254_vm0, %v10148_v43  ;;  %v10177_v23 = vld [vmem:[#allocation4 + $0x92] sm:$0xff]  ;;  %v2203_v5 = vpop.permute.xlu0 %2202 }
 0x314   : > { %3158 = vst.msk [vmem:[#allocation4 + $0xe0] sm:$0xff] %vm254_vm0, %v13428_v63  ;;  %2063 = vst.msk [vmem:[#allocation5 + $0x48] sm:$0xff] %vm254_vm0, %v10155_v50  ;;  %2690 = vrot.lane.b32.xlu0 %v9974_v62, %s8592_s11 }
 0x315   : > { %3157 = vst.msk [vmem:[#allocation4 + $0xd8] sm:$0xf] %vm823_vm1, %v13428_v63  ;;  %13442 = vst [vmem:[#allocation40_spill] sm:$0xff] %v10175_v42  ;;  %2308 = vrot.lane.b32.xlu1 %v9972_v22, %s8595_s27 }
 0x316   : > { %3156 = vst.msk [vmem:[#allocation4 + $0xd0] sm:$0xff] %vm254_vm0, %v13428_v63  ;;  %13443 = vst [vmem:[#allocation41_spill] sm:$0xff] %v10177_v23  ;;  %v2489_v23 = vpop.permute.xlu1 %2488 }
 0x317   : > { %5924 = vst.msk [vmem:[#allocation4 + $0x90] sm:$0xff] %vm254_vm0, %v13428_v63  ;;  %v10188_v60 = vld [vmem:[#allocation3 + $0x38] sm:$0xff]  ;;  %v2583_v42 = vpop.permute.xlu0 %2582 }
 0x318   : > { %5925 = vst.msk [vmem:[#allocation4 + $0x98] sm:$0xf] %vm823_vm1, %v13428_v63  ;;  %13444 = vst [vmem:[#allocation42_spill] sm:$0xff] %v10188_v60  ;;  %v3121_v30 = vmax.f32 %v10188_v60, 0.0  ;;  %2786 = vrot.lane.b32.xlu0 %v9970_v24, %s8594_s13 }
 0x319   : > { %2248 = vst.msk [vmem:[#allocation5 + $0x10] sm:$0xff] %vm1097_vm3, %v2203_v5  ;;  %2404 = vrot.lane.b32.xlu1 %v9974_v62, %s8596_s28 }
 0x31a   : > { %v10191_v26 = vld [vmem:[#allocation3 + $0x30] sm:$0xff]  ;;  %3185 = vst.msk [vmem:[#allocation4 + $0x81] sm:$0xff] %vm254_vm0, %v3121_v30  ;;  %v2105_v20 = vpop.permute.xlu1 %2104 }
 0x31b   : > { %13445 = vst [vmem:[#allocation43_spill] sm:$0xff] %v10191_v26  ;;  %v13369_v52 = vmax.f32 %v10191_v26, 0.0  ;;  %v2679_v15 = vpop.permute.xlu0 %2678  ;;  %2151 = vst.msk [vmem:[#allocation5 + $0x8] sm:$0xff] %vm1000_vm2, %v2105_v20 }
 0x31c   : > { %2306 = vrot.lane.b32.xlu0 %v9986_v17, %s8595_s27  ;;  %v8195_v62 = vpop.f32.mrb[26].mxu0 }
 0x31d   : > { %3184 = vst.msk [vmem:[#allocation4 + $0x71] sm:$0xff] %vm254_vm0, %v13369_v52  ;;  %2500 = vrot.lane.b32.xlu1 %v9970_v24, %s8597_s30  ;;  %v1932_v24 = vmul.f32 %v8195_v62, %v9756_v34  ;;  %v1887_v26 = vpop.f32.mrb[27].mxu0 }
 0x31e   : > { %v10202_v27 = vld [vmem:[#allocation4 + $0x90] sm:$0xff]  ;;  %v2201_v52 = vpop.permute.xlu1 %2200 }
 0x31f   : > { %13446 = vst [vmem:[#allocation44_spill] sm:$0xff] %v10202_v27  ;;  %v10204_v5 = vld [vmem:[#allocation4 + $0x91] sm:$0xff]  ;;  %v2775_v22 = vpop.permute.xlu0 %2774  ;;  %2247 = vst.msk [vmem:[#allocation5 + $0x8] sm:$0xff] %vm1097_vm3, %v2201_v52 }
 0x320   : > { %13447 = vst [vmem:[#allocation45_spill] sm:$0xff] %v10204_v5  ;;  %v10206_v60 = vld [vmem:[#allocation4 + $0x92] sm:$0xff]  ;;  %2343 = vst.msk [vmem:[#allocation5 + $0x8] sm:$0xff] %vm1194_vm4, %v2297_v53  ;;  %2402 = vrot.lane.b32.xlu0 %v9988_v35, %s8596_s28 }
 0x321   : > { %13448 = vst [vmem:[#allocation46_spill] sm:$0xff] %v10206_v60  ;;  %6435 = vst.msk [vmem:[#allocation4 + $0x98] sm:$0xf] %vm823_vm1, %v13428_v63  ;;  %v10228_v60 = vld [vmem:[#allocation4 + $0x82] sm:$0xff]  ;;  %2116 = vrot.lane.b32.xlu1 %v9988_v35, %s8591_s10 }
 0x322   : > { %6434 = vst.msk [vmem:[#allocation4 + $0x90] sm:$0xff] %vm254_vm0, %v13428_v63  ;;  %v10235_v53 = vld [vmem:[#allocation4 + $0x81] sm:$0xff] }
 0x323   : > { %6471 = vst.msk [vmem:[#allocation4 + $0x92] sm:$0xff] %vm254_vm0, %v3121_v30  ;;  %v10226_v30 = vld [vmem:[#allocation4 + $0x80] sm:$0xff]  ;;  %13449 = vst [vmem:[#allocation47_spill] sm:$0xff] %v10235_v53  ;;  %v2295_v27 = vpop.permute.xlu0 %2294  ;;  %v13463_v53 = vmov -3.4028235e+38  }
 0x324   : > { %v10224_v20 = vld [vmem:[#allocation4 + $0x70] sm:$0xff]  ;;  %2439 = vst.msk [vmem:[#allocation5 + $0x8] sm:$0xff] %vm1291_vm5, %v2393_v61  ;;  %v1931_v61 = vmul.f32 %v9756_v34, %v1887_v26  ;;  %2498 = vrot.lane.b32.xlu0 %v9978_v57, %s8597_s30 }
 0x325   : > { %v10231_v5 = vld [vmem:[#allocation4 + $0x71] sm:$0xff]  ;;  %2535 = vst.msk [vmem:[#allocation5 + $0x8] sm:$0xff] %vm1388_vm6, %v2489_v23  ;;  %v1953_v23 = vadd.f32 %v9761_v1, %v1932_v24  ;;  %2212 = vrot.lane.b32.xlu1 %v9978_v57, %s8593_s12 }
 0x326   : > { %v10233_v52 = vld [vmem:[#allocation4 + $0x72] sm:$0xff]  ;;  %4287 = vst.msk [vmem:[#allocation4 + $0x88] sm:$0xf] %vm823_vm1, %v13428_v63  ;;  %v1952_v62 = vadd.f32 %v9761_v1, %v1931_v61 }
 0x327   : > { %4284 = vst.msk [vmem:[#allocation4 + $0x70] sm:$0xff] %vm254_vm0, %v13428_v63  ;;  %4286 = vst.msk [vmem:[#allocation4 + $0x80] sm:$0xff] %vm254_vm0, %v13428_v63  ;;  %v2391_v16 = vpop.permute.xlu0 %2390  ;;  %v1969_v40 = vmax.f32 %v1953_v23, 0.0 }
 0x328   : > { %4285 = vst.msk [vmem:[#allocation4 + $0x78] sm:$0xf] %vm823_vm1, %v13428_v63  ;;  %v1968_v31 = vmax.f32 %v1952_v62, 0.0  ;;  %3266 = vrot.lane.b32.xlu0 %v9886_v51, %s8591_s10 }
 0x329   : > { %2342 = vst.msk [vmem:[#allocation5] sm:$0xff] %vm1194_vm4, %v2295_v27  ;;  %2592 = vrot.lane.b32.xlu1 %v9986_v17, %s8590_s9 }
 0x32a   : > { %2438 = vst.msk [vmem:[#allocation5] sm:$0xff] %vm1291_vm5, %v2391_v16  ;;  %v8150_v16 = vpop.f32.mrb[8].mxu1 }
 0x32b   : > { %2033 = vst.msk [vmem:[#allocation4 + $0x101] sm:$0xff] %vm254_vm0, %v1969_v40  ;;  %2032 = vst.msk [vmem:[#allocation4 + $0xf1] sm:$0xff] %vm254_vm0, %v1968_v31  ;;  %v2487_v26 = vpop.permute.xlu0 %2486  ;;  %v2301_v40 = vpop.permute.xlu1 %2300  ;;  %v746_v31 = vmul.f32 %v8150_v16, %v9722_v4 }
 0x32c   : > { %2534 = vst.msk [vmem:[#allocation5] sm:$0xff] %vm1388_vm6, %v2487_v26  ;;  %3362 = vrot.lane.b32.xlu0 %v9888_v2, %s8593_s12  ;;  %v693_v26 = vpop.f32.mrb[9].mxu1 }
 0x32d   : > { %2630 = vst.msk [vmem:[#allocation5] sm:$0xff] %vm1486_vm7, %v2583_v42  ;;  %2688 = vrot.lane.b32.xlu1 %v9988_v35, %s8592_s11  ;;  %v767_v23 = vadd.f32 %v9729_v6, %v746_v31  ;;  %v745_v16 = vmul.f32 %v9722_v4, %v693_v26 }
 0x32e   : > { %2726 = vst.msk [vmem:[#allocation5] sm:$0xff] %vm1583_vm8, %v2679_v15 }
 0x32f   : > { %2822 = vst.msk [vmem:[#allocation5] sm:$0xff] %vm1680_vm9, %v2775_v22  ;;  %v2111_v27 = vpop.permute.xlu0 %2110  ;;  %v2397_v62 = vpop.permute.xlu1 %2396 }
 0x330   : > { %2154 = vst.msk [vmem:[#allocation5 + $0x20] sm:$0xff] %vm1000_vm2, %v2111_v27  ;;  %3648 = vrot.lane.b32.xlu0 %v9888_v2, %s8597_s30 }
 0x331   : > { %783 = vst.msk [vmem:[#allocation3 + $0x48] sm:$0xff] %vm254_vm0, %v767_v23  ;;  %2784 = vrot.lane.b32.xlu1 %v9978_v57, %s8594_s13 }
 0x332   : > { %v10272_v24 = vld [vmem:[#allocation4 + $0x100] sm:$0xff]  ;;  %v10288_v15 = vld [vmem:[#allocation4 + $0xf0] sm:$0xff] }
 0x333   : > { %v10274_v42 = vld [vmem:[#allocation4 + $0x101] sm:$0xff]  ;;  %2066 = vst.msk [vmem:[#allocation5 + $0x60] sm:$0xff] %vm254_vm0, %v10272_v24  ;;  %v10290_v17 = vld [vmem:[#allocation4 + $0xf1] sm:$0xff]  ;;  %2065 = vst.msk [vmem:[#allocation5 + $0x58] sm:$0xff] %vm254_vm0, %v10288_v15  ;;  %v2207_v35 = vpop.permute.xlu0 %2206  ;;  %v2493_v23 = vpop.permute.xlu1 %2492 }
 0x334   : > { %v10276_v61 = vld [vmem:[#allocation4 + $0x102] sm:$0xff]  ;;  %v10292_v22 = vld [vmem:[#allocation4 + $0xf2] sm:$0xff]  ;;  %2250 = vst.msk [vmem:[#allocation5 + $0x20] sm:$0xff] %vm1097_vm3, %v2207_v35  ;;  %v766_v35 = vadd.f32 %v9729_v6, %v745_v16  ;;  %3934 = vrot.lane.b32.xlu0 %v9888_v2, %s8594_s13 }
 0x335   : > { %3162 = vst.msk [vmem:[#allocation4 + $0x100] sm:$0xff] %vm254_vm0, %v13428_v63  ;;  %3160 = vst.msk [vmem:[#allocation4 + $0xf0] sm:$0xff] %vm254_vm0, %v13428_v63  ;;  %3456 = vrot.lane.b32.xlu1 %v9890_v18, %s8595_s27  ;;  %v4011_v2 = vld [vmem:[%s13332_s2 + $0xa8] sm:$0xff] }
 0x336   : > { %3163 = vst.msk [vmem:[#allocation4 + $0x108] sm:$0xf] %vm823_vm1, %v13428_v63  ;;  %3161 = vst.msk [vmem:[#allocation4 + $0xf8] sm:$0xf] %vm823_vm1, %v13428_v63  ;;  %v2838_v27 = vld [vmem:[#allocation5] sm:$0xff] }
 0x337   : > { %8220 = vmatprep.mubr.msk.f32.mxu1 %vm1722_vm10, %v2838_v27  ;;  %3210 = vst.msk [vmem:[#allocation5] sm:$0xff] %vm254_vm0, %v9839_v13  ;;  %v10311_v31 = vpop.permute.xlu0 %2586  ;;  %782 = vst.msk [vmem:[#allocation3 + $0x40] sm:$0xff] %vm254_vm0, %v766_v35  ;;  %v2109_v57 = vpop.permute.xlu1 %2108  ;;  %v4012_v35 = vld [vmem:[%s13332_s2 + $0xb0] sm:$0xff] }
 0x338   : > { %3306 = vst.msk [vmem:[#allocation5] sm:$0xff] %vm1000_vm2, %v10032_v39  ;;  %v10323_v4 = vld [vmem:[#allocation3 + $0x48] sm:$0xff]  ;;  %2153 = vst.msk [vmem:[#allocation5 + $0x18] sm:$0xff] %vm1000_vm2, %v2109_v57  ;;  %3454 = vrot.lane.b32.xlu0 %v9892_v36, %s8595_s27  ;;  %v4013_v57 = vld [vmem:[%s13332_s2 + $0xb8] sm:$0xff] }
 0x339   : > { %3402 = vst.msk [vmem:[#allocation5] sm:$0xff] %vm1097_vm3, %v10056_v47  ;;  %13450 = vst [vmem:[#allocation48_spill] sm:$0xff] %v10323_v4  ;;  %v13377_v6 = vmax.f32 %v10323_v4, 0.0  ;;  %v4010_v47 = vld [vmem:[%s13332_s2 + $0xa0] sm:$0xff]  ;;  %3552 = vrot.lane.b32.xlu1 %v9886_v51, %s8596_s28 }
 0x33a   : > { %v8402_v39 = vpack.c.bf16 %v4011_v2, %v4010_v47  ;;  %v8406_v2 = vpack.c.bf16 %v4013_v57, %v4012_v35 }
 0x33b   : > { %v10325_v13 = vpop.permute.xlu0 %2682  ;;  %3187 = vst.msk [vmem:[#allocation4 + $0xe1] sm:$0xff] %vm254_vm0, %v13377_v6  ;;  %v2205_v16 = vpop.permute.xlu1 %2204 }
 0x33c   : > { %8403 = vmatprep.subr.bf16.mxu0 %v8402_v39  ;;  %2249 = vst.msk [vmem:[#allocation5 + $0x18] sm:$0xff] %vm1097_vm3, %v2205_v16  ;;  %3740 = vrot.lane.b32.xlu0 %v9892_v36, %s8590_s9 }
 0x33d   : > { %8405 = vmatpush3.bf16.msra.mxu0 %v8402_v39  ;;  %2345 = vst.msk [vmem:[#allocation5 + $0x18] sm:$0xff] %vm1194_vm4, %v2301_v40  ;;  %3742 = vrot.lane.b32.xlu1 %v9890_v18, %s8590_s9  ;;  %v8198_v39 = vpop.f32.mrb[28].mxu0 }
 0x33e   : > { %v10345_v27 = vld [vmem:[#allocation3 + $0x40] sm:$0xff]  ;;  %2441 = vst.msk [vmem:[#allocation5 + $0x18] sm:$0xff] %vm1291_vm5, %v2397_v62  ;;  %v1934_v4 = vmul.f32 %v8198_v39, %v9756_v34  ;;  %8407 = vmatprep.subr.bf16.mxu0 %v8406_v2  ;;  %v1897_v40 = vpop.f32.mrb[29].mxu0 }
 0x33f   : > { %v10342_v26 = vpop.permute.xlu0 %2778  ;;  %13451 = vst [vmem:[#allocation49_spill] sm:$0xff] %v10345_v27  ;;  %v13380_v47 = vmax.f32 %v10345_v27, 0.0  ;;  %2537 = vst.msk [vmem:[#allocation5 + $0x18] sm:$0xff] %vm1388_vm6, %v2493_v23  ;;  %v2585_v6 = vpop.permute.xlu1 %2584  ;;  %v4014_v62 = vld [vmem:[%s13332_s2 + $0xc0] sm:$0xff]  ;;  %v4015_v23 = vld [vmem:[%s13332_s2 + $0xc8] sm:$0xff] }
 0x340   : > { %2631 = vst.msk [vmem:[#allocation5 + $0x8] sm:$0xff] %vm1486_vm7, %v2585_v6  ;;  %3550 = vrot.lane.b32.xlu0 %v9894_v58, %s8596_s28  ;;  %v1955_v35 = vadd.f32 %v9761_v1, %v1934_v4  ;;  %v1933_v6 = vmul.f32 %v9756_v34, %v1897_v40  ;;  %v8410_v57 = vpack.c.bf16 %v4015_v23, %v4014_v62  ;;  %v4017_v4 = vld [vmem:[%s13332_s2 + $0xd8] sm:$0xff] }
 0x341   : > { %3186 = vst.msk [vmem:[#allocation4 + $0xd1] sm:$0xff] %vm254_vm0, %v13380_v47  ;;  %8409 = vmatpush3.bf16.msra.mxu0 %v8406_v2  ;;  %3838 = vrot.lane.b32.xlu1 %v9886_v51, %s8592_s11  ;;  %v4016_v51 = vld [vmem:[%s13332_s2 + $0xd0] sm:$0xff] }
 0x342   : > { %v1954_v47 = vadd.f32 %v9761_v1, %v1933_v6  ;;  %v10380_v27 = vld [vmem:[#allocation4 + $0xe1] sm:$0xff]  ;;  %8411 = vmatprep.subr.bf16.mxu0 %v8410_v57  ;;  %v8414_v40 = vpack.c.bf16 %v4017_v4, %v4016_v51 }
 0x343   : > { %v2299_v16 = vpop.permute.xlu0 %2298  ;;  %v2681_v39 = vpop.permute.xlu1 %2680  ;;  %v10384_v12 = vld [vmem:[#allocation4 + $0xe2] sm:$0xff] }
 0x344   : > { %2344 = vst.msk [vmem:[#allocation5 + $0x10] sm:$0xff] %vm1194_vm4, %v2299_v16  ;;  %v1971_v16 = vmax.f32 %v1955_v35, 0.0  ;;  %3646 = vrot.lane.b32.xlu0 %v9898_v49, %s8597_s30  ;;  %v1970_v1 = vmax.f32 %v1954_v47, 0.0  ;;  %v4018_v47 = vld [vmem:[%s13332_s2 + $0xe0] sm:$0xff] }
 0x345   : > { %2727 = vst.msk [vmem:[#allocation5 + $0x8] sm:$0xff] %vm1583_vm8, %v2681_v39  ;;  %8413 = vmatpush3.bf16.msra.mxu0 %v8410_v57  ;;  %3264 = vrot.lane.b32.xlu1 %v9894_v58, %s8591_s10 }
 0x346   : > { %2035 = vst.msk [vmem:[#allocation4 + $0x121] sm:$0xff] %vm254_vm0, %v1971_v16  ;;  %2034 = vst.msk [vmem:[#allocation4 + $0x111] sm:$0xff] %vm254_vm0, %v1970_v1  ;;  %8415 = vmatprep.subr.bf16.mxu0 %v8414_v40 }
 0x347   : > { %v2395_v2 = vpop.permute.xlu0 %2394  ;;  %4299 = vst.msk [vmem:[#allocation4 + $0xe8] sm:$0xf] %vm823_vm1, %v13428_v63  ;;  %v2777_v23 = vpop.permute.xlu1 %2776 }
 0x348   : > { %2440 = vst.msk [vmem:[#allocation5 + $0x10] sm:$0xff] %vm1291_vm5, %v2395_v2  ;;  %v10402_v35 = vld [vmem:[#allocation4 + $0xd0] sm:$0xff]  ;;  %2122 = vrot.lane.b32.xlu0 %v10146_v37, %s8591_s10  ;;  %v10417_v2 = vld [vmem:[#allocation4 + $0xe0] sm:$0xff] }
 0x349   : > { %2823 = vst.msk [vmem:[#allocation5 + $0x8] sm:$0xff] %vm1680_vm9, %v2777_v23  ;;  %8417 = vmatpush3.bf16.msra.mxu0 %v8414_v40  ;;  %v10404_v6 = vld [vmem:[#allocation4 + $0xd1] sm:$0xff]  ;;  %3360 = vrot.lane.b32.xlu1 %v9898_v49, %s8593_s12 }
 0x34a   : > { %v10406_v57 = vld [vmem:[#allocation4 + $0xd2] sm:$0xff]  ;;  %8260 = vmatprep.subr.mxu0 %v4018_v47  ;;  %4298 = vst.msk [vmem:[#allocation4 + $0xe0] sm:$0xff] %vm254_vm0, %v13428_v63 }
 0x34b   : > { %v2491_v62 = vpop.permute.xlu0 %2490  ;;  %4297 = vst.msk [vmem:[#allocation4 + $0xd8] sm:$0xf] %vm823_vm1, %v13428_v63  ;;  %v10430_v51 = vpop.permute.xlu1 %2304 }
 0x34c   : > { %2536 = vst.msk [vmem:[#allocation5 + $0x10] sm:$0xff] %vm1388_vm6, %v2491_v62  ;;  %v8515_v62 = vld [vmem:[%s13333_s3 + $0x5] ss:$0 sm:$0xff]  ;;  %2218 = vrot.lane.b32.xlu0 %v10144_v41, %s8593_s12 }
 0x34d   : > { %2632 = vst.msk [vmem:[#allocation5 + $0x10] sm:$0xff] %vm1486_vm7, %v10311_v31  ;;  %v8201_v31 = vpop.f32.mrb[30].mxu0  ;;  %v10433_v1 = vld [vmem:[#allocation4 + $0x121] sm:$0xff]  ;;  %8261 = vmatpush3.msra.mxu0 %v4018_v47  ;;  %3836 = vrot.lane.b32.xlu1 %v9894_v58, %s8592_s11  ;;  %v10455_v47 = vld [vmem:[#allocation4 + $0x110] sm:$0xff] }
 0x34e   : > { %4296 = vst.msk [vmem:[#allocation4 + $0xd0] sm:$0xff] %vm254_vm0, %v13428_v63  ;;  %v1936_v39 = vmul.f32 %v8201_v31, %v9756_v34  ;;  %v1907_v4 = vpop.f32.mrb[31].mxu0  ;;  %v10435_v40 = vld [vmem:[#allocation4 + $0x122] sm:$0xff]  ;;  %v10457_v31 = vld [vmem:[#allocation4 + $0x112] sm:$0xff]  ;;  %2067 = vst.msk [vmem:[#allocation5 + $0x68] sm:$0xff] %vm254_vm0, %v10455_v47 }
 0x34f   : > { %2728 = vst.msk [vmem:[#allocation5 + $0x10] sm:$0xff] %vm1583_vm8, %v10325_v13  ;;  %v2115_v16 = vpop.permute.xlu0 %2114  ;;  %v10437_v13 = vld [vmem:[#allocation4 + $0x120] sm:$0xff]  ;;  %v2401_v58 = vpop.permute.xlu1 %2400 }
 0x350   : > { %2824 = vst.msk [vmem:[#allocation5 + $0x10] sm:$0xff] %vm1680_vm9, %v10342_v26  ;;  %v1957_v26 = vadd.f32 %v8515_v62, %v1936_v39  ;;  %v8516_v34 = vld [vmem:[%s13333_s3 + $0x4] ss:$0 sm:$0xff]  ;;  %v10459_v39 = vld [vmem:[#allocation4 + $0x111] sm:$0xff]  ;;  %v2839_v46 = vld [vmem:[#allocation5 + $0x8] sm:$0xff]  ;;  %2598 = vrot.lane.b32.xlu0 %v10148_v43, %s8590_s9 }
 0x351   : > { %2156 = vst.msk [vmem:[#allocation5 + $0x30] sm:$0xff] %vm1000_vm2, %v2115_v16  ;;  %v1935_v23 = vmul.f32 %v8516_v34, %v1907_v4  ;;  %v8153_v16 = vpop.f32.mrb[10].mxu1  ;;  %8221 = vmatmul.mubr.msk.f32.vlgmr.msra.gmra.mrb[16].mxu1 %vm1722_vm10, %v2839_v46  ;;  %3932 = vrot.lane.b32.xlu1 %v9898_v49, %s8594_s13 }
 0x352   : > { %2068 = vst.msk [vmem:[#allocation5 + $0x70] sm:$0xff] %vm254_vm0, %v10437_v13  ;;  %3166 = vst.msk [vmem:[#allocation4 + $0x120] sm:$0xff] %vm254_vm0, %v13428_v63  ;;  %v1973_v4 = vmax.f32 %v1957_v26, 0.0  ;;  %v748_v26 = vmul.f32 %v10470_v28, %v8153_v16  ;;  %v703_v49 = vpop.f32.mrb[11].mxu1 }
 0x353   : > { %3167 = vst.msk [vmem:[#allocation4 + $0x128] sm:$0xf] %vm823_vm1, %v13428_v63  ;;  %v1956_v34 = vadd.f32 %v8515_v62, %v1935_v23  ;;  %v2211_v56 = vpop.permute.xlu0 %2210  ;;  %3165 = vst.msk [vmem:[#allocation4 + $0x118] sm:$0xf] %vm823_vm1, %v13428_v63  ;;  %v10485_v23 = vld [vmem:[%s13333_s3 + $0x3] ss:$0 sm:$0xff]  ;;  %v2497_v16 = vpop.permute.xlu1 %2496 }
 0x354   : > { %3164 = vst.msk [vmem:[#allocation4 + $0x110] sm:$0xff] %vm254_vm0, %v13428_v63  ;;  %3211 = vst.msk [vmem:[#allocation5 + $0x8] sm:$0xff] %vm254_vm0, %v9818_v54  ;;  %2694 = vrot.lane.b32.xlu0 %v10146_v37, %s8592_s11 }
 0x355   : > { %2252 = vst.msk [vmem:[#allocation5 + $0x30] sm:$0xff] %vm1097_vm3, %v2211_v56  ;;  %v1972_v62 = vmax.f32 %v1956_v34, 0.0  ;;  %v769_v56 = vadd.f32 %v10485_v23, %v748_v26  ;;  %2312 = vrot.lane.b32.xlu1 %v10148_v43, %s8595_s27  ;;  %v8156_v34 = vpop.f32.mrb[12].mxu1 }
 0x356   : > { %2037 = vst.msk [vmem:[#allocation4 + $0x141] sm:$0xff] %vm254_vm0, %v1973_v4  ;;  %v747_v4 = vmul.f32 %v10470_v28, %v703_v49  ;;  %v750_v11 = vmul.f32 %v10470_v28, %v8156_v34 }
 0x357   : > { %v2840_v46 = vld [vmem:[#allocation5 + $0x10] sm:$0xff]  ;;  %2036 = vst.msk [vmem:[#allocation4 + $0x131] sm:$0xff] %vm254_vm0, %v1972_v62  ;;  %v10489_v54 = vpop.permute.xlu0 %2590  ;;  %785 = vst.msk [vmem:[#allocation3 + $0x58] sm:$0xff] %vm254_vm0, %v769_v56  ;;  %v2113_v62 = vpop.permute.xlu1 %2112 }
 0x358   : > { %8223 = vmatprep.mubr.msk.f32.mxu1 %vm1722_vm10, %v2840_v46  ;;  %3212 = vst.msk [vmem:[#allocation5 + $0x10] sm:$0xff] %vm254_vm0, %v9807_v25  ;;  %v768_v46 = vadd.f32 %v10485_v23, %v747_v4  ;;  %2790 = vrot.lane.b32.xlu0 %v10144_v41, %s8594_s13  ;;  %v771_v43 = vadd.f32 %v10485_v23, %v750_v11 }
 0x359   : > { %2155 = vst.msk [vmem:[#allocation5 + $0x28] sm:$0xff] %vm1000_vm2, %v2113_v62  ;;  %2408 = vrot.lane.b32.xlu1 %v10146_v37, %s8596_s28 }
 0x35a   : > { %784 = vst.msk [vmem:[#allocation3 + $0x50] sm:$0xff] %vm254_vm0, %v768_v46  ;;  %787 = vst.msk [vmem:[#allocation3 + $0x68] sm:$0xff] %vm254_vm0, %v771_v43 }
 0x35b   : > { %v10500_v26 = vpop.permute.xlu0 %2686  ;;  %v2209_v62 = vpop.permute.xlu1 %2208 }
 0x35c   : > { %2251 = vst.msk [vmem:[#allocation5 + $0x28] sm:$0xff] %vm1097_vm3, %v2209_v62  ;;  %2310 = vrot.lane.b32.xlu0 %v10155_v50, %s8595_s27 }
 0x35d   : > { %v10504_v25 = vld [vmem:[#allocation4 + $0x142] sm:$0xff]  ;;  %2347 = vst.msk [vmem:[#allocation5 + $0x28] sm:$0xff] %vm1194_vm4, %v10430_v51  ;;  %2504 = vrot.lane.b32.xlu1 %v10144_v41, %s8597_s30 }
 0x35e   : > { %v10507_v56 = vld [vmem:[#allocation4 + $0x140] sm:$0xff]  ;;  %v10521_v49 = vld [vmem:[#allocation3 + $0x58] sm:$0xff]  ;;  %v10523_v4 = vld [vmem:[#allocation4 + $0x130] sm:$0xff]  ;;  %2443 = vst.msk [vmem:[#allocation5 + $0x28] sm:$0xff] %vm1291_vm5, %v2401_v58 }
 0x35f   : > { %v10509_v7 = vld [vmem:[#allocation4 + $0x141] sm:$0xff]  ;;  %13452 = vst [vmem:[#allocation50_spill] sm:$0xff] %v10521_v49  ;;  %v2783_v34 = vpop.permute.xlu0 %2782  ;;  %v13383_v32 = vmax.f32 %v10521_v49, 0.0  ;;  %v10527_v37 = vld [vmem:[#allocation4 + $0x132] sm:$0xff]  ;;  %2069 = vst.msk [vmem:[#allocation5 + $0x78] sm:$0xff] %vm254_vm0, %v10523_v4  ;;  %v2589_v43 = vpop.permute.xlu1 %2588 }
 0x360   : > { %3171 = vst.msk [vmem:[#allocation4 + $0x148] sm:$0xf] %vm823_vm1, %v13428_v63  ;;  %v10531_v46 = vld [vmem:[#allocation4 + $0x131] sm:$0xff]  ;;  %2406 = vrot.lane.b32.xlu0 %v10161_v44, %s8596_s28 }
 0x361   : > { %3170 = vst.msk [vmem:[#allocation4 + $0x140] sm:$0xff] %vm254_vm0, %v13428_v63  ;;  %3168 = vst.msk [vmem:[#allocation4 + $0x130] sm:$0xff] %vm254_vm0, %v13428_v63  ;;  %v10551_v51 = vld [vmem:[#allocation3 + $0x50] sm:$0xff]  ;;  %2120 = vrot.lane.b32.xlu1 %v10161_v44, %s8591_s10  ;;  %v10558_v50 = vld [vmem:[#allocation3 + $0x68] sm:$0xff] }
 0x362   : > { %3169 = vst.msk [vmem:[#allocation4 + $0x138] sm:$0xf] %vm823_vm1, %v13428_v63  ;;  %13453 = vst [vmem:[#allocation51_spill] sm:$0xff] %v10551_v51  ;;  %v13385_v41 = vmax.f32 %v10551_v51, 0.0  ;;  %v13384_v62 = vmax.f32 %v10558_v50, 0.0 }
 0x363   : > { %3189 = vst.msk [vmem:[#allocation4 + $0x101] sm:$0xff] %vm254_vm0, %v13383_v32  ;;  %v2303_v11 = vpop.permute.xlu0 %2302  ;;  %13454 = vst [vmem:[#allocation52_spill] sm:$0xff] %v10558_v50  ;;  %v10583_v32 = vld [vmem:[#allocation4 + $0x152] sm:$0xff] }
 0x364   : > { %2539 = vst.msk [vmem:[#allocation5 + $0x28] sm:$0xff] %vm1388_vm6, %v2497_v16  ;;  %v2685_v16 = vpop.permute.xlu1 %2684  ;;  %2502 = vrot.lane.b32.xlu0 %v10157_v3, %s8597_s30  ;;  %13457 = vst [vmem:[#allocation55_spill] sm:$0xff] %v10583_v32 }
 0x365   : > { %2346 = vst.msk [vmem:[#allocation5 + $0x20] sm:$0xff] %vm1194_vm4, %v2303_v11  ;;  %v10566_v11 = vld [vmem:[#allocation4 + $0xc0] sm:$0xff]  ;;  %2216 = vrot.lane.b32.xlu1 %v10157_v3, %s8593_s12 }
 0x366   : > { %2633 = vst.msk [vmem:[#allocation5 + $0x18] sm:$0xff] %vm1486_vm7, %v2589_v43 }
 0x367   : > { %v2399_v58 = vpop.permute.xlu0 %2398  ;;  %3188 = vst.msk [vmem:[#allocation4 + $0xf1] sm:$0xff] %vm254_vm0, %v13385_v41  ;;  %3191 = vst.msk [vmem:[#allocation4 + $0x121] sm:$0xff] %vm254_vm0, %v13384_v62 }
 0x368   : > { %2442 = vst.msk [vmem:[#allocation5 + $0x20] sm:$0xff] %vm1291_vm5, %v2399_v58  ;;  %v2781_v43 = vpop.permute.xlu1 %2780  ;;  %v10579_v58 = vld [vmem:[#allocation4 + $0x150] sm:$0xff]  ;;  %3270 = vrot.lane.b32.xlu0 %v10006_v0, %s8591_s10 }
 0x369   : > { %2729 = vst.msk [vmem:[#allocation5 + $0x18] sm:$0xff] %vm1583_vm8, %v2685_v16  ;;  %13455 = vst [vmem:[#allocation53_spill] sm:$0xff] %v10579_v58  ;;  %v10581_v16 = vld [vmem:[#allocation4 + $0x151] sm:$0xff]  ;;  %3460 = vrot.lane.b32.xlu1 %v10014_v33, %s8595_s27 }
 0x36a   : > { %4294 = vst.msk [vmem:[#allocation4 + $0xc0] sm:$0xff] %vm254_vm0, %v13428_v63  ;;  %13456 = vst [vmem:[#allocation54_spill] sm:$0xff] %v10581_v16  ;;  %v10597_v3 = vld [vmem:[#allocation4 + $0x101] sm:$0xff] }
 0x36b   : > { %v2495_v44 = vpop.permute.xlu0 %2494  ;;  %2825 = vst.msk [vmem:[#allocation5 + $0x18] sm:$0xff] %vm1680_vm9, %v2781_v43  ;;  %v10599_v43 = vld [vmem:[#allocation4 + $0x102] sm:$0xff] }
 0x36c   : > { %2538 = vst.msk [vmem:[#allocation5 + $0x20] sm:$0xff] %vm1388_vm6, %v2495_v44  ;;  %v713_v44 = vpop.f32.mrb[13].mxu1  ;;  %v3453_v62 = vpop.permute.xlu1 %3452  ;;  %3366 = vrot.lane.b32.xlu0 %v10016_v48, %s8593_s12 }
 0x36d   : > { %2634 = vst.msk [vmem:[#allocation5 + $0x20] sm:$0xff] %vm1486_vm7, %v10489_v54  ;;  %v749_v41 = vmul.f32 %v10470_v28, %v713_v44  ;;  %3556 = vrot.lane.b32.xlu1 %v10006_v0, %s8596_s28 }
 0x36e   : > { %4312 = vst.msk [vmem:[#allocation4 + $0x150] sm:$0xff] %vm254_vm0, %v13428_v63  ;;  %v10618_v44 = vld [vmem:[#allocation4 + $0x121] sm:$0xff]  ;;  %v10626_v0 = vld [vmem:[#allocation4 + $0xf1] sm:$0xff] }
 0x36f   : > { %4313 = vst.msk [vmem:[#allocation4 + $0x158] sm:$0xf] %vm823_vm1, %v13428_v63  ;;  %v3263_v54 = vpop.permute.xlu0 %3262  ;;  %4303 = vst.msk [vmem:[#allocation4 + $0x108] sm:$0xf] %vm823_vm1, %v13428_v63 }
 0x370   : > { %2730 = vst.msk [vmem:[#allocation5 + $0x20] sm:$0xff] %vm1583_vm8, %v10500_v26  ;;  %v770_v26 = vadd.f32 %v10485_v23, %v749_v41  ;;  %v10611_v51 = vpop.permute.xlu1 %3738  ;;  %3458 = vrot.lane.b32.xlu0 %v10008_v9, %s8595_s27  ;;  %v10628_v41 = vld [vmem:[#allocation4 + $0xf2] sm:$0xff] }
 0x371   : > { %2826 = vst.msk [vmem:[#allocation5 + $0x20] sm:$0xff] %vm1680_vm9, %v2783_v34  ;;  %3268 = vrot.lane.b32.xlu1 %v10010_v55, %s8591_s10 }
 0x372   : > { %3308 = vst.msk [vmem:[#allocation5 + $0x10] sm:$0xff] %vm1000_vm2, %v3263_v54  ;;  %v2841_v34 = vld [vmem:[#allocation5 + $0x18] sm:$0xff]  ;;  %v10620_v54 = vld [vmem:[#allocation4 + $0x122] sm:$0xff] }
 0x373   : > { %v3359_v50 = vpop.permute.xlu0 %3358  ;;  %786 = vst.msk [vmem:[#allocation3 + $0x60] sm:$0xff] %vm254_vm0, %v770_v26  ;;  %8224 = vmatmul.mubr.msk.f32.gmra.mrb[18].mxu1 %vm1722_vm10, %v2841_v34  ;;  %3213 = vst.msk [vmem:[#allocation5 + $0x18] sm:$0xff] %vm254_vm0, %v9892_v36  ;;  %v8159_v26 = vpop.f32.mrb[14].mxu1  ;;  %v10634_v34 = vld [vmem:[#allocation4 + $0x100] sm:$0xff] }
 0x374   : > { %3404 = vst.msk [vmem:[#allocation5 + $0x10] sm:$0xff] %vm1097_vm3, %v3359_v50  ;;  %v10630_v50 = vld [vmem:[#allocation4 + $0xf0] sm:$0xff]  ;;  %13459 = vst [vmem:[#allocation57_spill] sm:$0xff] %v10634_v34  ;;  %v10643_v16 = vpop.permute.xlu1 %3834  ;;  %v752_v58 = vmul.f32 %v10470_v28, %v8159_v26  ;;  %v723_v29 = vpop.f32.mrb[15].mxu1  ;;  %3744 = vrot.lane.b32.xlu0 %v10008_v9, %s8590_s9 }
 0x375   : > { %13458 = vst [vmem:[#allocation56_spill] sm:$0xff] %v10630_v50  ;;  %4307 = vst.msk [vmem:[#allocation4 + $0x128] sm:$0xf] %vm823_vm1, %v13428_v63  ;;  %v10640_v49 = vld [vmem:[#allocation4 + $0x150] sm:$0xff]  ;;  %3364 = vrot.lane.b32.xlu1 %v10012_v14, %s8593_s12 }
 0x376   : > { %4301 = vst.msk [vmem:[#allocation4 + $0xf8] sm:$0xf] %vm823_vm1, %v13428_v63  ;;  %13460 = vst [vmem:[#allocation58_spill] sm:$0xff] %v10640_v49  ;;  %v10650_v34 = vld [vmem:[#allocation4 + $0x151] sm:$0xff] }
 0x377   : > { %4300 = vst.msk [vmem:[#allocation4 + $0xf0] sm:$0xff] %vm254_vm0, %v13428_v63  ;;  %v3549_v32 = vpop.permute.xlu0 %3548  ;;  %4302 = vst.msk [vmem:[#allocation4 + $0x100] sm:$0xff] %vm254_vm0, %v13428_v63  ;;  %v10652_v50 = vld [vmem:[#allocation4 + $0x152] sm:$0xff] }
 0x378   : > { %v2842_v36 = vld [vmem:[#allocation5 + $0x20] sm:$0xff]  ;;  %13461 = vst [vmem:[#allocation59_spill] sm:$0xff] %v10650_v34  ;;  %13462 = vst [vmem:[#allocation60_spill] sm:$0xff] %v10652_v50  ;;  %v3261_v34 = vpop.permute.xlu1 %3260  ;;  %3554 = vrot.lane.b32.xlu0 %v10010_v55, %s8596_s28 }
 0x379   : > { %8226 = vmatprep.mubr.msk.f32.mxu1 %vm1722_vm10, %v2842_v36  ;;  %3214 = vst.msk [vmem:[#allocation5 + $0x20] sm:$0xff] %vm254_vm0, %v9890_v18  ;;  %5500 = vst.msk [vmem:[#allocation4 + $0x150] sm:$0xff] %vm254_vm0, %v13463_v53  ;;  %v773_v18 = vadd.f32 %v10485_v23, %v752_v58  ;;  %v751_v36 = vmul.f32 %v10470_v28, %v723_v29  ;;  %3840 = vrot.lane.b32.xlu1 %v10010_v55, %s8592_s11 }
 0x37a   : > { %5501 = vst.msk [vmem:[#allocation4 + $0x158] sm:$0xf] %vm823_vm1, %v13463_v53  ;;  %v10664_v26 = vld [vmem:[#allocation3 + $0x60] sm:$0xff] }
 0x37b   : > { %13464 = vst [vmem:[#allocation61_spill] sm:$0xff] %v10664_v26  ;;  %v3645_v50 = vpop.permute.xlu0 %3644  ;;  %v13396_v49 = vmax.f32 %v10664_v26, 0.0  ;;  %789 = vst.msk [vmem:[#allocation3 + $0x78] sm:$0xff] %vm254_vm0, %v773_v18  ;;  %v772_v53 = vadd.f32 %v10485_v23, %v751_v36 }
 0x37c   : > { %3307 = vst.msk [vmem:[#allocation5 + $0x8] sm:$0xff] %vm1000_vm2, %v3261_v34  ;;  %v3357_v28 = vpop.permute.xlu1 %3356  ;;  %2126 = vrot.lane.b32.xlu0 %v10274_v42, %s8591_s10 }
 0x37d   : > { %3190 = vst.msk [vmem:[#allocation4 + $0x111] sm:$0xff] %vm254_vm0, %v13396_v49  ;;  %788 = vst.msk [vmem:[#allocation3 + $0x70] sm:$0xff] %vm254_vm0, %v772_v53  ;;  %2316 = vrot.lane.b32.xlu1 %v10272_v24, %s8595_s27 }
 0x37e   : > { %3403 = vst.msk [vmem:[#allocation5 + $0x8] sm:$0xff] %vm1097_vm3, %v3357_v28 }
 0x37f   : > { %v3931_v29 = vpop.permute.xlu0 %3930  ;;  %3499 = vst.msk [vmem:[#allocation5 + $0x8] sm:$0xff] %vm1194_vm4, %v3453_v62 }
 0x380   : > { %v10678_v58 = vld [vmem:[#allocation4 + $0x150] sm:$0xff]  ;;  %3595 = vst.msk [vmem:[#allocation5 + $0x8] sm:$0xff] %vm1291_vm5, %v3549_v32  ;;  %v3547_v34 = vpop.permute.xlu1 %3546  ;;  %2222 = vrot.lane.b32.xlu0 %v10276_v61, %s8593_s12 }
 0x381   : > { %13465 = vst [vmem:[#allocation62_spill] sm:$0xff] %v10678_v58  ;;  %v10680_v18 = vld [vmem:[#allocation4 + $0x151] sm:$0xff]  ;;  %3691 = vst.msk [vmem:[#allocation5 + $0x8] sm:$0xff] %vm1388_vm6, %v3645_v50  ;;  %2412 = vrot.lane.b32.xlu1 %v10274_v42, %s8596_s28 }
 0x382   : > { %13466 = vst [vmem:[#allocation63_spill] sm:$0xff] %v10680_v18  ;;  %v10682_v23 = vld [vmem:[#allocation4 + $0x152] sm:$0xff] }
 0x383   : > { %13467 = vst [vmem:[#allocation64_spill] sm:$0xff] %v10682_v23  ;;  %5948 = vst.msk [vmem:[#allocation4 + $0x150] sm:$0xff] %vm254_vm0, %v13428_v63  ;;  %v10695_v55 = vld [vmem:[#allocation3 + $0x78] sm:$0xff]  ;;  %v3451_v53 = vpop.permute.xlu0 %3450 }
 0x384   : > { %5949 = vst.msk [vmem:[#allocation4 + $0x158] sm:$0xf] %vm823_vm1, %v13428_v63  ;;  %13468 = vst [vmem:[#allocation65_spill] sm:$0xff] %v10695_v55  ;;  %v3129_v36 = vmax.f32 %v10695_v55, 0.0  ;;  %v10700_v28 = vld [vmem:[#allocation3 + $0x70] sm:$0xff]  ;;  %v3643_v23 = vpop.permute.xlu1 %3642  ;;  %2602 = vrot.lane.b32.xlu0 %v10272_v24, %s8590_s9 }
 0x385   : > { %3498 = vst.msk [vmem:[#allocation5] sm:$0xff] %vm1194_vm4, %v3451_v53  ;;  %13469 = vst [vmem:[#allocation66_spill] sm:$0xff] %v10700_v28  ;;  %v13398_v32 = vmax.f32 %v10700_v28, 0.0  ;;  %v10709_v62 = vld [vmem:[#allocation4 + $0x111] sm:$0xff]  ;;  %v10715_v53 = vld [vmem:[#allocation4 + $0x120] sm:$0xff]  ;;  %2508 = vrot.lane.b32.xlu1 %v10276_v61, %s8597_s30 }
 0x386   : > { %3594 = vst.msk [vmem:[#allocation5] sm:$0xff] %vm1291_vm5, %v3547_v34  ;;  %v10711_v50 = vld [vmem:[#allocation4 + $0x112] sm:$0xff] }
 0x387   : > { %3193 = vst.msk [vmem:[#allocation4 + $0x141] sm:$0xff] %vm254_vm0, %v3129_v36  ;;  %v10713_v49 = vld [vmem:[#allocation4 + $0x110] sm:$0xff]  ;;  %v2595_v34 = vpop.permute.xlu0 %2594  ;;  %3192 = vst.msk [vmem:[#allocation4 + $0x131] sm:$0xff] %vm254_vm0, %v13398_v32 }
 0x388   : > { %4305 = vst.msk [vmem:[#allocation4 + $0x118] sm:$0xf] %vm823_vm1, %v13428_v63  ;;  %v2309_v32 = vpop.permute.xlu1 %2308  ;;  %2698 = vrot.lane.b32.xlu0 %v10274_v42, %s8592_s11 }
 0x389   : > { %4304 = vst.msk [vmem:[#allocation4 + $0x110] sm:$0xff] %vm254_vm0, %v13428_v63  ;;  %4306 = vst.msk [vmem:[#allocation4 + $0x120] sm:$0xff] %vm254_vm0, %v13428_v63  ;;  %2124 = vrot.lane.b32.xlu1 %v10290_v17, %s8591_s10 }
 0x38a   : > { %v10726_v58 = vld [vmem:[#allocation4 + $0x150] sm:$0xff]  ;;  %3690 = vst.msk [vmem:[#allocation5] sm:$0xff] %vm1388_vm6, %v3643_v23 }
 0x38b   : > { %13470 = vst [vmem:[#allocation67_spill] sm:$0xff] %v10726_v58  ;;  %v10728_v18 = vld [vmem:[#allocation4 + $0x151] sm:$0xff]  ;;  %3786 = vst.msk [vmem:[#allocation5] sm:$0xff] %vm1486_vm7, %v10611_v51  ;;  %v2691_v23 = vpop.permute.xlu0 %2690 }
 0x38c   : > { %13471 = vst [vmem:[#allocation68_spill] sm:$0xff] %v10728_v18  ;;  %v10730_v55 = vld [vmem:[#allocation4 + $0x152] sm:$0xff]  ;;  %3882 = vst.msk [vmem:[#allocation5] sm:$0xff] %vm1583_vm8, %v10643_v16  ;;  %2794 = vrot.lane.b32.xlu0 %v10276_v61, %s8594_s13 }
 0x38d   : > { %13472 = vst [vmem:[#allocation69_spill] sm:$0xff] %v10730_v55  ;;  %6459 = vst.msk [vmem:[#allocation4 + $0x158] sm:$0xf] %vm823_vm1, %v13428_v63  ;;  %2220 = vrot.lane.b32.xlu1 %v10292_v22, %s8593_s12 }
 0x38e   : > { %6458 = vst.msk [vmem:[#allocation4 + $0x150] sm:$0xff] %vm254_vm0, %v13428_v63  ;;  %v10751_v51 = vld [vmem:[#allocation4 + $0x140] sm:$0xff]  ;;  %v10759_v18 = vld [vmem:[#allocation4 + $0x132] sm:$0xff] }
 0x38f   : > { %6479 = vst.msk [vmem:[#allocation4 + $0x152] sm:$0xff] %vm254_vm0, %v3129_v36  ;;  %v10753_v24 = vld [vmem:[#allocation4 + $0x142] sm:$0xff]  ;;  %v10757_v36 = vld [vmem:[#allocation4 + $0x131] sm:$0xff]  ;;  %v2787_v42 = vpop.permute.xlu0 %2786 }
 0x390   : > { %3978 = vst.msk [vmem:[#allocation5] sm:$0xff] %vm1680_vm9, %v3931_v29  ;;  %13473 = vst [vmem:[#allocation70_spill] sm:$0xff] %v10753_v24  ;;  %v10755_v55 = vld [vmem:[#allocation4 + $0x141] sm:$0xff]  ;;  %v10761_v16 = vld [vmem:[#allocation4 + $0x130] sm:$0xff]  ;;  %v2405_v29 = vpop.permute.xlu1 %2404  ;;  %2314 = vrot.lane.b32.xlu0 %v10288_v15, %s8595_s27 }
 0x391   : > { %13474 = vst [vmem:[#allocation71_spill] sm:$0xff] %v10755_v55  ;;  %4311 = vst.msk [vmem:[#allocation4 + $0x148] sm:$0xf] %vm823_vm1, %v13428_v63  ;;  %2600 = vrot.lane.b32.xlu1 %v10288_v15, %s8590_s9 }
 0x392   : > { %4310 = vst.msk [vmem:[#allocation4 + $0x140] sm:$0xff] %vm254_vm0, %v13428_v63  ;;  %4308 = vst.msk [vmem:[#allocation4 + $0x130] sm:$0xff] %vm254_vm0, %v13428_v63 }
 0x393   : > { %4309 = vst.msk [vmem:[#allocation4 + $0x138] sm:$0xf] %vm823_vm1, %v13428_v63  ;;  %v2307_v28 = vpop.permute.xlu0 %2306 }
 0x394   : > { %v2501_v26 = vpop.permute.xlu1 %2500  ;;  %2348 = vst.msk [vmem:[#allocation5 + $0x30] sm:$0xff] %vm1194_vm4, %v2307_v28  ;;  %2410 = vrot.lane.b32.xlu0 %v10290_v17, %s8596_s28 }
 0x395   : > { %2696 = vrot.lane.b32.xlu1 %v10290_v17, %s8592_s11 }
 0x397   : > { %v3994_v58 = vld [vmem:[#allocation5] sm:$0xff]  ;;  %v2403_v24 = vpop.permute.xlu0 %2402 }
 0x398   : > { %8262 = vmatprep.mubr.msk.f32.mxu0 %vm1722_vm10, %v3994_v58  ;;  %v2117_v55 = vpop.permute.xlu1 %2116  ;;  %2444 = vst.msk [vmem:[#allocation5 + $0x30] sm:$0xff] %vm1291_vm5, %v2403_v24  ;;  %2506 = vrot.lane.b32.xlu0 %v10292_v22, %s8597_s30 }
 0x399   : > { %2157 = vst.msk [vmem:[#allocation5 + $0x38] sm:$0xff] %vm1000_vm2, %v2117_v55  ;;  %2792 = vrot.lane.b32.xlu1 %v10292_v22, %s8594_s13 }
 0x39b   : > { %v2499_v61 = vpop.permute.xlu0 %2498 }
 0x39c   : > { %v2213_v58 = vpop.permute.xlu1 %2212  ;;  %2540 = vst.msk [vmem:[#allocation5 + $0x30] sm:$0xff] %vm1388_vm6, %v2499_v61  ;;  %3462 = vrot.lane.b32.xlu0 %v10224_v20, %s8595_s27 }
 0x39d   : > { %2253 = vst.msk [vmem:[#allocation5 + $0x38] sm:$0xff] %vm1097_vm3, %v2213_v58  ;;  %3464 = vrot.lane.b32.xlu1 %v10226_v30, %s8595_s27 }
 0x39e   : > { %2636 = vst.msk [vmem:[#allocation5 + $0x30] sm:$0xff] %vm1486_vm7, %v2595_v34 }
 0x39f   : > { %2349 = vst.msk [vmem:[#allocation5 + $0x38] sm:$0xff] %vm1194_vm4, %v2309_v32  ;;  %v3267_v15 = vpop.permute.xlu0 %3266 }
 0x3a0   : > { %2732 = vst.msk [vmem:[#allocation5 + $0x30] sm:$0xff] %vm1583_vm8, %v2691_v23  ;;  %v2593_v17 = vpop.permute.xlu1 %2592  ;;  %2130 = vrot.lane.b32.xlu0 %v10433_v1, %s8591_s10 }
 0x3a1   : > { %2445 = vst.msk [vmem:[#allocation5 + $0x38] sm:$0xff] %vm1291_vm5, %v2405_v29  ;;  %3272 = vrot.lane.b32.xlu1 %v10231_v5, %s8591_s10 }
 0x3a2   : > { %2828 = vst.msk [vmem:[#allocation5 + $0x30] sm:$0xff] %vm1680_vm9, %v2787_v42 }
 0x3a3   : > { %2541 = vst.msk [vmem:[#allocation5 + $0x38] sm:$0xff] %vm1388_vm6, %v2501_v26  ;;  %v3363_v22 = vpop.permute.xlu0 %3362 }
 0x3a4   : > { %2637 = vst.msk [vmem:[#allocation5 + $0x38] sm:$0xff] %vm1486_vm7, %v9349_v8  ;;  %2635 = vst.msk [vmem:[#allocation5 + $0x28] sm:$0xff] %vm1486_vm7, %v2593_v17  ;;  %v2689_v26 = vpop.permute.xlu1 %2688  ;;  %2226 = vrot.lane.b32.xlu0 %v10435_v40, %s8593_s12 }
 0x3a5   : > { %3310 = vst.msk [vmem:[#allocation5 + $0x20] sm:$0xff] %vm1000_vm2, %v3267_v15  ;;  %3368 = vrot.lane.b32.xlu1 %v10233_v52, %s8593_s12 }
 0x3a6   : > { %2733 = vst.msk [vmem:[#allocation5 + $0x38] sm:$0xff] %vm1583_vm8, %v9373_v10  ;;  %2731 = vst.msk [vmem:[#allocation5 + $0x28] sm:$0xff] %vm1583_vm8, %v2689_v26 }
 0x3a7   : > { %2829 = vst.msk [vmem:[#allocation5 + $0x38] sm:$0xff] %vm1680_vm9, %v9399_v19  ;;  %v3649_v10 = vpop.permute.xlu0 %3648 }
 0x3a8   : > { %3406 = vst.msk [vmem:[#allocation5 + $0x20] sm:$0xff] %vm1097_vm3, %v3363_v22  ;;  %v2785_v55 = vpop.permute.xlu1 %2784  ;;  %2606 = vrot.lane.b32.xlu0 %v10437_v13, %s8590_s9 }
 0x3a9   : > { %v2844_v8 = vld [vmem:[#allocation5 + $0x30] sm:$0xff]  ;;  %2827 = vst.msk [vmem:[#allocation5 + $0x28] sm:$0xff] %vm1680_vm9, %v2785_v55  ;;  %2320 = vrot.lane.b32.xlu1 %v10437_v13, %s8595_s27 }
 0x3aa   : > { %3216 = vst.msk [vmem:[#allocation5 + $0x30] sm:$0xff] %vm254_vm0, %v10014_v33 }
 0x3ab   : > { %v3935_v28 = vpop.permute.xlu0 %3934 }
 0x3ac   : > { %v3457_v32 = vpop.permute.xlu1 %3456  ;;  %2702 = vrot.lane.b32.xlu0 %v10433_v1, %s8592_s11 }
 0x3ad   : > { %2416 = vrot.lane.b32.xlu1 %v10433_v1, %s8596_s28 }
 0x3ae   : > { %v2845_v19 = vld [vmem:[#allocation5 + $0x38] sm:$0xff] }
 0x3af   : > { %3217 = vst.msk [vmem:[#allocation5 + $0x38] sm:$0xff] %vm254_vm0, %v10224_v20  ;;  %v3455_v34 = vpop.permute.xlu0 %3454 }
 0x3b0   : > { %v3553_v23 = vpop.permute.xlu1 %3552  ;;  %v2843_v24 = vld [vmem:[#allocation5 + $0x28] sm:$0xff]  ;;  %3500 = vst.msk [vmem:[#allocation5 + $0x10] sm:$0xff] %vm1194_vm4, %v3455_v34  ;;  %2798 = vrot.lane.b32.xlu0 %v10435_v40, %s8594_s13 }
 0x3b1   : > { %8227 = vmatmul.mubr.msk.f32.gmra.mrb[20].mxu1 %vm1722_vm10, %v2843_v24  ;;  %3215 = vst.msk [vmem:[#allocation5 + $0x28] sm:$0xff] %vm254_vm0, %v10008_v9  ;;  %2512 = vrot.lane.b32.xlu1 %v10435_v40, %s8597_s30 }
 0x3b2   : > { %8229 = vmatprep.mubr.msk.f32.mxu1 %vm1722_vm10, %v2844_v8 }
 0x3b3   : > { %v3741_v42 = vpop.permute.xlu0 %3740 }
 0x3b4   : > { %v3743_v13 = vpop.permute.xlu1 %3742  ;;  %3787 = vst.msk [vmem:[#allocation5 + $0x8] sm:$0xff] %vm1486_vm7, %v3741_v42  ;;  %2318 = vrot.lane.b32.xlu0 %v10455_v47, %s8595_s27 }
 0x3b5   : > { %8230 = vmatmul.mubr.msk.f32.gmra.mrb[22].mxu1 %vm1722_vm10, %v2845_v19  ;;  %2128 = vrot.lane.b32.xlu1 %v10459_v39, %s8591_s10 }
 0x3b7   : > { %v3551_v9 = vpop.permute.xlu0 %3550 }
 0x3b8   : > { %v3839_v29 = vpop.permute.xlu1 %3838  ;;  %3596 = vst.msk [vmem:[#allocation5 + $0x10] sm:$0xff] %vm1291_vm5, %v3551_v9  ;;  %2414 = vrot.lane.b32.xlu0 %v10459_v39, %s8596_s28 }
 0x3b9   : > { %2224 = vrot.lane.b32.xlu1 %v10457_v31, %s8593_s12 }
 0x3bb   : > { %v3647_v1 = vpop.permute.xlu0 %3646 }
 0x3bc   : > { %v3265_v61 = vpop.permute.xlu1 %3264  ;;  %3692 = vst.msk [vmem:[#allocation5 + $0x10] sm:$0xff] %vm1388_vm6, %v3647_v1  ;;  %2510 = vrot.lane.b32.xlu0 %v10457_v31, %s8597_s30 }
 0x3bd   : > { %3309 = vst.msk [vmem:[#allocation5 + $0x18] sm:$0xff] %vm1000_vm2, %v3265_v61  ;;  %2604 = vrot.lane.b32.xlu1 %v10455_v47, %s8590_s9 }
 0x3be   : > { %3788 = vst.msk [vmem:[#allocation5 + $0x10] sm:$0xff] %vm1486_vm7, %v3743_v13 }
 0x3bf   : > { %3884 = vst.msk [vmem:[#allocation5 + $0x10] sm:$0xff] %vm1583_vm8, %v3839_v29  ;;  %v2123_v40 = vpop.permute.xlu0 %2122 }
 0x3c0   : > { %3980 = vst.msk [vmem:[#allocation5 + $0x10] sm:$0xff] %vm1680_vm9, %v3935_v28  ;;  %v3361_v58 = vpop.permute.xlu1 %3360  ;;  %3278 = vrot.lane.b32.xlu0 %v10380_v27, %s8591_s10 }
 0x3c1   : > { %2160 = vst.msk [vmem:[#allocation5 + $0x50] sm:$0xff] %vm1000_vm2, %v2123_v40  ;;  %2700 = vrot.lane.b32.xlu1 %v10459_v39, %s8592_s11 }
 0x3c2   : > { %3405 = vst.msk [vmem:[#allocation5 + $0x18] sm:$0xff] %vm1097_vm3, %v3361_v58 }
 0x3c3   : > { %3501 = vst.msk [vmem:[#allocation5 + $0x18] sm:$0xff] %vm1194_vm4, %v3457_v32  ;;  %v2219_v15 = vpop.permute.xlu0 %2218 }
 0x3c4   : > { %3597 = vst.msk [vmem:[#allocation5 + $0x18] sm:$0xff] %vm1291_vm5, %v3553_v23  ;;  %v3837_v17 = vpop.permute.xlu1 %3836  ;;  %3374 = vrot.lane.b32.xlu0 %v10384_v12, %s8593_s12 }
 0x3c5   : > { %3693 = vst.msk [vmem:[#allocation5 + $0x18] sm:$0xff] %vm1388_vm6, %v3649_v10  ;;  %2796 = vrot.lane.b32.xlu1 %v10457_v31, %s8594_s13 }
 0x3c6   : > { %2256 = vst.msk [vmem:[#allocation5 + $0x50] sm:$0xff] %vm1097_vm3, %v2219_v15 }
 0x3c7   : > { %3883 = vst.msk [vmem:[#allocation5 + $0x8] sm:$0xff] %vm1583_vm8, %v3837_v17  ;;  %v2599_v22 = vpop.permute.xlu0 %2598  ;;  %v3996_v19 = vld [vmem:[#allocation5 + $0x10] sm:$0xff] }
 0x3c8   : > { %v3933_v26 = vpop.permute.xlu1 %3932  ;;  %3466 = vrot.lane.b32.xlu0 %v10402_v35, %s8595_s27 }
 0x3c9   : > { %3979 = vst.msk [vmem:[#allocation5 + $0x8] sm:$0xff] %vm1680_vm9, %v3933_v26  ;;  %3276 = vrot.lane.b32.xlu1 %v10404_v6, %s8591_s10 }
 0x3cb   : > { %v2695_v47 = vpop.permute.xlu0 %2694 }
 0x3cc   : > { %v2313_v8 = vpop.permute.xlu1 %2312  ;;  %2610 = vrot.lane.b32.xlu0 %v10507_v56, %s8590_s9 }
 0x3cd   : > { %3372 = vrot.lane.b32.xlu1 %v10406_v57, %s8593_s12 }
 0x3cf   : > { %v2791_v10 = vpop.permute.xlu0 %2790 }
 0x3d0   : > { %v2409_v39 = vpop.permute.xlu1 %2408  ;;  %v3995_v55 = vld [vmem:[#allocation5 + $0x8] sm:$0xff]  ;;  %2706 = vrot.lane.b32.xlu0 %v10509_v7, %s8592_s11 }
 0x3d1   : > { %8263 = vmatmul.mubr.msk.f32.vlgmr.msra.gmra.mrb[32].mxu0 %vm1722_vm10, %v3995_v55  ;;  %2324 = vrot.lane.b32.xlu1 %v10507_v56, %s8595_s27 }
 0x3d2   : > { %8265 = vmatprep.mubr.msk.f32.mxu0 %vm1722_vm10, %v3996_v19 }
 0x3d3   : > { %v2311_v31 = vpop.permute.xlu0 %2310 }
 0x3d4   : > { %v2505_v28 = vpop.permute.xlu1 %2504  ;;  %2350 = vst.msk [vmem:[#allocation5 + $0x40] sm:$0xff] %vm1194_vm4, %v2311_v31  ;;  %2802 = vrot.lane.b32.xlu0 %v10504_v25, %s8594_s13 }
 0x3d5   : > { %2420 = vrot.lane.b32.xlu1 %v10509_v7, %s8596_s28 }
 0x3d7   : > { %v2407_v32 = vpop.permute.xlu0 %2406 }
 0x3d8   : > { %v2121_v34 = vpop.permute.xlu1 %2120  ;;  %2446 = vst.msk [vmem:[#allocation5 + $0x40] sm:$0xff] %vm1291_vm5, %v2407_v32  ;;  %2322 = vrot.lane.b32.xlu0 %v10523_v4, %s8595_s27 }
 0x3d9   : > { %2159 = vst.msk [vmem:[#allocation5 + $0x48] sm:$0xff] %vm1000_vm2, %v2121_v34  ;;  %2516 = vrot.lane.b32.xlu1 %v10504_v25, %s8597_s30 }
 0x3db   : > { %v2503_v23 = vpop.permute.xlu0 %2502 }
 0x3dc   : > { %v2217_v24 = vpop.permute.xlu1 %2216  ;;  %2542 = vst.msk [vmem:[#allocation5 + $0x40] sm:$0xff] %vm1388_vm6, %v2503_v23  ;;  %2418 = vrot.lane.b32.xlu0 %v10531_v46, %s8596_s28 }
 0x3dd   : > { %2255 = vst.msk [vmem:[#allocation5 + $0x48] sm:$0xff] %vm1097_vm3, %v2217_v24  ;;  %2132 = vrot.lane.b32.xlu1 %v10531_v46, %s8591_s10 }
 0x3de   : > { %2638 = vst.msk [vmem:[#allocation5 + $0x40] sm:$0xff] %vm1486_vm7, %v2599_v22 }
 0x3df   : > { %2351 = vst.msk [vmem:[#allocation5 + $0x48] sm:$0xff] %vm1194_vm4, %v2313_v8  ;;  %v3271_v7 = vpop.permute.xlu0 %3270 }
 0x3e0   : > { %2734 = vst.msk [vmem:[#allocation5 + $0x40] sm:$0xff] %vm1583_vm8, %v2695_v47  ;;  %v3461_v56 = vpop.permute.xlu1 %3460  ;;  %2514 = vrot.lane.b32.xlu0 %v10527_v37, %s8597_s30 }
 0x3e1   : > { %2447 = vst.msk [vmem:[#allocation5 + $0x48] sm:$0xff] %vm1291_vm5, %v2409_v39  ;;  %2228 = vrot.lane.b32.xlu1 %v10527_v37, %s8593_s12 }
 0x3e2   : > { %2830 = vst.msk [vmem:[#allocation5 + $0x40] sm:$0xff] %vm1680_vm9, %v2791_v10 }
 0x3e3   : > { %2543 = vst.msk [vmem:[#allocation5 + $0x48] sm:$0xff] %vm1388_vm6, %v2505_v28  ;;  %v3367_v25 = vpop.permute.xlu0 %3366 }
 0x3e4   : > { %3312 = vst.msk [vmem:[#allocation5 + $0x30] sm:$0xff] %vm1000_vm2, %v3271_v7  ;;  %v3557_v42 = vpop.permute.xlu1 %3556  ;;  %3282 = vrot.lane.b32.xlu0 %v10597_v3, %s8591_s10  ;;  %v13477_v7 = vld [vmem:[#allocation34_spill] sm:$0xff] }
 0x3e5   : > { %3408 = vst.msk [vmem:[#allocation5 + $0x30] sm:$0xff] %vm1097_vm3, %v3367_v25  ;;  %2608 = vrot.lane.b32.xlu1 %v10523_v4, %s8590_s9 }
 0x3e7   : > { %v3459_v9 = vpop.permute.xlu0 %3458 }
 0x3e8   : > { %v3269_v29 = vpop.permute.xlu1 %3268  ;;  %3502 = vst.msk [vmem:[#allocation5 + $0x20] sm:$0xff] %vm1194_vm4, %v3459_v9  ;;  %3378 = vrot.lane.b32.xlu0 %v10599_v43, %s8593_s12 }
 0x3e9   : > { %v2846_v13 = vld [vmem:[#allocation5 + $0x40] sm:$0xff]  ;;  %3311 = vst.msk [vmem:[#allocation5 + $0x28] sm:$0xff] %vm1000_vm2, %v3269_v29  ;;  %2704 = vrot.lane.b32.xlu1 %v10531_v46, %s8592_s11  ;;  %v13478_v29 = vmov -3.4028235e+38  }
 0x3ea   : > { %8232 = vmatprep.mubr.msk.f32.mxu1 %vm1722_vm10, %v2846_v13  ;;  %3218 = vst.msk [vmem:[#allocation5 + $0x40] sm:$0xff] %vm254_vm0, %v10566_v11  ;;  %v11033_v13 = vld [vmem:[#allocation4 + $0x2] sm:$0xff] }
 0x3eb   : > { %3314 = vst.msk [vmem:[#allocation5 + $0x40] sm:$0xff] %vm1000_vm2, %v10040_v45  ;;  %v3745_v1 = vpop.permute.xlu0 %3744 }
 0x3ec   : > { %3410 = vst.msk [vmem:[#allocation5 + $0x40] sm:$0xff] %vm1097_vm3, %v10070_v59  ;;  %v3365_v61 = vpop.permute.xlu1 %3364  ;;  %3286 = vrot.lane.b32.xlu0 %v10618_v44, %s8591_s10 }
 0x3ed   : > { %3789 = vst.msk [vmem:[#allocation5 + $0x18] sm:$0xff] %vm1486_vm7, %v3745_v1  ;;  %2800 = vrot.lane.b32.xlu1 %v10527_v37, %s8594_s13  ;;  %v11043_v1 = vld [vmem:[#allocation4 + $0xc1] sm:$0xff] }
 0x3ee   : > { %3407 = vst.msk [vmem:[#allocation5 + $0x28] sm:$0xff] %vm1097_vm3, %v3365_v61  ;;  %v11045_v61 = vld [vmem:[#allocation4 + $0xc2] sm:$0xff] }
 0x3ef   : > { %3503 = vst.msk [vmem:[#allocation5 + $0x28] sm:$0xff] %vm1194_vm4, %v3461_v56  ;;  %v3555_v45 = vpop.permute.xlu0 %3554 }
 0x3f0   : > { %3599 = vst.msk [vmem:[#allocation5 + $0x28] sm:$0xff] %vm1291_vm5, %v3557_v42  ;;  %v3841_v59 = vpop.permute.xlu1 %3840  ;;  %3598 = vst.msk [vmem:[#allocation5 + $0x20] sm:$0xff] %vm1291_vm5, %v3555_v45  ;;  %3382 = vrot.lane.b32.xlu0 %v10620_v54, %s8593_s12  ;;  %v11031_v42 = vld [vmem:[#allocation4 + $0x1] sm:$0xff] }
 0x3f1   : > { %3885 = vst.msk [vmem:[#allocation5 + $0x18] sm:$0xff] %vm1583_vm8, %v3841_v59  ;;  %3280 = vrot.lane.b32.xlu1 %v10626_v0, %s8591_s10  ;;  %v13479_v59 = vld [vmem:[#allocation56_spill] sm:$0xff] }
 0x3f2   : > { %5459 = vst.msk [vmem:[#allocation4 + $0x8] sm:$0xf] %vm823_vm1, %v13478_v29  ;;  %5483 = vst.msk [vmem:[#allocation4 + $0xc8] sm:$0xf] %vm823_vm1, %v13478_v29 }
 0x3f3   : > { %v2127_v4 = vpop.permute.xlu0 %2126 }
 0x3f4   : > { %v2317_v11 = vpop.permute.xlu1 %2316  ;;  %2162 = vst.msk [vmem:[#allocation5 + $0x60] sm:$0xff] %vm1000_vm2, %v2127_v4  ;;  %3650 = vrot.lane.b32.xlu0 %v10012_v14, %s8597_s30 }
 0x3f5   : > { %3376 = vrot.lane.b32.xlu1 %v10628_v41, %s8593_s12 }
 0x3f7   : > { %v2223_v46 = vpop.permute.xlu0 %2222 }
 0x3f8   : > { %v2413_v40 = vpop.permute.xlu1 %2412  ;;  %2258 = vst.msk [vmem:[#allocation5 + $0x60] sm:$0xff] %vm1097_vm3, %v2223_v46  ;;  %3652 = vrot.lane.b32.xlu0 %v10016_v48, %s8597_s30 }
 0x3f9   : > { %3936 = vrot.lane.b32.xlu1 %v10012_v14, %s8594_s13 }
 0x3fb   : > { %v2603_v37 = vpop.permute.xlu0 %2602 }
 0x3fc   : > { %v2509_v58 = vpop.permute.xlu1 %2508  ;;  %3748 = vrot.lane.b32.xlu0 %v10224_v20, %s8590_s9 }
 0x3fd   : > { %3746 = vrot.lane.b32.xlu1 %v10014_v33, %s8590_s9 }
 0x3ff   : > { %v2699_v15 = vpop.permute.xlu0 %2698 }
 0x400   : > { %v2125_v17 = vpop.permute.xlu1 %2124  ;;  %3558 = vrot.lane.b32.xlu0 %v10231_v5, %s8596_s28 }
 0x401   : > { %2161 = vst.msk [vmem:[#allocation5 + $0x58] sm:$0xff] %vm1000_vm2, %v2125_v17  ;;  %3284 = vrot.lane.b32.xlu1 %v10709_v62, %s8591_s10 }
 0x403   : > { %v2795_v22 = vpop.permute.xlu0 %2794 }
 0x404   : > { %v2221_v26 = vpop.permute.xlu1 %2220  ;;  %3938 = vrot.lane.b32.xlu0 %v10016_v48, %s8594_s13 }
 0x405   : > { %2257 = vst.msk [vmem:[#allocation5 + $0x58] sm:$0xff] %vm1097_vm3, %v2221_v26  ;;  %3380 = vrot.lane.b32.xlu1 %v10711_v50, %s8593_s12 }
 0x406   : > { %2353 = vst.msk [vmem:[#allocation5 + $0x58] sm:$0xff] %vm1194_vm4, %v2317_v11  ;;  %v13480_v11 = vld [vmem:[#allocation57_spill] sm:$0xff] }
 0x407   : > { %2449 = vst.msk [vmem:[#allocation5 + $0x58] sm:$0xff] %vm1291_vm5, %v2413_v40  ;;  %v2315_v14 = vpop.permute.xlu0 %2314 }
 0x408   : > { %2545 = vst.msk [vmem:[#allocation5 + $0x58] sm:$0xff] %vm1388_vm6, %v2509_v58  ;;  %v2601_v33 = vpop.permute.xlu1 %2600  ;;  %3654 = vrot.lane.b32.xlu0 %v10233_v52, %s8597_s30 }
 0x409   : > { %2352 = vst.msk [vmem:[#allocation5 + $0x50] sm:$0xff] %vm1194_vm4, %v2315_v14  ;;  %3288 = vrot.lane.b32.xlu1 %v10757_v36, %s8591_s10 }
 0x40a   : > { %2639 = vst.msk [vmem:[#allocation5 + $0x48] sm:$0xff] %vm1486_vm7, %v2601_v33 }
 0x40b   : > { %v2411_v20 = vpop.permute.xlu0 %2410 }
 0x40c   : > { %v2697_v47 = vpop.permute.xlu1 %2696  ;;  %2448 = vst.msk [vmem:[#allocation5 + $0x50] sm:$0xff] %vm1291_vm5, %v2411_v20  ;;  %3656 = vrot.lane.b32.xlu0 %v10228_v60, %s8597_s30 }
 0x40d   : > { %2735 = vst.msk [vmem:[#allocation5 + $0x48] sm:$0xff] %vm1583_vm8, %v2697_v47  ;;  %3384 = vrot.lane.b32.xlu1 %v10759_v18, %s8593_s12 }
 0x40f   : > { %v2507_v8 = vpop.permute.xlu0 %2506 }
 0x410   : > { %v2793_v10 = vpop.permute.xlu1 %2792  ;;  %2544 = vst.msk [vmem:[#allocation5 + $0x50] sm:$0xff] %vm1388_vm6, %v2507_v8  ;;  %3752 = vrot.lane.b32.xlu0 %v10046_v38, %s8590_s9 }
 0x411   : > { %2831 = vst.msk [vmem:[#allocation5 + $0x48] sm:$0xff] %vm1680_vm9, %v2793_v10  ;;  %3842 = vrot.lane.b32.xlu1 %v10022_v21, %s8592_s11 }
 0x412   : > { %2640 = vst.msk [vmem:[#allocation5 + $0x50] sm:$0xff] %vm1486_vm7, %v2603_v37 }
 0x413   : > { %2736 = vst.msk [vmem:[#allocation5 + $0x50] sm:$0xff] %vm1583_vm8, %v2699_v15  ;;  %v3463_v48 = vpop.permute.xlu0 %3462 }
 0x414   : > { %2832 = vst.msk [vmem:[#allocation5 + $0x50] sm:$0xff] %vm1680_vm9, %v2795_v22  ;;  %v3465_v39 = vpop.permute.xlu1 %3464  ;;  %3468 = vrot.lane.b32.xlu0 %v10417_v2, %s8595_s27 }
 0x415   : > { %3504 = vst.msk [vmem:[#allocation5 + $0x30] sm:$0xff] %vm1194_vm4, %v3463_v48  ;;  %3844 = vrot.lane.b32.xlu1 %v10231_v5, %s8592_s11  ;;  %v13476_v5 = vld [vmem:[#allocation33_spill] sm:$0xff] }
 0x417   : > { %v2131_v55 = vpop.permute.xlu0 %2130 }
 0x418   : > { %v3273_v19 = vpop.permute.xlu1 %3272  ;;  %v2847_v31 = vld [vmem:[#allocation5 + $0x48] sm:$0xff]  ;;  %2164 = vst.msk [vmem:[#allocation5 + $0x70] sm:$0xff] %vm1000_vm2, %v2131_v55  ;;  %3848 = vrot.lane.b32.xlu0 %v13476_v5, %s8592_s11 }
 0x419   : > { %3313 = vst.msk [vmem:[#allocation5 + $0x38] sm:$0xff] %vm1000_vm2, %v3273_v19  ;;  %8233 = vmatmul.mubr.msk.f32.gmra.mrb[24].mxu1 %vm1722_vm10, %v2847_v31 }
 0x41a   : > { %3219 = vst.msk [vmem:[#allocation5 + $0x48] sm:$0xff] %vm254_vm0, %v10402_v35  ;;  %v13475_v35 = vld [vmem:[#allocation47_spill] sm:$0xff] }
 0x41b   : > { %v2848_v21 = vld [vmem:[#allocation5 + $0x50] sm:$0xff]  ;;  %v2227_v38 = vpop.permute.xlu0 %2226  ;;  %3560 = vrot.lane.b32.xlu1 %v13475_v35, %s8596_s28 }
 0x41c   : > { %8235 = vmatprep.mubr.msk.f32.mxu1 %vm1722_vm10, %v2848_v21  ;;  %v3369_v28 = vpop.permute.xlu1 %3368  ;;  %3220 = vst.msk [vmem:[#allocation5 + $0x50] sm:$0xff] %vm254_vm0, %v10417_v2  ;;  %3564 = vrot.lane.b32.xlu0 %v10380_v27, %s8596_s28 }
 0x41d   : > { %2260 = vst.msk [vmem:[#allocation5 + $0x70] sm:$0xff] %vm1097_vm3, %v2227_v38  ;;  %3409 = vst.msk [vmem:[#allocation5 + $0x38] sm:$0xff] %vm1097_vm3, %v3369_v28 }
 0x41e   : > { %3505 = vst.msk [vmem:[#allocation5 + $0x38] sm:$0xff] %vm1194_vm4, %v3465_v39 }
 0x41f   : > { %v2607_v32 = vpop.permute.xlu0 %2606  ;;  %3940 = vrot.lane.b32.xlu1 %v10233_v52, %s8594_s13 }
 0x420   : > { %v2321_v34 = vpop.permute.xlu1 %2320  ;;  %3944 = vrot.lane.b32.xlu0 %v13477_v7, %s8594_s13 }
 0x423   : > { %v2703_v23 = vpop.permute.xlu0 %2702  ;;  %3750 = vrot.lane.b32.xlu1 %v10226_v30, %s8590_s9 }
 0x424   : > { %v2417_v24 = vpop.permute.xlu1 %2416  ;;  %v11029_v25 = vpop.f32.mrb[16].mxu1  ;;  %3754 = vrot.lane.b32.xlu0 %v10417_v2, %s8590_s9 }
 0x425   : > { %v11035_v52 = vpop.f32.mrb[17].mxu1 }
 0x427   : > { %v2799_v56 = vpop.permute.xlu0 %2798  ;;  %3846 = vrot.lane.b32.xlu1 %v13475_v35, %s8592_s11 }
 0x428   : > { %v2513_v9 = vpop.permute.xlu1 %2512  ;;  %3756 = vrot.lane.b32.xlu0 %v13479_v59, %s8590_s9 }
 0x42b   : > { %v2319_v30 = vpop.permute.xlu0 %2318  ;;  %3562 = vrot.lane.b32.xlu1 %v10404_v6, %s8596_s28 }
 0x42c   : > { %2354 = vst.msk [vmem:[#allocation5 + $0x60] sm:$0xff] %vm1194_vm4, %v2319_v30  ;;  %v2129_v45 = vpop.permute.xlu1 %2128  ;;  %3472 = vrot.lane.b32.xlu0 %v13480_v11, %s8595_s27  ;;  %v13483_v30 = vld [vmem:[#allocation35_spill] sm:$0xff] }
 0x42d   : > { %2163 = vst.msk [vmem:[#allocation5 + $0x68] sm:$0xff] %vm1000_vm2, %v2129_v45 }
 0x42f   : > { %v2415_v2 = vpop.permute.xlu0 %2414  ;;  %3942 = vrot.lane.b32.xlu1 %v10228_v60, %s8594_s13  ;;  %v4334_v60 = vld [vmem:[#allocation4] sm:$0xff] }
 0x430   : > { %2450 = vst.msk [vmem:[#allocation5 + $0x60] sm:$0xff] %vm1291_vm5, %v2415_v2  ;;  %v2225_v4 = vpop.permute.xlu1 %2224  ;;  %3852 = vrot.lane.b32.xlu0 %v10626_v0, %s8592_s11 }
 0x431   : > { %2259 = vst.msk [vmem:[#allocation5 + $0x68] sm:$0xff] %vm1097_vm3, %v2225_v4 }
 0x432   : > { %2355 = vst.msk [vmem:[#allocation5 + $0x68] sm:$0xff] %vm1194_vm4, %v2321_v34 }
 0x433   : > { %2451 = vst.msk [vmem:[#allocation5 + $0x68] sm:$0xff] %vm1291_vm5, %v2417_v24  ;;  %v2511_v6 = vpop.permute.xlu0 %2510  ;;  %3658 = vrot.lane.b32.xlu1 %v10406_v57, %s8597_s30 }
 0x434   : > { %2547 = vst.msk [vmem:[#allocation5 + $0x68] sm:$0xff] %vm1388_vm6, %v2513_v9  ;;  %2546 = vst.msk [vmem:[#allocation5 + $0x60] sm:$0xff] %vm1388_vm6, %v2511_v6  ;;  %v2605_v46 = vpop.permute.xlu1 %2604  ;;  %3568 = vrot.lane.b32.xlu0 %v10597_v3, %s8596_s28  ;;  %v13481_v9 = vld [vmem:[#allocation25_spill] sm:$0xff] }
 0x435   : > { %2642 = vst.msk [vmem:[#allocation5 + $0x60] sm:$0xff] %vm1486_vm7, %v2607_v32  ;;  %2641 = vst.msk [vmem:[#allocation5 + $0x58] sm:$0xff] %vm1486_vm7, %v2605_v46 }
 0x436   : > { %2738 = vst.msk [vmem:[#allocation5 + $0x60] sm:$0xff] %vm1583_vm8, %v2703_v23 }
 0x437   : > { %4350 = vst.msk [vmem:[#allocation5] sm:$0xff] %vm254_vm0, %v4334_v60  ;;  %5458 = vst.msk [vmem:[#allocation4] sm:$0xff] %vm254_vm0, %v13478_v29  ;;  %v3279_v40 = vpop.permute.xlu0 %3278  ;;  %3660 = vrot.lane.b32.xlu1 %v10384_v12, %s8597_s30 }
 0x438   : > { %2834 = vst.msk [vmem:[#allocation5 + $0x60] sm:$0xff] %vm1680_vm9, %v2799_v56  ;;  %v2701_v37 = vpop.permute.xlu1 %2700  ;;  %3948 = vrot.lane.b32.xlu0 %v10628_v41, %s8594_s13 }
 0x439   : > { %3316 = vst.msk [vmem:[#allocation5 + $0x50] sm:$0xff] %vm1000_vm2, %v3279_v40 }
 0x43a   : > { %2737 = vst.msk [vmem:[#allocation5 + $0x58] sm:$0xff] %vm1583_vm8, %v2701_v37 }
 0x43b   : > { %v3375_v57 = vpop.permute.xlu0 %3374  ;;  %3470 = vrot.lane.b32.xlu1 %v13479_v59, %s8595_s27 }
 0x43c   : > { %3412 = vst.msk [vmem:[#allocation5 + $0x50] sm:$0xff] %vm1097_vm3, %v3375_v57  ;;  %v2797_v58 = vpop.permute.xlu1 %2796  ;;  %3758 = vrot.lane.b32.xlu0 %v13480_v11, %s8590_s9 }
 0x43d   : > { %2833 = vst.msk [vmem:[#allocation5 + $0x58] sm:$0xff] %vm1680_vm9, %v2797_v58 }
 0x43e   : > { %v5522_v17 = vld [vmem:[#allocation4] sm:$0xff] }
 0x43f   : > { %v2850_v15 = vld [vmem:[#allocation5 + $0x60] sm:$0xff]  ;;  %v3467_v26 = vpop.permute.xlu0 %3466  ;;  %3850 = vrot.lane.b32.xlu1 %v10380_v27, %s8592_s11 }
 0x440   : > { %v5538_v22 = vld [vmem:[#allocation4 + $0x1] sm:$0xff]  ;;  %3222 = vst.msk [vmem:[#allocation5 + $0x60] sm:$0xff] %vm254_vm0, %v13480_v11  ;;  %v3277_v20 = vpop.permute.xlu1 %3276  ;;  %3760 = vrot.lane.b32.xlu0 %v10713_v49, %s8590_s9 }
 0x441   : > { %v5554_v14 = vmax.f32 %v5522_v17, %v5538_v22  ;;  %v5570_v33 = vld [vmem:[#allocation4 + $0x2] sm:$0xff]  ;;  %3506 = vst.msk [vmem:[#allocation5 + $0x40] sm:$0xff] %vm1194_vm4, %v3467_v26 }
 0x442   : > { %5906 = vst.msk [vmem:[#allocation4] sm:$0xff] %vm254_vm0, %v13428_v63 }
 0x443   : > { %5907 = vst.msk [vmem:[#allocation4 + $0x8] sm:$0xf] %vm823_vm1, %v13428_v63  ;;  %v11098_v47 = vmax.f32 %v5554_v14, %v5570_v33  ;;  %v2611_v10 = vpop.permute.xlu0 %2610  ;;  %3566 = vrot.lane.b32.xlu1 %v10626_v0, %s8596_s28 }
 0x444   : > { %3315 = vst.msk [vmem:[#allocation5 + $0x48] sm:$0xff] %vm1000_vm2, %v3277_v20  ;;  %v3373_v8 = vpop.permute.xlu1 %3372  ;;  %v2849_v48 = vld [vmem:[#allocation5 + $0x58] sm:$0xff]  ;;  %3476 = vrot.lane.b32.xlu0 %v10715_v53, %s8595_s27 }
 0x445   : > { %3411 = vst.msk [vmem:[#allocation5 + $0x48] sm:$0xff] %vm1097_vm3, %v3373_v8  ;;  %8236 = vmatmul.mubr.msk.f32.gmra.mrb[26].mxu1 %vm1722_vm10, %v2849_v48  ;;  %v11243_v48 = vld [vmem:[#allocation4 + $0xc0] sm:$0xff] }
 0x446   : > { %3221 = vst.msk [vmem:[#allocation5 + $0x58] sm:$0xff] %vm254_vm0, %v13479_v59  ;;  %8238 = vmatprep.mubr.msk.f32.mxu1 %vm1722_vm10, %v2850_v15  ;;  %v11111_v27 = vpop.f32.mrb[18].mxu1  ;;  %5482 = vst.msk [vmem:[#allocation4 + $0xc0] sm:$0xff] %vm254_vm0, %v13478_v29 }
 0x447   : > { %v2707_v19 = vpop.permute.xlu0 %2706  ;;  %v11113_v21 = vpop.f32.mrb[19].mxu1  ;;  %3946 = vrot.lane.b32.xlu1 %v10384_v12, %s8594_s13 }
 0x448   : > { %v2325_v31 = vpop.permute.xlu1 %2324  ;;  %3856 = vrot.lane.b32.xlu0 %v10709_v62, %s8592_s11 }
 0x449   : > { %v5970_v39 = vld [vmem:[#allocation4] sm:$0xff] }
 0x44a   : > { %v5986_v55 = vld [vmem:[#allocation4 + $0x1] sm:$0xff] }
 0x44b   : > { %v6018_v0 = vld [vmem:[#allocation4 + $0x2] sm:$0xff]  ;;  %v6002_v38 = vadd.f32 %v5986_v55, %v5970_v39  ;;  %v2803_v28 = vpop.permute.xlu0 %2802  ;;  %3662 = vrot.lane.b32.xlu1 %v10628_v41, %s8597_s30  ;;  %v13488_v55 = vld [vmem:[#allocation55_spill] sm:$0xff] }
 0x44c   : > { %6416 = vst.msk [vmem:[#allocation4] sm:$0xff] %vm254_vm0, %v13428_v63  ;;  %v2421_v35 = vpop.permute.xlu1 %2420  ;;  %3572 = vrot.lane.b32.xlu0 %v10618_v44, %s8596_s28 }
 0x44d   : > { %6417 = vst.msk [vmem:[#allocation4 + $0x8] sm:$0xf] %vm823_vm1, %v13428_v63  ;;  %v11123_v5 = vadd.f32 %v6018_v0, %v6002_v38  ;;  %v13490_v38 = vld [vmem:[#allocation36_spill] sm:$0xff] }
 0x44f   : > { %v2323_v32 = vpop.permute.xlu0 %2322  ;;  %3664 = vrot.lane.b32.xlu1 %v10599_v43, %s8597_s30 }
 0x450   : > { %v2517_v12 = vpop.permute.xlu1 %2516  ;;  %2356 = vst.msk [vmem:[#allocation5 + $0x70] sm:$0xff] %vm1194_vm4, %v2323_v32  ;;  %3952 = vrot.lane.b32.xlu0 %v10711_v50, %s8594_s13 }
 0x453   : > { %v2419_v34 = vpop.permute.xlu0 %2418  ;;  %3474 = vrot.lane.b32.xlu1 %v10713_v49, %s8595_s27 }
 0x454   : > { %v2133_v23 = vpop.permute.xlu1 %2132  ;;  %2452 = vst.msk [vmem:[#allocation5 + $0x70] sm:$0xff] %vm1291_vm5, %v2419_v34  ;;  %3762 = vrot.lane.b32.xlu0 %v10715_v53, %s8590_s9 }
 0x455   : > { %2165 = vst.msk [vmem:[#allocation5 + $0x78] sm:$0xff] %vm1000_vm2, %v2133_v23 }
 0x457   : > { %v2515_v41 = vpop.permute.xlu0 %2514  ;;  %3854 = vrot.lane.b32.xlu1 %v10597_v3, %s8592_s11  ;;  %v13482_v3 = vld [vmem:[#allocation26_spill] sm:$0xff] }
 0x458   : > { %v2229_v24 = vpop.permute.xlu1 %2228  ;;  %2548 = vst.msk [vmem:[#allocation5 + $0x70] sm:$0xff] %vm1388_vm6, %v2515_v41  ;;  %3764 = vrot.lane.b32.xlu0 %v10761_v16, %s8590_s9 }
 0x459   : > { %2261 = vst.msk [vmem:[#allocation5 + $0x78] sm:$0xff] %vm1097_vm3, %v2229_v24 }
 0x45a   : > { %2644 = vst.msk [vmem:[#allocation5 + $0x70] sm:$0xff] %vm1486_vm7, %v2611_v10  ;;  %v13487_v10 = vld [vmem:[#allocation54_spill] sm:$0xff] }
 0x45b   : > { %2357 = vst.msk [vmem:[#allocation5 + $0x78] sm:$0xff] %vm1194_vm4, %v2325_v31  ;;  %v3283_v7 = vpop.permute.xlu0 %3282  ;;  %3570 = vrot.lane.b32.xlu1 %v10709_v62, %s8596_s28 }
 0x45c   : > { %2740 = vst.msk [vmem:[#allocation5 + $0x70] sm:$0xff] %vm1583_vm8, %v2707_v19  ;;  %v2609_v56 = vpop.permute.xlu1 %2608  ;;  %3480 = vrot.lane.b32.xlu0 %v10751_v51, %s8595_s27  ;;  %v13489_v19 = vld [vmem:[#allocation37_spill] sm:$0xff] }
 0x45d   : > { %2453 = vst.msk [vmem:[#allocation5 + $0x78] sm:$0xff] %vm1291_vm5, %v2421_v35 }
 0x45e   : > { %2836 = vst.msk [vmem:[#allocation5 + $0x70] sm:$0xff] %vm1680_vm9, %v2803_v28 }
 0x45f   : > { %2549 = vst.msk [vmem:[#allocation5 + $0x78] sm:$0xff] %vm1388_vm6, %v2517_v12  ;;  %v3379_v45 = vpop.permute.xlu0 %3378  ;;  %3950 = vrot.lane.b32.xlu1 %v10599_v43, %s8594_s13  ;;  %v13491_v12 = vld [vmem:[#allocation38_spill] sm:$0xff] }
 0x460   : > { %2645 = vst.msk [vmem:[#allocation5 + $0x78] sm:$0xff] %vm1486_vm7, %v13481_v9  ;;  %2643 = vst.msk [vmem:[#allocation5 + $0x68] sm:$0xff] %vm1486_vm7, %v2609_v56  ;;  %v2705_v59 = vpop.permute.xlu1 %2704  ;;  %3860 = vrot.lane.b32.xlu0 %v10757_v36, %s8592_s11  ;;  %v11275_v9 = vld [vmem:[%s13333_s3 + $0x8] ss:$0 sm:$0xff] }
 0x461   : > { %3318 = vst.msk [vmem:[#allocation5 + $0x60] sm:$0xff] %vm1000_vm2, %v3283_v7 }
 0x462   : > { %2741 = vst.msk [vmem:[#allocation5 + $0x78] sm:$0xff] %vm1583_vm8, %v13482_v3  ;;  %2739 = vst.msk [vmem:[#allocation5 + $0x68] sm:$0xff] %vm1583_vm8, %v2705_v59 }
 0x463   : > { %2837 = vst.msk [vmem:[#allocation5 + $0x78] sm:$0xff] %vm1680_vm9, %v13483_v30  ;;  %v3287_v2 = vpop.permute.xlu0 %3286  ;;  %3666 = vrot.lane.b32.xlu1 %v10711_v50, %s8597_s30  ;;  %v11280_v30 = vld [vmem:[%s13333_s3 + $0x9] ss:$0 sm:$0xff] }
 0x464   : > { %3414 = vst.msk [vmem:[#allocation5 + $0x60] sm:$0xff] %vm1097_vm3, %v3379_v45  ;;  %v2801_v4 = vpop.permute.xlu1 %2800 }
 0x465   : > { %v2852_v62 = vld [vmem:[#allocation5 + $0x70] sm:$0xff]  ;;  %2835 = vst.msk [vmem:[#allocation5 + $0x68] sm:$0xff] %vm1680_vm9, %v2801_v4 }
 0x466   : > { %3224 = vst.msk [vmem:[#allocation5 + $0x70] sm:$0xff] %vm254_vm0, %v10715_v53  ;;  %v13484_v53 = vld [vmem:[#allocation71_spill] sm:$0xff] }
 0x467   : > { %3320 = vst.msk [vmem:[#allocation5 + $0x70] sm:$0xff] %vm1000_vm2, %v3287_v2  ;;  %v3383_v11 = vpop.permute.xlu0 %3382  ;;  %3668 = vrot.lane.b32.xlu1 %v10620_v54, %s8597_s30  ;;  %3576 = vrot.lane.b32.xlu0 %v13484_v53, %s8596_s28 }
 0x468   : > { %v3281_v6 = vpop.permute.xlu1 %3280  ;;  %3416 = vst.msk [vmem:[#allocation5 + $0x70] sm:$0xff] %vm1097_vm3, %v3383_v11 }
 0x469   : > { %3317 = vst.msk [vmem:[#allocation5 + $0x58] sm:$0xff] %vm1000_vm2, %v3281_v6 }
 0x46a   : > { %v2853_v43 = vld [vmem:[#allocation5 + $0x78] sm:$0xff] }
 0x46b   : > { %3225 = vst.msk [vmem:[#allocation5 + $0x78] sm:$0xff] %vm254_vm0, %v10761_v16  ;;  %v3651_v50 = vpop.permute.xlu0 %3650  ;;  %3478 = vrot.lane.b32.xlu1 %v10761_v16, %s8595_s27  ;;  %3956 = vrot.lane.b32.xlu0 %v10759_v18, %s8594_s13 }
 0x46c   : > { %v3377_v46 = vpop.permute.xlu1 %3376  ;;  %v2851_v60 = vld [vmem:[#allocation5 + $0x68] sm:$0xff]  ;;  %3694 = vst.msk [vmem:[#allocation5 + $0x20] sm:$0xff] %vm1388_vm6, %v3651_v50 }
 0x46d   : > { %3413 = vst.msk [vmem:[#allocation5 + $0x58] sm:$0xff] %vm1097_vm3, %v3377_v46  ;;  %8239 = vmatmul.mubr.msk.f32.gmra.mrb[28].mxu1 %vm1722_vm10, %v2851_v60 }
 0x46e   : > { %3223 = vst.msk [vmem:[#allocation5 + $0x68] sm:$0xff] %vm254_vm0, %v10713_v49  ;;  %8241 = vmatprep.mubr.msk.f32.mxu1 %vm1722_vm10, %v2852_v62 }
 0x46f   : > { %v3653_v40 = vpop.permute.xlu0 %3652  ;;  %3858 = vrot.lane.b32.xlu1 %v10618_v44, %s8592_s11  ;;  %3766 = vrot.lane.b32.xlu0 %v10751_v51, %s8590_s9  ;;  %v13485_v44 = vld [vmem:[#allocation70_spill] sm:$0xff] }
 0x470   : > { %v3937_v37 = vpop.permute.xlu1 %3936  ;;  %3695 = vst.msk [vmem:[#allocation5 + $0x28] sm:$0xff] %vm1388_vm6, %v3653_v40 }
 0x471   : > { %3981 = vst.msk [vmem:[#allocation5 + $0x18] sm:$0xff] %vm1680_vm9, %v3937_v37  ;;  %8242 = vmatmul.mubr.msk.f32.gmra.mrb[30].mxu1 %vm1722_vm10, %v2853_v43 }
 0x473   : > { %v3749_v49 = vpop.permute.xlu0 %3748  ;;  %3574 = vrot.lane.b32.xlu1 %v10757_v36, %s8596_s28  ;;  %3862 = vrot.lane.b32.xlu0 %v13484_v53, %s8592_s11 }
 0x474   : > { %v3747_v16 = vpop.permute.xlu1 %3746  ;;  %3791 = vst.msk [vmem:[#allocation5 + $0x28] sm:$0xff] %vm1486_vm7, %v3749_v49 }
 0x475   : > { %3790 = vst.msk [vmem:[#allocation5 + $0x20] sm:$0xff] %vm1486_vm7, %v3747_v16 }
 0x477   : > { %v3559_v57 = vpop.permute.xlu0 %3558  ;;  %3954 = vrot.lane.b32.xlu1 %v10620_v54, %s8594_s13  ;;  %3958 = vrot.lane.b32.xlu0 %v13485_v44, %s8594_s13 }
 0x478   : > { %v3285_v58 = vpop.permute.xlu1 %3284  ;;  %v3997_v15 = vld [vmem:[#allocation5 + $0x18] sm:$0xff]  ;;  %3600 = vst.msk [vmem:[#allocation5 + $0x30] sm:$0xff] %vm1291_vm5, %v3559_v57 }
 0x479   : > { %3319 = vst.msk [vmem:[#allocation5 + $0x68] sm:$0xff] %vm1000_vm2, %v3285_v58  ;;  %8266 = vmatmul.mubr.msk.f32.gmra.mrb[34].mxu0 %vm1722_vm10, %v3997_v15 }
 0x47b   : > { %v3939_v51 = vpop.permute.xlu0 %3938  ;;  %3670 = vrot.lane.b32.xlu1 %v10759_v18, %s8597_s30  ;;  %4398 = vrot.lane.b32.xlu0 %v11031_v42, %s8591_s10  ;;  %v13486_v42 = vld [vmem:[#allocation53_spill] sm:$0xff] }
 0x47c   : > { %v3381_v36 = vpop.permute.xlu1 %3380 }
 0x47d   : > { %3415 = vst.msk [vmem:[#allocation5 + $0x68] sm:$0xff] %vm1097_vm3, %v3381_v36 }
 0x47f   : > { %v3655_v17 = vpop.permute.xlu0 %3654  ;;  %3672 = vrot.lane.b32.xlu1 %v13485_v44, %s8597_s30  ;;  %4414 = vrot.lane.b32.xlu0 %v11043_v1, %s8591_s10 }
 0x480   : > { %v3289_v22 = vpop.permute.xlu1 %3288  ;;  %3696 = vst.msk [vmem:[#allocation5 + $0x30] sm:$0xff] %vm1388_vm6, %v3655_v17 }
 0x481   : > { %3321 = vst.msk [vmem:[#allocation5 + $0x78] sm:$0xff] %vm1000_vm2, %v3289_v22  ;;  %v13492_v22 = vld [vmem:[#allocation27_spill] sm:$0xff] }
 0x483   : > { %v3657_v26 = vpop.permute.xlu0 %3656  ;;  %3768 = vrot.lane.b32.xlu1 %v13486_v42, %s8590_s9  ;;  %4494 = vrot.lane.b32.xlu0 %v11033_v13, %s8593_s12  ;;  %v13493_v42 = vld [vmem:[#allocation28_spill] sm:$0xff] }
 0x484   : > { %v11227_v54 = vpop.f32.mrb[20].mxu1  ;;  %v3385_v14 = vpop.permute.xlu1 %3384 }
 0x485   : > { %3417 = vst.msk [vmem:[#allocation5 + $0x78] sm:$0xff] %vm1097_vm3, %v3385_v14  ;;  %v11230_v18 = vpop.f32.mrb[21].mxu1 }
 0x487   : > { %v3753_v20 = vpop.permute.xlu0 %3752  ;;  %3864 = vrot.lane.b32.xlu1 %v13487_v10, %s8592_s11  ;;  %4510 = vrot.lane.b32.xlu0 %v11045_v61, %s8593_s12 }
 0x488   : > { %v11236_v33 = vpop.f32.mrb[22].mxu1  ;;  %v3843_v8 = vpop.permute.xlu1 %3842 }
 0x489   : > { %3886 = vst.msk [vmem:[#allocation5 + $0x20] sm:$0xff] %vm1583_vm8, %v3843_v8  ;;  %v11239_v1 = vpop.f32.mrb[23].mxu1 }
 0x48a   : > { %3982 = vst.msk [vmem:[#allocation5 + $0x20] sm:$0xff] %vm1680_vm9, %v3939_v51 }
 0x48b   : > { %v3469_v13 = vpop.permute.xlu0 %3468  ;;  %3960 = vrot.lane.b32.xlu1 %v13488_v55, %s8594_s13  ;;  %5084 = vrot.lane.b32.xlu0 %v13489_v19, %s8594_s13 }
 0x48c   : > { %v3845_v39 = vpop.permute.xlu1 %3844  ;;  %3507 = vst.msk [vmem:[#allocation5 + $0x48] sm:$0xff] %vm1194_vm4, %v3469_v13 }
 0x48d   : > { %3887 = vst.msk [vmem:[#allocation5 + $0x28] sm:$0xff] %vm1583_vm8, %v3845_v39 }
 0x48f   : > { %v3849_v31 = vpop.permute.xlu0 %3848  ;;  %4892 = vrot.lane.b32.xlu1 %v13490_v38, %s8590_s9 }
 0x490   : > { %v3561_v0 = vpop.permute.xlu1 %3560 }
 0x491   : > { %3601 = vst.msk [vmem:[#allocation5 + $0x38] sm:$0xff] %vm1291_vm5, %v3561_v0  ;;  %v3998_v61 = vld [vmem:[#allocation5 + $0x20] sm:$0xff] }
 0x492   : > { %3697 = vst.msk [vmem:[#allocation5 + $0x38] sm:$0xff] %vm1388_vm6, %v3657_v26  ;;  %8268 = vmatprep.mubr.msk.f32.mxu0 %vm1722_vm10, %v3998_v61 }
 0x493   : > { %3793 = vst.msk [vmem:[#allocation5 + $0x38] sm:$0xff] %vm1486_vm7, %v3753_v20  ;;  %v3565_v28 = vpop.permute.xlu0 %3564  ;;  %4988 = vrot.lane.b32.xlu1 %v13491_v12, %s8592_s11 }
 0x494   : > { %3889 = vst.msk [vmem:[#allocation5 + $0x38] sm:$0xff] %vm1583_vm8, %v3849_v31  ;;  %v3941_v35 = vpop.permute.xlu1 %3940 }
 0x495   : > { %3603 = vst.msk [vmem:[#allocation5 + $0x48] sm:$0xff] %vm1291_vm5, %v3565_v28  ;;  %v13494_v28 = vld [vmem:[#allocation9_spill] sm:$0xff] }
 0x496   : > { %3983 = vst.msk [vmem:[#allocation5 + $0x28] sm:$0xff] %vm1680_vm9, %v3941_v35 }
 0x497   : > { %v3945_v32 = vpop.permute.xlu0 %3944 }
 0x498   : > { %v3751_v34 = vpop.permute.xlu1 %3750  ;;  %3985 = vst.msk [vmem:[#allocation5 + $0x38] sm:$0xff] %vm1680_vm9, %v3945_v32 }
 0x499   : > { %3792 = vst.msk [vmem:[#allocation5 + $0x30] sm:$0xff] %vm1486_vm7, %v3751_v34 }
 0x49b   : > { %v3755_v23 = vpop.permute.xlu0 %3754 }
 0x49c   : > { %v3847_v41 = vpop.permute.xlu1 %3846 }
 0x49d   : > { %v3999_v24 = vld [vmem:[#allocation5 + $0x28] sm:$0xff]  ;;  %3888 = vst.msk [vmem:[#allocation5 + $0x30] sm:$0xff] %vm1583_vm8, %v3847_v41 }
 0x49e   : > { %8269 = vmatmul.mubr.msk.f32.gmra.mrb[36].mxu0 %vm1722_vm10, %v3999_v24 }
 0x49f   : > { %v3757_v7 = vpop.permute.xlu0 %3756  ;;  %v4001_v60 = vld [vmem:[#allocation5 + $0x38] sm:$0xff] }
 0x4a0   : > { %v3563_v56 = vpop.permute.xlu1 %3562 }
 0x4a1   : > { %3602 = vst.msk [vmem:[#allocation5 + $0x40] sm:$0xff] %vm1291_vm5, %v3563_v56 }
 0x4a3   : > { %v3473_v59 = vpop.permute.xlu0 %3472 }
 0x4a4   : > { %v8264_v3 = vpop.f32.mrb[32].mxu0  ;;  %v3943_v62 = vpop.permute.xlu1 %3942  ;;  %3509 = vst.msk [vmem:[#allocation5 + $0x58] sm:$0xff] %vm1194_vm4, %v3473_v59 }
 0x4a5   : > { %v4218_v45 = vmul.f32 %v8264_v3, %v11275_v9  ;;  %3984 = vst.msk [vmem:[#allocation5 + $0x30] sm:$0xff] %vm1680_vm9, %v3943_v62  ;;  %v4133_v2 = vpop.f32.mrb[33].mxu0 }
 0x4a6   : > { %v4217_v43 = vmul.f32 %v11275_v9, %v4133_v2 }
 0x4a7   : > { %v4239_v4 = vadd.f32 %v11280_v30, %v4218_v45  ;;  %v3853_v53 = vpop.permute.xlu0 %3852 }
 0x4a8   : > { %v4238_v6 = vadd.f32 %v11280_v30, %v4217_v43  ;;  %v3659_v50 = vpop.permute.xlu1 %3658 }
 0x4a9   : > { %v4255_v11 = vmax.f32 %v4239_v4, 0.0  ;;  %3698 = vst.msk [vmem:[#allocation5 + $0x40] sm:$0xff] %vm1388_vm6, %v3659_v50  ;;  %v13496_v50 = vmax.f32 %v13493_v42, 0.0 }
 0x4aa   : > { %v4254_v46 = vmax.f32 %v4238_v6, 0.0  ;;  %3794 = vst.msk [vmem:[#allocation5 + $0x40] sm:$0xff] %vm1486_vm7, %v3755_v23  ;;  %v13495_v23 = vld [vmem:[#allocation10_spill] sm:$0xff] }
 0x4ab   : > { %4319 = vst.msk [vmem:[#allocation4 + $0x21] sm:$0xff] %vm254_vm0, %v4255_v11  ;;  %v3569_v40 = vpop.permute.xlu0 %3568 }
 0x4ac   : > { %4318 = vst.msk [vmem:[#allocation4 + $0x11] sm:$0xff] %vm254_vm0, %v4254_v46  ;;  %v3661_v37 = vpop.permute.xlu1 %3660  ;;  %v4000_v49 = vld [vmem:[#allocation5 + $0x30] sm:$0xff] }
 0x4ad   : > { %3605 = vst.msk [vmem:[#allocation5 + $0x58] sm:$0xff] %vm1291_vm5, %v3569_v40  ;;  %8271 = vmatprep.mubr.msk.f32.mxu0 %vm1722_vm10, %v4000_v49 }
 0x4ae   : > { %3699 = vst.msk [vmem:[#allocation5 + $0x48] sm:$0xff] %vm1388_vm6, %v3661_v37  ;;  %8272 = vmatmul.mubr.msk.f32.gmra.mrb[38].mxu0 %vm1722_vm10, %v4001_v60 }
 0x4af   : > { %3795 = vst.msk [vmem:[#allocation5 + $0x48] sm:$0xff] %vm1486_vm7, %v3757_v7  ;;  %v3949_v16 = vpop.permute.xlu0 %3948 }
 0x4b0   : > { %3891 = vst.msk [vmem:[#allocation5 + $0x48] sm:$0xff] %vm1583_vm8, %v3853_v53  ;;  %v3471_v57 = vpop.permute.xlu1 %3470 }
 0x4b1   : > { %3987 = vst.msk [vmem:[#allocation5 + $0x48] sm:$0xff] %vm1680_vm9, %v3949_v16 }
 0x4b2   : > { %3508 = vst.msk [vmem:[#allocation5 + $0x50] sm:$0xff] %vm1194_vm4, %v3471_v57  ;;  %v4368_v58 = vld [vmem:[#allocation4 + $0x21] sm:$0xff] }
 0x4b3   : > { %v4559_v15 = vld [vmem:[#allocation4 + $0x20] sm:$0xff]  ;;  %4402 = vrot.lane.b32.xlu0 %v4368_v58, %s8591_s10  ;;  %v11307_v51 = vld [vmem:[#allocation4 + $0x11] sm:$0xff]  ;;  %v3759_v26 = vpop.permute.xlu0 %3758 }
 0x4b4   : > { %v4464_v44 = vld [vmem:[#allocation4 + $0x22] sm:$0xff]  ;;  %4592 = vrot.lane.b32.xlu1 %v4559_v15, %s8595_s27  ;;  %4352 = vst.msk [vmem:[#allocation5 + $0x10] sm:$0xff] %vm254_vm0, %v4559_v15  ;;  %v11309_v36 = vld [vmem:[#allocation4 + $0x12] sm:$0xff]  ;;  %v3851_v14 = vpop.permute.xlu1 %3850 }
 0x4b5   : > { %5463 = vst.msk [vmem:[#allocation4 + $0x28] sm:$0xf] %vm823_vm1, %v13478_v29  ;;  %v11311_v17 = vld [vmem:[#allocation4 + $0x10] sm:$0xff]  ;;  %5461 = vst.msk [vmem:[#allocation4 + $0x18] sm:$0xf] %vm823_vm1, %v13478_v29 }
 0x4b6   : > { %5462 = vst.msk [vmem:[#allocation4 + $0x20] sm:$0xff] %vm254_vm0, %v13478_v29  ;;  %4351 = vst.msk [vmem:[#allocation5 + $0x8] sm:$0xff] %vm254_vm0, %v11311_v17 }
 0x4b7   : > { %5507 = vst.msk [vmem:[#allocation4 + $0x21] sm:$0xff] %vm254_vm0, %v13492_v22  ;;  %5460 = vst.msk [vmem:[#allocation4 + $0x10] sm:$0xff] %vm254_vm0, %v13478_v29  ;;  %4498 = vrot.lane.b32.xlu0 %v4464_v44, %s8593_s12  ;;  %v3761_v20 = vpop.permute.xlu0 %3760 }
 0x4b8   : > { %3890 = vst.msk [vmem:[#allocation5 + $0x40] sm:$0xff] %vm1583_vm8, %v3851_v14  ;;  %4688 = vrot.lane.b32.xlu1 %v4368_v58, %s8596_s28  ;;  %v3567_v8 = vpop.permute.xlu1 %3566 }
 0x4b9   : > { %5506 = vst.msk [vmem:[#allocation4 + $0x11] sm:$0xff] %vm254_vm0, %v13493_v42 }
 0x4ba   : > { %3604 = vst.msk [vmem:[#allocation5 + $0x50] sm:$0xff] %vm1291_vm5, %v3567_v8 }
 0x4bb   : > { %4878 = vrot.lane.b32.xlu0 %v4559_v15, %s8590_s9  ;;  %v3477_v19 = vpop.permute.xlu0 %3476 }
 0x4bc   : > { %4784 = vrot.lane.b32.xlu1 %v4464_v44, %s8597_s30  ;;  %v3947_v31 = vpop.permute.xlu1 %3946  ;;  %3511 = vst.msk [vmem:[#allocation5 + $0x68] sm:$0xff] %vm1194_vm4, %v3477_v19 }
 0x4bd   : > { %3986 = vst.msk [vmem:[#allocation5 + $0x40] sm:$0xff] %vm1680_vm9, %v3947_v31 }
 0x4be   : > { %v5682_v10 = vld [vmem:[#allocation4 + $0x20] sm:$0xff] }
 0x4bf   : > { %v5698_v13 = vld [vmem:[#allocation4 + $0x21] sm:$0xff]  ;;  %4974 = vrot.lane.b32.xlu0 %v4368_v58, %s8592_s11  ;;  %v3857_v24 = vpop.permute.xlu0 %3856 }
 0x4c0   : > { %v5730_v39 = vld [vmem:[#allocation4 + $0x22] sm:$0xff]  ;;  %v5714_v55 = vmax.f32 %v5682_v10, %v5698_v13  ;;  %v5539_v0 = vld [vmem:[#allocation4 + $0x11] sm:$0xff]  ;;  %4400 = vrot.lane.b32.xlu1 %v11307_v51, %s8591_s10  ;;  %v3663_v7 = vpop.permute.xlu1 %3662 }
 0x4c1   : > { %5910 = vst.msk [vmem:[#allocation4 + $0x20] sm:$0xff] %vm254_vm0, %v13428_v63  ;;  %v5523_v61 = vld [vmem:[#allocation4 + $0x10] sm:$0xff] }
 0x4c2   : > { %5911 = vst.msk [vmem:[#allocation4 + $0x28] sm:$0xf] %vm823_vm1, %v13428_v63  ;;  %v5571_v38 = vld [vmem:[#allocation4 + $0x12] sm:$0xff]  ;;  %v11337_v12 = vmax.f32 %v5714_v55, %v5730_v39  ;;  %v5555_v32 = vmax.f32 %v5523_v61, %v5539_v0 }
 0x4c3   : > { %5955 = vst.msk [vmem:[#allocation4 + $0x21] sm:$0xff] %vm254_vm0, %v13494_v28  ;;  %v5618_v35 = vld [vmem:[#allocation4 + $0x11] sm:$0xff]  ;;  %5070 = vrot.lane.b32.xlu0 %v4464_v44, %s8594_s13  ;;  %v3573_v4 = vpop.permute.xlu0 %3572 }
 0x4c4   : > { %v5634_v34 = vmax.f32 %v5523_v61, %v5618_v35  ;;  %5908 = vst.msk [vmem:[#allocation4 + $0x10] sm:$0xff] %vm254_vm0, %v13428_v63  ;;  %v11348_v41 = vmax.f32 %v5555_v32, %v5571_v38  ;;  %4496 = vrot.lane.b32.xlu1 %v11309_v36, %s8593_s12  ;;  %v3665_v43 = vpop.permute.xlu1 %3664  ;;  %v4002_v11 = vld [vmem:[#allocation5 + $0x40] sm:$0xff] }
 0x4c5   : > { %5909 = vst.msk [vmem:[#allocation4 + $0x18] sm:$0xf] %vm823_vm1, %v13428_v63  ;;  %8274 = vmatprep.mubr.msk.f32.mxu0 %vm1722_vm10, %v4002_v11 }
 0x4c6   : > { %5954 = vst.msk [vmem:[#allocation4 + $0x11] sm:$0xff] %vm254_vm0, %v13495_v23  ;;  %v5666_v56 = vmax.f32 %v5634_v34, %v5571_v38  ;;  %v5763_v3 = vmax.f32 %v11348_v41, %v11337_v12  ;;  %4358 = vst.msk [vmem:[#allocation5 + $0x40] sm:$0xff] %vm254_vm0, %v11243_v48 }
 0x4c7   : > { %3700 = vst.msk [vmem:[#allocation5 + $0x50] sm:$0xff] %vm1388_vm6, %v3663_v7  ;;  %3701 = vst.msk [vmem:[#allocation5 + $0x58] sm:$0xff] %vm1388_vm6, %v3665_v43  ;;  %4590 = vrot.lane.b32.xlu0 %v11311_v17, %s8595_s27  ;;  %v3953_v49 = vpop.permute.xlu0 %3952 }
 0x4c8   : > { %3796 = vst.msk [vmem:[#allocation5 + $0x50] sm:$0xff] %vm1486_vm7, %v3759_v26  ;;  %v5762_v45 = vmax.f32 %v11098_v47, %v5666_v56  ;;  %v4003_v47 = vld [vmem:[#allocation5 + $0x48] sm:$0xff]  ;;  %3797 = vst.msk [vmem:[#allocation5 + $0x58] sm:$0xff] %vm1486_vm7, %v3761_v20  ;;  %v3475_v16 = vpop.permute.xlu1 %3474 }
 0x4c9   : > { %3607 = vst.msk [vmem:[#allocation5 + $0x68] sm:$0xff] %vm1291_vm5, %v3573_v4  ;;  %8275 = vmatmul.mubr.msk.f32.gmra.mrb[40].mxu0 %vm1722_vm10, %v4003_v47 }
 0x4ca   : > { %v5988_v59 = vld [vmem:[#allocation4 + $0x21] sm:$0xff]  ;;  %v11359_v6 = vmax.f32 %v5762_v45, %v11337_v12  ;;  %3893 = vst.msk [vmem:[#allocation5 + $0x58] sm:$0xff] %vm1583_vm8, %v3857_v24 }
 0x4cb   : > { %v6020_v62 = vld [vmem:[#allocation4 + $0x22] sm:$0xff]  ;;  %3989 = vst.msk [vmem:[#allocation5 + $0x58] sm:$0xff] %vm1680_vm9, %v3953_v49  ;;  %4686 = vrot.lane.b32.xlu0 %v11307_v51, %s8596_s28  ;;  %v3763_v44 = vpop.permute.xlu0 %3762 }
 0x4cc   : > { %v5972_v2 = vld [vmem:[#allocation4 + $0x20] sm:$0xff]  ;;  %6421 = vst.msk [vmem:[#allocation4 + $0x28] sm:$0xf] %vm823_vm1, %v13428_v63  ;;  %v3855_v17 = vpop.permute.xlu1 %3854 }
 0x4cd   : > { %6420 = vst.msk [vmem:[#allocation4 + $0x20] sm:$0xff] %vm254_vm0, %v13428_v63  ;;  %v6162_v53 = vadd.f32 %v5988_v59, %v5972_v2  ;;  %v6019_v46 = vld [vmem:[#allocation4 + $0x12] sm:$0xff] }
 0x4ce   : > { %6464 = vst.msk [vmem:[#allocation4 + $0x22] sm:$0xff] %vm254_vm0, %v13496_v50  ;;  %v5971_v60 = vld [vmem:[#allocation4 + $0x10] sm:$0xff] }
 0x4cf   : > { %v5987_v40 = vld [vmem:[#allocation4 + $0x11] sm:$0xff]  ;;  %v11377_v37 = vadd.f32 %v6162_v53, %v6020_v62  ;;  %3510 = vst.msk [vmem:[#allocation5 + $0x60] sm:$0xff] %vm1194_vm4, %v3475_v16  ;;  %4782 = vrot.lane.b32.xlu0 %v11309_v36, %s8597_s30  ;;  %v3765_v14 = vpop.permute.xlu0 %3764 }
 0x4d0   : > { %6418 = vst.msk [vmem:[#allocation4 + $0x10] sm:$0xff] %vm254_vm0, %v13428_v63  ;;  %v6082_v48 = vadd.f32 %v5987_v40, %v5971_v60  ;;  %v3571_v42 = vpop.permute.xlu1 %3570 }
 0x4d1   : > { %6419 = vst.msk [vmem:[#allocation4 + $0x18] sm:$0xf] %vm823_vm1, %v13428_v63 }
 0x4d2   : > { %v6114_v57 = vadd.f32 %v6082_v48, %v6019_v46  ;;  %3892 = vst.msk [vmem:[#allocation5 + $0x50] sm:$0xff] %vm1583_vm8, %v3855_v17  ;;  %v4005_v36 = vld [vmem:[#allocation5 + $0x58] sm:$0xff] }
 0x4d3   : > { %3606 = vst.msk [vmem:[#allocation5 + $0x60] sm:$0xff] %vm1291_vm5, %v3571_v42  ;;  %v3481_v51 = vpop.permute.xlu0 %3480 }
 0x4d4   : > { %v6210_v58 = vadd.f32 %v6114_v57, %v11123_v5  ;;  %v11390_v15 = vadd.f32 %v11377_v37, %v6114_v57  ;;  %v3951_v20 = vpop.permute.xlu1 %3950  ;;  %3513 = vst.msk [vmem:[#allocation5 + $0x78] sm:$0xff] %vm1194_vm4, %v3481_v51  ;;  %v5530_v51 = vld [vmem:[#allocation4 + $0xc0] sm:$0xff] }
 0x4d5   : > { %3988 = vst.msk [vmem:[#allocation5 + $0x50] sm:$0xff] %vm1680_vm9, %v3951_v20  ;;  %v5546_v20 = vld [vmem:[#allocation4 + $0xc1] sm:$0xff] }
 0x4d6   : > { %v11394_v26 = vadd.f32 %v6210_v58, %v11377_v37 }
 0x4d7   : > { %v3861_v5 = vpop.permute.xlu0 %3860 }
 0x4d8   : > { %v3667_v8 = vpop.permute.xlu1 %3666 }
 0x4d9   : > { %3702 = vst.msk [vmem:[#allocation5 + $0x60] sm:$0xff] %vm1388_vm6, %v3667_v8 }
 0x4da   : > { %3798 = vst.msk [vmem:[#allocation5 + $0x60] sm:$0xff] %vm1486_vm7, %v3763_v44 }
 0x4db   : > { %v3577_v10 = vpop.permute.xlu0 %3576 }
 0x4dc   : > { %v3669_v13 = vpop.permute.xlu1 %3668  ;;  %v4004_v39 = vld [vmem:[#allocation5 + $0x50] sm:$0xff]  ;;  %3609 = vst.msk [vmem:[#allocation5 + $0x78] sm:$0xff] %vm1291_vm5, %v3577_v10  ;;  %v5562_v10 = vmax.f32 %v5530_v51, %v5546_v20 }
 0x4dd   : > { %3703 = vst.msk [vmem:[#allocation5 + $0x68] sm:$0xff] %vm1388_vm6, %v3669_v13  ;;  %8277 = vmatprep.mubr.msk.f32.mxu0 %vm1722_vm10, %v4004_v39  ;;  %v5578_v13 = vld [vmem:[#allocation4 + $0xc2] sm:$0xff]  ;;  %v5151_v51 = vld [vmem:[%s13332_s2 + $0xf0] sm:$0xff] }
 0x4de   : > { %3799 = vst.msk [vmem:[#allocation5 + $0x68] sm:$0xff] %vm1486_vm7, %v3765_v14  ;;  %8278 = vmatmul.mubr.msk.f32.gmra.mrb[42].mxu0 %vm1722_vm10, %v4005_v36  ;;  %v11453_v39 = vmax.f32 %v5562_v10, %v5578_v13 }
 0x4df   : > { %3895 = vst.msk [vmem:[#allocation5 + $0x68] sm:$0xff] %vm1583_vm8, %v3861_v5  ;;  %v3957_v55 = vpop.permute.xlu0 %3956 }
 0x4e0   : > { %v3479_v19 = vpop.permute.xlu1 %3478  ;;  %3991 = vst.msk [vmem:[#allocation5 + $0x68] sm:$0xff] %vm1680_vm9, %v3957_v55 }
 0x4e1   : > { %3512 = vst.msk [vmem:[#allocation5 + $0x70] sm:$0xff] %vm1194_vm4, %v3479_v19 }
 0x4e2   : > { %5930 = vst.msk [vmem:[#allocation4 + $0xc0] sm:$0xff] %vm254_vm0, %v13428_v63 }
 0x4e3   : > { %v3767_v31 = vpop.permute.xlu0 %3766  ;;  %5931 = vst.msk [vmem:[#allocation4 + $0xc8] sm:$0xf] %vm823_vm1, %v13428_v63 }
 0x4e4   : > { %v3859_v0 = vpop.permute.xlu1 %3858 }
 0x4e5   : > { %3894 = vst.msk [vmem:[#allocation5 + $0x60] sm:$0xff] %vm1583_vm8, %v3859_v0 }
 0x4e7   : > { %v3863_v61 = vpop.permute.xlu0 %3862  ;;  %v4007_v59 = vld [vmem:[#allocation5 + $0x68] sm:$0xff] }
 0x4e8   : > { %v3575_v38 = vpop.permute.xlu1 %3574 }
 0x4e9   : > { %3608 = vst.msk [vmem:[#allocation5 + $0x70] sm:$0xff] %vm1291_vm5, %v3575_v38  ;;  %v5978_v19 = vld [vmem:[#allocation4 + $0xc0] sm:$0xff] }
 0x4ea   : > { %v6026_v0 = vld [vmem:[#allocation4 + $0xc2] sm:$0xff] }
 0x4eb   : > { %v3959_v35 = vpop.permute.xlu0 %3958 }
 0x4ec   : > { %v11413_v28 = vpop.f32.mrb[24].mxu1  ;;  %v3955_v32 = vpop.permute.xlu1 %3954 }
 0x4ed   : > { %3990 = vst.msk [vmem:[#allocation5 + $0x60] sm:$0xff] %vm1680_vm9, %v3955_v32  ;;  %v11416_v34 = vpop.f32.mrb[25].mxu1 }
 0x4ef   : > { %v4399_v24 = vpop.permute.xlu0 %4398 }
 0x4f0   : > { %v3671_v23 = vpop.permute.xlu1 %3670  ;;  %4446 = vst.msk [vmem:[#allocation5] sm:$0xff] %vm1000_vm2, %v4399_v24 }
 0x4f1   : > { %3704 = vst.msk [vmem:[#allocation5 + $0x70] sm:$0xff] %vm1388_vm6, %v3671_v23 }
 0x4f2   : > { %3800 = vst.msk [vmem:[#allocation5 + $0x70] sm:$0xff] %vm1486_vm7, %v3767_v31  ;;  %v5994_v31 = vld [vmem:[#allocation4 + $0xc1] sm:$0xff] }
 0x4f3   : > { %3896 = vst.msk [vmem:[#allocation5 + $0x70] sm:$0xff] %vm1583_vm8, %v3863_v61  ;;  %v4415_v45 = vpop.permute.xlu0 %4414  ;;  %v6010_v61 = vadd.f32 %v5994_v31, %v5978_v19 }
 0x4f4   : > { %3992 = vst.msk [vmem:[#allocation5 + $0x70] sm:$0xff] %vm1680_vm9, %v3959_v35  ;;  %v3673_v7 = vpop.permute.xlu1 %3672  ;;  %v4006_v56 = vld [vmem:[#allocation5 + $0x60] sm:$0xff] }
 0x4f5   : > { %3705 = vst.msk [vmem:[#allocation5 + $0x78] sm:$0xff] %vm1388_vm6, %v3673_v7  ;;  %8280 = vmatprep.mubr.msk.f32.mxu0 %vm1722_vm10, %v4006_v56  ;;  %v11468_v23 = vadd.f32 %v6026_v0, %v6010_v61 }
 0x4f6   : > { %4454 = vst.msk [vmem:[#allocation5 + $0x40] sm:$0xff] %vm1000_vm2, %v4415_v45  ;;  %8281 = vmatmul.mubr.msk.f32.gmra.mrb[44].mxu0 %vm1722_vm10, %v4007_v59 }
 0x4f7   : > { %v4495_v2 = vpop.permute.xlu0 %4494  ;;  %6440 = vst.msk [vmem:[#allocation4 + $0xc0] sm:$0xff] %vm254_vm0, %v13428_v63 }
 0x4f8   : > { %v3769_v62 = vpop.permute.xlu1 %3768  ;;  %4542 = vst.msk [vmem:[#allocation5] sm:$0xff] %vm1097_vm3, %v4495_v2 }
 0x4f9   : > { %3801 = vst.msk [vmem:[#allocation5 + $0x78] sm:$0xff] %vm1486_vm7, %v3769_v62 }
 0x4fa   : > { %6441 = vst.msk [vmem:[#allocation4 + $0xc8] sm:$0xf] %vm823_vm1, %v13428_v63 }
 0x4fb   : > { %v4008_v4 = vld [vmem:[#allocation5 + $0x70] sm:$0xff]  ;;  %v4511_v11 = vpop.permute.xlu0 %4510 }
 0x4fc   : > { %8283 = vmatprep.mubr.msk.f32.mxu0 %vm1722_vm10, %v4008_v4  ;;  %v3865_v43 = vpop.permute.xlu1 %3864  ;;  %4550 = vst.msk [vmem:[#allocation5 + $0x40] sm:$0xff] %vm1097_vm3, %v4511_v11 }
 0x4fd   : > { %3897 = vst.msk [vmem:[#allocation5 + $0x78] sm:$0xff] %vm1583_vm8, %v3865_v43 }
 0x4ff   : > { %v11440_v40 = vpop.permute.xlu0 %5084 }
 0x500   : > { %v3961_v53 = vpop.permute.xlu1 %3960 }
 0x501   : > { %3993 = vst.msk [vmem:[#allocation5 + $0x78] sm:$0xff] %vm1680_vm9, %v3961_v53 }
 0x504   : > { %v11436_v46 = vpop.permute.xlu1 %4892 }
 0x508   : > { %v4009_v47 = vld [vmem:[#allocation5 + $0x78] sm:$0xff]  ;;  %v11442_v48 = vpop.permute.xlu1 %4988 }
 0x509   : > { %8284 = vmatmul.mubr.msk.f32.gmra.mrb[46].mxu0 %vm1722_vm10, %v4009_v47 }
 0x518   : > { %v11434_v50 = vpop.f32.mrb[26].mxu1 }
 0x519   : > { %13497 = vst [vmem:[#allocation47_spill] sm:$0xff] %v11434_v50  ;;  %v11438_v60 = vpop.f32.mrb[27].mxu1 }
 0x51a   : > { %13498 = vst [vmem:[#allocation33_spill] sm:$0xff] %v11438_v60 }
 0x525   : > { %v4403_v49 = vpop.permute.xlu0 %4402 }
 0x526   : > { %v4593_v16 = vpop.permute.xlu1 %4592  ;;  %4448 = vst.msk [vmem:[#allocation5 + $0x10] sm:$0xff] %vm1000_vm2, %v4403_v49 }
 0x529   : > { %v4499_v57 = vpop.permute.xlu0 %4498 }
 0x52a   : > { %v4689_v58 = vpop.permute.xlu1 %4688  ;;  %4544 = vst.msk [vmem:[#allocation5 + $0x10] sm:$0xff] %vm1097_vm3, %v4499_v57 }
 0x52d   : > { %v4879_v44 = vpop.permute.xlu0 %4878 }
 0x52e   : > { %v4785_v17 = vpop.permute.xlu1 %4784 }
 0x531   : > { %v4975_v14 = vpop.permute.xlu0 %4974 }
 0x532   : > { %v4401_v42 = vpop.permute.xlu1 %4400 }
 0x533   : > { %4447 = vst.msk [vmem:[#allocation5 + $0x8] sm:$0xff] %vm1000_vm2, %v4401_v42  ;;  %v5150_v42 = vld [vmem:[%s13332_s2 + $0xe8] sm:$0xff] }
 0x534   : > { %v8418_v20 = vpack.c.bf16 %v5151_v51, %v5150_v42  ;;  %v5157_v42 = vld [vmem:[%s13332_s2 + $0x120] sm:$0xff] }
 0x535   : > { %v5071_v5 = vpop.permute.xlu0 %5070 }
 0x536   : > { %v4497_v8 = vpop.permute.xlu1 %4496  ;;  %8419 = vmatprep.subr.bf16.mxu1 %v8418_v20 }
 0x537   : > { %4543 = vst.msk [vmem:[#allocation5 + $0x8] sm:$0xff] %vm1097_vm3, %v4497_v8  ;;  %8421 = vmatpush3.bf16.msra.mxu1 %v8418_v20  ;;  %v5153_v8 = vld [vmem:[%s13332_s2 + $0x100] sm:$0xff] }
 0x538   : > { %4639 = vst.msk [vmem:[#allocation5 + $0x8] sm:$0xff] %vm1194_vm4, %v4593_v16 }
 0x539   : > { %4735 = vst.msk [vmem:[#allocation5 + $0x8] sm:$0xff] %vm1291_vm5, %v4689_v58  ;;  %v4591_v36 = vpop.permute.xlu0 %4590 }
 0x53a   : > { %4831 = vst.msk [vmem:[#allocation5 + $0x8] sm:$0xff] %vm1388_vm6, %v4785_v17  ;;  %v13503_v17 = vld [vmem:[#allocation29_spill] sm:$0xff] }
 0x53b   : > { %4638 = vst.msk [vmem:[#allocation5] sm:$0xff] %vm1194_vm4, %v4591_v36 }
 0x53d   : > { %v4687_v55 = vpop.permute.xlu0 %4686 }
 0x53e   : > { %4734 = vst.msk [vmem:[#allocation5] sm:$0xff] %vm1291_vm5, %v4687_v55 }
 0x540   : > { %v11463_v38 = vpop.f32.mrb[28].mxu1 }
 0x541   : > { %13499 = vst [vmem:[#allocation34_spill] sm:$0xff] %v11463_v38  ;;  %v4783_v35 = vpop.permute.xlu0 %4782  ;;  %v11465_v32 = vpop.f32.mrb[29].mxu1 }
 0x542   : > { %13500 = vst [vmem:[#allocation56_spill] sm:$0xff] %v11465_v32  ;;  %4830 = vst.msk [vmem:[#allocation5] sm:$0xff] %vm1388_vm6, %v4783_v35 }
 0x543   : > { %4926 = vst.msk [vmem:[#allocation5] sm:$0xff] %vm1486_vm7, %v4879_v44 }
 0x544   : > { %5022 = vst.msk [vmem:[#allocation5] sm:$0xff] %vm1583_vm8, %v4975_v14  ;;  %v11473_v24 = vpop.f32.mrb[30].mxu1  ;;  %v13504_v14 = vld [vmem:[#allocation30_spill] sm:$0xff] }
 0x545   : > { %5118 = vst.msk [vmem:[#allocation5] sm:$0xff] %vm1680_vm9, %v5071_v5  ;;  %13501 = vst [vmem:[#allocation57_spill] sm:$0xff] %v11473_v24  ;;  %v11475_v7 = vpop.f32.mrb[31].mxu1  ;;  %v5152_v5 = vld [vmem:[%s13332_s2 + $0xf8] sm:$0xff] }
 0x546   : > { %13502 = vst [vmem:[#allocation25_spill] sm:$0xff] %v11475_v7  ;;  %v8422_v10 = vpack.c.bf16 %v5153_v8, %v5152_v5 }
 0x548   : > { %8423 = vmatprep.subr.bf16.mxu1 %v8422_v10 }
 0x549   : > { %8425 = vmatpush3.bf16.msra.mxu1 %v8422_v10 }
 0x54c   : > { %v5134_v56 = vld [vmem:[#allocation5] sm:$0xff]  ;;  %v8267_v45 = vpop.f32.mrb[34].mxu0 }
 0x54d   : > { %8304 = vmatprep.mubr.msk.f32.mxu1 %vm1722_vm10, %v5134_v56  ;;  %v4220_v59 = vmul.f32 %v8267_v45, %v11275_v9  ;;  %v4143_v62 = vpop.f32.mrb[35].mxu0  ;;  %v13505_v56 = vld [vmem:[#allocation11_spill] sm:$0xff]  ;;  %v5154_v45 = vld [vmem:[%s13332_s2 + $0x108] sm:$0xff] }
 0x54e   : > { %v4219_v2 = vmul.f32 %v11275_v9, %v4143_v62 }
 0x54f   : > { %v4241_v4 = vadd.f32 %v11280_v30, %v4220_v59  ;;  %v5155_v59 = vld [vmem:[%s13332_s2 + $0x110] sm:$0xff] }
 0x550   : > { %v4240_v43 = vadd.f32 %v11280_v30, %v4219_v2  ;;  %v13506_v2 = vld [vmem:[#allocation12_spill] sm:$0xff] }
 0x551   : > { %v4257_v11 = vmax.f32 %v4241_v4, 0.0  ;;  %v8426_v4 = vpack.c.bf16 %v5155_v59, %v5154_v45 }
 0x552   : > { %v4256_v53 = vmax.f32 %v4240_v43, 0.0 }
 0x553   : > { %4321 = vst.msk [vmem:[#allocation4 + $0x41] sm:$0xff] %vm254_vm0, %v4257_v11  ;;  %8427 = vmatprep.subr.bf16.mxu1 %v8426_v4 }
 0x554   : > { %4320 = vst.msk [vmem:[#allocation4 + $0x31] sm:$0xff] %vm254_vm0, %v4256_v53  ;;  %8429 = vmatpush3.bf16.msra.mxu1 %v8426_v4 }
 0x55a   : > { %v4370_v47 = vld [vmem:[#allocation4 + $0x41] sm:$0xff] }
 0x55b   : > { %v4561_v49 = vld [vmem:[#allocation4 + $0x40] sm:$0xff]  ;;  %4406 = vrot.lane.b32.xlu0 %v4370_v47, %s8591_s10  ;;  %v11486_v57 = vld [vmem:[#allocation4 + $0x31] sm:$0xff] }
 0x55c   : > { %v4466_v16 = vld [vmem:[#allocation4 + $0x42] sm:$0xff]  ;;  %4596 = vrot.lane.b32.xlu1 %v4561_v49, %s8595_s27  ;;  %v11490_v58 = vld [vmem:[#allocation4 + $0x32] sm:$0xff]  ;;  %4354 = vst.msk [vmem:[#allocation5 + $0x20] sm:$0xff] %vm254_vm0, %v4561_v49 }
 0x55d   : > { %5467 = vst.msk [vmem:[#allocation4 + $0x48] sm:$0xf] %vm823_vm1, %v13478_v29  ;;  %v11492_v44 = vld [vmem:[#allocation4 + $0x30] sm:$0xff]  ;;  %5465 = vst.msk [vmem:[#allocation4 + $0x38] sm:$0xf] %vm823_vm1, %v13478_v29 }
 0x55e   : > { %5466 = vst.msk [vmem:[#allocation4 + $0x40] sm:$0xff] %vm254_vm0, %v13478_v29  ;;  %4353 = vst.msk [vmem:[#allocation5 + $0x18] sm:$0xff] %vm254_vm0, %v11492_v44 }
 0x55f   : > { %5509 = vst.msk [vmem:[#allocation4 + $0x41] sm:$0xff] %vm254_vm0, %v13503_v17  ;;  %5464 = vst.msk [vmem:[#allocation4 + $0x30] sm:$0xff] %vm254_vm0, %v13478_v29  ;;  %4502 = vrot.lane.b32.xlu0 %v4466_v16, %s8593_s12 }
 0x560   : > { %5508 = vst.msk [vmem:[#allocation4 + $0x31] sm:$0xff] %vm254_vm0, %v13504_v14  ;;  %4692 = vrot.lane.b32.xlu1 %v4370_v47, %s8596_s28 }
 0x563   : > { %4882 = vrot.lane.b32.xlu0 %v4561_v49, %s8590_s9 }
 0x564   : > { %4788 = vrot.lane.b32.xlu1 %v4466_v16, %s8597_s30 }
 0x566   : > { %v5684_v13 = vld [vmem:[#allocation4 + $0x40] sm:$0xff] }
 0x567   : > { %v5700_v36 = vld [vmem:[#allocation4 + $0x41] sm:$0xff]  ;;  %v5604_v19 = vld [vmem:[#allocation4 + $0x30] sm:$0xff]  ;;  %4978 = vrot.lane.b32.xlu0 %v4370_v47, %s8592_s11  ;;  %v5156_v47 = vld [vmem:[%s13332_s2 + $0x118] sm:$0xff] }
 0x568   : > { %v5732_v55 = vld [vmem:[#allocation4 + $0x42] sm:$0xff]  ;;  %v5620_v31 = vld [vmem:[#allocation4 + $0x31] sm:$0xff]  ;;  %v5716_v61 = vmax.f32 %v5684_v13, %v5700_v36  ;;  %4404 = vrot.lane.b32.xlu1 %v11486_v57, %s8591_s10  ;;  %v13507_v13 = vmax.f32 %v13504_v14, 0.0 }
 0x569   : > { %v5652_v0 = vld [vmem:[#allocation4 + $0x32] sm:$0xff]  ;;  %5914 = vst.msk [vmem:[#allocation4 + $0x40] sm:$0xff] %vm254_vm0, %v13428_v63  ;;  %v5636_v35 = vmax.f32 %v5604_v19, %v5620_v31  ;;  %v13508_v19 = vmax.f32 %v13492_v22, 0.0 }
 0x56a   : > { %5915 = vst.msk [vmem:[#allocation4 + $0x48] sm:$0xf] %vm823_vm1, %v13428_v63  ;;  %5913 = vst.msk [vmem:[#allocation4 + $0x38] sm:$0xf] %vm823_vm1, %v13428_v63  ;;  %v11539_v62 = vmax.f32 %v5716_v61, %v5732_v55  ;;  %v5158_v55 = vld [vmem:[%s13332_s2 + $0x128] sm:$0xff] }
 0x56b   : > { %5912 = vst.msk [vmem:[#allocation4 + $0x30] sm:$0xff] %vm254_vm0, %v13428_v63  ;;  %5957 = vst.msk [vmem:[#allocation4 + $0x41] sm:$0xff] %vm254_vm0, %v13505_v56  ;;  %v11546_v43 = vmax.f32 %v5636_v35, %v5652_v0  ;;  %5074 = vrot.lane.b32.xlu0 %v4466_v16, %s8594_s13 }
 0x56c   : > { %5956 = vst.msk [vmem:[#allocation4 + $0x31] sm:$0xff] %vm254_vm0, %v13506_v2  ;;  %4500 = vrot.lane.b32.xlu1 %v11490_v58, %s8593_s12 }
 0x56d   : > { %v5764_v11 = vmax.f32 %v11337_v12, %v11546_v43  ;;  %v11554_v53 = vmax.f32 %v5763_v3, %v11546_v43  ;;  %v5765_v49 = vmax.f32 %v11546_v43, %v11539_v62  ;;  %v8430_v12 = vpack.c.bf16 %v5157_v42, %v5156_v47 }
 0x56f   : > { %v11568_v41 = vmax.f32 %v5764_v11, %v11539_v62  ;;  %8431 = vmatprep.subr.bf16.mxu1 %v8430_v12  ;;  %4594 = vrot.lane.b32.xlu0 %v11492_v44, %s8595_s27 }
 0x570   : > { %8433 = vmatpush3.bf16.msra.mxu1 %v8430_v12  ;;  %4880 = vrot.lane.b32.xlu1 %v11492_v44, %s8590_s9 }
 0x571   : > { %v8270_v14 = vpop.f32.mrb[36].mxu0  ;;  %8302 = vmatprep.subr.mxu1 %v5158_v55 }
 0x572   : > { %v5990_v3 = vld [vmem:[#allocation4 + $0x41] sm:$0xff]  ;;  %v4222_v61 = vmul.f32 %v8270_v14, %v11275_v9  ;;  %v4153_v35 = vpop.f32.mrb[37].mxu0 }
 0x573   : > { %v6022_v51 = vld [vmem:[#allocation4 + $0x42] sm:$0xff]  ;;  %v5989_v5 = vld [vmem:[#allocation4 + $0x31] sm:$0xff]  ;;  %v4221_v56 = vmul.f32 %v11275_v9, %v4153_v35  ;;  %4690 = vrot.lane.b32.xlu0 %v11486_v57, %s8596_s28 }
 0x574   : > { %v5974_v20 = vld [vmem:[#allocation4 + $0x40] sm:$0xff]  ;;  %v6021_v8 = vld [vmem:[#allocation4 + $0x32] sm:$0xff]  ;;  %6425 = vst.msk [vmem:[#allocation4 + $0x48] sm:$0xf] %vm823_vm1, %v13428_v63  ;;  %8303 = vmatpush3.msra.mxu1 %v5158_v55  ;;  %v4243_v59 = vadd.f32 %v11280_v30, %v4222_v61  ;;  %4976 = vrot.lane.b32.xlu1 %v11486_v57, %s8592_s11 }
 0x575   : > { %v5973_v10 = vld [vmem:[#allocation4 + $0x30] sm:$0xff]  ;;  %6424 = vst.msk [vmem:[#allocation4 + $0x40] sm:$0xff] %vm254_vm0, %v13428_v63  ;;  %v6164_v16 = vadd.f32 %v5990_v3, %v5974_v20  ;;  %v4242_v2 = vadd.f32 %v11280_v30, %v4221_v56  ;;  %v13511_v20 = vld [vmem:[#allocation32_spill] sm:$0xff] }
 0x576   : > { %6423 = vst.msk [vmem:[#allocation4 + $0x38] sm:$0xf] %vm823_vm1, %v13428_v63  ;;  %v6084_v36 = vadd.f32 %v5989_v5, %v5973_v10 }
 0x577   : > { %6422 = vst.msk [vmem:[#allocation4 + $0x30] sm:$0xff] %vm254_vm0, %v13428_v63  ;;  %6466 = vst.msk [vmem:[#allocation4 + $0x42] sm:$0xff] %vm254_vm0, %v13507_v13  ;;  %v11591_v31 = vadd.f32 %v6164_v16, %v6022_v51  ;;  %v4258_v11 = vmax.f32 %v4242_v2, 0.0  ;;  %5072 = vrot.lane.b32.xlu0 %v11490_v58, %s8594_s13  ;;  %v13512_v2 = vld [vmem:[#allocation13_spill] sm:$0xff] }
 0x578   : > { %6465 = vst.msk [vmem:[#allocation4 + $0x32] sm:$0xff] %vm254_vm0, %v13508_v19  ;;  %v6116_v0 = vadd.f32 %v6084_v36, %v6021_v8  ;;  %4786 = vrot.lane.b32.xlu1 %v11490_v58, %s8597_s30  ;;  %v13510_v58 = vld [vmem:[#allocation31_spill] sm:$0xff] }
 0x579   : > { %4322 = vst.msk [vmem:[#allocation4 + $0x51] sm:$0xff] %vm254_vm0, %v4258_v11  ;;  %v13513_v11 = vld [vmem:[#allocation14_spill] sm:$0xff] }
 0x57a   : > { %v6212_v44 = vadd.f32 %v11377_v37, %v6116_v0  ;;  %v11597_v45 = vadd.f32 %v11390_v15, %v6116_v0  ;;  %v11600_v22 = vadd.f32 %v11591_v31, %v6116_v0  ;;  %v4259_v37 = vmax.f32 %v4243_v59, 0.0 }
 0x57c   : > { %13509 = vst [vmem:[#allocation26_spill] sm:$0xff] %v11597_v45  ;;  %v11609_v4 = vadd.f32 %v6212_v44, %v11591_v31  ;;  %4323 = vst.msk [vmem:[#allocation4 + $0x61] sm:$0xff] %vm254_vm0, %v4259_v37 }
 0x580   : > { %v11619_v42 = vld [vmem:[#allocation4 + $0x51] sm:$0xff] }
 0x581   : > { %v11623_v12 = vld [vmem:[#allocation4 + $0x52] sm:$0xff]  ;;  %v8273_v51 = vpop.f32.mrb[38].mxu0 }
 0x582   : > { %v11625_v3 = vld [vmem:[#allocation4 + $0x50] sm:$0xff]  ;;  %5469 = vst.msk [vmem:[#allocation4 + $0x58] sm:$0xf] %vm823_vm1, %v13478_v29  ;;  %v4224_v5 = vmul.f32 %v8273_v51, %v11275_v9  ;;  %v4163_v8 = vpop.f32.mrb[39].mxu0 }
 0x583   : > { %v4563_v15 = vld [vmem:[#allocation4 + $0x60] sm:$0xff]  ;;  %4355 = vst.msk [vmem:[#allocation5 + $0x28] sm:$0xff] %vm254_vm0, %v11625_v3  ;;  %5468 = vst.msk [vmem:[#allocation4 + $0x50] sm:$0xff] %vm254_vm0, %v13478_v29  ;;  %v4223_v10 = vmul.f32 %v11275_v9, %v4163_v8 }
 0x584   : > { %v4372_v47 = vld [vmem:[#allocation4 + $0x61] sm:$0xff]  ;;  %4600 = vrot.lane.b32.xlu1 %v4563_v15, %s8595_s27  ;;  %4356 = vst.msk [vmem:[#allocation5 + $0x30] sm:$0xff] %vm254_vm0, %v4563_v15  ;;  %5510 = vst.msk [vmem:[#allocation4 + $0x51] sm:$0xff] %vm254_vm0, %v13511_v20  ;;  %v4245_v16 = vadd.f32 %v11280_v30, %v4224_v5 }
 0x585   : > { %v4468_v57 = vld [vmem:[#allocation4 + $0x62] sm:$0xff]  ;;  %4410 = vrot.lane.b32.xlu0 %v4372_v47, %s8591_s10  ;;  %v4244_v13 = vadd.f32 %v11280_v30, %v4223_v10 }
 0x586   : > { %5471 = vst.msk [vmem:[#allocation4 + $0x68] sm:$0xf] %vm823_vm1, %v13478_v29  ;;  %v4261_v36 = vmax.f32 %v4245_v16, 0.0 }
 0x587   : > { %5470 = vst.msk [vmem:[#allocation4 + $0x60] sm:$0xff] %vm254_vm0, %v13478_v29  ;;  %v4260_v55 = vmax.f32 %v4244_v13, 0.0 }
 0x588   : > { %5511 = vst.msk [vmem:[#allocation4 + $0x61] sm:$0xff] %vm254_vm0, %v13510_v58  ;;  %4696 = vrot.lane.b32.xlu1 %v4372_v47, %s8596_s28  ;;  %4325 = vst.msk [vmem:[#allocation4 + $0x81] sm:$0xff] %vm254_vm0, %v4261_v36 }
 0x589   : > { %4506 = vrot.lane.b32.xlu0 %v4468_v57, %s8593_s12  ;;  %4324 = vst.msk [vmem:[#allocation4 + $0x71] sm:$0xff] %vm254_vm0, %v4260_v55 }
 0x58b   : > { %v5606_v61 = vld [vmem:[#allocation4 + $0x50] sm:$0xff] }
 0x58c   : > { %4792 = vrot.lane.b32.xlu1 %v4468_v57, %s8597_s30  ;;  %v5622_v35 = vld [vmem:[#allocation4 + $0x51] sm:$0xff] }
 0x58d   : > { %4886 = vrot.lane.b32.xlu0 %v4563_v15, %s8590_s9  ;;  %v5654_v56 = vld [vmem:[#allocation4 + $0x52] sm:$0xff]  ;;  %v5638_v59 = vmax.f32 %v5606_v61, %v5622_v35 }
 0x58e   : > { %5916 = vst.msk [vmem:[#allocation4 + $0x50] sm:$0xff] %vm254_vm0, %v13428_v63 }
 0x58f   : > { %v5686_v19 = vld [vmem:[#allocation4 + $0x60] sm:$0xff]  ;;  %5917 = vst.msk [vmem:[#allocation4 + $0x58] sm:$0xf] %vm823_vm1, %v13428_v63  ;;  %v11667_v15 = vmax.f32 %v5638_v59, %v5654_v56  ;;  %v13516_v59 = vmax.f32 %v13503_v17, 0.0 }
 0x590   : > { %v5702_v14 = vld [vmem:[#allocation4 + $0x61] sm:$0xff]  ;;  %5958 = vst.msk [vmem:[#allocation4 + $0x51] sm:$0xff] %vm254_vm0, %v13513_v11  ;;  %4408 = vrot.lane.b32.xlu1 %v11619_v42, %s8591_s10  ;;  %v11697_v43 = vld [vmem:[#allocation4 + $0x71] sm:$0xff] }
 0x591   : > { %v5734_v0 = vld [vmem:[#allocation4 + $0x62] sm:$0xff]  ;;  %v5718_v44 = vmax.f32 %v5686_v19, %v5702_v14  ;;  %4982 = vrot.lane.b32.xlu0 %v4372_v47, %s8592_s11  ;;  %v5766_v51 = vmax.f32 %v11539_v62, %v11667_v15  ;;  %v11675_v5 = vmax.f32 %v5765_v49, %v11667_v15  ;;  %v11695_v62 = vld [vmem:[#allocation4 + $0x70] sm:$0xff] }
 0x592   : > { %5918 = vst.msk [vmem:[#allocation4 + $0x60] sm:$0xff] %vm254_vm0, %v13428_v63  ;;  %v11682_v47 = vld [vmem:[#allocation4 + $0x80] sm:$0xff]  ;;  %v11699_v49 = vld [vmem:[#allocation4 + $0x72] sm:$0xff]  ;;  %4357 = vst.msk [vmem:[#allocation5 + $0x38] sm:$0xff] %vm254_vm0, %v11695_v62 }
 0x593   : > { %5919 = vst.msk [vmem:[#allocation4 + $0x68] sm:$0xf] %vm823_vm1, %v13428_v63  ;;  %v11660_v37 = vmax.f32 %v5718_v44, %v5734_v0  ;;  %v11684_v10 = vld [vmem:[#allocation4 + $0x81] sm:$0xff]  ;;  %5473 = vst.msk [vmem:[#allocation4 + $0x78] sm:$0xf] %vm823_vm1, %v13478_v29  ;;  %v13515_v14 = vld [vmem:[#allocation43_spill] sm:$0xff] }
 0x594   : > { %5959 = vst.msk [vmem:[#allocation4 + $0x61] sm:$0xff] %vm254_vm0, %v13512_v2  ;;  %4504 = vrot.lane.b32.xlu1 %v11623_v12, %s8593_s12  ;;  %v11686_v16 = vld [vmem:[#allocation4 + $0x82] sm:$0xff]  ;;  %5472 = vst.msk [vmem:[#allocation4 + $0x70] sm:$0xff] %vm254_vm0, %v13478_v29  ;;  %v13517_v2 = vmax.f32 %v13511_v20, 0.0 }
 0x595   : > { %v5767_v8 = vmax.f32 %v11667_v15, %v11660_v37  ;;  %5078 = vrot.lane.b32.xlu0 %v4468_v57, %s8594_s13  ;;  %v11689_v13 = vmax.f32 %v5766_v51, %v11660_v37  ;;  %5474 = vst.msk [vmem:[#allocation4 + $0x80] sm:$0xff] %vm254_vm0, %v13478_v29  ;;  %v13514_v57 = vld [vmem:[#allocation42_spill] sm:$0xff]  ;;  %5512 = vst.msk [vmem:[#allocation4 + $0x71] sm:$0xff] %vm254_vm0, %v13515_v14 }
 0x596   : > { %5475 = vst.msk [vmem:[#allocation4 + $0x88] sm:$0xf] %vm823_vm1, %v13478_v29 }
 0x597   : > { %5513 = vst.msk [vmem:[#allocation4 + $0x81] sm:$0xff] %vm254_vm0, %v13514_v57  ;;  %v5991_v36 = vld [vmem:[#allocation4 + $0x51] sm:$0xff] }
 0x598   : > { %v6023_v19 = vld [vmem:[#allocation4 + $0x52] sm:$0xff]  ;;  %4884 = vrot.lane.b32.xlu1 %v11625_v3, %s8590_s9 }
 0x599   : > { %6427 = vst.msk [vmem:[#allocation4 + $0x58] sm:$0xf] %vm823_vm1, %v13428_v63  ;;  %v5975_v61 = vld [vmem:[#allocation4 + $0x50] sm:$0xff]  ;;  %4598 = vrot.lane.b32.xlu0 %v11625_v3, %s8595_s27 }
 0x59a   : > { %6426 = vst.msk [vmem:[#allocation4 + $0x50] sm:$0xff] %vm254_vm0, %v13428_v63  ;;  %v6086_v56 = vadd.f32 %v5991_v36, %v5975_v61 }
 0x59b   : > { %v5992_v55 = vld [vmem:[#allocation4 + $0x61] sm:$0xff]  ;;  %6467 = vst.msk [vmem:[#allocation4 + $0x52] sm:$0xff] %vm254_vm0, %v13516_v59  ;;  %v13520_v59 = vld [vmem:[#allocation15_spill] sm:$0xff] }
 0x59c   : > { %v6024_v0 = vld [vmem:[#allocation4 + $0x62] sm:$0xff]  ;;  %v6118_v3 = vadd.f32 %v6086_v56, %v6023_v19  ;;  %4980 = vrot.lane.b32.xlu1 %v11619_v42, %s8592_s11  ;;  %v8276_v61 = vpop.f32.mrb[40].mxu0  ;;  %v5608_v19 = vld [vmem:[#allocation4 + $0x70] sm:$0xff] }
 0x59d   : > { %v5976_v35 = vld [vmem:[#allocation4 + $0x60] sm:$0xff]  ;;  %6429 = vst.msk [vmem:[#allocation4 + $0x68] sm:$0xf] %vm823_vm1, %v13428_v63  ;;  %4694 = vrot.lane.b32.xlu0 %v11619_v42, %s8596_s28  ;;  %v4173_v42 = vpop.f32.mrb[41].mxu0 }
 0x59e   : > { %6428 = vst.msk [vmem:[#allocation4 + $0x60] sm:$0xff] %vm254_vm0, %v13428_v63  ;;  %v6166_v44 = vadd.f32 %v5992_v55, %v5976_v35  ;;  %v6214_v51 = vadd.f32 %v11591_v31, %v6118_v3  ;;  %v11737_v57 = vadd.f32 %v11600_v22, %v6118_v3  ;;  %v5688_v36 = vld [vmem:[#allocation4 + $0x80] sm:$0xff]  ;;  %v5656_v35 = vld [vmem:[#allocation4 + $0x72] sm:$0xff]  ;;  %v4226_v22 = vmul.f32 %v8276_v61, %v11275_v9 }
 0x59f   : > { %6468 = vst.msk [vmem:[#allocation4 + $0x62] sm:$0xff] %vm254_vm0, %v13517_v2  ;;  %v5704_v20 = vld [vmem:[#allocation4 + $0x81] sm:$0xff]  ;;  %v4225_v2 = vmul.f32 %v11275_v9, %v4173_v42  ;;  %v13522_v42 = vmax.f32 %v13515_v14, 0.0 }
 0x5a0   : > { %v11729_v11 = vadd.f32 %v6166_v44, %v6024_v0  ;;  %13518 = vst [vmem:[#allocation35_spill] sm:$0xff] %v11737_v57  ;;  %v5736_v55 = vld [vmem:[#allocation4 + $0x82] sm:$0xff]  ;;  %v5624_v0 = vld [vmem:[#allocation4 + $0x71] sm:$0xff]  ;;  %v5720_v56 = vmax.f32 %v5688_v36, %v5704_v20  ;;  %4790 = vrot.lane.b32.xlu1 %v11623_v12, %s8597_s30  ;;  %v4247_v36 = vadd.f32 %v11280_v30, %v4226_v22 }
 0x5a1   : > { %5922 = vst.msk [vmem:[#allocation4 + $0x80] sm:$0xff] %vm254_vm0, %v13428_v63  ;;  %v5640_v44 = vmax.f32 %v5608_v19, %v5624_v0  ;;  %5920 = vst.msk [vmem:[#allocation4 + $0x70] sm:$0xff] %vm254_vm0, %v13428_v63  ;;  %5076 = vrot.lane.b32.xlu0 %v11623_v12, %s8594_s13  ;;  %v4246_v61 = vadd.f32 %v11280_v30, %v4225_v2  ;;  %v13535_v57 = vld [vmem:[#allocation19_spill] sm:$0xff] }
 0x5a2   : > { %v6215_v17 = vadd.f32 %v11729_v11, %v6118_v3  ;;  %5923 = vst.msk [vmem:[#allocation4 + $0x88] sm:$0xf] %vm823_vm1, %v13428_v63  ;;  %v11745_v31 = vadd.f32 %v6214_v51, %v11729_v11  ;;  %5921 = vst.msk [vmem:[#allocation4 + $0x78] sm:$0xf] %vm823_vm1, %v13428_v63  ;;  %v11759_v3 = vmax.f32 %v5720_v56, %v5736_v55  ;;  %v13521_v51 = vld [vmem:[#allocation16_spill] sm:$0xff]  ;;  %v4263_v19 = vmax.f32 %v4247_v36, 0.0 }
 0x5a3   : > { %5961 = vst.msk [vmem:[#allocation4 + $0x81] sm:$0xff] %vm254_vm0, %v13520_v59  ;;  %5960 = vst.msk [vmem:[#allocation4 + $0x71] sm:$0xff] %vm254_vm0, %v13521_v51  ;;  %v11764_v20 = vmax.f32 %v5640_v44, %v5656_v35  ;;  %v4262_v0 = vmax.f32 %v4246_v61, 0.0  ;;  %v13523_v59 = vmax.f32 %v13510_v58, 0.0 }
 0x5a4   : > { %13519 = vst [vmem:[#allocation71_spill] sm:$0xff] %v11745_v31  ;;  %4604 = vrot.lane.b32.xlu1 %v11682_v47, %s8595_s27  ;;  %4327 = vst.msk [vmem:[#allocation4 + $0xe1] sm:$0xff] %vm254_vm0, %v4263_v19 }
 0x5a5   : > { %v5768_v9 = vmax.f32 %v11660_v37, %v11764_v20  ;;  %v11773_v12 = vmax.f32 %v5767_v8, %v11764_v20  ;;  %4890 = vrot.lane.b32.xlu0 %v11682_v47, %s8590_s9  ;;  %4326 = vst.msk [vmem:[#allocation4 + $0xd1] sm:$0xff] %vm254_vm0, %v4262_v0 }
 0x5a7   : > { %v11783_v30 = vmax.f32 %v5768_v9, %v11759_v3 }
 0x5a8   : > { %4700 = vrot.lane.b32.xlu1 %v11684_v10, %s8596_s28 }
 0x5a9   : > { %4986 = vrot.lane.b32.xlu0 %v11684_v10, %s8592_s11 }
 0x5aa   : > { %v6073_v37 = vld [vmem:[#allocation4 + $0x81] sm:$0xff]  ;;  %v5993_v35 = vld [vmem:[#allocation4 + $0x71] sm:$0xff] }
 0x5ab   : > { %v6105_v15 = vld [vmem:[#allocation4 + $0x82] sm:$0xff]  ;;  %v6025_v56 = vld [vmem:[#allocation4 + $0x72] sm:$0xff] }
 0x5ac   : > { %v6057_v8 = vld [vmem:[#allocation4 + $0x80] sm:$0xff]  ;;  %6433 = vst.msk [vmem:[#allocation4 + $0x88] sm:$0xf] %vm823_vm1, %v13428_v63  ;;  %v5977_v22 = vld [vmem:[#allocation4 + $0x70] sm:$0xff]  ;;  %6431 = vst.msk [vmem:[#allocation4 + $0x78] sm:$0xf] %vm823_vm1, %v13428_v63  ;;  %4796 = vrot.lane.b32.xlu1 %v11686_v16, %s8597_s30 }
 0x5ad   : > { %6432 = vst.msk [vmem:[#allocation4 + $0x80] sm:$0xff] %vm254_vm0, %v13428_v63  ;;  %v6168_v47 = vadd.f32 %v6073_v37, %v6057_v8  ;;  %6430 = vst.msk [vmem:[#allocation4 + $0x70] sm:$0xff] %vm254_vm0, %v13428_v63  ;;  %v6088_v44 = vadd.f32 %v5993_v35, %v5977_v22  ;;  %5082 = vrot.lane.b32.xlu0 %v11686_v16, %s8594_s13  ;;  %v11808_v10 = vld [vmem:[#allocation4 + $0xe1] sm:$0xff]  ;;  %v11825_v16 = vld [vmem:[#allocation4 + $0xd0] sm:$0xff] }
 0x5ae   : > { %6470 = vst.msk [vmem:[#allocation4 + $0x82] sm:$0xff] %vm254_vm0, %v13522_v42  ;;  %6469 = vst.msk [vmem:[#allocation4 + $0x72] sm:$0xff] %vm254_vm0, %v13523_v59  ;;  %v11810_v36 = vld [vmem:[#allocation4 + $0xe2] sm:$0xff]  ;;  %v11827_v9 = vld [vmem:[#allocation4 + $0xd1] sm:$0xff] }
 0x5af   : > { %v6200_v2 = vadd.f32 %v6168_v47, %v6105_v15  ;;  %v6120_v51 = vadd.f32 %v6088_v44, %v6025_v56  ;;  %v11812_v14 = vld [vmem:[#allocation4 + $0xe0] sm:$0xff]  ;;  %5487 = vst.msk [vmem:[#allocation4 + $0xe8] sm:$0xf] %vm823_vm1, %v13478_v29  ;;  %v11829_v0 = vld [vmem:[#allocation4 + $0xd2] sm:$0xff]  ;;  %v11854_v59 = vld [vmem:[%s13333_s3 + $0x8] ss:$0 sm:$0xff] }
 0x5b0   : > { %5486 = vst.msk [vmem:[#allocation4 + $0xe0] sm:$0xff] %vm254_vm0, %v13478_v29  ;;  %4360 = vst.msk [vmem:[#allocation5 + $0x50] sm:$0xff] %vm254_vm0, %v11812_v14  ;;  %v13528_v37 = vld [vmem:[#allocation49_spill] sm:$0xff]  ;;  %4412 = vrot.lane.b32.xlu1 %v11697_v43, %s8591_s10 }
 0x5b1   : > { %v6216_v61 = vadd.f32 %v11729_v11, %v6120_v51  ;;  %v11815_v19 = vadd.f32 %v6215_v17, %v6120_v51  ;;  %v11817_v58 = vadd.f32 %v6200_v2, %v6120_v51  ;;  %v13526_v11 = vld [vmem:[#allocation48_spill] sm:$0xff]  ;;  %4359 = vst.msk [vmem:[#allocation5 + $0x48] sm:$0xff] %vm254_vm0, %v11825_v16  ;;  %5484 = vst.msk [vmem:[#allocation4 + $0xd0] sm:$0xff] %vm254_vm0, %v13478_v29  ;;  %4602 = vrot.lane.b32.xlu0 %v11695_v62, %s8595_s27  ;;  %v8279_v56 = vpop.f32.mrb[42].mxu0 }
 0x5b2   : > { %5515 = vst.msk [vmem:[#allocation4 + $0xe1] sm:$0xff] %vm254_vm0, %v13526_v11  ;;  %v4183_v51 = vpop.f32.mrb[43].mxu0 }
 0x5b3   : > { %13524 = vst [vmem:[#allocation70_spill] sm:$0xff] %v11815_v19  ;;  %13525 = vst [vmem:[#allocation53_spill] sm:$0xff] %v11817_v58  ;;  %v11839_v17 = vadd.f32 %v6216_v61, %v6200_v2  ;;  %v4228_v2 = vmul.f32 %v11854_v59, %v8279_v56  ;;  %v4227_v24 = vmul.f32 %v11854_v59, %v4183_v51  ;;  %v13529_v56 = vld [vmem:[#allocation18_spill] sm:$0xff] }
 0x5b4   : > { %5485 = vst.msk [vmem:[#allocation4 + $0xd8] sm:$0xf] %vm823_vm1, %v13478_v29  ;;  %4508 = vrot.lane.b32.xlu1 %v11699_v49, %s8593_s12 }
 0x5b5   : > { %13527 = vst [vmem:[#allocation54_spill] sm:$0xff] %v11839_v17  ;;  %5514 = vst.msk [vmem:[#allocation4 + $0xd1] sm:$0xff] %vm254_vm0, %v13528_v37  ;;  %4698 = vrot.lane.b32.xlu0 %v11697_v43, %s8596_s28 }
 0x5b8   : > { %4888 = vrot.lane.b32.xlu1 %v11695_v62, %s8590_s9 }
 0x5b9   : > { %v5548_v15 = vld [vmem:[#allocation4 + $0xe1] sm:$0xff]  ;;  %5080 = vrot.lane.b32.xlu0 %v11699_v49, %s8594_s13 }
 0x5ba   : > { %v5580_v8 = vld [vmem:[#allocation4 + $0xe2] sm:$0xff] }
 0x5bb   : > { %v5532_v35 = vld [vmem:[#allocation4 + $0xe0] sm:$0xff] }
 0x5bc   : > { %v5610_v22 = vld [vmem:[#allocation4 + $0xd0] sm:$0xff]  ;;  %v5564_v44 = vmax.f32 %v5532_v35, %v5548_v15  ;;  %v5706_v55 = vld [vmem:[#allocation4 + $0xe1] sm:$0xff]  ;;  %4984 = vrot.lane.b32.xlu1 %v11697_v43, %s8592_s11 }
 0x5bd   : > { %v5626_v47 = vld [vmem:[#allocation4 + $0xd1] sm:$0xff]  ;;  %v5738_v7 = vld [vmem:[#allocation4 + $0xe2] sm:$0xff]  ;;  %v5722_v15 = vmax.f32 %v5532_v35, %v5706_v55  ;;  %4418 = vrot.lane.b32.xlu0 %v11808_v10, %s8591_s10 }
 0x5be   : > { %v5658_v42 = vld [vmem:[#allocation4 + $0xd2] sm:$0xff]  ;;  %v5642_v61 = vmax.f32 %v5610_v22, %v5626_v47  ;;  %5934 = vst.msk [vmem:[#allocation4 + $0xe0] sm:$0xff] %vm254_vm0, %v13428_v63  ;;  %v11872_v22 = vmax.f32 %v5564_v44, %v5580_v8  ;;  %v11877_v47 = vld [vmem:[%s13333_s3 + $0x9] ss:$0 sm:$0xff]  ;;  %v13530_v55 = vld [vmem:[#allocation17_spill] sm:$0xff] }
 0x5bf   : > { %5932 = vst.msk [vmem:[#allocation4 + $0xd0] sm:$0xff] %vm254_vm0, %v13428_v63  ;;  %v4249_v51 = vadd.f32 %v11877_v47, %v4228_v2  ;;  %v4248_v35 = vadd.f32 %v11877_v47, %v4227_v24  ;;  %v11885_v32 = vmax.f32 %v5722_v15, %v5738_v7 }
 0x5c0   : > { %5933 = vst.msk [vmem:[#allocation4 + $0xd8] sm:$0xf] %vm823_vm1, %v13428_v63  ;;  %5935 = vst.msk [vmem:[#allocation4 + $0xe8] sm:$0xf] %vm823_vm1, %v13428_v63  ;;  %v11880_v62 = vmax.f32 %v5642_v61, %v5658_v42  ;;  %4794 = vrot.lane.b32.xlu1 %v11699_v49, %s8597_s30 }
 0x5c1   : > { %5962 = vst.msk [vmem:[#allocation4 + $0xd1] sm:$0xff] %vm254_vm0, %v13529_v56  ;;  %5963 = vst.msk [vmem:[#allocation4 + $0xe1] sm:$0xff] %vm254_vm0, %v13530_v55  ;;  %v4265_v38 = vmax.f32 %v4249_v51, 0.0  ;;  %v4264_v44 = vmax.f32 %v4248_v35, 0.0  ;;  %4514 = vrot.lane.b32.xlu0 %v11810_v36, %s8593_s12  ;;  %v13531_v56 = vmax.f32 %v13528_v37, 0.0 }
 0x5c2   : > { %v5770_v8 = vmax.f32 %v11453_v39, %v11880_v62 }
 0x5c3   : > { %4329 = vst.msk [vmem:[#allocation4 + $0x101] sm:$0xff] %vm254_vm0, %v4265_v38  ;;  %4328 = vst.msk [vmem:[#allocation4 + $0xf1] sm:$0xff] %vm254_vm0, %v4264_v44 }
 0x5c4   : > { %v11897_v24 = vmax.f32 %v5770_v8, %v11885_v32  ;;  %4608 = vrot.lane.b32.xlu1 %v11812_v14, %s8595_s27 }
 0x5c5   : > { %4894 = vrot.lane.b32.xlu0 %v11812_v14, %s8590_s9 }
 0x5c8   : > { %v5979_v7 = vld [vmem:[#allocation4 + $0xd0] sm:$0xff]  ;;  %v5996_v43 = vld [vmem:[#allocation4 + $0xe1] sm:$0xff]  ;;  %4704 = vrot.lane.b32.xlu1 %v11808_v10, %s8596_s28 }
 0x5c9   : > { %v6027_v2 = vld [vmem:[#allocation4 + $0xd2] sm:$0xff]  ;;  %v6028_v61 = vld [vmem:[#allocation4 + $0xe2] sm:$0xff]  ;;  %4990 = vrot.lane.b32.xlu0 %v11808_v10, %s8592_s11 }
 0x5ca   : > { %v5995_v39 = vld [vmem:[#allocation4 + $0xd1] sm:$0xff]  ;;  %v5980_v38 = vld [vmem:[#allocation4 + $0xe0] sm:$0xff]  ;;  %6445 = vst.msk [vmem:[#allocation4 + $0xe8] sm:$0xf] %vm823_vm1, %v13428_v63 }
 0x5cb   : > { %6442 = vst.msk [vmem:[#allocation4 + $0xd0] sm:$0xff] %vm254_vm0, %v13428_v63  ;;  %v6090_v15 = vadd.f32 %v5995_v39, %v5979_v7  ;;  %6444 = vst.msk [vmem:[#allocation4 + $0xe0] sm:$0xff] %vm254_vm0, %v13428_v63  ;;  %v6170_v49 = vadd.f32 %v5996_v43, %v5980_v38  ;;  %v11921_v35 = vld [vmem:[#allocation4 + $0x101] sm:$0xff]  ;;  %v11928_v37 = vld [vmem:[#allocation4 + $0xf0] sm:$0xff] }
 0x5cc   : > { %6443 = vst.msk [vmem:[#allocation4 + $0xd8] sm:$0xf] %vm823_vm1, %v13428_v63  ;;  %v11923_v8 = vld [vmem:[#allocation4 + $0x100] sm:$0xff]  ;;  %v11936_v14 = vld [vmem:[#allocation4 + $0xf1] sm:$0xff]  ;;  %4800 = vrot.lane.b32.xlu1 %v11810_v36, %s8597_s30 }
 0x5cd   : > { %6472 = vst.msk [vmem:[#allocation4 + $0xe2] sm:$0xff] %vm254_vm0, %v13531_v56  ;;  %v6122_v51 = vadd.f32 %v6090_v15, %v6027_v2  ;;  %v11915_v55 = vadd.f32 %v6170_v49, %v6028_v61  ;;  %v11925_v44 = vld [vmem:[#allocation4 + $0x102] sm:$0xff]  ;;  %4362 = vst.msk [vmem:[#allocation5 + $0x60] sm:$0xff] %vm254_vm0, %v11923_v8  ;;  %v11938_v2 = vld [vmem:[#allocation4 + $0xf2] sm:$0xff]  ;;  %5086 = vrot.lane.b32.xlu0 %v11810_v36, %s8594_s13  ;;  %v8282_v56 = vpop.f32.mrb[44].mxu0 }
 0x5ce   : > { %5490 = vst.msk [vmem:[#allocation4 + $0x100] sm:$0xff] %vm254_vm0, %v13478_v29  ;;  %4361 = vst.msk [vmem:[#allocation5 + $0x58] sm:$0xff] %vm254_vm0, %v11928_v37  ;;  %v13534_v61 = vld [vmem:[#allocation51_spill] sm:$0xff]  ;;  %v4230_v58 = vmul.f32 %v11854_v59, %v8282_v56  ;;  %v4193_v19 = vpop.f32.mrb[45].mxu0  ;;  %v11986_v56 = vpop.permute.xlu1 %4596 }
 0x5cf   : > { %v6218_v7 = vadd.f32 %v6122_v51, %v11468_v23  ;;  %5491 = vst.msk [vmem:[#allocation4 + $0x108] sm:$0xf] %vm823_vm1, %v13478_v29  ;;  %v11941_v39 = vadd.f32 %v11915_v55, %v6122_v51  ;;  %v13532_v23 = vld [vmem:[#allocation50_spill] sm:$0xff]  ;;  %5489 = vst.msk [vmem:[#allocation4 + $0xf8] sm:$0xf] %vm823_vm1, %v13478_v29  ;;  %v4229_v60 = vmul.f32 %v11854_v59, %v4193_v19 }
 0x5d0   : > { %5517 = vst.msk [vmem:[#allocation4 + $0x101] sm:$0xff] %vm254_vm0, %v13532_v23  ;;  %5488 = vst.msk [vmem:[#allocation4 + $0xf0] sm:$0xff] %vm254_vm0, %v13478_v29  ;;  %4416 = vrot.lane.b32.xlu1 %v11827_v9, %s8591_s10 }
 0x5d1   : > { %v11952_v43 = vadd.f32 %v6218_v7, %v11915_v55  ;;  %5516 = vst.msk [vmem:[#allocation4 + $0xf1] sm:$0xff] %vm254_vm0, %v13534_v61  ;;  %4606 = vrot.lane.b32.xlu0 %v11825_v16, %s8595_s27  ;;  %v4250_v19 = vadd.f32 %v11877_v47, %v4229_v60  ;;  %v4407_v16 = vpop.permute.xlu0 %4406  ;;  %v13537_v60 = vmax.f32 %v11880_v62, %v11885_v32  ;;  %v13538_v62 = vmax.f32 %v13534_v61, 0.0 }
 0x5d2   : > { %4450 = vst.msk [vmem:[#allocation5 + $0x20] sm:$0xff] %vm1000_vm2, %v4407_v16 }
 0x5d3   : > { %13533 = vst [vmem:[#allocation55_spill] sm:$0xff] %v11952_v43 }
 0x5d4   : > { %4512 = vrot.lane.b32.xlu1 %v11829_v0, %s8593_s12 }
 0x5d5   : > { %4702 = vrot.lane.b32.xlu0 %v11827_v9, %s8596_s28 }
 0x5d7   : > { %v5550_v38 = vld [vmem:[#allocation4 + $0x101] sm:$0xff] }
 0x5d8   : > { %v5534_v15 = vld [vmem:[#allocation4 + $0x100] sm:$0xff]  ;;  %v5533_v51 = vld [vmem:[#allocation4 + $0xf0] sm:$0xff]  ;;  %4798 = vrot.lane.b32.xlu1 %v11829_v0, %s8597_s30 }
 0x5d9   : > { %v5582_v49 = vld [vmem:[#allocation4 + $0x102] sm:$0xff]  ;;  %v5549_v7 = vld [vmem:[#allocation4 + $0xf1] sm:$0xff]  ;;  %v5724_v10 = vmax.f32 %v5534_v15, %v5550_v38  ;;  %v4251_v38 = vadd.f32 %v11877_v47, %v4230_v58  ;;  %4422 = vrot.lane.b32.xlu0 %v11921_v35, %s8591_s10 }
 0x5da   : > { %5938 = vst.msk [vmem:[#allocation4 + $0x100] sm:$0xff] %vm254_vm0, %v13428_v63  ;;  %v5581_v42 = vld [vmem:[#allocation4 + $0xf2] sm:$0xff]  ;;  %v5644_v45 = vmax.f32 %v5533_v51, %v5549_v7 }
 0x5db   : > { %5939 = vst.msk [vmem:[#allocation4 + $0x108] sm:$0xf] %vm823_vm1, %v13428_v63  ;;  %v5691_v36 = vld [vmem:[#allocation4 + $0xf0] sm:$0xff]  ;;  %v11976_v17 = vmax.f32 %v5724_v10, %v5582_v49  ;;  %v13536_v51 = vld [vmem:[#allocation20_spill] sm:$0xff]  ;;  %v4267_v49 = vmax.f32 %v4251_v38, 0.0  ;;  %v4693_v10 = vpop.permute.xlu1 %4692 }
 0x5dc   : > { %5965 = vst.msk [vmem:[#allocation4 + $0x101] sm:$0xff] %vm254_vm0, %v13535_v57  ;;  %v5707_v50 = vld [vmem:[#allocation4 + $0xf1] sm:$0xff]  ;;  %v11983_v57 = vmax.f32 %v5644_v45, %v5581_v42  ;;  %v4266_v45 = vmax.f32 %v4250_v19, 0.0  ;;  %4612 = vrot.lane.b32.xlu1 %v11923_v8, %s8595_s27 }
 0x5dd   : > { %v5739_v43 = vld [vmem:[#allocation4 + $0xf2] sm:$0xff]  ;;  %v5723_v15 = vmax.f32 %v5691_v36, %v5707_v50  ;;  %4331 = vst.msk [vmem:[#allocation4 + $0x121] sm:$0xff] %vm254_vm0, %v4267_v49  ;;  %4518 = vrot.lane.b32.xlu0 %v11925_v44, %s8593_s12 }
 0x5de   : > { %5936 = vst.msk [vmem:[#allocation4 + $0xf0] sm:$0xff] %vm254_vm0, %v13428_v63  ;;  %v5772_v58 = vmax.f32 %v11872_v22, %v11983_v57  ;;  %4330 = vst.msk [vmem:[#allocation4 + $0x111] sm:$0xff] %vm254_vm0, %v4266_v45  ;;  %v4503_v22 = vpop.permute.xlu0 %4502 }
 0x5df   : > { %5937 = vst.msk [vmem:[#allocation4 + $0xf8] sm:$0xf] %vm823_vm1, %v13428_v63  ;;  %v5755_v50 = vmax.f32 %v5723_v15, %v5739_v43 }
 0x5e0   : > { %5964 = vst.msk [vmem:[#allocation4 + $0xf1] sm:$0xff] %vm254_vm0, %v13536_v51  ;;  %v12006_v43 = vmax.f32 %v5772_v58, %v11976_v17  ;;  %v13539_v58 = vmax.f32 %v13526_v11, 0.0  ;;  %4708 = vrot.lane.b32.xlu1 %v11921_v35, %s8596_s28 }
 0x5e1   : > { %v12003_v42 = vmax.f32 %v13537_v60, %v5755_v50  ;;  %4546 = vst.msk [vmem:[#allocation5 + $0x20] sm:$0xff] %vm1097_vm3, %v4503_v22  ;;  %v4789_v50 = vpop.permute.xlu1 %4788  ;;  %4898 = vrot.lane.b32.xlu0 %v11923_v8, %s8590_s9 }
 0x5e2   : > { %v12023_v49 = vpop.permute.xlu0 %4882 }
 0x5e3   : > { %v5998_v36 = vld [vmem:[#allocation4 + $0x101] sm:$0xff] }
 0x5e4   : > { %v6030_v38 = vld [vmem:[#allocation4 + $0x102] sm:$0xff]  ;;  %4804 = vrot.lane.b32.xlu1 %v11925_v44, %s8597_s30 }
 0x5e5   : > { %v5982_v9 = vld [vmem:[#allocation4 + $0x100] sm:$0xff]  ;;  %6449 = vst.msk [vmem:[#allocation4 + $0x108] sm:$0xf] %vm823_vm1, %v13428_v63  ;;  %v12048_v11 = vld [vmem:[#allocation4 + $0x111] sm:$0xff]  ;;  %4994 = vrot.lane.b32.xlu0 %v11921_v35, %s8592_s11 }
 0x5e6   : > { %6448 = vst.msk [vmem:[#allocation4 + $0x100] sm:$0xff] %vm254_vm0, %v13428_v63  ;;  %v6172_v32 = vadd.f32 %v5998_v36, %v5982_v9  ;;  %v12036_v61 = vld [vmem:[#allocation4 + $0x121] sm:$0xff]  ;;  %v12050_v36 = vld [vmem:[#allocation4 + $0x110] sm:$0xff]  ;;  %v12054_v9 = vpop.permute.xlu0 %4978 }
 0x5e7   : > { %6474 = vst.msk [vmem:[#allocation4 + $0x102] sm:$0xff] %vm254_vm0, %v13538_v62  ;;  %v5997_v15 = vld [vmem:[#allocation4 + $0xf1] sm:$0xff]  ;;  %v12038_v45 = vld [vmem:[#allocation4 + $0x122] sm:$0xff]  ;;  %4363 = vst.msk [vmem:[#allocation5 + $0x68] sm:$0xff] %vm254_vm0, %v12050_v36 }
 0x5e8   : > { %v6029_v19 = vld [vmem:[#allocation4 + $0xf2] sm:$0xff]  ;;  %v12021_v51 = vadd.f32 %v6172_v32, %v6030_v38  ;;  %v12040_v60 = vld [vmem:[#allocation4 + $0x120] sm:$0xff]  ;;  %5495 = vst.msk [vmem:[#allocation4 + $0x128] sm:$0xf] %vm823_vm1, %v13478_v29  ;;  %v4405_v32 = vpop.permute.xlu1 %4404  ;;  %4420 = vrot.lane.b32.xlu1 %v11936_v14, %s8591_s10 }
 0x5e9   : > { %v5981_v16 = vld [vmem:[#allocation4 + $0xf0] sm:$0xff]  ;;  %6447 = vst.msk [vmem:[#allocation4 + $0xf8] sm:$0xf] %vm823_vm1, %v13428_v63  ;;  %v13540_v62 = vld [vmem:[#allocation52_spill] sm:$0xff]  ;;  %5090 = vrot.lane.b32.xlu0 %v11925_v44, %s8594_s13  ;;  %v13546_v44 = vmax.f32 %v11983_v57, %v11976_v17 }
 0x5ea   : > { %6446 = vst.msk [vmem:[#allocation4 + $0xf0] sm:$0xff] %vm254_vm0, %v13428_v63  ;;  %v6171_v0 = vadd.f32 %v5997_v15, %v5981_v16  ;;  %5494 = vst.msk [vmem:[#allocation4 + $0x120] sm:$0xff] %vm254_vm0, %v13478_v29  ;;  %v12052_v38 = vld [vmem:[#allocation4 + $0x112] sm:$0xff]  ;;  %v12082_v7 = vpop.permute.xlu0 %5074 }
 0x5eb   : > { %6473 = vst.msk [vmem:[#allocation4 + $0xf2] sm:$0xff] %vm254_vm0, %v13539_v58  ;;  %4364 = vst.msk [vmem:[#allocation5 + $0x70] sm:$0xff] %vm254_vm0, %v12040_v60 }
 0x5ec   : > { %v6203_v22 = vadd.f32 %v6171_v0, %v6029_v19  ;;  %5519 = vst.msk [vmem:[#allocation4 + $0x121] sm:$0xff] %vm254_vm0, %v13540_v62  ;;  %5492 = vst.msk [vmem:[#allocation4 + $0x110] sm:$0xff] %vm254_vm0, %v13478_v29  ;;  %v13542_v0 = vld [vmem:[#allocation61_spill] sm:$0xff]  ;;  %4516 = vrot.lane.b32.xlu1 %v11938_v2, %s8593_s12 }
 0x5ed   : > { %5493 = vst.msk [vmem:[#allocation4 + $0x118] sm:$0xf] %vm823_vm1, %v13478_v29  ;;  %4610 = vrot.lane.b32.xlu0 %v11928_v37, %s8595_s27 }
 0x5ee   : > { %v12065_v15 = vadd.f32 %v11941_v39, %v6203_v22  ;;  %v6220_v19 = vadd.f32 %v6203_v22, %v11915_v55  ;;  %v12069_v16 = vadd.f32 %v12021_v51, %v6203_v22  ;;  %4449 = vst.msk [vmem:[#allocation5 + $0x18] sm:$0xff] %vm1000_vm2, %v4405_v32  ;;  %v8285_v39 = vpop.f32.mrb[46].mxu0  ;;  %v4501_v22 = vpop.permute.xlu1 %4500 }
 0x5ef   : > { %5518 = vst.msk [vmem:[#allocation4 + $0x111] sm:$0xff] %vm254_vm0, %v13542_v0  ;;  %v4232_v55 = vmul.f32 %v11854_v59, %v8285_v39  ;;  %v4203_v32 = vpop.f32.mrb[47].mxu0 }
 0x5f0   : > { %13541 = vst [vmem:[#allocation37_spill] sm:$0xff] %v12065_v15  ;;  %v12079_v58 = vadd.f32 %v6220_v19, %v12021_v51  ;;  %4545 = vst.msk [vmem:[#allocation5 + $0x18] sm:$0xff] %vm1097_vm3, %v4501_v22  ;;  %v4231_v8 = vmul.f32 %v11854_v59, %v4203_v32  ;;  %4896 = vrot.lane.b32.xlu1 %v11928_v37, %s8590_s9 }
 0x5f1   : > { %v4253_v15 = vadd.f32 %v11877_v47, %v4232_v55  ;;  %4641 = vst.msk [vmem:[#allocation5 + $0x18] sm:$0xff] %vm1194_vm4, %v11986_v56  ;;  %v4595_v55 = vpop.permute.xlu0 %4594  ;;  %4706 = vrot.lane.b32.xlu0 %v11936_v14, %s8596_s28 }
 0x5f2   : > { %13543 = vst [vmem:[#allocation36_spill] sm:$0xff] %v12079_v58  ;;  %4737 = vst.msk [vmem:[#allocation5 + $0x18] sm:$0xff] %vm1291_vm5, %v4693_v10  ;;  %v4252_v31 = vadd.f32 %v11877_v47, %v4231_v8  ;;  %v4881_v56 = vpop.permute.xlu1 %4880  ;;  %v13545_v8 = vld [vmem:[#allocation22_spill] sm:$0xff] }
 0x5f3   : > { %v5552_v19 = vld [vmem:[#allocation4 + $0x121] sm:$0xff]  ;;  %v4269_v22 = vmax.f32 %v4253_v15, 0.0  ;;  %4833 = vst.msk [vmem:[#allocation5 + $0x18] sm:$0xff] %vm1388_vm6, %v4789_v50 }
 0x5f4   : > { %v5536_v39 = vld [vmem:[#allocation4 + $0x120] sm:$0xff]  ;;  %4640 = vst.msk [vmem:[#allocation5 + $0x10] sm:$0xff] %vm1194_vm4, %v4595_v55  ;;  %v4268_v50 = vmax.f32 %v4252_v31, 0.0  ;;  %4992 = vrot.lane.b32.xlu1 %v11936_v14, %s8592_s11 }
 0x5f5   : > { %v5584_v58 = vld [vmem:[#allocation4 + $0x122] sm:$0xff]  ;;  %v5726_v10 = vmax.f32 %v5536_v39, %v5552_v19  ;;  %4927 = vst.msk [vmem:[#allocation5 + $0x8] sm:$0xff] %vm1486_vm7, %v4881_v56  ;;  %v4691_v55 = vpop.permute.xlu0 %4690  ;;  %5088 = vrot.lane.b32.xlu0 %v11938_v2, %s8594_s13 }
 0x5f6   : > { %5942 = vst.msk [vmem:[#allocation4 + $0x120] sm:$0xff] %vm254_vm0, %v13428_v63  ;;  %v5535_v59 = vld [vmem:[#allocation4 + $0x110] sm:$0xff]  ;;  %v13544_v15 = vld [vmem:[#allocation21_spill] sm:$0xff]  ;;  %4333 = vst.msk [vmem:[#allocation4 + $0x141] sm:$0xff] %vm254_vm0, %v4269_v22  ;;  %v4977_v56 = vpop.permute.xlu1 %4976 }
 0x5f7   : > { %5943 = vst.msk [vmem:[#allocation4 + $0x128] sm:$0xf] %vm823_vm1, %v13428_v63  ;;  %v5551_v35 = vld [vmem:[#allocation4 + $0x111] sm:$0xff]  ;;  %v12115_v19 = vmax.f32 %v5726_v10, %v5584_v58  ;;  %v12215_v14 = vld [vmem:[#allocation4 + $0x20] sm:$0xff] }
 0x5f8   : > { %v5583_v32 = vld [vmem:[#allocation4 + $0x112] sm:$0xff]  ;;  %5967 = vst.msk [vmem:[#allocation4 + $0x121] sm:$0xff] %vm254_vm0, %v13544_v15  ;;  %v5646_v47 = vmax.f32 %v5535_v59, %v5551_v35  ;;  %4332 = vst.msk [vmem:[#allocation4 + $0x131] sm:$0xff] %vm254_vm0, %v4268_v50  ;;  %4802 = vrot.lane.b32.xlu1 %v11938_v2, %s8597_s30 }
 0x5f9   : > { %5940 = vst.msk [vmem:[#allocation4 + $0x110] sm:$0xff] %vm254_vm0, %v13428_v63  ;;  %v5073_v35 = vpop.permute.xlu0 %5072  ;;  %4426 = vrot.lane.b32.xlu0 %v12036_v61, %s8591_s10 }
 0x5fa   : > { %5941 = vst.msk [vmem:[#allocation4 + $0x118] sm:$0xf] %vm823_vm1, %v13428_v63  ;;  %v12117_v39 = vmax.f32 %v5646_v47, %v5583_v32  ;;  %v4787_v32 = vpop.permute.xlu1 %4786 }
 0x5fb   : > { %5966 = vst.msk [vmem:[#allocation4 + $0x111] sm:$0xff] %vm254_vm0, %v13545_v8 }
 0x5fc   : > { %4736 = vst.msk [vmem:[#allocation5 + $0x10] sm:$0xff] %vm1291_vm5, %v4691_v55  ;;  %v5774_v31 = vmax.f32 %v11976_v17, %v12117_v39  ;;  %v12128_v22 = vmax.f32 %v13546_v44, %v12117_v39  ;;  %v13547_v44 = vmax.f32 %v13542_v0, 0.0  ;;  %4616 = vrot.lane.b32.xlu1 %v12040_v60, %s8595_s27 }
 0x5fd   : > { %5023 = vst.msk [vmem:[#allocation5 + $0x8] sm:$0xff] %vm1583_vm8, %v4977_v56  ;;  %v12143_v50 = vld [vmem:[#allocation4 + $0x140] sm:$0xff]  ;;  %4522 = vrot.lane.b32.xlu0 %v12038_v45, %s8593_s12 }
 0x5fe   : > { %v12137_v59 = vmax.f32 %v5774_v31, %v12115_v19  ;;  %5119 = vst.msk [vmem:[#allocation5 + $0x8] sm:$0xff] %vm1680_vm9, %v5073_v35  ;;  %v12155_v55 = vld [vmem:[#allocation4 + $0x141] sm:$0xff] }
 0x5ff   : > { %v6000_v10 = vld [vmem:[#allocation4 + $0x121] sm:$0xff]  ;;  %4832 = vst.msk [vmem:[#allocation5 + $0x10] sm:$0xff] %vm1388_vm6, %v4787_v32  ;;  %v12166_v35 = vld [vmem:[#allocation4 + $0x131] sm:$0xff] }
 0x600   : > { %v6032_v15 = vld [vmem:[#allocation4 + $0x122] sm:$0xff]  ;;  %4928 = vst.msk [vmem:[#allocation5 + $0x10] sm:$0xff] %vm1486_vm7, %v12023_v49  ;;  %v12164_v49 = vld [vmem:[#allocation4 + $0x130] sm:$0xff]  ;;  %4712 = vrot.lane.b32.xlu1 %v12036_v61, %s8596_s28 }
 0x601   : > { %v5984_v47 = vld [vmem:[#allocation4 + $0x120] sm:$0xff]  ;;  %6453 = vst.msk [vmem:[#allocation4 + $0x128] sm:$0xf] %vm823_vm1, %v13428_v63  ;;  %v12168_v37 = vld [vmem:[#allocation4 + $0x132] sm:$0xff]  ;;  %4902 = vrot.lane.b32.xlu0 %v12040_v60, %s8590_s9 }
 0x602   : > { %v5999_v17 = vld [vmem:[#allocation4 + $0x111] sm:$0xff]  ;;  %6452 = vst.msk [vmem:[#allocation4 + $0x120] sm:$0xff] %vm254_vm0, %v13428_v63  ;;  %v6174_v8 = vadd.f32 %v6000_v10, %v5984_v47  ;;  %v12157_v56 = vld [vmem:[#allocation4 + $0x142] sm:$0xff]  ;;  %5496 = vst.msk [vmem:[#allocation4 + $0x130] sm:$0xff] %vm254_vm0, %v13478_v29  ;;  %v13549_v10 = vmax.f32 %v13532_v23, 0.0  ;;  %v4411_v23 = vpop.permute.xlu0 %4410 }
 0x603   : > { %v6031_v57 = vld [vmem:[#allocation4 + $0x112] sm:$0xff]  ;;  %6476 = vst.msk [vmem:[#allocation4 + $0x122] sm:$0xff] %vm254_vm0, %v13547_v44  ;;  %5498 = vst.msk [vmem:[#allocation4 + $0x140] sm:$0xff] %vm254_vm0, %v13478_v29 }
 0x604   : > { %6451 = vst.msk [vmem:[#allocation4 + $0x118] sm:$0xf] %vm823_vm1, %v13428_v63  ;;  %v5983_v31 = vld [vmem:[#allocation4 + $0x110] sm:$0xff]  ;;  %5499 = vst.msk [vmem:[#allocation4 + $0x148] sm:$0xf] %vm823_vm1, %v13478_v29  ;;  %v12176_v32 = vadd.f32 %v6174_v8, %v6032_v15  ;;  %v13550_v15 = vld [vmem:[#allocation66_spill] sm:$0xff]  ;;  %v12204_v8 = vpop.permute.xlu1 %4600  ;;  %4808 = vrot.lane.b32.xlu1 %v12038_v45, %s8597_s30 }
 0x605   : > { %5024 = vst.msk [vmem:[#allocation5 + $0x10] sm:$0xff] %vm1583_vm8, %v12054_v9  ;;  %v6094_v0 = vadd.f32 %v5999_v17, %v5983_v31  ;;  %v13548_v9 = vld [vmem:[#allocation65_spill] sm:$0xff]  ;;  %v5135_v31 = vld [vmem:[#allocation5 + $0x8] sm:$0xff]  ;;  %4998 = vrot.lane.b32.xlu0 %v12036_v61, %s8592_s11 }
 0x606   : > { %6450 = vst.msk [vmem:[#allocation4 + $0x110] sm:$0xff] %vm254_vm0, %v13428_v63  ;;  %5521 = vst.msk [vmem:[#allocation4 + $0x141] sm:$0xff] %vm254_vm0, %v13548_v9  ;;  %8305 = vmatmul.mubr.msk.f32.vlgmr.msra.gmra.mrb[32].mxu1 %vm1722_vm10, %v5135_v31 }
 0x607   : > { %5120 = vst.msk [vmem:[#allocation5 + $0x10] sm:$0xff] %vm1680_vm9, %v12082_v7  ;;  %v6126_v7 = vadd.f32 %v6094_v0, %v6031_v57  ;;  %v4507_v0 = vpop.permute.xlu0 %4506 }
 0x608   : > { %5497 = vst.msk [vmem:[#allocation4 + $0x138] sm:$0xf] %vm823_vm1, %v13478_v29  ;;  %v4697_v9 = vpop.permute.xlu1 %4696  ;;  %4424 = vrot.lane.b32.xlu1 %v12048_v11, %s8591_s10 }
 0x609   : > { %4365 = vst.msk [vmem:[#allocation5 + $0x78] sm:$0xff] %vm254_vm0, %v12164_v49  ;;  %6475 = vst.msk [vmem:[#allocation4 + $0x112] sm:$0xff] %vm254_vm0, %v13549_v10  ;;  %v6222_v47 = vadd.f32 %v12021_v51, %v6126_v7  ;;  %v12199_v29 = vadd.f32 %v12069_v16, %v6126_v7  ;;  %v12202_v17 = vadd.f32 %v12176_v32, %v6126_v7  ;;  %5094 = vrot.lane.b32.xlu0 %v12038_v45, %s8594_s13 }
 0x60a   : > { %5520 = vst.msk [vmem:[#allocation4 + $0x131] sm:$0xff] %vm254_vm0, %v13550_v15 }
 0x60b   : > { %13551 = vst [vmem:[#allocation38_spill] sm:$0xff] %v12199_v29  ;;  %4452 = vst.msk [vmem:[#allocation5 + $0x30] sm:$0xff] %vm1000_vm2, %v4411_v23  ;;  %v12209_v57 = vadd.f32 %v6222_v47, %v12176_v32 }
 0x60c   : > { %4548 = vst.msk [vmem:[#allocation5 + $0x30] sm:$0xff] %vm1097_vm3, %v4507_v0  ;;  %4520 = vrot.lane.b32.xlu1 %v12052_v38, %s8593_s12 }
 0x60d   : > { %13552 = vst [vmem:[#allocation27_spill] sm:$0xff] %v12209_v57  ;;  %v5617_v16 = vld [vmem:[#allocation4 + $0x140] sm:$0xff]  ;;  %4614 = vrot.lane.b32.xlu0 %v12050_v36, %s8595_s27 }
 0x60e   : > { %v5136_v51 = vld [vmem:[#allocation5 + $0x10] sm:$0xff]  ;;  %v5633_v44 = vld [vmem:[#allocation4 + $0x141] sm:$0xff] }
 0x60f   : > { %8307 = vmatprep.mubr.msk.f32.mxu1 %vm1722_vm10, %v5136_v51  ;;  %v5665_v10 = vld [vmem:[#allocation4 + $0x142] sm:$0xff]  ;;  %6498 = vst.msk [vmem:[#allocation5 + $0x10] sm:$0xff] %vm254_vm0, %v12215_v14  ;;  %v5728_v47 = vmax.f32 %v5617_v16, %v5633_v44  ;;  %v13553_v51 = vld [vmem:[#allocation23_spill] sm:$0xff]  ;;  %v13555_v44 = vld [vmem:[#allocation24_spill] sm:$0xff] }
 0x610   : > { %5946 = vst.msk [vmem:[#allocation4 + $0x140] sm:$0xff] %vm254_vm0, %v13428_v63  ;;  %4900 = vrot.lane.b32.xlu1 %v12050_v36, %s8590_s9 }
 0x611   : > { %v5537_v7 = vld [vmem:[#allocation4 + $0x130] sm:$0xff]  ;;  %5947 = vst.msk [vmem:[#allocation4 + $0x148] sm:$0xf] %vm823_vm1, %v13428_v63  ;;  %v12235_v16 = vmax.f32 %v5728_v47, %v5665_v10  ;;  %4710 = vrot.lane.b32.xlu0 %v12048_v11, %s8596_s28 }
 0x612   : > { %v5553_v23 = vld [vmem:[#allocation4 + $0x131] sm:$0xff]  ;;  %5969 = vst.msk [vmem:[#allocation4 + $0x141] sm:$0xff] %vm254_vm0, %v13553_v51  ;;  %v13557_v51 = vmax.f32 %v12117_v39, %v12115_v19 }
 0x613   : > { %v5585_v2 = vld [vmem:[#allocation4 + $0x132] sm:$0xff]  ;;  %v5648_v31 = vmax.f32 %v5537_v7, %v5553_v23  ;;  %13554 = vst [vmem:[#allocation28_spill] sm:$0xff] %v12235_v16  ;;  %v4887_v7 = vpop.permute.xlu0 %4886  ;;  %v4793_v23 = vpop.permute.xlu1 %4792 }
 0x614   : > { %5944 = vst.msk [vmem:[#allocation4 + $0x130] sm:$0xff] %vm254_vm0, %v13428_v63  ;;  %4996 = vrot.lane.b32.xlu1 %v12048_v11, %s8592_s11 }
 0x615   : > { %5945 = vst.msk [vmem:[#allocation4 + $0x138] sm:$0xf] %vm823_vm1, %v13428_v63  ;;  %v12239_v0 = vmax.f32 %v5648_v31, %v5585_v2  ;;  %5092 = vrot.lane.b32.xlu0 %v12052_v38, %s8594_s13 }
 0x616   : > { %5968 = vst.msk [vmem:[#allocation4 + $0x131] sm:$0xff] %vm254_vm0, %v13555_v44 }
 0x617   : > { %13556 = vst [vmem:[#allocation9_spill] sm:$0xff] %v12239_v0  ;;  %v5776_v58 = vmax.f32 %v12115_v19, %v12239_v0  ;;  %v12247_v29 = vmax.f32 %v13557_v51, %v12239_v0  ;;  %v4983_v2 = vpop.permute.xlu0 %4982  ;;  %v4409_v31 = vpop.permute.xlu1 %4408  ;;  %v13560_v0 = vmax.f32 %v13540_v62, 0.0 }
 0x618   : > { %4451 = vst.msk [vmem:[#allocation5 + $0x28] sm:$0xff] %vm1000_vm2, %v4409_v31  ;;  %v13559_v31 = vmax.f32 %v13550_v15, 0.0  ;;  %4806 = vrot.lane.b32.xlu1 %v12052_v38, %s8597_s30  ;;  %v12328_v38 = vld [vmem:[#allocation4 + $0x40] sm:$0xff] }
 0x619   : > { %13558 = vst [vmem:[#allocation10_spill] sm:$0xff] %v12247_v29  ;;  %v12256_v47 = vmax.f32 %v5776_v58, %v12235_v16  ;;  %v6065_v44 = vld [vmem:[#allocation4 + $0x140] sm:$0xff]  ;;  %4618 = vrot.lane.b32.xlu0 %v12164_v49, %s8595_s27 }
 0x61a   : > { %v6081_v19 = vld [vmem:[#allocation4 + $0x141] sm:$0xff] }
 0x61b   : > { %v6113_v39 = vld [vmem:[#allocation4 + $0x142] sm:$0xff]  ;;  %v6176_v10 = vadd.f32 %v6081_v19, %v6065_v44  ;;  %v5079_v57 = vpop.permute.xlu0 %5078  ;;  %v4505_v16 = vpop.permute.xlu1 %4504 }
 0x61c   : > { %6457 = vst.msk [vmem:[#allocation4 + $0x148] sm:$0xf] %vm823_vm1, %v13428_v63  ;;  %4620 = vrot.lane.b32.xlu1 %v12143_v50, %s8595_s27 }
 0x61d   : > { %v6001_v60 = vld [vmem:[#allocation4 + $0x131] sm:$0xff]  ;;  %6456 = vst.msk [vmem:[#allocation4 + $0x140] sm:$0xff] %vm254_vm0, %v13428_v63  ;;  %v6208_v29 = vadd.f32 %v6176_v10, %v6113_v39  ;;  %4714 = vrot.lane.b32.xlu0 %v12166_v35, %s8596_s28 }
 0x61e   : > { %v6033_v51 = vld [vmem:[#allocation4 + $0x132] sm:$0xff]  ;;  %6478 = vst.msk [vmem:[#allocation4 + $0x142] sm:$0xff] %vm254_vm0, %v13559_v31 }
 0x61f   : > { %v5985_v58 = vld [vmem:[#allocation4 + $0x130] sm:$0xff]  ;;  %6455 = vst.msk [vmem:[#allocation4 + $0x138] sm:$0xf] %vm823_vm1, %v13428_v63  ;;  %v4885_v10 = vpop.permute.xlu1 %4884 }
 0x620   : > { %6454 = vst.msk [vmem:[#allocation4 + $0x130] sm:$0xff] %vm254_vm0, %v13428_v63  ;;  %v6096_v61 = vadd.f32 %v6001_v60, %v5985_v58  ;;  %v12319_v39 = vld [vmem:[#allocation4 + $0x30] sm:$0xff]  ;;  %4716 = vrot.lane.b32.xlu1 %v12155_v55, %s8596_s28 }
 0x621   : > { %6477 = vst.msk [vmem:[#allocation4 + $0x132] sm:$0xff] %vm254_vm0, %v13560_v0  ;;  %5096 = vrot.lane.b32.xlu0 %v12168_v37, %s8594_s13 }
 0x622   : > { %4547 = vst.msk [vmem:[#allocation5 + $0x28] sm:$0xff] %vm1097_vm3, %v4505_v16  ;;  %v6128_v44 = vadd.f32 %v6096_v61, %v6033_v51  ;;  %v4599_v16 = vpop.permute.xlu0 %4598 }
 0x623   : > { %4643 = vst.msk [vmem:[#allocation5 + $0x28] sm:$0xff] %vm1194_vm4, %v12204_v8  ;;  %4642 = vst.msk [vmem:[#allocation5 + $0x20] sm:$0xff] %vm1194_vm4, %v4599_v16 }
 0x624   : > { %4739 = vst.msk [vmem:[#allocation5 + $0x28] sm:$0xff] %vm1291_vm5, %v4697_v9  ;;  %v6224_v15 = vadd.f32 %v12176_v32, %v6128_v44  ;;  %v12287_v62 = vadd.f32 %v12202_v17, %v6128_v44  ;;  %v12289_v0 = vadd.f32 %v6208_v29, %v6128_v44  ;;  %v4981_v17 = vpop.permute.xlu1 %4980  ;;  %4428 = vrot.lane.b32.xlu1 %v12166_v35, %s8591_s10 }
 0x625   : > { %4835 = vst.msk [vmem:[#allocation5 + $0x28] sm:$0xff] %vm1388_vm6, %v4793_v23  ;;  %4906 = vrot.lane.b32.xlu0 %v12143_v50, %s8590_s9 }
 0x626   : > { %4929 = vst.msk [vmem:[#allocation5 + $0x18] sm:$0xff] %vm1486_vm7, %v4885_v10  ;;  %v12294_v45 = vadd.f32 %v6224_v15, %v6208_v29  ;;  %v4695_v32 = vpop.permute.xlu0 %4694  ;;  %v6480_v10 = vld [vmem:[#allocation4] sm:$0xff] }
 0x627   : > { %4738 = vst.msk [vmem:[#allocation5 + $0x20] sm:$0xff] %vm1291_vm5, %v4695_v32  ;;  %v6487_v32 = vld [vmem:[#allocation4 + $0x70] sm:$0xff] }
 0x628   : > { %5025 = vst.msk [vmem:[#allocation5 + $0x18] sm:$0xff] %vm1583_vm8, %v4981_v17  ;;  %v4791_v8 = vpop.permute.xlu1 %4790  ;;  %4524 = vrot.lane.b32.xlu1 %v12168_v37, %s8593_s12 }
 0x629   : > { %4834 = vst.msk [vmem:[#allocation5 + $0x20] sm:$0xff] %vm1388_vm6, %v4791_v8  ;;  %5002 = vrot.lane.b32.xlu0 %v12155_v55, %s8592_s11  ;;  %v5426_v55 = vld [vmem:[#allocation2] sm:$0xff] }
 0x62a   : > { %v5077_v29 = vpop.permute.xlu0 %5076  ;;  %4930 = vst.msk [vmem:[#allocation5 + $0x20] sm:$0xff] %vm1486_vm7, %v4887_v7  ;;  %v5794_v16 = vadd.f32 %v11359_v6, %v5426_v55  ;;  %v5427_v55 = vld [vmem:[#allocation2 + $0x8] sm:$0xff] }
 0x62b   : > { %5121 = vst.msk [vmem:[#allocation5 + $0x18] sm:$0xff] %vm1680_vm9, %v5077_v29 }
 0x62c   : > { %5026 = vst.msk [vmem:[#allocation5 + $0x20] sm:$0xff] %vm1583_vm8, %v4983_v2  ;;  %v4605_v36 = vpop.permute.xlu1 %4604  ;;  %4904 = vrot.lane.b32.xlu1 %v12164_v49, %s8590_s9 }
 0x62d   : > { %5122 = vst.msk [vmem:[#allocation5 + $0x20] sm:$0xff] %vm1680_vm9, %v5079_v57  ;;  %5098 = vrot.lane.b32.xlu0 %v12157_v56, %s8594_s13 }
 0x62e   : > { %v4891_v9 = vpop.permute.xlu0 %4890  ;;  %6496 = vst.msk [vmem:[#allocation5] sm:$0xff] %vm254_vm0, %v6480_v10 }
 0x630   : > { %v4701_v7 = vpop.permute.xlu1 %4700  ;;  %5000 = vrot.lane.b32.xlu1 %v12166_v35, %s8592_s11  ;;  %v5430_v35 = vld [vmem:[#allocation2 + $0x20] sm:$0xff] }
 0x631   : > { %5826 = vrot.lane.b32.xlu0 %v5794_v16, %s8591_s10  ;;  %v5798_v29 = vadd.f32 %v11689_v13, %v5430_v35  ;;  %v5795_v16 = vadd.f32 %v11554_v53, %v5427_v55  ;;  %v13566_v35 = vld [vmem:[#allocation41_spill] sm:$0xff]  ;;  %v6801_v55 = vld [vmem:[#allocation4 + $0x32] sm:$0xff] }
 0x632   : > { %v4987_v23 = vpop.permute.xlu0 %4986  ;;  %v5137_v19 = vld [vmem:[#allocation5 + $0x18] sm:$0xff] }
 0x633   : > { %8308 = vmatmul.mubr.msk.f32.gmra.mrb[34].mxu1 %vm1722_vm10, %v5137_v19  ;;  %6499 = vst.msk [vmem:[#allocation5 + $0x18] sm:$0xff] %vm254_vm0, %v12319_v39  ;;  %v13561_v19 = vld [vmem:[#allocation58_spill] sm:$0xff] }
 0x634   : > { %v5138_v11 = vld [vmem:[#allocation5 + $0x20] sm:$0xff]  ;;  %v4797_v2 = vpop.permute.xlu1 %4796  ;;  %4810 = vrot.lane.b32.xlu1 %v12168_v37, %s8597_s30  ;;  %v6481_v37 = vld [vmem:[#allocation4 + $0x10] sm:$0xff] }
 0x635   : > { %8310 = vmatprep.mubr.msk.f32.mxu1 %vm1722_vm10, %v5138_v11  ;;  %6500 = vst.msk [vmem:[#allocation5 + $0x20] sm:$0xff] %vm254_vm0, %v12328_v38  ;;  %6497 = vst.msk [vmem:[#allocation5 + $0x8] sm:$0xff] %vm254_vm0, %v6481_v37 }
 0x636   : > { %v5083_v57 = vpop.permute.xlu0 %5082 }
 0x638   : > { %v4413_v51 = vpop.permute.xlu1 %4412  ;;  %4812 = vrot.lane.b32.xlu1 %v12157_v56, %s8597_s30  ;;  %v5434_v56 = vld [vmem:[#allocation2 + $0x40] sm:$0xff] }
 0x639   : > { %4453 = vst.msk [vmem:[#allocation5 + $0x38] sm:$0xff] %vm1000_vm2, %v4413_v51  ;;  %v5802_v51 = vadd.f32 %v11897_v24, %v5434_v56  ;;  %v13563_v24 = vld [vmem:[#allocation60_spill] sm:$0xff]  ;;  %v6488_v56 = vld [vmem:[#allocation4 + $0xc0] sm:$0xff] }
 0x63a   : > { %v4603_v60 = vpop.permute.xlu0 %4602 }
 0x63b   : > { %4644 = vst.msk [vmem:[#allocation5 + $0x30] sm:$0xff] %vm1194_vm4, %v4603_v60 }
 0x63c   : > { %v4509_v31 = vpop.permute.xlu1 %4508  ;;  %4908 = vrot.lane.b32.xlu1 %v13561_v19, %s8590_s9 }
 0x63d   : > { %4549 = vst.msk [vmem:[#allocation5 + $0x38] sm:$0xff] %vm1097_vm3, %v4509_v31 }
 0x63e   : > { %v4699_v58 = vpop.permute.xlu0 %4698  ;;  %4645 = vst.msk [vmem:[#allocation5 + $0x38] sm:$0xff] %vm1194_vm4, %v4605_v36  ;;  %v5432_v36 = vld [vmem:[#allocation2 + $0x30] sm:$0xff] }
 0x63f   : > { %4740 = vst.msk [vmem:[#allocation5 + $0x30] sm:$0xff] %vm1291_vm5, %v4699_v58  ;;  %4741 = vst.msk [vmem:[#allocation5 + $0x38] sm:$0xff] %vm1291_vm5, %v4701_v7  ;;  %v5800_v13 = vadd.f32 %v11783_v30, %v5432_v36  ;;  %v13562_v30 = vld [vmem:[#allocation59_spill] sm:$0xff]  ;;  %v6512_v58 = vld [vmem:[#allocation4 + $0x2] sm:$0xff] }
 0x640   : > { %4837 = vst.msk [vmem:[#allocation5 + $0x38] sm:$0xff] %vm1388_vm6, %v4797_v2  ;;  %v4889_v61 = vpop.permute.xlu1 %4888  ;;  %5004 = vrot.lane.b32.xlu1 %v13562_v30, %s8592_s11 }
 0x641   : > { %4933 = vst.msk [vmem:[#allocation5 + $0x38] sm:$0xff] %vm1486_vm7, %v11436_v46  ;;  %4931 = vst.msk [vmem:[#allocation5 + $0x28] sm:$0xff] %vm1486_vm7, %v4889_v61  ;;  %v5428_v46 = vld [vmem:[#allocation2 + $0x10] sm:$0xff] }
 0x642   : > { %v5081_v50 = vpop.permute.xlu0 %5080  ;;  %5029 = vst.msk [vmem:[#allocation5 + $0x38] sm:$0xff] %vm1583_vm8, %v11442_v48  ;;  %v6513_v61 = vld [vmem:[#allocation4 + $0x12] sm:$0xff] }
 0x643   : > { %5125 = vst.msk [vmem:[#allocation5 + $0x38] sm:$0xff] %vm1680_vm9, %v11440_v40  ;;  %v5796_v40 = vadd.f32 %v11568_v41, %v5428_v46  ;;  %v13564_v46 = vld [vmem:[#allocation40_spill] sm:$0xff] }
 0x644   : > { %v4985_v15 = vpop.permute.xlu1 %4984  ;;  %5100 = vrot.lane.b32.xlu1 %v13563_v24, %s8594_s13 }
 0x645   : > { %5027 = vst.msk [vmem:[#allocation5 + $0x28] sm:$0xff] %vm1583_vm8, %v4985_v15  ;;  %5830 = vrot.lane.b32.xlu0 %v5796_v40, %s8591_s10  ;;  %v6608_v40 = vld [vmem:[#allocation4 + $0x4] sm:$0xff] }
 0x646   : > { %v4419_v44 = vpop.permute.xlu0 %4418  ;;  %5123 = vst.msk [vmem:[#allocation5 + $0x28] sm:$0xff] %vm1680_vm9, %v5081_v50 }
 0x647   : > { %4456 = vst.msk [vmem:[#allocation5 + $0x50] sm:$0xff] %vm1000_vm2, %v4419_v44 }
 0x648   : > { %v4795_v49 = vpop.permute.xlu1 %4794  ;;  %5828 = vrot.lane.b32.xlu1 %v5795_v16, %s8591_s10 }
 0x649   : > { %4836 = vst.msk [vmem:[#allocation5 + $0x30] sm:$0xff] %vm1388_vm6, %v4795_v49  ;;  %5834 = vrot.lane.b32.xlu0 %v5798_v29, %s8591_s10 }
 0x64a   : > { %v4515_v48 = vpop.permute.xlu0 %4514  ;;  %4932 = vst.msk [vmem:[#allocation5 + $0x30] sm:$0xff] %vm1486_vm7, %v4891_v9  ;;  %v5141_v6 = vld [vmem:[#allocation5 + $0x38] sm:$0xff]  ;;  %v12382_v9 = vld [vmem:[#allocation4 + $0x50] sm:$0xff] }
 0x64b   : > { %4552 = vst.msk [vmem:[#allocation5 + $0x50] sm:$0xff] %vm1097_vm3, %v4515_v48  ;;  %v13565_v48 = vld [vmem:[#allocation39_spill] sm:$0xff] }
 0x64c   : > { %5028 = vst.msk [vmem:[#allocation5 + $0x30] sm:$0xff] %vm1583_vm8, %v4987_v23  ;;  %v4609_v17 = vpop.permute.xlu1 %4608  ;;  %v5721_v49 = vmax.f32 %v13565_v48, %v13564_v46  ;;  %v6896_v46 = vld [vmem:[#allocation4 + $0x24] sm:$0xff] }
 0x64d   : > { %6503 = vst.msk [vmem:[#allocation5 + $0x38] sm:$0xff] %vm254_vm0, %v6487_v32  ;;  %v5139_v8 = vld [vmem:[#allocation5 + $0x28] sm:$0xff]  ;;  %5838 = vrot.lane.b32.xlu0 %v5800_v13, %s8591_s10 }
 0x64e   : > { %5124 = vst.msk [vmem:[#allocation5 + $0x30] sm:$0xff] %vm1680_vm9, %v5083_v57  ;;  %v4895_v41 = vpop.permute.xlu0 %4894  ;;  %8311 = vmatmul.mubr.msk.f32.gmra.mrb[36].mxu1 %vm1722_vm10, %v5139_v8  ;;  %v12395_v57 = vld [vmem:[#allocation4 + $0x60] sm:$0xff]  ;;  %v5753_v29 = vmax.f32 %v5721_v49, %v13566_v35  ;;  %v5431_v8 = vld [vmem:[#allocation2 + $0x28] sm:$0xff] }
 0x64f   : > { %6501 = vst.msk [vmem:[#allocation5 + $0x28] sm:$0xff] %vm254_vm0, %v12382_v9  ;;  %v5799_v36 = vadd.f32 %v11773_v12, %v5431_v8  ;;  %v6897_v8 = vld [vmem:[#allocation4 + $0x34] sm:$0xff] }
 0x650   : > { %v4705_v7 = vpop.permute.xlu1 %4704 }
 0x651   : > { %5842 = vrot.lane.b32.xlu0 %v5802_v51, %s8591_s10  ;;  %v6520_v51 = vld [vmem:[#allocation4 + $0xc2] sm:$0xff] }
 0x652   : > { %v4991_v23 = vpop.permute.xlu0 %4990 }
 0x654   : > { %v4801_v60 = vpop.permute.xlu1 %4800 }
 0x655   : > { %v5140_v11 = vld [vmem:[#allocation5 + $0x30] sm:$0xff]  ;;  %6544 = vrot.lane.b32.xlu0 %v6512_v58, %s8591_s10  ;;  %v6800_v58 = vld [vmem:[#allocation4 + $0x22] sm:$0xff] }
 0x656   : > { %v5087_v2 = vpop.permute.xlu0 %5086  ;;  %8313 = vmatprep.mubr.msk.f32.mxu1 %vm1722_vm10, %v5140_v11  ;;  %6502 = vst.msk [vmem:[#allocation5 + $0x30] sm:$0xff] %vm254_vm0, %v12395_v57 }
 0x657   : > { %8314 = vmatmul.mubr.msk.f32.gmra.mrb[38].mxu1 %vm1722_vm10, %v5141_v6  ;;  %v5429_v6 = vld [vmem:[#allocation2 + $0x18] sm:$0xff] }
 0x658   : > { %v4417_v50 = vpop.permute.xlu1 %4416  ;;  %v5797_v32 = vadd.f32 %v11675_v5, %v5429_v6  ;;  %v6489_v6 = vld [vmem:[#allocation4 + $0xd0] sm:$0xff] }
 0x659   : > { %4455 = vst.msk [vmem:[#allocation5 + $0x48] sm:$0xff] %vm1000_vm2, %v4417_v50  ;;  %6546 = vrot.lane.b32.xlu0 %v6513_v61, %s8591_s10 }
 0x65a   : > { %v4607_v31 = vpop.permute.xlu0 %4606  ;;  %5832 = vrot.lane.b32.xlu1 %v5797_v32, %s8591_s10  ;;  %v12471_v32 = vld [vmem:[#allocation4 + $0xf0] sm:$0xff] }
 0x65b   : > { %4646 = vst.msk [vmem:[#allocation5 + $0x40] sm:$0xff] %vm1194_vm4, %v4607_v31  ;;  %v6521_v31 = vld [vmem:[#allocation4 + $0xd2] sm:$0xff] }
 0x65c   : > { %v4513_v15 = vpop.permute.xlu1 %4512 }
 0x65d   : > { %4551 = vst.msk [vmem:[#allocation5 + $0x48] sm:$0xff] %vm1097_vm3, %v4513_v15  ;;  %6640 = vrot.lane.b32.xlu0 %v6608_v40, %s8593_s12  ;;  %v6712_v40 = vld [vmem:[#allocation4 + $0xe0] sm:$0xff] }
 0x65e   : > { %v4703_v44 = vpop.permute.xlu0 %4702  ;;  %4647 = vst.msk [vmem:[#allocation5 + $0x48] sm:$0xff] %vm1194_vm4, %v4609_v17  ;;  %v6609_v17 = vld [vmem:[#allocation4 + $0x14] sm:$0xff]  ;;  %5836 = vrot.lane.b32.xlu1 %v5799_v36, %s8591_s10 }
 0x65f   : > { %4742 = vst.msk [vmem:[#allocation5 + $0x40] sm:$0xff] %vm1291_vm5, %v4703_v44  ;;  %4743 = vst.msk [vmem:[#allocation5 + $0x48] sm:$0xff] %vm1291_vm5, %v4705_v7  ;;  %v13567_v7 = vmax.f32 %v11764_v20, %v11759_v3  ;;  %v6617_v44 = vld [vmem:[#allocation4 + $0xd4] sm:$0xff] }
 0x660   : > { %4839 = vst.msk [vmem:[#allocation5 + $0x48] sm:$0xff] %vm1388_vm6, %v4801_v60  ;;  %v4799_v10 = vpop.permute.xlu1 %4798 }
 0x661   : > { %4838 = vst.msk [vmem:[#allocation5 + $0x40] sm:$0xff] %vm1388_vm6, %v4799_v10  ;;  %v5785_v13 = vmax.f32 %v13567_v7, %v5753_v29  ;;  %6642 = vrot.lane.b32.xlu0 %v6609_v17, %s8593_s12 }
 0x662   : > { %v4423_v53 = vpop.permute.xlu0 %4422  ;;  %4934 = vst.msk [vmem:[#allocation5 + $0x40] sm:$0xff] %vm1486_vm7, %v4895_v41  ;;  %v5433_v41 = vld [vmem:[#allocation2 + $0x38] sm:$0xff] }
 0x663   : > { %4458 = vst.msk [vmem:[#allocation5 + $0x60] sm:$0xff] %vm1000_vm2, %v4423_v53  ;;  %v5801_v11 = vadd.f32 %v5785_v13, %v5433_v41 }
 0x664   : > { %5030 = vst.msk [vmem:[#allocation5 + $0x40] sm:$0xff] %vm1583_vm8, %v4991_v23  ;;  %v4613_v5 = vpop.permute.xlu1 %4612 }
 0x665   : > { %5126 = vst.msk [vmem:[#allocation5 + $0x40] sm:$0xff] %vm1680_vm9, %v5087_v2  ;;  %6736 = vrot.lane.b32.xlu0 %v12215_v14, %s8595_s27  ;;  %5840 = vrot.lane.b32.xlu1 %v5801_v11, %s8591_s10  ;;  %v5435_v2 = vld [vmem:[#allocation2 + $0x48] sm:$0xff] }
 0x666   : > { %v4519_v37 = vpop.permute.xlu0 %4518  ;;  %v5803_v60 = vadd.f32 %v12003_v42, %v5435_v2 }
 0x667   : > { %4554 = vst.msk [vmem:[#allocation5 + $0x60] sm:$0xff] %vm1097_vm3, %v4519_v37  ;;  %v6808_v37 = vld [vmem:[#allocation4 + $0xe2] sm:$0xff] }
 0x668   : > { %v4709_v19 = vpop.permute.xlu1 %4708 }
 0x669   : > { %6738 = vrot.lane.b32.xlu0 %v12319_v39, %s8595_s27  ;;  %5844 = vrot.lane.b32.xlu1 %v5803_v60, %s8591_s10  ;;  %v6616_v39 = vld [vmem:[#allocation4 + $0xc4] sm:$0xff] }
 0x66a   : > { %v4899_v23 = vpop.permute.xlu0 %4898 }
 0x66c   : > { %v5142_v12 = vld [vmem:[#allocation5 + $0x40] sm:$0xff]  ;;  %v4805_v20 = vpop.permute.xlu1 %4804 }
 0x66d   : > { %8316 = vmatprep.mubr.msk.f32.mxu1 %vm1722_vm10, %v5142_v12  ;;  %6504 = vst.msk [vmem:[#allocation5 + $0x40] sm:$0xff] %vm254_vm0, %v6488_v56  ;;  %6832 = vrot.lane.b32.xlu0 %v6800_v58, %s8596_s28  ;;  %v6904_v56 = vld [vmem:[#allocation4 + $0xe4] sm:$0xff] }
 0x66e   : > { %v4995_v3 = vpop.permute.xlu0 %4994  ;;  %6560 = vrot.lane.b32.xlu1 %v6520_v51, %s8591_s10 }
 0x670   : > { %v4421_v14 = vpop.permute.xlu1 %4420 }
 0x671   : > { %4457 = vst.msk [vmem:[#allocation5 + $0x58] sm:$0xff] %vm1000_vm2, %v4421_v14  ;;  %6548 = vrot.lane.b32.xlu0 %v6800_v58, %s8591_s10 }
 0x672   : > { %v5091_v30 = vpop.permute.xlu0 %5090  ;;  %6562 = vrot.lane.b32.xlu1 %v6521_v31, %s8591_s10  ;;  %v7001_v31 = vld [vmem:[#allocation4 + $0x100] sm:$0xff] }
 0x674   : > { %v4517_v42 = vpop.permute.xlu1 %4516 }
 0x675   : > { %4553 = vst.msk [vmem:[#allocation5 + $0x58] sm:$0xff] %vm1097_vm3, %v4517_v42  ;;  %6834 = vrot.lane.b32.xlu0 %v6801_v55, %s8596_s28 }
 0x676   : > { %v4611_v50 = vpop.permute.xlu0 %4610  ;;  %4649 = vst.msk [vmem:[#allocation5 + $0x58] sm:$0xff] %vm1194_vm4, %v4613_v5  ;;  %6656 = vrot.lane.b32.xlu1 %v6616_v39, %s8593_s12  ;;  %v7297_v39 = vld [vmem:[%s13332_s2 + $0x130] sm:$0xff] }
 0x677   : > { %4648 = vst.msk [vmem:[#allocation5 + $0x50] sm:$0xff] %vm1194_vm4, %v4611_v50 }
 0x678   : > { %4745 = vst.msk [vmem:[#allocation5 + $0x58] sm:$0xff] %vm1291_vm5, %v4709_v19  ;;  %v4897_v61 = vpop.permute.xlu1 %4896 }
 0x679   : > { %4841 = vst.msk [vmem:[#allocation5 + $0x58] sm:$0xff] %vm1388_vm6, %v4805_v20  ;;  %6928 = vrot.lane.b32.xlu0 %v6896_v46, %s8597_s30 }
 0x67a   : > { %v4707_v24 = vpop.permute.xlu0 %4706  ;;  %4935 = vst.msk [vmem:[#allocation5 + $0x48] sm:$0xff] %vm1486_vm7, %v4897_v61  ;;  %6658 = vrot.lane.b32.xlu1 %v6617_v44, %s8593_s12  ;;  %v12525_v61 = vld [vmem:[#allocation4 + $0x52] sm:$0xff] }
 0x67b   : > { %4744 = vst.msk [vmem:[#allocation5 + $0x50] sm:$0xff] %vm1291_vm5, %v4707_v24  ;;  %v7298_v24 = vld [vmem:[%s13332_s2 + $0x138] sm:$0xff] }
 0x67c   : > { %v4993_v16 = vpop.permute.xlu1 %4992 }
 0x67d   : > { %5031 = vst.msk [vmem:[#allocation5 + $0x48] sm:$0xff] %vm1583_vm8, %v4993_v16  ;;  %6550 = vrot.lane.b32.xlu0 %v6801_v55, %s8591_s10  ;;  %v8434_v55 = vpack.c.bf16 %v7298_v24, %v7297_v39 }
 0x67e   : > { %v5089_v15 = vpop.permute.xlu0 %5088  ;;  %6752 = vrot.lane.b32.xlu1 %v6712_v40, %s8595_s27 }
 0x67f   : > { %5127 = vst.msk [vmem:[#allocation5 + $0x48] sm:$0xff] %vm1680_vm9, %v5089_v15  ;;  %8435 = vmatprep.subr.bf16.mxu0 %v8434_v55  ;;  %8450 = vmatprep.subr.bf16.mxu1 %v8434_v55 }
 0x680   : > { %v4803_v49 = vpop.permute.xlu1 %4802  ;;  %8437 = vmatpush3.bf16.msra.mxu0 %v8434_v55  ;;  %8455 = vmatpush3.bf16.msra.mxu1 %v8434_v55 }
 0x681   : > { %4840 = vst.msk [vmem:[#allocation5 + $0x50] sm:$0xff] %vm1388_vm6, %v4803_v49  ;;  %6644 = vrot.lane.b32.xlu0 %v6896_v46, %s8593_s12  ;;  %v7299_v46 = vld [vmem:[%s13332_s2 + $0x140] sm:$0xff] }
 0x682   : > { %v4427_v48 = vpop.permute.xlu0 %4426  ;;  %4936 = vst.msk [vmem:[#allocation5 + $0x50] sm:$0xff] %vm1486_vm7, %v4899_v23  ;;  %6754 = vrot.lane.b32.xlu1 %v12471_v32, %s8595_s27  ;;  %v6809_v23 = vld [vmem:[#allocation4 + $0xf2] sm:$0xff]  ;;  %v12539_v49 = vld [vmem:[#allocation4 + $0x44] sm:$0xff] }
 0x683   : > { %4460 = vst.msk [vmem:[#allocation5 + $0x70] sm:$0xff] %vm1000_vm2, %v4427_v48  ;;  %v7300_v48 = vld [vmem:[%s13332_s2 + $0x148] sm:$0xff] }
 0x684   : > { %5032 = vst.msk [vmem:[#allocation5 + $0x50] sm:$0xff] %vm1583_vm8, %v4995_v3  ;;  %v4617_v10 = vpop.permute.xlu1 %4616 }
 0x685   : > { %5128 = vst.msk [vmem:[#allocation5 + $0x50] sm:$0xff] %vm1680_vm9, %v5091_v30  ;;  %6930 = vrot.lane.b32.xlu0 %v6897_v8, %s8597_s30  ;;  %v6905_v30 = vld [vmem:[#allocation4 + $0xf4] sm:$0xff] }
 0x686   : > { %v4523_v53 = vpop.permute.xlu0 %4522  ;;  %v5143_v35 = vld [vmem:[#allocation5 + $0x48] sm:$0xff]  ;;  %6848 = vrot.lane.b32.xlu1 %v6808_v37, %s8596_s28 }
 0x687   : > { %4556 = vst.msk [vmem:[#allocation5 + $0x70] sm:$0xff] %vm1097_vm3, %v4523_v53  ;;  %8317 = vmatmul.mubr.msk.f32.gmra.mrb[40].mxu1 %vm1722_vm10, %v5143_v35  ;;  %v7002_v35 = vld [vmem:[#allocation4 + $0x110] sm:$0xff] }
 0x688   : > { %6505 = vst.msk [vmem:[#allocation5 + $0x48] sm:$0xff] %vm254_vm0, %v6489_v6  ;;  %v4713_v17 = vpop.permute.xlu1 %4712 }
 0x689   : > { %7025 = vrot.lane.b32.xlu0 %v12328_v38, %s8590_s9 }
 0x68a   : > { %v4903_v29 = vpop.permute.xlu0 %4902  ;;  %6564 = vrot.lane.b32.xlu1 %v6808_v37, %s8591_s10 }
 0x68c   : > { %v5144_v5 = vld [vmem:[#allocation5 + $0x50] sm:$0xff]  ;;  %v4809_v7 = vpop.permute.xlu1 %4808 }
 0x68d   : > { %8319 = vmatprep.mubr.msk.f32.mxu1 %vm1722_vm10, %v5144_v5  ;;  %6506 = vst.msk [vmem:[#allocation5 + $0x50] sm:$0xff] %vm254_vm0, %v6712_v40  ;;  %6646 = vrot.lane.b32.xlu0 %v6897_v8, %s8593_s12  ;;  %v8438_v40 = vpack.c.bf16 %v7300_v48, %v7299_v46  ;;  %v7304_v8 = vld [vmem:[%s13332_s2 + $0x168] sm:$0xff]  ;;  %v6996_v48 = vld [vmem:[#allocation4 + $0x70] sm:$0xff] }
 0x68e   : > { %v4999_v36 = vpop.permute.xlu0 %4998  ;;  %6850 = vrot.lane.b32.xlu1 %v6809_v23, %s8596_s28 }
 0x68f   : > { %8439 = vmatprep.subr.bf16.mxu0 %v8438_v40  ;;  %8451 = vmatprep.subr.bf16.mxu1 %v8438_v40 }
 0x690   : > { %v4425_v41 = vpop.permute.xlu1 %4424  ;;  %8441 = vmatpush3.bf16.msra.mxu0 %v8438_v40  ;;  %8456 = vmatpush3.bf16.msra.mxu1 %v8438_v40 }
 0x691   : > { %4459 = vst.msk [vmem:[#allocation5 + $0x68] sm:$0xff] %vm1000_vm2, %v4425_v41  ;;  %6740 = vrot.lane.b32.xlu0 %v12328_v38, %s8595_s27  ;;  %v7089_v38 = vld [vmem:[#allocation4 + $0x42] sm:$0xff] }
 0x692   : > { %v5095_v13 = vpop.permute.xlu0 %5094  ;;  %6944 = vrot.lane.b32.xlu1 %v6904_v56, %s8597_s30 }
 0x694   : > { %v4521_v11 = vpop.permute.xlu1 %4520 }
 0x695   : > { %4555 = vst.msk [vmem:[#allocation5 + $0x68] sm:$0xff] %vm1097_vm3, %v4521_v11  ;;  %7027 = vrot.lane.b32.xlu0 %v12382_v9, %s8590_s9 }
 0x696   : > { %v4615_v19 = vpop.permute.xlu0 %4614  ;;  %4651 = vst.msk [vmem:[#allocation5 + $0x68] sm:$0xff] %vm1194_vm4, %v4617_v10  ;;  %6566 = vrot.lane.b32.xlu1 %v6809_v23, %s8591_s10  ;;  %v7301_v10 = vld [vmem:[%s13332_s2 + $0x150] sm:$0xff] }
 0x697   : > { %4650 = vst.msk [vmem:[#allocation5 + $0x60] sm:$0xff] %vm1194_vm4, %v4615_v19 }
 0x698   : > { %4747 = vst.msk [vmem:[#allocation5 + $0x68] sm:$0xff] %vm1291_vm5, %v4713_v17  ;;  %v4901_v2 = vpop.permute.xlu1 %4900  ;;  %v7303_v17 = vld [vmem:[%s13332_s2 + $0x160] sm:$0xff] }
 0x699   : > { %4843 = vst.msk [vmem:[#allocation5 + $0x68] sm:$0xff] %vm1388_vm6, %v4809_v7  ;;  %7121 = vrot.lane.b32.xlu0 %v7089_v38, %s8592_s11  ;;  %v8446_v37 = vpack.c.bf16 %v7304_v8, %v7303_v17  ;;  %v7097_v7 = vld [vmem:[#allocation4 + $0x102] sm:$0xff] }
 0x69a   : > { %v4711_v12 = vpop.permute.xlu0 %4710  ;;  %4937 = vst.msk [vmem:[#allocation5 + $0x58] sm:$0xff] %vm1486_vm7, %v4901_v2  ;;  %6660 = vrot.lane.b32.xlu1 %v6904_v56, %s8593_s12  ;;  %v7186_v56 = vld [vmem:[#allocation4 + $0x54] sm:$0xff] }
 0x69b   : > { %4746 = vst.msk [vmem:[#allocation5 + $0x60] sm:$0xff] %vm1291_vm5, %v4711_v12 }
 0x69c   : > { %v4997_v20 = vpop.permute.xlu1 %4996 }
 0x69d   : > { %5033 = vst.msk [vmem:[#allocation5 + $0x58] sm:$0xff] %vm1583_vm8, %v4997_v20  ;;  %6742 = vrot.lane.b32.xlu0 %v12382_v9, %s8595_s27 }
 0x69e   : > { %v5093_v3 = vpop.permute.xlu0 %5092  ;;  %6946 = vrot.lane.b32.xlu1 %v6905_v30, %s8597_s30 }
 0x69f   : > { %5129 = vst.msk [vmem:[#allocation5 + $0x58] sm:$0xff] %vm1680_vm9, %v5093_v3  ;;  %v7098_v3 = vld [vmem:[#allocation4 + $0x112] sm:$0xff] }
 0x6a0   : > { %v4807_v60 = vpop.permute.xlu1 %4806 }
 0x6a1   : > { %4842 = vst.msk [vmem:[#allocation5 + $0x60] sm:$0xff] %vm1388_vm6, %v4807_v60  ;;  %6836 = vrot.lane.b32.xlu0 %v7089_v38, %s8596_s28 }
 0x6a2   : > { %v4619_v51 = vpop.permute.xlu0 %4618  ;;  %4938 = vst.msk [vmem:[#allocation5 + $0x60] sm:$0xff] %vm1486_vm7, %v4903_v29  ;;  %7041 = vrot.lane.b32.xlu1 %v7001_v31, %s8590_s9 }
 0x6a3   : > { %4652 = vst.msk [vmem:[#allocation5 + $0x70] sm:$0xff] %vm1194_vm4, %v4619_v51  ;;  %v7193_v51 = vld [vmem:[#allocation4 + $0x104] sm:$0xff] }
 0x6a4   : > { %5034 = vst.msk [vmem:[#allocation5 + $0x60] sm:$0xff] %vm1583_vm8, %v4999_v36  ;;  %v4621_v14 = vpop.permute.xlu1 %4620 }
 0x6a5   : > { %5130 = vst.msk [vmem:[#allocation5 + $0x60] sm:$0xff] %vm1680_vm9, %v5095_v13  ;;  %7123 = vrot.lane.b32.xlu0 %v12525_v61, %s8592_s11  ;;  %v7305_v13 = vld [vmem:[%s13332_s2 + $0x170] sm:$0xff] }
 0x6a6   : > { %v4715_v58 = vpop.permute.xlu0 %4714  ;;  %v5145_v50 = vld [vmem:[#allocation5 + $0x58] sm:$0xff]  ;;  %6662 = vrot.lane.b32.xlu1 %v6905_v30, %s8593_s12 }
 0x6a7   : > { %4748 = vst.msk [vmem:[#allocation5 + $0x70] sm:$0xff] %vm1291_vm5, %v4715_v58  ;;  %8320 = vmatmul.mubr.msk.f32.gmra.mrb[42].mxu1 %vm1722_vm10, %v5145_v50 }
 0x6a8   : > { %6507 = vst.msk [vmem:[#allocation5 + $0x58] sm:$0xff] %vm254_vm0, %v12471_v32  ;;  %v4717_v9 = vpop.permute.xlu1 %4716  ;;  %v7302_v32 = vld [vmem:[%s13332_s2 + $0x158] sm:$0xff] }
 0x6a9   : > { %7217 = vrot.lane.b32.xlu0 %v12539_v49, %s8594_s13  ;;  %v8442_v29 = vpack.c.bf16 %v7302_v32, %v7301_v10 }
 0x6aa   : > { %v5097_v42 = vpop.permute.xlu0 %5096  ;;  %6756 = vrot.lane.b32.xlu1 %v7001_v31, %s8595_s27 }
 0x6ab   : > { %8443 = vmatprep.subr.bf16.mxu0 %v8442_v29  ;;  %8452 = vmatprep.subr.bf16.mxu1 %v8442_v29 }
 0x6ac   : > { %v5146_v44 = vld [vmem:[#allocation5 + $0x60] sm:$0xff]  ;;  %v4429_v16 = vpop.permute.xlu1 %4428  ;;  %8445 = vmatpush3.bf16.msra.mxu0 %v8442_v29  ;;  %8457 = vmatpush3.bf16.msra.mxu1 %v8442_v29 }
 0x6ad   : > { %8322 = vmatprep.mubr.msk.f32.mxu1 %vm1722_vm10, %v5146_v44  ;;  %6508 = vst.msk [vmem:[#allocation5 + $0x60] sm:$0xff] %vm254_vm0, %v7001_v31  ;;  %6552 = vrot.lane.b32.xlu0 %v7089_v38, %s8591_s10  ;;  %v6495_v44 = vld [vmem:[#allocation4 + $0x130] sm:$0xff]  ;;  %v12648_v29 = vld [vmem:[%s13333_s3 + $0x7] ss:$0 sm:$0xff] }
 0x6ae   : > { %v4907_v15 = vpop.permute.xlu0 %4906  ;;  %4461 = vst.msk [vmem:[#allocation5 + $0x78] sm:$0xff] %vm1000_vm2, %v4429_v16  ;;  %7043 = vrot.lane.b32.xlu1 %v7002_v35, %s8590_s9  ;;  %8447 = vmatprep.subr.bf16.mxu0 %v8446_v37 }
 0x6af   : > { %8453 = vmatprep.subr.bf16.mxu1 %v8446_v37 }
 0x6b0   : > { %v4525_v53 = vpop.permute.xlu1 %4524  ;;  %8449 = vmatpush3.bf16.msra.mxu0 %v8446_v37  ;;  %8458 = vmatpush3.bf16.msra.mxu1 %v8446_v37  ;;  %v12656_v37 = vld [vmem:[%s13333_s3 + $0xb] ss:$0 sm:$0xff] }
 0x6b1   : > { %4557 = vst.msk [vmem:[#allocation5 + $0x78] sm:$0xff] %vm1097_vm3, %v4525_v53  ;;  %6838 = vrot.lane.b32.xlu0 %v12525_v61, %s8596_s28  ;;  %8344 = vmatprep.subr.mxu0 %v7305_v13  ;;  %v12639_v53 = vld [vmem:[%s13333_s3 + $0xa] ss:$0 sm:$0xff] }
 0x6b2   : > { %v5003_v6 = vpop.permute.xlu0 %5002  ;;  %4653 = vst.msk [vmem:[#allocation5 + $0x78] sm:$0xff] %vm1194_vm4, %v4621_v14  ;;  %7137 = vrot.lane.b32.xlu1 %v7097_v7, %s8592_s11  ;;  %8454 = vmatprep.subr.mxu1 %v7305_v13  ;;  %v6494_v14 = vld [vmem:[#allocation4 + $0x120] sm:$0xff] }
 0x6b3   : > { %4749 = vst.msk [vmem:[#allocation5 + $0x78] sm:$0xff] %vm1291_vm5, %v4717_v9 }
 0x6b4   : > { %v4905_v36 = vpop.permute.xlu1 %4904  ;;  %8345 = vmatpush3.msra.mxu0 %v7305_v13  ;;  %8459 = vmatpush3.msra.mxu1 %v7305_v13 }
 0x6b5   : > { %4939 = vst.msk [vmem:[#allocation5 + $0x68] sm:$0xff] %vm1486_vm7, %v4905_v36  ;;  %6932 = vrot.lane.b32.xlu0 %v12539_v49, %s8597_s30 }
 0x6b6   : > { %v5099_v5 = vpop.permute.xlu0 %5098  ;;  %6758 = vrot.lane.b32.xlu1 %v7002_v35, %s8595_s27 }
 0x6b8   : > { %v5001_v23 = vpop.permute.xlu1 %5000 }
 0x6b9   : > { %5035 = vst.msk [vmem:[#allocation5 + $0x68] sm:$0xff] %vm1583_vm8, %v5001_v23  ;;  %7219 = vrot.lane.b32.xlu0 %v7186_v56, %s8594_s13 }
 0x6ba   : > { %v12568_v41 = vpop.permute.xlu0 %5826  ;;  %5131 = vst.msk [vmem:[#allocation5 + $0x68] sm:$0xff] %vm1680_vm9, %v5097_v42  ;;  %6852 = vrot.lane.b32.xlu1 %v7097_v7, %s8596_s28 }
 0x6bc   : > { %v4811_v11 = vpop.permute.xlu1 %4810 }
 0x6bd   : > { %4844 = vst.msk [vmem:[#allocation5 + $0x70] sm:$0xff] %vm1388_vm6, %v4811_v11  ;;  %6554 = vrot.lane.b32.xlu0 %v12525_v61, %s8591_s10 }
 0x6be   : > { %v12575_v19 = vpop.permute.xlu0 %5830  ;;  %4940 = vst.msk [vmem:[#allocation5 + $0x70] sm:$0xff] %vm1486_vm7, %v4907_v15  ;;  %7139 = vrot.lane.b32.xlu1 %v7098_v3, %s8592_s11  ;;  %v7194_v15 = vld [vmem:[#allocation4 + $0x114] sm:$0xff] }
 0x6bf   : > { %5036 = vst.msk [vmem:[#allocation5 + $0x70] sm:$0xff] %vm1583_vm8, %v5003_v6  ;;  %v7091_v6 = vld [vmem:[#allocation4 + $0x62] sm:$0xff] }
 0x6c0   : > { %5132 = vst.msk [vmem:[#allocation5 + $0x70] sm:$0xff] %vm1680_vm9, %v5099_v5  ;;  %v4813_v2 = vpop.permute.xlu1 %4812 }
 0x6c1   : > { %4845 = vst.msk [vmem:[#allocation5 + $0x78] sm:$0xff] %vm1388_vm6, %v4813_v2  ;;  %v5147_v20 = vld [vmem:[#allocation5 + $0x68] sm:$0xff]  ;;  %6648 = vrot.lane.b32.xlu0 %v12539_v49, %s8593_s12  ;;  %v7003_v2 = vld [vmem:[#allocation4 + $0x120] sm:$0xff] }
 0x6c2   : > { %v12583_v12 = vpop.permute.xlu0 %5834  ;;  %6509 = vst.msk [vmem:[#allocation5 + $0x68] sm:$0xff] %vm254_vm0, %v7002_v35  ;;  %8323 = vmatmul.mubr.msk.f32.gmra.mrb[44].mxu1 %vm1722_vm10, %v5147_v20  ;;  %7233 = vrot.lane.b32.xlu1 %v7193_v51, %s8594_s13 }
 0x6c4   : > { %v4909_v60 = vpop.permute.xlu1 %4908 }
 0x6c5   : > { %4941 = vst.msk [vmem:[#allocation5 + $0x78] sm:$0xff] %vm1486_vm7, %v4909_v60  ;;  %6934 = vrot.lane.b32.xlu0 %v7186_v56, %s8597_s30 }
 0x6c6   : > { %v12591_v38 = vpop.permute.xlu0 %5838  ;;  %6568 = vrot.lane.b32.xlu1 %v7097_v7, %s8591_s10 }
 0x6c7   : > { %v5148_v30 = vld [vmem:[#allocation5 + $0x70] sm:$0xff] }
 0x6c8   : > { %v5005_v31 = vpop.permute.xlu1 %5004  ;;  %8325 = vmatprep.mubr.msk.f32.mxu1 %vm1722_vm10, %v5148_v30  ;;  %6510 = vst.msk [vmem:[#allocation5 + $0x70] sm:$0xff] %vm254_vm0, %v6494_v14  ;;  %v7092_v30 = vld [vmem:[#allocation4 + $0x72] sm:$0xff] }
 0x6c9   : > { %5037 = vst.msk [vmem:[#allocation5 + $0x78] sm:$0xff] %vm1583_vm8, %v5005_v31  ;;  %7029 = vrot.lane.b32.xlu0 %v12395_v57, %s8590_s9 }
 0x6ca   : > { %v12597_v58 = vpop.permute.xlu0 %5842  ;;  %6854 = vrot.lane.b32.xlu1 %v7098_v3, %s8596_s28 }
 0x6cc   : > { %v5101_v9 = vpop.permute.xlu1 %5100 }
 0x6cd   : > { %5133 = vst.msk [vmem:[#allocation5 + $0x78] sm:$0xff] %vm1680_vm9, %v5101_v9  ;;  %6650 = vrot.lane.b32.xlu0 %v7186_v56, %s8593_s12 }
 0x6ce   : > { %v6545_v50 = vpop.permute.xlu0 %6544  ;;  %6948 = vrot.lane.b32.xlu1 %v7193_v51, %s8597_s30 }
 0x6cf   : > { %6592 = vst.msk [vmem:[#allocation5] sm:$0xff] %vm1000_vm2, %v6545_v50  ;;  %v7187_v50 = vld [vmem:[#allocation4 + $0x64] sm:$0xff] }
 0x6d0   : > { %v5829_v39 = vpop.permute.xlu1 %5828 }
 0x6d1   : > { %6744 = vrot.lane.b32.xlu0 %v12395_v57, %s8595_s27  ;;  %v12630_v57 = vld [vmem:[%s13333_s3 + $0x6] ss:$0 sm:$0xff] }
 0x6d2   : > { %v6547_v42 = vpop.permute.xlu0 %6546  ;;  %7235 = vrot.lane.b32.xlu1 %v7194_v15, %s8594_s13  ;;  %v3062_v10 = vmul.f32 %v11029_v25, %v12630_v57  ;;  %v3061_v17 = vmul.f32 %v12630_v57, %v11035_v52 }
 0x6d3   : > { %6593 = vst.msk [vmem:[#allocation5 + $0x8] sm:$0xff] %vm1000_vm2, %v6547_v42 }
 0x6d4   : > { %v12612_v61 = vpop.permute.xlu1 %5832  ;;  %v5149_v55 = vld [vmem:[#allocation5 + $0x78] sm:$0xff]  ;;  %v3083_v52 = vadd.f32 %v12648_v29, %v3062_v10  ;;  %v3082_v11 = vadd.f32 %v12648_v29, %v3061_v17  ;;  %v3064_v17 = vmul.f32 %v11111_v27, %v12630_v57 }
 0x6d5   : > { %8326 = vmatmul.mubr.msk.f32.gmra.mrb[46].mxu1 %vm1722_vm10, %v5149_v55  ;;  %6511 = vst.msk [vmem:[#allocation5 + $0x78] sm:$0xff] %vm254_vm0, %v6495_v44  ;;  %7031 = vrot.lane.b32.xlu0 %v6996_v48, %s8590_s9  ;;  %v7099_v55 = vld [vmem:[#allocation4 + $0x122] sm:$0xff] }
 0x6d6   : > { %v6641_v24 = vpop.permute.xlu0 %6640  ;;  %6570 = vrot.lane.b32.xlu1 %v7098_v3, %s8591_s10 }
 0x6d7   : > { %6688 = vst.msk [vmem:[#allocation5] sm:$0xff] %vm1097_vm3, %v6641_v24 }
 0x6d8   : > { %v12620_v46 = vpop.permute.xlu1 %5836 }
 0x6d9   : > { %7125 = vrot.lane.b32.xlu0 %v7091_v6, %s8592_s11  ;;  %v8306_v8 = vpop.f32.mrb[32].mxu1 }
 0x6da   : > { %v6643_v16 = vpop.permute.xlu0 %6642  ;;  %6664 = vrot.lane.b32.xlu1 %v7193_v51, %s8593_s12  ;;  %v5358_v25 = vmul.f32 %v8306_v8, %v12639_v53  ;;  %v5273_v5 = vpop.f32.mrb[33].mxu1 }
 0x6db   : > { %6689 = vst.msk [vmem:[#allocation5 + $0x8] sm:$0xff] %vm1097_vm3, %v6643_v16  ;;  %v5357_v36 = vmul.f32 %v12639_v53, %v5273_v5  ;;  %v3063_v5 = vmul.f32 %v12630_v57, %v11113_v21 }
 0x6dc   : > { %v12625_v40 = vpop.permute.xlu1 %5840  ;;  %v5379_v7 = vadd.f32 %v12656_v37, %v5358_v25 }
 0x6dd   : > { %6746 = vrot.lane.b32.xlu0 %v6996_v48, %s8595_s27  ;;  %v5378_v56 = vadd.f32 %v12656_v37, %v5357_v36 }
 0x6de   : > { %v6737_v49 = vpop.permute.xlu0 %6736  ;;  %6950 = vrot.lane.b32.xlu1 %v7194_v15, %s8597_s30  ;;  %v5395_v3 = vadd.f32 %v5379_v7, %v3083_v52  ;;  %v7195_v52 = vld [vmem:[#allocation4 + $0x124] sm:$0xff] }
 0x6df   : > { %6784 = vst.msk [vmem:[#allocation5] sm:$0xff] %vm1194_vm4, %v6737_v49  ;;  %v5394_v20 = vadd.f32 %v5378_v56, %v3082_v11  ;;  %v7188_v49 = vld [vmem:[#allocation4 + $0x74] sm:$0xff] }
 0x6e0   : > { %v12643_v35 = vpop.permute.xlu1 %5844  ;;  %5411 = vst.msk [vmem:[%s12672_s7 + $0x8] sm:$0xff] %vm254_vm0, %v5395_v3 }
 0x6e1   : > { %6840 = vrot.lane.b32.xlu0 %v7091_v6, %s8596_s28  ;;  %5875 = vst.msk [vmem:[%s12672_s7 + $0x8] sm:$0xff] %vm1000_vm2, %v5829_v39 }
 0x6e2   : > { %v6739_v32 = vpop.permute.xlu0 %6738  ;;  %7045 = vrot.lane.b32.xlu1 %v7003_v2, %s8590_s9  ;;  %5410 = vst.msk [vmem:[%s12672_s7] sm:$0xff] %vm254_vm0, %v5394_v20 }
 0x6e3   : > { %6785 = vst.msk [vmem:[#allocation5 + $0x8] sm:$0xff] %vm1194_vm4, %v6739_v32  ;;  %v7100_v32 = vld [vmem:[#allocation4 + $0x132] sm:$0xff] }
 0x6e4   : > { %v6561_v23 = vpop.permute.xlu1 %6560  ;;  %5874 = vst.msk [vmem:[%s12672_s7] sm:$0xff] %vm1000_vm2, %v12568_v41  ;;  %v7004_v41 = vld [vmem:[#allocation4 + $0x130] sm:$0xff] }
 0x6e5   : > { %6600 = vst.msk [vmem:[#allocation5 + $0x40] sm:$0xff] %vm1000_vm2, %v6561_v23  ;;  %7127 = vrot.lane.b32.xlu0 %v7092_v30, %s8592_s11  ;;  %v3085_v23 = vadd.f32 %v12648_v29, %v3064_v17 }
 0x6e6   : > { %v6833_v13 = vpop.permute.xlu0 %6832  ;;  %6666 = vrot.lane.b32.xlu1 %v7194_v15, %s8593_s12 }
 0x6e7   : > { %6880 = vst.msk [vmem:[#allocation5] sm:$0xff] %vm1291_vm5, %v6833_v13 }
 0x6e8   : > { %v6563_v51 = vpop.permute.xlu1 %6562 }
 0x6e9   : > { %6601 = vst.msk [vmem:[#allocation5 + $0x48] sm:$0xff] %vm1000_vm2, %v6563_v51  ;;  %7221 = vrot.lane.b32.xlu0 %v7187_v50, %s8594_s13 }
 0x6ea   : > { %v6549_v60 = vpop.permute.xlu0 %6548  ;;  %6760 = vrot.lane.b32.xlu1 %v7003_v2, %s8595_s27  ;;  %v3084_v2 = vadd.f32 %v12648_v29, %v3063_v5 }
 0x6eb   : > { %6594 = vst.msk [vmem:[#allocation5 + $0x10] sm:$0xff] %vm1000_vm2, %v6549_v60 }
 0x6ec   : > { %v6657_v31 = vpop.permute.xlu1 %6656 }
 0x6ed   : > { %6696 = vst.msk [vmem:[#allocation5 + $0x40] sm:$0xff] %vm1097_vm3, %v6657_v31  ;;  %6556 = vrot.lane.b32.xlu0 %v7091_v6, %s8591_s10 }
 0x6ee   : > { %v6835_v14 = vpop.permute.xlu0 %6834  ;;  %7047 = vrot.lane.b32.xlu1 %v7004_v41, %s8590_s9 }
 0x6ef   : > { %6881 = vst.msk [vmem:[#allocation5 + $0x8] sm:$0xff] %vm1291_vm5, %v6835_v14  ;;  %v6997_v14 = vld [vmem:[#allocation4 + $0x80] sm:$0xff] }
 0x6f0   : > { %v6659_v42 = vpop.permute.xlu1 %6658 }
 0x6f1   : > { %6697 = vst.msk [vmem:[#allocation5 + $0x48] sm:$0xff] %vm1097_vm3, %v6659_v42  ;;  %6842 = vrot.lane.b32.xlu0 %v7092_v30, %s8596_s28 }
 0x6f2   : > { %v6929_v9 = vpop.permute.xlu0 %6928  ;;  %7141 = vrot.lane.b32.xlu1 %v7099_v55, %s8592_s11 }
 0x6f3   : > { %6976 = vst.msk [vmem:[#allocation5] sm:$0xff] %vm1388_vm6, %v6929_v9 }
 0x6f4   : > { %v6753_v24 = vpop.permute.xlu1 %6752 }
 0x6f5   : > { %6792 = vst.msk [vmem:[#allocation5 + $0x40] sm:$0xff] %vm1194_vm4, %v6753_v24  ;;  %6936 = vrot.lane.b32.xlu0 %v7187_v50, %s8597_s30 }
 0x6f6   : > { %v6551_v39 = vpop.permute.xlu0 %6550  ;;  %6762 = vrot.lane.b32.xlu1 %v7004_v41, %s8595_s27 }
 0x6f7   : > { %6595 = vst.msk [vmem:[#allocation5 + $0x18] sm:$0xff] %vm1000_vm2, %v6551_v39  ;;  %v6998_v39 = vld [vmem:[#allocation4 + $0x90] sm:$0xff] }
 0x6f8   : > { %v6755_v15 = vpop.permute.xlu1 %6754 }
 0x6f9   : > { %6793 = vst.msk [vmem:[#allocation5 + $0x48] sm:$0xff] %vm1194_vm4, %v6755_v15  ;;  %7223 = vrot.lane.b32.xlu0 %v7188_v49, %s8594_s13 }
 0x6fa   : > { %v6645_v44 = vpop.permute.xlu0 %6644  ;;  %6856 = vrot.lane.b32.xlu1 %v7099_v55, %s8596_s28 }
 0x6fb   : > { %6690 = vst.msk [vmem:[#allocation5 + $0x10] sm:$0xff] %vm1097_vm3, %v6645_v44  ;;  %v7093_v44 = vld [vmem:[#allocation4 + $0x82] sm:$0xff] }
 0x6fc   : > { %v6849_v48 = vpop.permute.xlu1 %6848 }
 0x6fd   : > { %6888 = vst.msk [vmem:[#allocation5 + $0x40] sm:$0xff] %vm1291_vm5, %v6849_v48  ;;  %6558 = vrot.lane.b32.xlu0 %v7092_v30, %s8591_s10  ;;  %v3066_v48 = vmul.f32 %v11227_v54, %v12630_v57 }
 0x6fe   : > { %v6931_v16 = vpop.permute.xlu0 %6930  ;;  %7143 = vrot.lane.b32.xlu1 %v7100_v32, %s8592_s11 }
 0x6ff   : > { %6977 = vst.msk [vmem:[#allocation5 + $0x8] sm:$0xff] %vm1388_vm6, %v6931_v16  ;;  %v3087_v54 = vadd.f32 %v12648_v29, %v3066_v48 }
 0x700   : > { %v6565_v10 = vpop.permute.xlu1 %6564 }
 0x701   : > { %6602 = vst.msk [vmem:[#allocation5 + $0x50] sm:$0xff] %vm1000_vm2, %v6565_v10  ;;  %6652 = vrot.lane.b32.xlu0 %v7187_v50, %s8593_s12 }
 0x702   : > { %v7026_v6 = vpop.permute.xlu0 %7025  ;;  %7237 = vrot.lane.b32.xlu1 %v7195_v52, %s8594_s13 }
 0x703   : > { %7073 = vst.msk [vmem:[#allocation5] sm:$0xff] %vm1486_vm7, %v7026_v6 }
 0x704   : > { %v6851_v25 = vpop.permute.xlu1 %6850 }
 0x705   : > { %6889 = vst.msk [vmem:[#allocation5 + $0x48] sm:$0xff] %vm1291_vm5, %v6851_v25  ;;  %6938 = vrot.lane.b32.xlu0 %v7188_v49, %s8597_s30 }
 0x706   : > { %v6647_v8 = vpop.permute.xlu0 %6646  ;;  %v8309_v36 = vpop.f32.mrb[34].mxu1  ;;  %6572 = vrot.lane.b32.xlu1 %v7099_v55, %s8591_s10 }
 0x707   : > { %6691 = vst.msk [vmem:[#allocation5 + $0x18] sm:$0xff] %vm1097_vm3, %v6647_v8  ;;  %v5360_v7 = vmul.f32 %v8309_v36, %v12639_v53  ;;  %v5283_v13 = vpop.f32.mrb[35].mxu1 }
 0x708   : > { %v5359_v27 = vmul.f32 %v12639_v53, %v5283_v13  ;;  %v6945_v56 = vpop.permute.xlu1 %6944  ;;  %v3068_v13 = vmul.f32 %v11236_v33, %v12630_v57 }
 0x709   : > { %v5381_v21 = vadd.f32 %v12656_v37, %v5360_v7  ;;  %6984 = vst.msk [vmem:[#allocation5 + $0x40] sm:$0xff] %vm1388_vm6, %v6945_v56  ;;  %7033 = vrot.lane.b32.xlu0 %v6997_v14, %s8590_s9  ;;  %v3067_v56 = vmul.f32 %v12630_v57, %v11239_v1 }
 0x70a   : > { %v6741_v11 = vpop.permute.xlu0 %6740  ;;  %v5380_v3 = vadd.f32 %v12656_v37, %v5359_v27  ;;  %6858 = vrot.lane.b32.xlu1 %v7100_v32, %s8596_s28 }
 0x70b   : > { %6786 = vst.msk [vmem:[#allocation5 + $0x10] sm:$0xff] %vm1194_vm4, %v6741_v11  ;;  %v5397_v20 = vadd.f32 %v5381_v21, %v3085_v23 }
 0x70c   : > { %v5396_v60 = vadd.f32 %v5380_v3, %v3084_v2  ;;  %v6567_v30 = vpop.permute.xlu1 %6566  ;;  %v7094_v3 = vld [vmem:[#allocation4 + $0x92] sm:$0xff] }
 0x70d   : > { %5413 = vst.msk [vmem:[%s12672_s7 + $0x18] sm:$0xff] %vm254_vm0, %v5397_v20  ;;  %6654 = vrot.lane.b32.xlu0 %v7188_v49, %s8593_s12  ;;  %v3065_v49 = vmul.f32 %v12630_v57, %v11230_v18  ;;  %v7005_v18 = vld [vmem:[#allocation4 + $0x140] sm:$0xff] }
 0x70e   : > { %v7028_v51 = vpop.permute.xlu0 %7027  ;;  %5877 = vst.msk [vmem:[%s12672_s7 + $0x18] sm:$0xff] %vm1000_vm2, %v12612_v61  ;;  %6603 = vst.msk [vmem:[#allocation5 + $0x58] sm:$0xff] %vm1000_vm2, %v6567_v30  ;;  %6952 = vrot.lane.b32.xlu1 %v7195_v52, %s8597_s30 }
 0x70f   : > { %5412 = vst.msk [vmem:[%s12672_s7 + $0x10] sm:$0xff] %vm254_vm0, %v5396_v60  ;;  %v3086_v36 = vadd.f32 %v12648_v29, %v3065_v49  ;;  %v3089_v60 = vadd.f32 %v12648_v29, %v3068_v13  ;;  %v6999_v49 = vld [vmem:[#allocation4 + $0xa0] sm:$0xff] }
 0x710   : > { %7074 = vst.msk [vmem:[#allocation5 + $0x8] sm:$0xff] %vm1486_vm7, %v7028_v51  ;;  %v6661_v50 = vpop.permute.xlu1 %6660 }
 0x711   : > { %5876 = vst.msk [vmem:[%s12672_s7 + $0x10] sm:$0xff] %vm1000_vm2, %v12575_v19  ;;  %v7196_v19 = vld [vmem:[#allocation4 + $0x134] sm:$0xff]  ;;  %6748 = vrot.lane.b32.xlu0 %v6997_v14, %s8595_s27  ;;  %v3088_v14 = vadd.f32 %v12648_v29, %v3067_v56 }
 0x712   : > { %v7122_v31 = vpop.permute.xlu0 %7121  ;;  %6698 = vst.msk [vmem:[#allocation5 + $0x50] sm:$0xff] %vm1097_vm3, %v6661_v50  ;;  %7239 = vrot.lane.b32.xlu1 %v7196_v19, %s8594_s13 }
 0x713   : > { %7169 = vst.msk [vmem:[#allocation5] sm:$0xff] %vm1583_vm8, %v7122_v31 }
 0x714   : > { %v6947_v9 = vpop.permute.xlu1 %6946 }
 0x715   : > { %6985 = vst.msk [vmem:[#allocation5 + $0x48] sm:$0xff] %vm1388_vm6, %v6947_v9  ;;  %7035 = vrot.lane.b32.xlu0 %v6998_v39, %s8590_s9 }
 0x716   : > { %v6743_v61 = vpop.permute.xlu0 %6742  ;;  %6574 = vrot.lane.b32.xlu1 %v7100_v32, %s8591_s10 }
 0x717   : > { %6787 = vst.msk [vmem:[#allocation5 + $0x18] sm:$0xff] %vm1194_vm4, %v6743_v61 }
 0x718   : > { %v7042_v41 = vpop.permute.xlu1 %7041 }
 0x719   : > { %7081 = vst.msk [vmem:[#allocation5 + $0x40] sm:$0xff] %vm1486_vm7, %v7042_v41  ;;  %7129 = vrot.lane.b32.xlu0 %v7093_v44, %s8592_s11 }
 0x71a   : > { %v6837_v42 = vpop.permute.xlu0 %6836  ;;  %6668 = vrot.lane.b32.xlu1 %v7195_v52, %s8593_s12 }
 0x71b   : > { %6882 = vst.msk [vmem:[#allocation5 + $0x10] sm:$0xff] %vm1291_vm5, %v6837_v42  ;;  %v7006_v42 = vld [vmem:[#allocation4 + $0x150] sm:$0xff] }
 0x71c   : > { %v6663_v55 = vpop.permute.xlu1 %6662 }
 0x71d   : > { %6699 = vst.msk [vmem:[#allocation5 + $0x58] sm:$0xff] %vm1097_vm3, %v6663_v55  ;;  %6750 = vrot.lane.b32.xlu0 %v6998_v39, %s8595_s27 }
 0x71e   : > { %v7124_v24 = vpop.permute.xlu0 %7123  ;;  %6954 = vrot.lane.b32.xlu1 %v7196_v19, %s8597_s30 }
 0x71f   : > { %7170 = vst.msk [vmem:[#allocation5 + $0x8] sm:$0xff] %vm1583_vm8, %v7124_v24 }
 0x720   : > { %v6757_v16 = vpop.permute.xlu1 %6756 }
 0x721   : > { %6794 = vst.msk [vmem:[#allocation5 + $0x50] sm:$0xff] %vm1194_vm4, %v6757_v16  ;;  %v8312_v6 = vpop.f32.mrb[36].mxu1  ;;  %6844 = vrot.lane.b32.xlu0 %v7093_v44, %s8596_s28 }
 0x722   : > { %v7218_v15 = vpop.permute.xlu0 %7217  ;;  %v5362_v10 = vmul.f32 %v8312_v6, %v12639_v53  ;;  %v5293_v32 = vpop.f32.mrb[37].mxu1  ;;  %7049 = vrot.lane.b32.xlu1 %v7005_v18, %s8590_s9 }
 0x723   : > { %7265 = vst.msk [vmem:[#allocation5] sm:$0xff] %vm1680_vm9, %v7218_v15  ;;  %v5361_v17 = vmul.f32 %v12639_v53, %v5293_v32  ;;  %v6242_v15 = vlaneseq }
 0x724   : > { %v7044_v25 = vpop.permute.xlu1 %7043  ;;  %v5383_v5 = vadd.f32 %v12656_v37, %v5362_v10 }
 0x725   : > { %7082 = vst.msk [vmem:[#allocation5 + $0x48] sm:$0xff] %vm1486_vm7, %v7044_v25  ;;  %v5382_v52 = vadd.f32 %v12656_v37, %v5361_v17  ;;  %7131 = vrot.lane.b32.xlu0 %v7094_v3, %s8592_s11  ;;  %v6243_v6 = vshrl.u32 %v6242_v15, 7  ;;  %v7000_v25 = vld [vmem:[#allocation4 + $0xb0] sm:$0xff] }
 0x726   : > { %v6553_v8 = vpop.permute.xlu0 %6552  ;;  %v5399_v7 = vadd.f32 %v5383_v5, %v3087_v54  ;;  %6670 = vrot.lane.b32.xlu1 %v7196_v19, %s8593_s12 }
 0x727   : > { %6596 = vst.msk [vmem:[#allocation5 + $0x20] sm:$0xff] %vm1000_vm2, %v6553_v8  ;;  %v5398_v27 = vadd.f32 %v5382_v52, %v3086_v36  ;;  %v7102_v8 = vld [vmem:[#allocation4 + $0x152] sm:$0xff]  ;;  %vm6244_vm11 = vcmp.eq.s32.totalorder %v6243_v6, 0  ;;  %v7095_v52 = vld [vmem:[#allocation4 + $0xa2] sm:$0xff]  ;;  %vm6247_vm12 = vcmp.eq.s32.totalorder %v6243_v6, 7 }
 0x728   : > { %v7138_v21 = vpop.permute.xlu1 %7137  ;;  %5415 = vst.msk [vmem:[%s12672_s7 + $0x28] sm:$0xff] %vm254_vm0, %v5399_v7  ;;  %v6245_v36 = vsel %vm6244_vm11, 1.0, %v13428_v63  ;;  %v5440_v6 = vld [vmem:[#allocation2 + $0x70] sm:$0xff] }
 0x729   : > { %7177 = vst.msk [vmem:[#allocation5 + $0x40] sm:$0xff] %vm1583_vm8, %v7138_v21  ;;  %v7096_v21 = vld [vmem:[#allocation4 + $0xb2] sm:$0xff] }
 0x72a   : > { %v6839_v23 = vpop.permute.xlu0 %6838  ;;  %v7281_v11 = vld [vmem:[#allocation5] sm:$0xff]  ;;  %v8315_v2 = vpop.f32.mrb[38].mxu1  ;;  %5879 = vst.msk [vmem:[%s12672_s7 + $0x28] sm:$0xff] %vm1000_vm2, %v12620_v46  ;;  %6764 = vrot.lane.b32.xlu1 %v7005_v18, %s8595_s27 }
 0x72b   : > { %6883 = vst.msk [vmem:[#allocation5 + $0x18] sm:$0xff] %vm1291_vm5, %v6839_v23  ;;  %8346 = vmatprep.mubr.msk.f32.mxu0 %vm1722_vm10, %v7281_v11  ;;  %v5364_v33 = vmul.f32 %v8315_v2, %v12639_v53  ;;  %v5303_v20 = vpop.f32.mrb[39].mxu1  ;;  %v7197_v18 = vld [vmem:[#allocation4 + $0x144] sm:$0xff]  ;;  %v6248_v23 = vsel %vm6247_vm12, 1.0, %v13428_v63  ;;  %v7198_v63 = vld [vmem:[#allocation4 + $0x154] sm:$0xff] }
 0x72c   : > { %5414 = vst.msk [vmem:[%s12672_s7 + $0x20] sm:$0xff] %vm254_vm0, %v5398_v27  ;;  %v5363_v1 = vmul.f32 %v12639_v53, %v5303_v20  ;;  %v6759_v30 = vpop.permute.xlu1 %6758  ;;  %v6246_v27 = vsub.f32 3.0, %v6245_v36 }
 0x72d   : > { %5878 = vst.msk [vmem:[%s12672_s7 + $0x20] sm:$0xff] %vm1000_vm2, %v12583_v12  ;;  %v5385_v46 = vadd.f32 %v12656_v37, %v5364_v33  ;;  %v7189_v12 = vld [vmem:[#allocation4 + $0x84] sm:$0xff] }
 0x72e   : > { %v6933_v51 = vpop.permute.xlu0 %6932  ;;  %v5384_v31 = vadd.f32 %v12656_v37, %v5363_v1  ;;  %6795 = vst.msk [vmem:[#allocation5 + $0x58] sm:$0xff] %vm1194_vm4, %v6759_v30  ;;  %7225 = vrot.lane.b32.xlu0 %v7189_v12, %s8594_s13  ;;  %7051 = vrot.lane.b32.xlu1 %v7006_v42, %s8590_s9  ;;  %v6249_v2 = vsub.f32 %v6246_v27, %v6248_v23 }
 0x72f   : > { %6978 = vst.msk [vmem:[#allocation5 + $0x10] sm:$0xff] %vm1388_vm6, %v6933_v51  ;;  %v5401_v50 = vadd.f32 %v5385_v46, %v3089_v60  ;;  %v7192_v46 = vld [vmem:[#allocation4 + $0xb4] sm:$0xff] }
 0x730   : > { %v5400_v61 = vadd.f32 %v5384_v31, %v3088_v14  ;;  %v6853_v19 = vpop.permute.xlu1 %6852  ;;  %v6250_v60 = vmul.f32 2.0, %v6249_v2  ;;  %v5436_v14 = vld [vmem:[#allocation2 + $0x50] sm:$0xff]  ;;  %v7007_v31 = vld [vmem:[#allocation4 + $0x160] sm:$0xff] }
 0x731   : > { %5417 = vst.msk [vmem:[%s12672_s7 + $0x38] sm:$0xff] %vm254_vm0, %v5401_v50 }
 0x732   : > { %v7220_v9 = vpop.permute.xlu0 %7219  ;;  %5881 = vst.msk [vmem:[%s12672_s7 + $0x38] sm:$0xff] %vm1000_vm2, %v12625_v40  ;;  %6846 = vrot.lane.b32.xlu0 %v7094_v3, %s8596_s28  ;;  %v7101_v40 = vld [vmem:[#allocation4 + $0x142] sm:$0xff]  ;;  %8511 = vrcp.f32 %v6250_v60 }
 0x733   : > { %5416 = vst.msk [vmem:[%s12672_s7 + $0x30] sm:$0xff] %vm254_vm0, %v5400_v61  ;;  %7145 = vrot.lane.b32.xlu1 %v7101_v40, %s8592_s11  ;;  %v7191_v3 = vld [vmem:[#allocation4 + $0xa4] sm:$0xff] }
 0x734   : > { %7266 = vst.msk [vmem:[#allocation5 + $0x8] sm:$0xff] %vm1680_vm9, %v7220_v9  ;;  %v7140_v39 = vpop.permute.xlu1 %7139  ;;  %v5804_v9 = vadd.f32 %v12006_v43, %v5436_v14  ;;  %v7008_v43 = vld [vmem:[#allocation4 + $0x170] sm:$0xff]  ;;  %v5437_v14 = vld [vmem:[#allocation2 + $0x58] sm:$0xff] }
 0x735   : > { %6890 = vst.msk [vmem:[#allocation5 + $0x50] sm:$0xff] %vm1291_vm5, %v6853_v19  ;;  %v3070_v19 = vmul.f32 %v11413_v28, %v12630_v57 }
 0x736   : > { %5880 = vst.msk [vmem:[%s12672_s7 + $0x30] sm:$0xff] %vm1000_vm2, %v12591_v38  ;;  %v6555_v41 = vpop.permute.xlu0 %6554  ;;  %6940 = vrot.lane.b32.xlu0 %v7189_v12, %s8597_s30  ;;  %v7190_v38 = vld [vmem:[#allocation4 + $0x94] sm:$0xff]  ;;  %v6251_v12 = vmul.f32 3.0, %v6249_v2 }
 0x737   : > { %6597 = vst.msk [vmem:[#allocation5 + $0x28] sm:$0xff] %vm1000_vm2, %v6555_v41  ;;  %6766 = vrot.lane.b32.xlu1 %v7006_v42, %s8595_s27  ;;  %v3069_v42 = vmul.f32 %v12630_v57, %v11416_v34  ;;  %v3091_v15 = vadd.f32 %v12648_v29, %v3070_v19  ;;  %v7200_v2 = vld [vmem:[#allocation4 + $0x174] sm:$0xff] }
 0x738   : > { %7178 = vst.msk [vmem:[#allocation5 + $0x48] sm:$0xff] %vm1583_vm8, %v7140_v39  ;;  %v7234_v55 = vpop.permute.xlu1 %7233  ;;  %8513 = vrcp.f32 %v6251_v12 }
 0x739   : > { %7273 = vst.msk [vmem:[#allocation5 + $0x40] sm:$0xff] %vm1680_vm9, %v7234_v55 }
 0x73a   : > { %v6649_v24 = vpop.permute.xlu0 %6648  ;;  %7227 = vrot.lane.b32.xlu0 %v7190_v38, %s8594_s13 }
 0x73b   : > { %v7282_v44 = vld [vmem:[#allocation5 + $0x8] sm:$0xff]  ;;  %6692 = vst.msk [vmem:[#allocation5 + $0x20] sm:$0xff] %vm1097_vm3, %v6649_v24  ;;  %6860 = vrot.lane.b32.xlu1 %v7101_v40, %s8596_s28  ;;  %v5438_v24 = vld [vmem:[#allocation2 + $0x60] sm:$0xff] }
 0x73c   : > { %8347 = vmatmul.mubr.msk.f32.vlgmr.msra.gmra.mrb[48].mxu0 %vm1722_vm10, %v7282_v44  ;;  %v6569_v48 = vpop.permute.xlu1 %6568 }
 0x73d   : > { %6604 = vst.msk [vmem:[#allocation5 + $0x60] sm:$0xff] %vm1000_vm2, %v6569_v48 }
 0x73e   : > { %v6935_v16 = vpop.permute.xlu0 %6934  ;;  %6942 = vrot.lane.b32.xlu0 %v7190_v38, %s8597_s30  ;;  %v5806_v38 = vadd.f32 %v12137_v59, %v5438_v24  ;;  %v12881_v59 = vpop.eup %8511 }
 0x73f   : > { %6979 = vst.msk [vmem:[#allocation5 + $0x18] sm:$0xff] %vm1388_vm6, %v6935_v16  ;;  %7147 = vrot.lane.b32.xlu1 %v7102_v8, %s8592_s11  ;;  %v3090_v16 = vadd.f32 %v12648_v29, %v3069_v42 }
 0x740   : > { %v6855_v32 = vpop.permute.xlu1 %6854  ;;  %v7289_v17 = vld [vmem:[#allocation5 + $0x40] sm:$0xff] }
 0x741   : > { %6891 = vst.msk [vmem:[#allocation5 + $0x58] sm:$0xff] %vm1291_vm5, %v6855_v32  ;;  %8358 = vmatprep.mubr.msk.f32.mxu1 %vm1722_vm10, %v7289_v17 }
 0x742   : > { %v7030_v10 = vpop.permute.xlu0 %7029  ;;  %7037 = vrot.lane.b32.xlu0 %v6999_v49, %s8590_s9 }
 0x743   : > { %7075 = vst.msk [vmem:[#allocation5 + $0x10] sm:$0xff] %vm1486_vm7, %v7030_v10  ;;  %7241 = vrot.lane.b32.xlu1 %v7197_v18, %s8594_s13  ;;  %v7103_v10 = vld [vmem:[#allocation4 + $0x162] sm:$0xff] }
 0x744   : > { %v6949_v5 = vpop.permute.xlu1 %6948 }
 0x745   : > { %6986 = vst.msk [vmem:[#allocation5 + $0x50] sm:$0xff] %vm1388_vm6, %v6949_v5  ;;  %v7104_v5 = vld [vmem:[#allocation4 + $0x172] sm:$0xff] }
 0x746   : > { %v6651_v54 = vpop.permute.xlu0 %6650  ;;  %7039 = vrot.lane.b32.xlu0 %v7000_v25, %s8590_s9  ;;  %v5808_v25 = vadd.f32 %v12256_v47, %v5440_v6  ;;  %v6256_v47 = vmul.f32 %v12881_v59, %v11394_v26 }
 0x747   : > { %6693 = vst.msk [vmem:[#allocation5 + $0x28] sm:$0xff] %vm1097_vm3, %v6651_v54  ;;  %6862 = vrot.lane.b32.xlu1 %v7102_v8, %s8596_s28  ;;  %v6272_v54 = vld [vmem:[%s12672_s7] sm:$0xff] }
 0x748   : > { %v7236_v13 = vpop.permute.xlu1 %7235 }
 0x749   : > { %7274 = vst.msk [vmem:[#allocation5 + $0x48] sm:$0xff] %vm1680_vm9, %v7236_v13 }
 0x74a   : > { %v6745_v7 = vpop.permute.xlu0 %6744  ;;  %7133 = vrot.lane.b32.xlu0 %v7095_v52, %s8592_s11  ;;  %v6288_v52 = vadd.f32 %v6272_v54, %v6256_v47 }
 0x74b   : > { %6788 = vst.msk [vmem:[#allocation5 + $0x20] sm:$0xff] %vm1194_vm4, %v6745_v7  ;;  %6956 = vrot.lane.b32.xlu1 %v7197_v18, %s8597_s30  ;;  %v12901_v7 = vpop.eup %8513 }
 0x74c   : > { %v6571_v56 = vpop.permute.xlu1 %6570  ;;  %v6258_v26 = vmul.f32 %v12901_v7, %v11609_v4 }
 0x74d   : > { %6605 = vst.msk [vmem:[#allocation5 + $0x68] sm:$0xff] %vm1000_vm2, %v6571_v56  ;;  %v13568_v56 = vld [vmem:[#allocation71_spill] sm:$0xff] }
 0x74e   : > { %v7032_v11 = vpop.permute.xlu0 %7031  ;;  %7135 = vrot.lane.b32.xlu0 %v7096_v21, %s8592_s11  ;;  %v6260_v4 = vmul.f32 %v12901_v7, %v13568_v56 }
 0x74f   : > { %7076 = vst.msk [vmem:[#allocation5 + $0x18] sm:$0xff] %vm1486_vm7, %v7032_v11  ;;  %7243 = vrot.lane.b32.xlu1 %v7198_v63, %s8594_s13  ;;  %v6276_v11 = vld [vmem:[%s12672_s7 + $0x20] sm:$0xff] }
 0x750   : > { %v6665_v20 = vpop.permute.xlu1 %6664  ;;  %v7290_v1 = vld [vmem:[#allocation5 + $0x48] sm:$0xff] }
 0x751   : > { %6700 = vst.msk [vmem:[#allocation5 + $0x60] sm:$0xff] %vm1097_vm3, %v6665_v20  ;;  %8359 = vmatmul.mubr.msk.f32.vlgmr.msra.gmra.mrb[48].mxu1 %vm1722_vm10, %v7290_v1  ;;  %v6292_v20 = vadd.f32 %v6276_v11, %v6260_v4  ;;  %v13569_v1 = vld [vmem:[#allocation63_spill] sm:$0xff]  ;;  %v6275_v4 = vld [vmem:[%s12672_s7 + $0x18] sm:$0xff] }
 0x752   : > { %v7126_v33 = vpop.permute.xlu0 %7125  ;;  %7229 = vrot.lane.b32.xlu0 %v7191_v3, %s8594_s13 }
 0x753   : > { %7171 = vst.msk [vmem:[#allocation5 + $0x10] sm:$0xff] %vm1583_vm8, %v7126_v33  ;;  %6958 = vrot.lane.b32.xlu1 %v7198_v63, %s8597_s30  ;;  %v13570_v63 = vld [vmem:[#allocation62_spill] sm:$0xff]  ;;  %s13288_s30 = scalar_lea.sflag [#allocation7], %s205_s23 }
 0x754   : > { %v6951_v30 = vpop.permute.xlu1 %6950  ;;  %v5729_v60 = vmax.f32 %v13570_v63, %v13569_v1  ;;  %v13584_v1 = vld [vmem:[#allocation46_spill] sm:$0xff] }
 0x755   : > { %6987 = vst.msk [vmem:[#allocation5 + $0x58] sm:$0xff] %vm1388_vm6, %v6951_v30 }
 0x756   : > { %v6747_v51 = vpop.permute.xlu0 %6746  ;;  %7231 = vrot.lane.b32.xlu0 %v7192_v46, %s8594_s13  ;;  %v6278_v46 = vld [vmem:[%s12672_s7 + $0x30] sm:$0xff] }
 0x757   : > { %6789 = vst.msk [vmem:[#allocation5 + $0x28] sm:$0xff] %vm1194_vm4, %v6747_v51  ;;  %7053 = vrot.lane.b32.xlu1 %v7007_v31, %s8590_s9  ;;  %v13571_v51 = vld [vmem:[#allocation54_spill] sm:$0xff] }
 0x758   : > { %v7046_v61 = vpop.permute.xlu1 %7045  ;;  %v6262_v30 = vmul.f32 %v12901_v7, %v13571_v51 }
 0x759   : > { %7083 = vst.msk [vmem:[#allocation5 + $0x50] sm:$0xff] %vm1486_vm7, %v7046_v61 }
 0x75a   : > { %v6841_v50 = vpop.permute.xlu0 %6840  ;;  %v8318_v41 = vpop.f32.mrb[40].mxu1  ;;  %5846 = vrot.lane.b32.xlu0 %v5804_v9, %s8591_s10  ;;  %v6294_v61 = vadd.f32 %v6278_v46, %v6262_v30  ;;  %v13572_v9 = vld [vmem:[#allocation64_spill] sm:$0xff] }
 0x75b   : > { %6884 = vst.msk [vmem:[#allocation5 + $0x20] sm:$0xff] %vm1291_vm5, %v6841_v50  ;;  %v5366_v39 = vmul.f32 %v8318_v41, %v12639_v53  ;;  %v5313_v40 = vpop.f32.mrb[41].mxu1  ;;  %7055 = vrot.lane.b32.xlu1 %v7008_v43, %s8590_s9  ;;  %v5805_v50 = vadd.f32 %v12128_v22, %v5437_v14  ;;  %v5761_v19 = vmax.f32 %v5729_v60, %v13572_v9  ;;  %v13573_v41 = vld [vmem:[#allocation55_spill] sm:$0xff]  ;;  %v13586_v9 = vld [vmem:[#allocation53_spill] sm:$0xff]  ;;  %s7732_s9 = sshll.u32 %s12672_s7, 4  ;;  %s13282_s9 = int_to_ptr.vmem [resolvable:$true] %s7732_s9 }
 0x75c   : > { %v5365_v28 = vmul.f32 %v12639_v53, %v5313_v40  ;;  %v6667_v44 = vpop.permute.xlu1 %6666  ;;  %v5439_v40 = vld [vmem:[#allocation2 + $0x68] sm:$0xff]  ;;  %p8532_p0 = scmp.lt.s32.totalorder %s13282_s9, %s8530_s5 }
 0x75d   : > { %v5387_v34 = vadd.f32 %v12656_v37, %v5366_v39  ;;  %6701 = vst.msk [vmem:[#allocation5 + $0x68] sm:$0xff] %vm1097_vm3, %v6667_v44  ;;  %v6264_v39 = vmul.f32 %v12881_v59, %v13573_v41  ;;  %v13575_v44 = vld [vmem:[#allocation9_spill] sm:$0xff] }
 0x75e   : > { %v7128_v55 = vpop.permute.xlu0 %7127  ;;  %v5386_v48 = vadd.f32 %v12656_v37, %v5365_v28  ;;  %5850 = vrot.lane.b32.xlu0 %v5806_v38, %s8591_s10  ;;  %v13574_v28 = vld [vmem:[#allocation10_spill] sm:$0xff]  ;;  %v13576_v38 = vld [vmem:[#allocation28_spill] sm:$0xff] }
 0x75f   : > { %7172 = vst.msk [vmem:[#allocation5 + $0x18] sm:$0xff] %vm1583_vm8, %v7128_v55  ;;  %v5403_v49 = vadd.f32 %v5387_v34, %v3091_v15  ;;  %7149 = vrot.lane.b32.xlu1 %v7103_v10, %s8592_s11  ;;  %v5807_v22 = vadd.f32 %v13574_v28, %v5439_v40  ;;  %v13577_v15 = vmax.f32 %v13575_v44, %v13576_v38  ;;  %v6279_v40 = vld [vmem:[%s12672_s7 + $0x38] sm:$0xff]  ;;  %v13587_v44 = vld [vmem:[#allocation37_spill] sm:$0xff] }
 0x760   : > { %v5402_v32 = vadd.f32 %v5386_v48, %v3090_v16  ;;  %v6761_v8 = vpop.permute.xlu1 %6760  ;;  %v5441_v16 = vld [vmem:[#allocation2 + $0x78] sm:$0xff]  ;;  %v6265_v38 = vmul.f32 %v12901_v7, %v13587_v44 }
 0x761   : > { %5419 = vst.msk [vmem:[%s12672_s7 + $0x48] sm:$0xff] %vm254_vm0, %v5403_v49  ;;  %v5793_v34 = vmax.f32 %v13577_v15, %v5761_v19 }
 0x762   : > { %v7222_v17 = vpop.permute.xlu0 %7221  ;;  %6796 = vst.msk [vmem:[#allocation5 + $0x60] sm:$0xff] %vm1194_vm4, %v6761_v8  ;;  %5854 = vrot.lane.b32.xlu0 %v5808_v25, %s8591_s10  ;;  %v6273_v8 = vld [vmem:[%s12672_s7 + $0x8] sm:$0xff]  ;;  %v13579_v25 = vld [vmem:[#allocation33_spill] sm:$0xff] }
 0x763   : > { %7267 = vst.msk [vmem:[#allocation5 + $0x10] sm:$0xff] %vm1680_vm9, %v7222_v17  ;;  %7151 = vrot.lane.b32.xlu1 %v7104_v5, %s8592_s11  ;;  %v5809_v10 = vadd.f32 %v5793_v34, %v5441_v16  ;;  %v3071_v54 = vmul.f32 %v12630_v57, %v13579_v25  ;;  %v13580_v5 = vld [vmem:[#allocation26_spill] sm:$0xff]  ;;  %v13589_v25 = vld [vmem:[#allocation56_spill] sm:$0xff] }
 0x764   : > { %5883 = vst.msk [vmem:[%s12672_s7 + $0x48] sm:$0xff] %vm1000_vm2, %v12643_v35  ;;  %v7048_v36 = vpop.permute.xlu1 %7047  ;;  %v6274_v35 = vld [vmem:[%s12672_s7 + $0x10] sm:$0xff] }
 0x765   : > { %5418 = vst.msk [vmem:[%s12672_s7 + $0x40] sm:$0xff] %vm254_vm0, %v5402_v32  ;;  %v6290_v21 = vadd.f32 %v6274_v35, %v6258_v26  ;;  %v13578_v32 = vld [vmem:[#allocation47_spill] sm:$0xff] }
 0x766   : > { %5882 = vst.msk [vmem:[%s12672_s7 + $0x40] sm:$0xff] %vm1000_vm2, %v12597_v58  ;;  %v6557_v18 = vpop.permute.xlu0 %6556  ;;  %6320 = vrot.lane.b32.xlu0 %v6288_v52, %s8593_s12  ;;  %v7199_v58 = vld [vmem:[#allocation4 + $0x164] sm:$0xff]  ;;  %v3072_v17 = vmul.f32 %v13578_v32, %v12630_v57 }
 0x767   : > { %6598 = vst.msk [vmem:[#allocation5 + $0x30] sm:$0xff] %vm1000_vm2, %v6557_v18  ;;  %7245 = vrot.lane.b32.xlu1 %v7199_v58, %s8594_s13  ;;  %v6257_v18 = vmul.f32 %v12901_v7, %v13580_v5  ;;  %v13582_v52 = vld [vmem:[#allocation45_spill] sm:$0xff] }
 0x768   : > { %7084 = vst.msk [vmem:[#allocation5 + $0x58] sm:$0xff] %vm1486_vm7, %v7048_v36  ;;  %v7142_v27 = vpop.permute.xlu1 %7141  ;;  %v13581_v36 = vld [vmem:[#allocation44_spill] sm:$0xff]  ;;  %v3093_v11 = vadd.f32 %v12648_v29, %v3072_v17  ;;  %v13588_v17 = vld [vmem:[#allocation34_spill] sm:$0xff] }
 0x769   : > { %7179 = vst.msk [vmem:[#allocation5 + $0x50] sm:$0xff] %vm1583_vm8, %v7142_v27  ;;  %v6169_v35 = vadd.f32 %v13582_v52, %v13581_v36 }
 0x76a   : > { %v6843_v13 = vpop.permute.xlu0 %6842  ;;  %v7283_v23 = vld [vmem:[#allocation5 + $0x10] sm:$0xff]  ;;  %6324 = vrot.lane.b32.xlu0 %v6290_v21, %s8593_s12  ;;  %v6289_v21 = vadd.f32 %v6273_v8, %v6257_v18  ;;  %v3074_v8 = vmul.f32 %v13588_v17, %v12630_v57 }
 0x76b   : > { %6885 = vst.msk [vmem:[#allocation5 + $0x28] sm:$0xff] %vm1291_vm5, %v6843_v13  ;;  %8349 = vmatprep.mubr.msk.f32.mxu0 %vm1722_vm10, %v7283_v23  ;;  %7247 = vrot.lane.b32.xlu1 %v7200_v2, %s8594_s13  ;;  %v3092_v2 = vadd.f32 %v12648_v29, %v3071_v54  ;;  %v6201_v63 = vadd.f32 %v13584_v1, %v6169_v35 }
 0x76c   : > { %v6763_v33 = vpop.permute.xlu1 %6762  ;;  %v3073_v54 = vmul.f32 %v12630_v57, %v13589_v25 }
 0x76d   : > { %6797 = vst.msk [vmem:[#allocation5 + $0x68] sm:$0xff] %vm1194_vm4, %v6763_v33  ;;  %v6280_v42 = vld [vmem:[%s12672_s7 + $0x40] sm:$0xff]  ;;  %v13583_v33 = vld [vmem:[#allocation35_spill] sm:$0xff]  ;;  %v6233_v19 = vadd.f32 %v13586_v9, %v6201_v63 }
 0x76e   : > { %v6937_v3 = vpop.permute.xlu0 %6936  ;;  %6328 = vrot.lane.b32.xlu0 %v6292_v20, %s8593_s12  ;;  %v6296_v55 = vadd.f32 %v6280_v42, %v6264_v39  ;;  %v6259_v20 = vmul.f32 %v12901_v7, %v13583_v33 }
 0x76f   : > { %6980 = vst.msk [vmem:[#allocation5 + $0x20] sm:$0xff] %vm1388_vm6, %v6937_v3  ;;  %5848 = vrot.lane.b32.xlu1 %v5805_v50, %s8591_s10  ;;  %v13585_v50 = vld [vmem:[#allocation70_spill] sm:$0xff] }
 0x770   : > { %v6857_v12 = vpop.permute.xlu1 %6856 }
 0x771   : > { %6892 = vst.msk [vmem:[#allocation5 + $0x60] sm:$0xff] %vm1291_vm5, %v6857_v12  ;;  %v6277_v12 = vld [vmem:[%s12672_s7 + $0x28] sm:$0xff] }
 0x772   : > { %v7224_v31 = vpop.permute.xlu0 %7223  ;;  %6332 = vrot.lane.b32.xlu0 %v6294_v61, %s8593_s12  ;;  %v6261_v61 = vmul.f32 %v12901_v7, %v13585_v50  ;;  %v8523_v50 = vld [vmem:[%s13333_s3 + $0x7] ss:$0 sm:$0xff] }
 0x773   : > { %7268 = vst.msk [vmem:[#allocation5 + $0x18] sm:$0xff] %vm1680_vm9, %v7224_v31  ;;  %5852 = vrot.lane.b32.xlu1 %v5807_v22, %s8591_s10  ;;  %v6291_v31 = vadd.f32 %v6275_v4, %v6259_v20 }
 0x774   : > { %v7144_v43 = vpop.permute.xlu1 %7143  ;;  %v6293_v39 = vadd.f32 %v6277_v12, %v6261_v61 }
 0x775   : > { %7180 = vst.msk [vmem:[#allocation5 + $0x58] sm:$0xff] %vm1583_vm8, %v7144_v43 }
 0x776   : > { %v6559_v24 = vpop.permute.xlu0 %6558  ;;  %6336 = vrot.lane.b32.xlu0 %v6296_v55, %s8593_s12  ;;  %v6281_v55 = vld [vmem:[%s12672_s7 + $0x48] sm:$0xff] }
 0x777   : > { %6599 = vst.msk [vmem:[#allocation5 + $0x38] sm:$0xff] %vm1000_vm2, %v6559_v24  ;;  %5856 = vrot.lane.b32.xlu1 %v5809_v10, %s8591_s10  ;;  %v6263_v24 = vmul.f32 %v12881_v59, %v6233_v19  ;;  %v6297_v16 = vadd.f32 %v6281_v55, %v6265_v38 }
 0x778   : > { %v7238_v49 = vpop.permute.xlu1 %7237 }
 0x779   : > { %7275 = vst.msk [vmem:[#allocation5 + $0x50] sm:$0xff] %vm1680_vm9, %v7238_v49  ;;  %v6295_v22 = vadd.f32 %v6279_v40, %v6263_v24 }
 0x77a   : > { %v6653_v48 = vpop.permute.xlu0 %6652  ;;  %v7284_v6 = vld [vmem:[#allocation5 + $0x18] sm:$0xff]  ;;  %v8321_v47 = vpop.f32.mrb[42].mxu1 }
 0x77b   : > { %6694 = vst.msk [vmem:[#allocation5 + $0x30] sm:$0xff] %vm1097_vm3, %v6653_v48  ;;  %8350 = vmatmul.mubr.msk.f32.gmra.mrb[50].mxu0 %vm1722_vm10, %v7284_v6  ;;  %v5368_v26 = vmul.f32 %v8321_v47, %v12639_v53  ;;  %v5323_v58 = vpop.f32.mrb[43].mxu1  ;;  %6322 = vrot.lane.b32.xlu1 %v6289_v21, %s8593_s12 }
 0x77c   : > { %v5367_v13 = vmul.f32 %v12639_v53, %v5323_v58  ;;  %v6573_v23 = vpop.permute.xlu1 %6572 }
 0x77d   : > { %v5389_v56 = vadd.f32 %v12656_v37, %v5368_v26  ;;  %6606 = vst.msk [vmem:[#allocation5 + $0x70] sm:$0xff] %vm1000_vm2, %v6573_v23  ;;  %v3095_v26 = vadd.f32 %v12648_v29, %v3074_v8 }
 0x77e   : > { %v6939_v27 = vpop.permute.xlu0 %6938  ;;  %v5388_v3 = vadd.f32 %v12656_v37, %v5367_v13  ;;  %v3094_v13 = vadd.f32 %v12648_v29, %v3073_v54 }
 0x77f   : > { %6981 = vst.msk [vmem:[#allocation5 + $0x28] sm:$0xff] %vm1388_vm6, %v6939_v27  ;;  %v5405_v60 = vadd.f32 %v5389_v56, %v3093_v11  ;;  %6326 = vrot.lane.b32.xlu1 %v6291_v31, %s8593_s12 }
 0x780   : > { %v5404_v46 = vadd.f32 %v5388_v3, %v3092_v2  ;;  %v6859_v30 = vpop.permute.xlu1 %6858  ;;  %v7291_v14 = vld [vmem:[#allocation5 + $0x50] sm:$0xff]  ;;  %v13590_v3 = vld [vmem:[#allocation57_spill] sm:$0xff] }
 0x781   : > { %5421 = vst.msk [vmem:[%s12672_s7 + $0x58] sm:$0xff] %vm254_vm0, %v5405_v60  ;;  %8361 = vmatprep.mubr.msk.f32.mxu1 %vm1722_vm10, %v7291_v14  ;;  %v3076_v33 = vmul.f32 %v13590_v3, %v12630_v57  ;;  %v8521_v60 = vld [vmem:[%s13333_s3 + $0x6] ss:$0 sm:$0xff]  ;;  %v8522_v57 = vld [vmem:[%s13333_s3 + $0xa] ss:$0 sm:$0xff] }
 0x782   : > { %v7034_v51 = vpop.permute.xlu0 %7033  ;;  %6893 = vst.msk [vmem:[#allocation5 + $0x68] sm:$0xff] %vm1291_vm5, %v6859_v30 }
 0x783   : > { %7077 = vst.msk [vmem:[#allocation5 + $0x20] sm:$0xff] %vm1486_vm7, %v7034_v51  ;;  %6330 = vrot.lane.b32.xlu1 %v6293_v39, %s8593_s12  ;;  %v3097_v61 = vadd.f32 %v8523_v50, %v3076_v33  ;;  %v8524_v39 = vld [vmem:[%s13333_s3 + $0xb] ss:$0 sm:$0xff] }
 0x784   : > { %5420 = vst.msk [vmem:[%s12672_s7 + $0x50] sm:$0xff] %vm254_vm0, %v5404_v46  ;;  %v6953_v41 = vpop.permute.xlu1 %6952  ;;  %v13591_v46 = vld [vmem:[#allocation25_spill] sm:$0xff] }
 0x785   : > { %6988 = vst.msk [vmem:[#allocation5 + $0x60] sm:$0xff] %vm1388_vm6, %v6953_v41  ;;  %v3075_v51 = vmul.f32 %v8521_v60, %v13591_v46 }
 0x786   : > { %v6655_v42 = vpop.permute.xlu0 %6654 }
 0x787   : > { %6695 = vst.msk [vmem:[#allocation5 + $0x38] sm:$0xff] %vm1097_vm3, %v6655_v42  ;;  %6334 = vrot.lane.b32.xlu1 %v6295_v22, %s8593_s12  ;;  %v3096_v41 = vadd.f32 %v8523_v50, %v3075_v51 }
 0x788   : > { %v7240_v28 = vpop.permute.xlu1 %7239 }
 0x789   : > { %7276 = vst.msk [vmem:[#allocation5 + $0x58] sm:$0xff] %vm1680_vm9, %v7240_v28 }
 0x78a   : > { %v6749_v43 = vpop.permute.xlu0 %6748 }
 0x78b   : > { %6790 = vst.msk [vmem:[#allocation5 + $0x30] sm:$0xff] %vm1194_vm4, %v6749_v43  ;;  %6338 = vrot.lane.b32.xlu1 %v6297_v16, %s8593_s12 }
 0x78c   : > { %v6575_v34 = vpop.permute.xlu1 %6574 }
 0x78d   : > { %6607 = vst.msk [vmem:[#allocation5 + $0x78] sm:$0xff] %vm1000_vm2, %v6575_v34 }
 0x78e   : > { %v7036_v15 = vpop.permute.xlu0 %7035 }
 0x78f   : > { %7078 = vst.msk [vmem:[#allocation5 + $0x28] sm:$0xff] %vm1486_vm7, %v7036_v15 }
 0x790   : > { %v6669_v49 = vpop.permute.xlu1 %6668  ;;  %v7292_v6 = vld [vmem:[#allocation5 + $0x58] sm:$0xff] }
 0x791   : > { %6702 = vst.msk [vmem:[#allocation5 + $0x70] sm:$0xff] %vm1097_vm3, %v6669_v49  ;;  %8362 = vmatmul.mubr.msk.f32.gmra.mrb[50].mxu1 %vm1722_vm10, %v7292_v6 }
 0x792   : > { %v7130_v48 = vpop.permute.xlu0 %7129 }
 0x793   : > { %7173 = vst.msk [vmem:[#allocation5 + $0x20] sm:$0xff] %vm1583_vm8, %v7130_v48 }
 0x794   : > { %v6955_v32 = vpop.permute.xlu1 %6954 }
 0x795   : > { %6989 = vst.msk [vmem:[#allocation5 + $0x68] sm:$0xff] %vm1388_vm6, %v6955_v32  ;;  %v8324_v47 = vpop.f32.mrb[44].mxu1 }
 0x796   : > { %v6751_v10 = vpop.permute.xlu0 %6750  ;;  %v5370_v5 = vmul.f32 %v8324_v47, %v12639_v53  ;;  %v5333_v18 = vpop.f32.mrb[45].mxu1 }
 0x797   : > { %6791 = vst.msk [vmem:[#allocation5 + $0x38] sm:$0xff] %vm1194_vm4, %v6751_v10  ;;  %v5369_v36 = vmul.f32 %v12639_v53, %v5333_v18 }
 0x798   : > { %v7050_v35 = vpop.permute.xlu1 %7049  ;;  %v5391_v58 = vadd.f32 %v12656_v37, %v5370_v5 }
 0x799   : > { %7085 = vst.msk [vmem:[#allocation5 + $0x60] sm:$0xff] %vm1486_vm7, %v7050_v35  ;;  %v5390_v27 = vadd.f32 %v12656_v37, %v5369_v36  ;;  %v13592_v35 = vld [vmem:[#allocation36_spill] sm:$0xff] }
 0x79a   : > { %v6845_v52 = vpop.permute.xlu0 %6844  ;;  %v5407_v23 = vadd.f32 %v5391_v58, %v3095_v26  ;;  %v6266_v26 = vmul.f32 %v12901_v7, %v13592_v35 }
 0x79b   : > { %6886 = vst.msk [vmem:[#allocation5 + $0x30] sm:$0xff] %vm1291_vm5, %v6845_v52  ;;  %v5406_v21 = vadd.f32 %v5390_v27, %v3094_v13 }
 0x79c   : > { %v6671_v56 = vpop.permute.xlu1 %6670  ;;  %5423 = vst.msk [vmem:[%s12672_s7 + $0x68] sm:$0xff] %vm254_vm0, %v5407_v23 }
 0x79d   : > { %6703 = vst.msk [vmem:[#allocation5 + $0x78] sm:$0xff] %vm1097_vm3, %v6671_v56 }
 0x79e   : > { %v7132_v11 = vpop.permute.xlu0 %7131  ;;  %5422 = vst.msk [vmem:[%s12672_s7 + $0x60] sm:$0xff] %vm254_vm0, %v5406_v21  ;;  %v13593_v21 = vld [vmem:[#allocation27_spill] sm:$0xff] }
 0x79f   : > { %7174 = vst.msk [vmem:[#allocation5 + $0x28] sm:$0xff] %vm1583_vm8, %v7132_v11  ;;  %v6268_v11 = vmul.f32 %v12901_v7, %v13593_v21  ;;  %v13177_v21 = vld [vmem:[%s13333_s3 + $0xd] ss:$0 sm:$0xff] }
 0x7a0   : > { %v6765_v4 = vpop.permute.xlu1 %6764 }
 0x7a1   : > { %6798 = vst.msk [vmem:[#allocation5 + $0x70] sm:$0xff] %vm1194_vm4, %v6765_v4 }
 0x7a2   : > { %v7226_v53 = vpop.permute.xlu0 %7225 }
 0x7a3   : > { %7269 = vst.msk [vmem:[#allocation5 + $0x20] sm:$0xff] %vm1680_vm9, %v7226_v53 }
 0x7a4   : > { %v7052_v2 = vpop.permute.xlu1 %7051 }
 0x7a5   : > { %7086 = vst.msk [vmem:[#allocation5 + $0x68] sm:$0xff] %vm1486_vm7, %v7052_v2  ;;  %v6270_v2 = vmul.f32 %v12901_v7, %v12294_v45 }
 0x7a6   : > { %v6847_v29 = vpop.permute.xlu0 %6846 }
 0x7a7   : > { %6887 = vst.msk [vmem:[#allocation5 + $0x38] sm:$0xff] %vm1291_vm5, %v6847_v29 }
 0x7a8   : > { %v7146_v1 = vpop.permute.xlu1 %7145  ;;  %v8327_v30 = vpop.f32.mrb[46].mxu1 }
 0x7a9   : > { %7181 = vst.msk [vmem:[#allocation5 + $0x60] sm:$0xff] %vm1583_vm8, %v7146_v1  ;;  %v5372_v14 = vmul.f32 %v8522_v57, %v8327_v30  ;;  %v5343_v31 = vpop.f32.mrb[47].mxu1 }
 0x7aa   : > { %v6941_v20 = vpop.permute.xlu0 %6940  ;;  %v7285_v63 = vld [vmem:[#allocation5 + $0x20] sm:$0xff]  ;;  %v5371_v12 = vmul.f32 %v8522_v57, %v5343_v31  ;;  %v13595_v31 = vld [vmem:[#allocation68_spill] sm:$0xff] }
 0x7ab   : > { %6982 = vst.msk [vmem:[#allocation5 + $0x30] sm:$0xff] %vm1388_vm6, %v6941_v20  ;;  %8352 = vmatprep.mubr.msk.f32.mxu0 %vm1722_vm10, %v7285_v63  ;;  %v5393_v9 = vadd.f32 %v12656_v37, %v5372_v14  ;;  %v13594_v14 = vld [vmem:[#allocation67_spill] sm:$0xff] }
 0x7ac   : > { %v6767_v42 = vpop.permute.xlu1 %6766  ;;  %v5392_v40 = vadd.f32 %v8524_v39, %v5371_v12  ;;  %v6177_v12 = vadd.f32 %v13595_v31, %v13594_v14  ;;  %v13597_v39 = vld [vmem:[#allocation69_spill] sm:$0xff] }
 0x7ad   : > { %6799 = vst.msk [vmem:[#allocation5 + $0x78] sm:$0xff] %vm1194_vm4, %v6767_v42  ;;  %v5409_v24 = vadd.f32 %v5393_v9, %v3097_v61  ;;  %v13596_v42 = vld [vmem:[#allocation38_spill] sm:$0xff] }
 0x7ae   : > { %v7228_v19 = vpop.permute.xlu0 %7227  ;;  %v5408_v43 = vadd.f32 %v5392_v40, %v3096_v41  ;;  %v6267_v41 = vmul.f32 %v12901_v7, %v13596_v42  ;;  %v6209_v40 = vadd.f32 %v13597_v39, %v6177_v12 }
 0x7af   : > { %7270 = vst.msk [vmem:[#allocation5 + $0x28] sm:$0xff] %vm1680_vm9, %v7228_v19 }
 0x7b0   : > { %5425 = vst.msk [vmem:[%s12672_s7 + $0x78] sm:$0xff] %vm254_vm0, %v5409_v24  ;;  %v6861_v22 = vpop.permute.xlu1 %6860  ;;  %5424 = vst.msk [vmem:[%s12672_s7 + $0x70] sm:$0xff] %vm254_vm0, %v5408_v43 }
 0x7b1   : > { %6894 = vst.msk [vmem:[#allocation5 + $0x70] sm:$0xff] %vm1291_vm5, %v6861_v22 }
 0x7b2   : > { %v6943_v28 = vpop.permute.xlu0 %6942 }
 0x7b3   : > { %6983 = vst.msk [vmem:[#allocation5 + $0x38] sm:$0xff] %vm1388_vm6, %v6943_v28 }
 0x7b4   : > { %v7148_v55 = vpop.permute.xlu1 %7147 }
 0x7b5   : > { %7182 = vst.msk [vmem:[#allocation5 + $0x68] sm:$0xff] %vm1583_vm8, %v7148_v55  ;;  %v6241_v55 = vadd.f32 %v12289_v0, %v6209_v40 }
 0x7b6   : > { %v7038_v37 = vpop.permute.xlu0 %7037  ;;  %v7286_v44 = vld [vmem:[#allocation5 + $0x28] sm:$0xff] }
 0x7b7   : > { %7079 = vst.msk [vmem:[#allocation5 + $0x30] sm:$0xff] %vm1486_vm7, %v7038_v37  ;;  %8353 = vmatmul.mubr.msk.f32.gmra.mrb[52].mxu0 %vm1722_vm10, %v7286_v44  ;;  %v6269_v37 = vmul.f32 %v12901_v7, %v12287_v62 }
 0x7b8   : > { %v7242_v15 = vpop.permute.xlu1 %7241 }
 0x7b9   : > { %7277 = vst.msk [vmem:[#allocation5 + $0x60] sm:$0xff] %vm1680_vm9, %v7242_v15 }
 0x7ba   : > { %v7040_v38 = vpop.permute.xlu0 %7039 }
 0x7bb   : > { %7080 = vst.msk [vmem:[#allocation5 + $0x38] sm:$0xff] %vm1486_vm7, %v7040_v38 }
 0x7bc   : > { %v6863_v16 = vpop.permute.xlu1 %6862 }
 0x7bd   : > { %6895 = vst.msk [vmem:[#allocation5 + $0x78] sm:$0xff] %vm1291_vm5, %v6863_v16  ;;  %v6271_v16 = vmul.f32 %v12881_v59, %v6241_v55 }
 0x7be   : > { %v7134_v34 = vpop.permute.xlu0 %7133 }
 0x7bf   : > { %7175 = vst.msk [vmem:[#allocation5 + $0x30] sm:$0xff] %vm1583_vm8, %v7134_v34 }
 0x7c0   : > { %v6957_v49 = vpop.permute.xlu1 %6956  ;;  %v7293_v6 = vld [vmem:[#allocation5 + $0x60] sm:$0xff] }
 0x7c1   : > { %6990 = vst.msk [vmem:[#allocation5 + $0x70] sm:$0xff] %vm1388_vm6, %v6957_v49  ;;  %8364 = vmatprep.mubr.msk.f32.mxu1 %vm1722_vm10, %v7293_v6 }
 0x7c2   : > { %v7136_v48 = vpop.permute.xlu0 %7135 }
 0x7c3   : > { %7176 = vst.msk [vmem:[#allocation5 + $0x38] sm:$0xff] %vm1583_vm8, %v7136_v48 }
 0x7c4   : > { %v7244_v32 = vpop.permute.xlu1 %7243 }
 0x7c5   : > { %7278 = vst.msk [vmem:[#allocation5 + $0x68] sm:$0xff] %vm1680_vm9, %v7244_v32 }
 0x7c6   : > { %v7230_v10 = vpop.permute.xlu0 %7229 }
 0x7c7   : > { %7271 = vst.msk [vmem:[#allocation5 + $0x30] sm:$0xff] %vm1680_vm9, %v7230_v10 }
 0x7c8   : > { %v6959_v8 = vpop.permute.xlu1 %6958 }
 0x7c9   : > { %6991 = vst.msk [vmem:[#allocation5 + $0x78] sm:$0xff] %vm1388_vm6, %v6959_v8 }
 0x7ca   : > { %v7232_v17 = vpop.permute.xlu0 %7231 }
 0x7cb   : > { %7272 = vst.msk [vmem:[#allocation5 + $0x38] sm:$0xff] %vm1680_vm9, %v7232_v17 }
 0x7cc   : > { %v7054_v54 = vpop.permute.xlu1 %7053  ;;  %v7294_v47 = vld [vmem:[#allocation5 + $0x68] sm:$0xff] }
 0x7cd   : > { %7087 = vst.msk [vmem:[#allocation5 + $0x70] sm:$0xff] %vm1486_vm7, %v7054_v54  ;;  %8365 = vmatmul.mubr.msk.f32.gmra.mrb[52].mxu1 %vm1722_vm10, %v7294_v47 }
 0x7ce   : > { %v5847_v25 = vpop.permute.xlu0 %5846  ;;  %v7287_v5 = vld [vmem:[#allocation5 + $0x30] sm:$0xff] }
 0x7cf   : > { %5884 = vst.msk [vmem:[%s12672_s7 + $0x50] sm:$0xff] %vm1000_vm2, %v5847_v25  ;;  %8355 = vmatprep.mubr.msk.f32.mxu0 %vm1722_vm10, %v7287_v5 }
 0x7d0   : > { %v7056_v36 = vpop.permute.xlu1 %7055 }
 0x7d1   : > { %7088 = vst.msk [vmem:[#allocation5 + $0x78] sm:$0xff] %vm1486_vm7, %v7056_v36 }
 0x7d2   : > { %v5851_v18 = vpop.permute.xlu0 %5850  ;;  %v7288_v52 = vld [vmem:[#allocation5 + $0x38] sm:$0xff] }
 0x7d3   : > { %5886 = vst.msk [vmem:[%s12672_s7 + $0x60] sm:$0xff] %vm1000_vm2, %v5851_v18  ;;  %8356 = vmatmul.mubr.msk.f32.gmra.mrb[54].mxu0 %vm1722_vm10, %v7288_v52 }
 0x7d4   : > { %v7150_v13 = vpop.permute.xlu1 %7149 }
 0x7d5   : > { %7183 = vst.msk [vmem:[#allocation5 + $0x70] sm:$0xff] %vm1583_vm8, %v7150_v13  ;;  %v13169_v13 = vld [vmem:[%s13333_s3 + $0xc] ss:$0 sm:$0xff] }
 0x7d6   : > { %v5855_v58 = vpop.permute.xlu0 %5854  ;;  %v6282_v27 = vld [vmem:[%s12672_s7 + $0x50] sm:$0xff] }
 0x7d7   : > { %5888 = vst.msk [vmem:[%s12672_s7 + $0x70] sm:$0xff] %vm1000_vm2, %v5855_v58  ;;  %v6298_v23 = vadd.f32 %v6282_v27, %v6266_v26 }
 0x7d8   : > { %v7152_v56 = vpop.permute.xlu1 %7151 }
 0x7d9   : > { %6340 = vrot.lane.b32.xlu0 %v6298_v23, %s8593_s12  ;;  %7184 = vst.msk [vmem:[#allocation5 + $0x78] sm:$0xff] %vm1583_vm8, %v7152_v56 }
 0x7da   : > { %v6321_v53 = vpop.permute.xlu0 %6320  ;;  %v6284_v4 = vld [vmem:[%s12672_s7 + $0x60] sm:$0xff] }
 0x7db   : > { %6368 = vst.msk [vmem:[%s12672_s7] sm:$0xff] %vm1097_vm3, %v6321_v53  ;;  %v6300_v29 = vadd.f32 %v6284_v4, %v6268_v11 }
 0x7dc   : > { %v7246_v3 = vpop.permute.xlu1 %7245 }
 0x7dd   : > { %6344 = vrot.lane.b32.xlu0 %v6300_v29, %s8593_s12  ;;  %7279 = vst.msk [vmem:[#allocation5 + $0x70] sm:$0xff] %vm1680_vm9, %v7246_v3 }
 0x7de   : > { %v6325_v33 = vpop.permute.xlu0 %6324  ;;  %v6286_v20 = vld [vmem:[%s12672_s7 + $0x70] sm:$0xff] }
 0x7df   : > { %6370 = vst.msk [vmem:[%s12672_s7 + $0x10] sm:$0xff] %vm1097_vm3, %v6325_v33  ;;  %v6302_v1 = vadd.f32 %v6286_v20, %v6270_v2 }
 0x7e0   : > { %v7248_v63 = vpop.permute.xlu1 %7247 }
 0x7e1   : > { %6348 = vrot.lane.b32.xlu0 %v6302_v1, %s8593_s12  ;;  %7280 = vst.msk [vmem:[#allocation5 + $0x78] sm:$0xff] %vm1680_vm9, %v7248_v63 }
 0x7e2   : > { %v6329_v60 = vpop.permute.xlu0 %6328  ;;  %v7541_v45 = vld [vmem:[%s12672_s7] sm:$0xff] }
 0x7e3   : > { %6372 = vst.msk [vmem:[%s12672_s7 + $0x20] sm:$0xff] %vm1097_vm3, %v6329_v60 }
 0x7e4   : > { %v5849_v46 = vpop.permute.xlu1 %5848  ;;  %v7295_v30 = vld [vmem:[#allocation5 + $0x70] sm:$0xff] }
 0x7e5   : > { %7573 = vrot.lane.b32.xlu0 %v7541_v45, %s8599_s14  ;;  %5885 = vst.msk [vmem:[%s12672_s7 + $0x58] sm:$0xff] %vm1000_vm2, %v5849_v46  ;;  %8367 = vmatprep.mubr.msk.f32.mxu1 %vm1722_vm10, %v7295_v30 }
 0x7e6   : > { %v6333_v51 = vpop.permute.xlu0 %6332  ;;  %v7543_v57 = vld [vmem:[%s12672_s7 + $0x10] sm:$0xff] }
 0x7e7   : > { %6374 = vst.msk [vmem:[%s12672_s7 + $0x30] sm:$0xff] %vm1097_vm3, %v6333_v51 }
 0x7e8   : > { %v5853_v50 = vpop.permute.xlu1 %5852  ;;  %v7296_v9 = vld [vmem:[#allocation5 + $0x78] sm:$0xff] }
 0x7e9   : > { %7577 = vrot.lane.b32.xlu0 %v7543_v57, %s8599_s14  ;;  %5887 = vst.msk [vmem:[%s12672_s7 + $0x68] sm:$0xff] %vm1000_vm2, %v5853_v50  ;;  %8368 = vmatmul.mubr.msk.f32.gmra.mrb[54].mxu1 %vm1722_vm10, %v7296_v9 }
 0x7ea   : > { %v6337_v61 = vpop.permute.xlu0 %6336  ;;  %v7545_v19 = vld [vmem:[%s12672_s7 + $0x20] sm:$0xff] }
 0x7eb   : > { %6376 = vst.msk [vmem:[%s12672_s7 + $0x40] sm:$0xff] %vm1097_vm3, %v6337_v61 }
 0x7ec   : > { %v5857_v24 = vpop.permute.xlu1 %5856  ;;  %v6283_v43 = vld [vmem:[%s12672_s7 + $0x58] sm:$0xff] }
 0x7ed   : > { %7581 = vrot.lane.b32.xlu0 %v7545_v19, %s8599_s14  ;;  %5889 = vst.msk [vmem:[%s12672_s7 + $0x78] sm:$0xff] %vm1000_vm2, %v5857_v24  ;;  %v6299_v28 = vadd.f32 %v6283_v43, %v6267_v41 }
 0x7ee   : > { %v7547_v22 = vld [vmem:[%s12672_s7 + $0x30] sm:$0xff] }
 0x7ef   : > { %6342 = vrot.lane.b32.xlu1 %v6299_v28, %s8593_s12 }
 0x7f0   : > { %v6323_v44 = vpop.permute.xlu1 %6322  ;;  %v6285_v38 = vld [vmem:[%s12672_s7 + $0x68] sm:$0xff] }
 0x7f1   : > { %7585 = vrot.lane.b32.xlu0 %v7547_v22, %s8599_s14  ;;  %6369 = vst.msk [vmem:[%s12672_s7 + $0x8] sm:$0xff] %vm1097_vm3, %v6323_v44  ;;  %v6301_v15 = vadd.f32 %v6285_v38, %v6269_v37 }
 0x7f2   : > { %v7549_v34 = vld [vmem:[%s12672_s7 + $0x40] sm:$0xff] }
 0x7f3   : > { %6346 = vrot.lane.b32.xlu1 %v6301_v15, %s8593_s12 }
 0x7f4   : > { %v6327_v62 = vpop.permute.xlu1 %6326  ;;  %v6287_v7 = vld [vmem:[%s12672_s7 + $0x78] sm:$0xff] }
 0x7f5   : > { %7589 = vrot.lane.b32.xlu0 %v7549_v34, %s8599_s14  ;;  %6371 = vst.msk [vmem:[%s12672_s7 + $0x18] sm:$0xff] %vm1097_vm3, %v6327_v62  ;;  %v6303_v0 = vadd.f32 %v6287_v7, %v6271_v16 }
 0x7f7   : > { %6350 = vrot.lane.b32.xlu1 %v6303_v0, %s8593_s12 }
 0x7f8   : > { %v6331_v48 = vpop.permute.xlu1 %6330  ;;  %v7542_v49 = vld [vmem:[%s12672_s7 + $0x8] sm:$0xff] }
 0x7f9   : > { %6373 = vst.msk [vmem:[%s12672_s7 + $0x28] sm:$0xff] %vm1097_vm3, %v6331_v48 }
 0x7fb   : > { %7575 = vrot.lane.b32.xlu1 %v7542_v49, %s8599_s14 }
 0x7fc   : > { %v6335_v6 = vpop.permute.xlu1 %6334  ;;  %v7544_v59 = vld [vmem:[%s12672_s7 + $0x18] sm:$0xff] }
 0x7fd   : > { %6375 = vst.msk [vmem:[%s12672_s7 + $0x38] sm:$0xff] %vm1097_vm3, %v6335_v6 }
 0x7ff   : > { %7579 = vrot.lane.b32.xlu1 %v7544_v59, %s8599_s14 }
 0x800   : > { %v6339_v10 = vpop.permute.xlu1 %6338  ;;  %v7546_v32 = vld [vmem:[%s12672_s7 + $0x28] sm:$0xff] }
 0x801   : > { %6377 = vst.msk [vmem:[%s12672_s7 + $0x48] sm:$0xff] %vm1097_vm3, %v6339_v10 }
 0x803   : > { %7583 = vrot.lane.b32.xlu1 %v7546_v32, %s8599_s14 }
 0x804   : > { %v7548_v17 = vld [vmem:[%s12672_s7 + $0x38] sm:$0xff] }
 0x807   : > { %7587 = vrot.lane.b32.xlu1 %v7548_v17, %s8599_s14 }
 0x808   : > { %v7550_v8 = vld [vmem:[%s12672_s7 + $0x48] sm:$0xff] }
 0x80b   : > { %7591 = vrot.lane.b32.xlu1 %v7550_v8, %s8599_s14 }
 0x80f   : > { %v8348_v25 = vpop.f32.mrb[48].mxu0 }
 0x810   : > { %v7420_v54 = vpop.f32.mrb[49].mxu0  ;;  %v7505_v30 = vmul.f32 %v8348_v25, %v13169_v13 }
 0x811   : > { %v7504_v23 = vmul.f32 %v13169_v13, %v7420_v54 }
 0x812   : > { %v7526_v12 = vadd.f32 %v13177_v21, %v7505_v30 }
 0x813   : > { %v7525_v4 = vadd.f32 %v13177_v21, %v7504_v23 }
 0x824   : > { %v13154_v47 = vpop.f32.mrb[48].mxu1 }
 0x825   : > { %v13156_v5 = vpop.f32.mrb[49].mxu1  ;;  %v7513_v48 = vmul.f32 %v13154_v47, %v13169_v13 }
 0x826   : > { %v7512_v6 = vmul.f32 %v13169_v13, %v13156_v5 }
 0x827   : > { %v7534_v25 = vadd.f32 %v13177_v21, %v7513_v48 }
 0x828   : > { %v7533_v54 = vadd.f32 %v13177_v21, %v7512_v6 }
 0x84b   : > { %v6341_v18 = vpop.permute.xlu0 %6340 }
 0x84c   : > { %6378 = vst.msk [vmem:[%s12672_s7 + $0x50] sm:$0xff] %vm1097_vm3, %v6341_v18 }
 0x84e   : > { %v8351_v36 = vpop.f32.mrb[50].mxu0 }
 0x84f   : > { %v7430_v52 = vpop.f32.mrb[51].mxu0  ;;  %v6345_v35 = vpop.permute.xlu0 %6344  ;;  %v7507_v31 = vmul.f32 %v8351_v36, %v13169_v13 }
 0x850   : > { %6380 = vst.msk [vmem:[%s12672_s7 + $0x60] sm:$0xff] %vm1097_vm3, %v6345_v35  ;;  %v7506_v53 = vmul.f32 %v13169_v13, %v7430_v52 }
 0x851   : > { %v7528_v9 = vadd.f32 %v13177_v21, %v7507_v31 }
 0x852   : > { %v7527_v3 = vadd.f32 %v13177_v21, %v7506_v53 }
 0x853   : > { %v6349_v26 = vpop.permute.xlu0 %6348  ;;  %v7551_v58 = vld [vmem:[%s12672_s7 + $0x50] sm:$0xff] }
 0x854   : > { %6382 = vst.msk [vmem:[%s12672_s7 + $0x70] sm:$0xff] %vm1097_vm3, %v6349_v26  ;;  %7593 = vrot.lane.b32.xlu0 %v7551_v58, %s8599_s14 }
 0x857   : > { %v7553_v27 = vld [vmem:[%s12672_s7 + $0x60] sm:$0xff]  ;;  %v7574_v11 = vpop.permute.xlu0 %7573 }
 0x858   : > { %7597 = vrot.lane.b32.xlu0 %v7553_v27, %s8599_s14  ;;  %v7621_v29 = vadd.f32 %v7574_v11, %v7525_v4 }
 0x85b   : > { %v7555_v56 = vld [vmem:[%s12672_s7 + $0x70] sm:$0xff]  ;;  %v7578_v2 = vpop.permute.xlu0 %7577 }
 0x85c   : > { %7601 = vrot.lane.b32.xlu0 %v7555_v56, %s8599_s14  ;;  %v7623_v33 = vadd.f32 %v7578_v2, %v7527_v3 }
 0x85f   : > { %v7582_v22 = vpop.permute.xlu0 %7581 }
 0x860   : > { %7653 = vrot.lane.b32.xlu0 %v7621_v29, %s8595_s27 }
 0x861   : > { %v6343_v20 = vpop.permute.xlu1 %6342 }
 0x862   : > { %6379 = vst.msk [vmem:[%s12672_s7 + $0x58] sm:$0xff] %vm1097_vm3, %v6343_v20 }
 0x863   : > { %v7586_v16 = vpop.permute.xlu0 %7585 }
 0x864   : > { %7657 = vrot.lane.b32.xlu0 %v7623_v33, %s8595_s27  ;;  %v13188_v1 = vpop.f32.mrb[50].mxu1 }
 0x865   : > { %v7470_v63 = vpop.f32.mrb[51].mxu1  ;;  %v6347_v60 = vpop.permute.xlu1 %6346  ;;  %v7515_v20 = vmul.f32 %v13188_v1, %v13169_v13 }
 0x866   : > { %6381 = vst.msk [vmem:[%s12672_s7 + $0x68] sm:$0xff] %vm1097_vm3, %v6347_v60  ;;  %v7514_v52 = vmul.f32 %v13169_v13, %v7470_v63 }
 0x867   : > { %v7590_v8 = vpop.permute.xlu0 %7589  ;;  %v7536_v60 = vadd.f32 %v13177_v21, %v7515_v20 }
 0x868   : > { %v7629_v18 = vadd.f32 %v7590_v8, %v7533_v54  ;;  %v7535_v26 = vadd.f32 %v13177_v21, %v7514_v52 }
 0x869   : > { %v6351_v45 = vpop.permute.xlu1 %6350  ;;  %v7552_v46 = vld [vmem:[%s12672_s7 + $0x58] sm:$0xff] }
 0x86a   : > { %6383 = vst.msk [vmem:[%s12672_s7 + $0x78] sm:$0xff] %vm1097_vm3, %v6351_v45  ;;  %7595 = vrot.lane.b32.xlu1 %v7552_v46, %s8599_s14 }
 0x86d   : > { %v7554_v51 = vld [vmem:[%s12672_s7 + $0x68] sm:$0xff]  ;;  %v7576_v57 = vpop.permute.xlu1 %7575 }
 0x86e   : > { %7599 = vrot.lane.b32.xlu1 %v7554_v51, %s8599_s14  ;;  %v7622_v50 = vadd.f32 %v7576_v57, %v7526_v12 }
 0x871   : > { %v7556_v14 = vld [vmem:[%s12672_s7 + $0x78] sm:$0xff]  ;;  %v7580_v61 = vpop.permute.xlu1 %7579 }
 0x872   : > { %7603 = vrot.lane.b32.xlu1 %v7556_v14, %s8599_s14  ;;  %v7624_v19 = vadd.f32 %v7580_v61, %v7528_v9 }
 0x875   : > { %v7584_v43 = vpop.permute.xlu1 %7583 }
 0x876   : > { %7655 = vrot.lane.b32.xlu1 %v7622_v50, %s8595_s27 }
 0x879   : > { %v7588_v15 = vpop.permute.xlu1 %7587 }
 0x87a   : > { %7659 = vrot.lane.b32.xlu1 %v7624_v19, %s8595_s27 }
 0x87d   : > { %v7592_v32 = vpop.permute.xlu1 %7591 }
 0x87e   : > { %v7630_v47 = vadd.f32 %v7592_v32, %v7534_v25 }
 0x88a   : > { %v8354_v42 = vpop.f32.mrb[52].mxu0 }
 0x88b   : > { %v7509_v41 = vmul.f32 %v8354_v42, %v13169_v13  ;;  %v7440_v39 = vpop.f32.mrb[53].mxu0 }
 0x88c   : > { %v7508_v40 = vmul.f32 %v13169_v13, %v7440_v39 }
 0x88d   : > { %v7530_v24 = vadd.f32 %v13177_v21, %v7509_v41 }
 0x88e   : > { %v7529_v28 = vadd.f32 %v13177_v21, %v7508_v40 }
 0x88f   : > { %v7626_v37 = vadd.f32 %v7584_v43, %v7530_v24 }
 0x890   : > { %v7625_v55 = vadd.f32 %v7582_v22, %v7529_v28 }
 0x891   : > { %7663 = vrot.lane.b32.xlu1 %v7626_v37, %s8595_s27 }
 0x892   : > { %7661 = vrot.lane.b32.xlu0 %v7625_v55, %s8595_s27 }
 0x8a0   : > { %v8366_v44 = vpop.f32.mrb[52].mxu1 }
 0x8a1   : > { %v7480_v38 = vpop.f32.mrb[53].mxu1  ;;  %v7517_v63 = vmul.f32 %v8366_v44, %v13169_v13 }
 0x8a2   : > { %v7516_v35 = vmul.f32 %v13169_v13, %v7480_v38 }
 0x8a3   : > { %v7538_v30 = vadd.f32 %v13177_v21, %v7517_v63 }
 0x8a4   : > { %v7537_v11 = vadd.f32 %v13177_v21, %v7516_v35 }
 0x8a6   : > { %v8357_v34 = vpop.f32.mrb[54].mxu0 }
 0x8a7   : > { %v7511_v62 = vmul.f32 %v8357_v34, %v13169_v13  ;;  %v7450_v7 = vpop.f32.mrb[55].mxu0 }
 0x8a8   : > { %v7510_v0 = vmul.f32 %v13169_v13, %v7450_v7 }
 0x8a9   : > { %v7532_v49 = vadd.f32 %v13177_v21, %v7511_v62 }
 0x8aa   : > { %v7531_v59 = vadd.f32 %v13177_v21, %v7510_v0 }
 0x8ab   : > { %v7628_v10 = vadd.f32 %v7588_v15, %v7532_v49 }
 0x8ac   : > { %v7627_v17 = vadd.f32 %v7586_v16, %v7531_v59 }
 0x8ad   : > { %7667 = vrot.lane.b32.xlu1 %v7628_v10, %s8595_s27 }
 0x8ae   : > { %7665 = vrot.lane.b32.xlu0 %v7627_v17, %s8595_s27 }
 0x8b1   : > { %7671 = vrot.lane.b32.xlu1 %v7630_v47, %s8595_s27 }
 0x8b2   : > { %7669 = vrot.lane.b32.xlu0 %v7629_v18, %s8595_s27 }
 0x8bc   : > { %v8369_v5 = vpop.f32.mrb[54].mxu1 }
 0x8bd   : > { %v7490_v36 = vpop.f32.mrb[55].mxu1  ;;  %v7519_v51 = vmul.f32 %v8369_v5, %v13169_v13 }
 0x8be   : > { %v7518_v23 = vmul.f32 %v13169_v13, %v7490_v36 }
 0x8bf   : > { %v7540_v1 = vadd.f32 %v13177_v21, %v7519_v51 }
 0x8c0   : > { %v7539_v4 = vadd.f32 %v13177_v21, %v7518_v23 }
 0x8c6   : > { %v7594_v58 = vpop.permute.xlu0 %7593 }
 0x8c7   : > { %v7631_v27 = vadd.f32 %v7594_v58, %v7535_v26 }
 0x8c9   : > { %7673 = vrot.lane.b32.xlu0 %v7631_v27, %s8595_s27 }
 0x8ca   : > { %v7598_v56 = vpop.permute.xlu0 %7597 }
 0x8cb   : > { %v7633_v53 = vadd.f32 %v7598_v56, %v7537_v11 }
 0x8cd   : > { %7677 = vrot.lane.b32.xlu0 %v7633_v53, %s8595_s27 }
 0x8ce   : > { %v7602_v29 = vpop.permute.xlu0 %7601 }
 0x8cf   : > { %v7635_v2 = vadd.f32 %v7602_v29, %v7539_v4 }
 0x8d1   : > { %7681 = vrot.lane.b32.xlu0 %v7635_v2, %s8595_s27 }
 0x8d2   : > { %v7654_v3 = vpop.permute.xlu0 %7653 }
 0x8d3   : > { %7701 = vst.msk [vmem:[%s12672_s7] sm:$0xff] %vm1194_vm4, %v7654_v3 }
 0x8d6   : > { %v7658_v33 = vpop.permute.xlu0 %7657 }
 0x8d7   : > { %7703 = vst.msk [vmem:[%s12672_s7 + $0x10] sm:$0xff] %vm1194_vm4, %v7658_v33 }
 0x8dc   : > { %v7596_v45 = vpop.permute.xlu1 %7595 }
 0x8dd   : > { %v7632_v46 = vadd.f32 %v7596_v45, %v7536_v60 }
 0x8df   : > { %7675 = vrot.lane.b32.xlu1 %v7632_v46, %s8595_s27 }
 0x8e0   : > { %v7600_v57 = vpop.permute.xlu1 %7599 }
 0x8e1   : > { %v7634_v14 = vadd.f32 %v7600_v57, %v7538_v30 }
 0x8e3   : > { %7679 = vrot.lane.b32.xlu1 %v7634_v14, %s8595_s27 }
 0x8e4   : > { %v7604_v31 = vpop.permute.xlu1 %7603 }
 0x8e5   : > { %v7636_v12 = vadd.f32 %v7604_v31, %v7540_v1 }
 0x8e7   : > { %7683 = vrot.lane.b32.xlu1 %v7636_v12, %s8595_s27  ;;  %s7948_s27 = sshll.u32 %s8648_s19, 11  ;;  %s8525_s19 = scalar_lea.vmem %s13282_s9, 2048 }
 0x8e8   : > { %v7656_v13 = vpop.permute.xlu1 %7655  ;;  %s13280_s28 = scalar_lea.hbm %s13334_s4, %s7948_s27  ;;  %p8526_p11 = scmp.ne.s32.totalorder %s13282_s9, %s8525_s19 }
 0x8e9   : > { %7702 = vst.msk [vmem:[%s12672_s7 + $0x8] sm:$0xff] %vm1194_vm4, %v7656_v13  ;;  %p8533_p1 = scmp.lt.s32.totalorder %s8531_s8, %s8525_s19 }
 0x8ea   : > { %p8527_p12 = pnand %p8526_p11, %p8665_p5 }
 0x8eb   : > { %p8534_p2 = por %p8533_p1, %p8532_p0 }
 0x8ec   : > { %v7660_v50 = vpop.permute.xlu1 %7659  ;;  %p8528_p13 = pneg %p8527_p12 }
 0x8ed   : > { %7704 = vst.msk [vmem:[%s12672_s7 + $0x18] sm:$0xff] %vm1194_vm4, %v7660_v50 }
 0x8ee   : > { %p8535_p3 = pnand %p8534_p2, %p8528_p13 }
 0x903   : > { %v7664_v61 = vpop.permute.xlu1 %7663 }
 0x904   : > { %7706 = vst.msk [vmem:[%s12672_s7 + $0x28] sm:$0xff] %vm1194_vm4, %v7664_v61  ;;  %v7662_v9 = vpop.permute.xlu0 %7661 }
 0x905   : > { %7705 = vst.msk [vmem:[%s12672_s7 + $0x20] sm:$0xff] %vm1194_vm4, %v7662_v9 }
 0x91f   : > { %v7668_v21 = vpop.permute.xlu1 %7667 }
 0x920   : > { %7708 = vst.msk [vmem:[%s12672_s7 + $0x38] sm:$0xff] %vm1194_vm4, %v7668_v21  ;;  %v7666_v19 = vpop.permute.xlu0 %7665 }
 0x921   : > { %7707 = vst.msk [vmem:[%s12672_s7 + $0x30] sm:$0xff] %vm1194_vm4, %v7666_v19 }
 0x923   : > { %v7672_v42 = vpop.permute.xlu1 %7671 }
 0x924   : > { %7710 = vst.msk [vmem:[%s12672_s7 + $0x48] sm:$0xff] %vm1194_vm4, %v7672_v42  ;;  %v7670_v41 = vpop.permute.xlu0 %7669 }
 0x925   : > { %7709 = vst.msk [vmem:[%s12672_s7 + $0x40] sm:$0xff] %vm1194_vm4, %v7670_v41 }
 0x93b   : > { %v7674_v39 = vpop.permute.xlu0 %7673 }
 0x93c   : > { %7711 = vst.msk [vmem:[%s12672_s7 + $0x50] sm:$0xff] %vm1194_vm4, %v7674_v39 }
 0x93f   : > { %v7678_v40 = vpop.permute.xlu0 %7677 }
 0x940   : > { %7713 = vst.msk [vmem:[%s12672_s7 + $0x60] sm:$0xff] %vm1194_vm4, %v7678_v40 }
 0x943   : > { %v7682_v24 = vpop.permute.xlu0 %7681 }
 0x944   : > { %7715 = vst.msk [vmem:[%s12672_s7 + $0x70] sm:$0xff] %vm1194_vm4, %v7682_v24 }
 0x951   : > { %v7676_v43 = vpop.permute.xlu1 %7675 }
 0x952   : > { %7712 = vst.msk [vmem:[%s12672_s7 + $0x58] sm:$0xff] %vm1194_vm4, %v7676_v43 }
 0x955   : > { %v7680_v28 = vpop.permute.xlu1 %7679 }
 0x956   : > { %7714 = vst.msk [vmem:[%s12672_s7 + $0x68] sm:$0xff] %vm1194_vm4, %v7680_v28 }
 0x959   : > { %v7684_v22 = vpop.permute.xlu1 %7683 }
 0x95a   : > { %7716 = vst.msk [vmem:[%s12672_s7 + $0x78] sm:$0xff] %vm1194_vm4, %v7684_v22 }
 0x95b   : > { %8538 = shalt.err (!%p8535_p3)
}
 0x95c   : > { %s8539_s23 = scalar_lea.hbm %s13280_s28, 2048  ;;  %s8543_s12 = scalar_lea.hbm %s13334_s4, 4096 }
 0x95d   : > { %p8540_p4 = scmp.ne.s32.totalorder %s13280_s28, %s8539_s23  ;;  %p8544_p9 = scmp.lt.u32.totalorder %s13280_s28, %s13334_s4 }
 0x95e   : > { %p8545_p10 = scmp.lt.u32.totalorder %s8543_s12, %s8539_s23  ;;  %p8547_p12 = scmp.lt.u32.totalorder %s8539_s23, %s13280_s28 }
 0x95f   : > { %p8541_p7 = pnand %p8540_p4, %p8665_p5 }
 0x960   : > { %p8546_p11 = por %p8545_p10, %p8544_p9 }
 0x961   : > { %p8542_p8 = pneg %p8541_p7 }
 0x962   : > { %p8548_p13 = por %p8547_p12, %p8546_p11 }
 0x964   : > { %p8549_p0 = pnand %p8548_p13, %p8542_p8 }
 0x966   : > { %8552 = shalt.err (!%p8549_p0)
}
 0x967   : > { %s8601_s6 = smov 128  }
 0x968   : > { %8460 = dma.vmem_to_hbm [thread:$0]  (%p8665_p5), %s13282_s9, 2048, %s13280_s28, %s13288_s30, %s8601_s6, %s8601_s6, %s8591_s10  }
 0x969 PF: > { %p8466_p1 = scmp.ge.s32.totalorder %s8587_s18, 2  ;;  %s7747_s27 = sand.u32 1, %s8575_s15  }
 0x96a   : > { %s7748_s11 = scalar_lea.sflag [#allocation7], %s7747_s27 }
 0x96b   : > { %p8463_p2 = pnand %p8466_p1, %p8669_p6 }
 0x96d   : > { %8570 = dma.done.wait (!%p8463_p2), %s7748_s11, 2048  }
 0x96e   : > { %8572 = vsyncadd (!%p8463_p2), %s7748_s11, 4294965248  ;;  %p14_p3 = scmp.ge.s32.totalorder %s8652_s21, 4   ;;  %s13598_s15 = smov %s8579_s16 }
 0x96f   : > { %s13599_s16 = smov %s8583_s17  ;;  %s13600_s17 = smov %s8663_s24 }
 0x970   : > { %s13601_s18 = smov %s8652_s21  ;;  %16 = sbr.rel (!%p14_p3) target bundleno = 3 (0x3), region = 77 }
 0x977   :  { %7753 = vsyncpa [#allocation7], 1 }
 0x978   :  { %7755 = vsyncpa [#allocation7 + $0x1], 1 }

</bundles_post_ra>
